<compile_context>
chip_gen: v7x
topology: tpu7x:2x2x1
jax: 0.10.0
libtpu: 0.0.40
codegen_flags: <defaults>
</compile_context>

<pallas_src>
import functools

import jax
import jax.numpy as jnp
from jax.experimental import pallas as pl
from jax.experimental.pallas import tpu as pltpu


def autopad(k, p=None, d=1):
    """Same-shape padding (matches the PyTorch reference)."""
    if d > 1:
        k = d * (k - 1) + 1
    if p is None:
        p = k // 2
    return p


def _silu(y):
    # SiLU in f32; the divide goes to the EUP slot via the approximate
    # reciprocal (~2^-12 relative error — fine for inference).
    return y * pl.reciprocal(1.0 + jnp.exp(-y), approx=True)


# ----------------------------------------------------------------------------
# Fused BottleneckC2f kernel: one grid step == one batch element.
#   cv1: k1 x k1 conv (g=1, d=1) + folded BN + SiLU  -> zero-padded VMEM scratch
#   cv2: k2 x k2 conv (block-diag dense, dilation d2) + folded BN + SiLU
#   add: + interior of the (padded) bf16 input tile
# ----------------------------------------------------------------------------
def _bottleneck_kernel(x_ref, w1_ref, b1_ref, w2_ref, b2_ref, o_ref, y1p_ref,
                       *, H, W, H1, W1, H2, W2, c1, c_, c2,
                       k1, k2, d2, p1, p2, add):
    # ---- cv1: in-VMEM tap accumulation over the padded input tile ----------
    acc1 = jnp.zeros((H1 * W1, c_), jnp.float32)
    for ki in range(k1):
        for kj in range(k1):
            xs = x_ref[ki:ki + H1, kj:kj + W1, :].reshape(H1 * W1, c1)
            acc1 = acc1 + jnp.dot(xs, w1_ref[ki * k1 + kj],
                                  preferred_element_type=jnp.float32)
    y1 = _silu(acc1 + b1_ref[...])

    # cv1 activation lives only in VMEM: zero the padded scratch, write the
    # interior (zero border == Conv2d zero padding for cv2).
    y1p_ref[...] = jnp.zeros_like(y1p_ref)
    y1p_ref[p2:p2 + H1, p2:p2 + W1, :] = (
        y1.astype(y1p_ref.dtype).reshape(H1, W1, c_))

    # ---- cv2: tap accumulation from the VMEM scratch (dilation d2) ---------
    acc2 = jnp.zeros((H2 * W2, c2), jnp.float32)
    for ki in range(k2):
        for kj in range(k2):
            ys = y1p_ref[ki * d2:ki * d2 + H2,
                         kj * d2:kj * d2 + W2, :].reshape(H2 * W2, c_)
            acc2 = acc2 + jnp.dot(ys, w2_ref[ki * k2 + kj],
                                  preferred_element_type=jnp.float32)
    y2 = _silu(acc2 + b2_ref[...])

    if add:
        # Shortcut: interior of the already-loaded (padded, bf16) input tile.
        res = x_ref[p1:p1 + H, p1:p1 + W, :].reshape(H * W, c1)
        y2 = y2 + res.astype(jnp.float32)

    # TODO(synk): for c2 < 128 the final stores are lane-masked; packing the
    # output into a (H2*W2*c2/128, 128) lane-dense slab would shave the last
    # store cycles but requires a cross-lane in-kernel reshape.
    o_ref[...] = y2.astype(o_ref.dtype)


# ----------------------------------------------------------------------------
# Parameter construction (done once; weights pre-transposed, BN folded, bf16).
# ----------------------------------------------------------------------------
def _init_conv_bn(key, c1, c2, k, g):
    """Per-tap dense weight (kk, c1, c2) bf16 (block-diagonal when g > 1) with
    the inference-mode BN scale folded in, plus folded BN bias (1, c2) f32."""
    kw, kgm, kbt, kmn, kvr = jax.random.split(key, 5)
    cin_g = c1 // g
    fan_in = cin_g * k * k
    w = jax.random.normal(kw, (c2, cin_g, k, k), jnp.float32) * (2.0 / fan_in) ** 0.5

    eps = 1e-5
    gamma = 1.0 + 0.1 * jax.random.normal(kgm, (c2,), jnp.float32)
    beta = 0.1 * jax.random.normal(kbt, (c2,), jnp.float32)
    mean = 0.1 * jax.random.normal(kmn, (c2,), jnp.float32)
    var = 1.0 + 0.1 * jax.random.uniform(kvr, (c2,), jnp.float32)
    scale = gamma * jax.lax.rsqrt(var + eps)           # (c2,)
    bias = beta - mean * scale                         # (c2,)

    kk = k * k
    if g == 1:
        wt = jnp.transpose(w.reshape(c2, c1, kk), (2, 1, 0))       # (kk, c1, c2)
    else:
        cout_g = c2 // g
        wg = w.reshape(g, cout_g, cin_g, kk)
        blocks = jnp.transpose(wg, (3, 0, 2, 1))                   # (kk, g, ig, og)
        wt = jnp.einsum("tgio,gh->tgiho", blocks,
                        jnp.eye(g, dtype=jnp.float32))
        wt = wt.reshape(kk, c1, c2)                                # block-diagonal
    wt = wt * scale[None, None, :]            # fold BN scale into the weights
    return wt.astype(jnp.bfloat16), bias.reshape(1, c2)


def init_bottleneck(key, c1, c2, shortcut=True, g=1, k=(3, 3), e=0.5, d=1):
    c_ = int(c2 * e)
    k1key, k2key = jax.random.split(key)
    w1, b1 = _init_conv_bn(k1key, c1, c_, k[0], 1)
    w2, b2 = _init_conv_bn(k2key, c_, c2, k[1], g)
    return {
        "w1": w1, "b1": b1, "w2": w2, "b2": b2,
        "cfg": dict(c1=c1, c_=c_, c2=c2, k1=k[0], k2=k[1], d2=d,
                    p1=autopad(k[0], None, 1), p2=autopad(k[1], None, d),
                    add=bool(shortcut and c1 == c2)),
    }


# ----------------------------------------------------------------------------
# Forward
# ----------------------------------------------------------------------------
def bottleneck_forward(params, x_nchw):
    cfg = params["cfg"]
    c1, c_, c2 = cfg["c1"], cfg["c_"], cfg["c2"]
    k1, k2, d2 = cfg["k1"], cfg["k2"], cfg["d2"]
    p1, p2 = cfg["p1"], cfg["p2"]
    N, C, H, W = x_nchw.shape
    assert C == c1

    # Boundary-only NCHW -> NHWC, cast to bf16, spatial zero-pad for cv1.
    # (transpose + cast + pad fuse into one XLA pass; no im2col in HBM.)
    x = jnp.transpose(x_nchw, (0, 2, 3, 1)).astype(jnp.bfloat16)
    if p1:
        x = jnp.pad(x, ((0, 0), (p1, p1), (p1, p1), (0, 0)))
    Hp1, Wp1 = H + 2 * p1, W + 2 * p1

    # Conv output spatial sizes (stride 1 for both convs in BottleneckC2f).
    H1, W1 = Hp1 - (k1 - 1), Wp1 - (k1 - 1)
    H2 = H1 + 2 * p2 - d2 * (k2 - 1)
    W2 = W1 + 2 * p2 - d2 * (k2 - 1)
    add = cfg["add"] and (H2 == H and W2 == W)

    kk1, kk2 = k1 * k1, k2 * k2
    kernel = functools.partial(
        _bottleneck_kernel,
        H=H, W=W, H1=H1, W1=W1, H2=H2, W2=W2,
        c1=c1, c_=c_, c2=c2, k1=k1, k2=k2, d2=d2, p1=p1, p2=p2, add=add)

    out = pl.pallas_call(
        kernel,
        out_shape=jax.ShapeDtypeStruct((N, H2 * W2, c2), jnp.float32),
        grid_spec=pltpu.PrefetchScalarGridSpec(
            num_scalar_prefetch=0,
            grid=(N,),
            in_specs=[
                pl.BlockSpec((None, Hp1, Wp1, c1), lambda n: (n, 0, 0, 0)),
                pl.BlockSpec((kk1, c1, c_), lambda n: (0, 0, 0)),   # cv1 weights
                pl.BlockSpec((1, c_), lambda n: (0, 0)),            # cv1 bias
                pl.BlockSpec((kk2, c_, c2), lambda n: (0, 0, 0)),   # cv2 weights
                pl.BlockSpec((1, c2), lambda n: (0, 0)),            # cv2 bias
            ],
            out_specs=pl.BlockSpec((None, H2 * W2, c2), lambda n: (n, 0, 0)),
            scratch_shapes=[
                # zero-padded cv1 activation (stays entirely in VMEM)
                pltpu.VMEM((H1 + 2 * p2, W1 + 2 * p2, c_), jnp.bfloat16),
            ],
        ),
        compiler_params=pltpu.CompilerParams(
            dimension_semantics=("parallel",)),   # v7x: one image per core
    )(x, params["w1"], params["b1"], params["w2"], params["b2"])

    y = out.reshape(N, H2, W2, c2)
    return jnp.transpose(y, (0, 3, 1, 2))         # back to NCHW


# ----------------------------------------------------------------------------
# Plain-JAX reference (same folded parameters) for a tolerance check.
# ----------------------------------------------------------------------------
def _reference_forward(params, x_nchw):
    cfg = params["cfg"]
    x = jnp.transpose(x_nchw, (0, 2, 3, 1)).astype(jnp.float32)

    def conv_bn_silu(h, wt, b, k, d, p):
        kk, cin, cout = wt.shape
        w_hwio = wt.astype(jnp.float32).reshape(k, k, cin, cout)
        y = jax.lax.conv_general_dilated(
            h, w_hwio, window_strides=(1, 1), padding=[(p, p), (p, p)],
            rhs_dilation=(d, d), dimension_numbers=("NHWC", "HWIO", "NHWC"),
            precision=jax.lax.Precision.HIGHEST)
        y = y + b.reshape(1, 1, 1, cout)
        return y * jax.nn.sigmoid(y)

    y = conv_bn_silu(x, params["w1"], params["b1"], cfg["k1"], 1, cfg["p1"])
    y = conv_bn_silu(y, params["w2"], params["b2"], cfg["k2"], cfg["d2"], cfg["p2"])
    if cfg["add"]:
        y = y + x
    return jnp.transpose(y, (0, 3, 1, 2))


if __name__ == "__main__":
    key = jax.random.PRNGKey(0)
    kx, kp1, kp2 = jax.random.split(key, 3)
    x = jax.random.normal(kx, (2, 64, 16, 16), jnp.float32)   # (N, C, H, W)

    # Default BottleneckC2f(64, 64): shortcut=True, g=1, k=(3, 3), e=0.5, d=1
    p_default = init_bottleneck(kp1, 64, 64)
    fwd = jax.jit(functools.partial(bottleneck_forward, p_default))
    out1 = jax.block_until_ready(fwd(x))
    assert out1.shape == (2, 64, 16, 16), out1.shape
    assert bool(jnp.all(jnp.isfinite(out1)))
    err1 = float(jnp.max(jnp.abs(out1 - _reference_forward(p_default, x))))
    assert err1 < 0.25, f"default variant max abs err {err1}"

    # Grouped + dilated variant: BottleneckC2f(64, 64, g=8, d=2)
    p_grouped = init_bottleneck(kp2, 64, 64, g=8, d=2)
    fwd_g = jax.jit(functools.partial(bottleneck_forward, p_grouped))
    out2 = jax.block_until_ready(fwd_g(x))
    assert out2.shape == (2, 64, 16, 16), out2.shape
    assert bool(jnp.all(jnp.isfinite(out2)))
    err2 = float(jnp.max(jnp.abs(out2 - _reference_forward(p_grouped, x))))
    assert err2 < 0.25, f"grouped variant max abs err {err2}"

    print("KERNEL_OK")
</pallas_src>

<mosaic_0001>
module attributes {stable_mosaic.version = 11 : i64} {
  func.func @_bottleneck_kernel(%arg0: i32, %arg1: memref<1x18x18x64xbf16, #tpu.memory_space<vmem>>, %arg2: memref<9x64x32xbf16, #tpu.memory_space<vmem>>, %arg3: memref<1x32xf32, #tpu.memory_space<vmem>>, %arg4: memref<9x32x64xbf16, #tpu.memory_space<vmem>>, %arg5: memref<1x64xf32, #tpu.memory_space<vmem>>, %arg6: memref<1x256x64xf32, #tpu.memory_space<vmem>>, %arg7: memref<18x18x32xbf16, #tpu.memory_space<vmem>>) attributes {dimension_semantics = [#tpu.dimension_semantics<parallel>], iteration_bounds = array<i64: 2>, scalar_prefetch = 0 : i64, scratch_operands = 1 : i64, tpu.core_type = #tpu.core_type<tc>, window_params = [{transform_indices = @transform_0, window_bounds = array<i64: 1, 18, 18, 64>}, {pipeline_mode = #tpu.pipeline_mode<synchronous>, transform_indices = @transform_1, window_bounds = array<i64: 9, 64, 32>}, {pipeline_mode = #tpu.pipeline_mode<synchronous>, transform_indices = @transform_2, window_bounds = array<i64: 1, 32>}, {pipeline_mode = #tpu.pipeline_mode<synchronous>, transform_indices = @transform_3, window_bounds = array<i64: 9, 32, 64>}, {pipeline_mode = #tpu.pipeline_mode<synchronous>, transform_indices = @transform_4, window_bounds = array<i64: 1, 64>}, {transform_indices = @transform_5, window_bounds = array<i64: 1, 256, 64>}]} {
    %cst = arith.constant 0.000000e+00 : f32
    %0 = vector.broadcast %cst : f32 to vector<256x32xf32>
    %c0 = arith.constant 0 : index
    %c0_0 = arith.constant 0 : index
    %c0_1 = arith.constant 0 : index
    %c0_2 = arith.constant 0 : index
    %1 = vector.load %arg1[%c0, %c0_0, %c0_1, %c0_2] : memref<1x18x18x64xbf16, #tpu.memory_space<vmem>>, vector<1x16x16x64xbf16>
    %2 = vector.shape_cast %1 : vector<1x16x16x64xbf16> to vector<16x16x64xbf16>
    %3 = vector.shape_cast %2 : vector<16x16x64xbf16> to vector<256x64xbf16>
    %c0_3 = arith.constant 0 : index
    %c0_4 = arith.constant 0 : index
    %c0_5 = arith.constant 0 : index
    %4 = vector.load %arg2[%c0_3, %c0_4, %c0_5] : memref<9x64x32xbf16, #tpu.memory_space<vmem>>, vector<1x64x32xbf16>
    %5 = vector.shape_cast %4 : vector<1x64x32xbf16> to vector<64x32xbf16>
    %cst_6 = arith.constant dense<0.000000e+00> : vector<256x32xf32>
    %6 = tpu.matmul %3, %5, %cst_6 {dimension_numbers = #tpu.dot_dimension_numbers<[1], [0], [0], [1], [0, 0, 1, 1], [], []>} : vector<256x64xbf16>, vector<64x32xbf16>, vector<256x32xf32> -> vector<256x32xf32>
    %7 = arith.addf %0, %6 : vector<256x32xf32>
    %c0_7 = arith.constant 0 : index
    %c0_8 = arith.constant 0 : index
    %c1 = arith.constant 1 : index
    %c0_9 = arith.constant 0 : index
    %8 = vector.load %arg1[%c0_7, %c0_8, %c1, %c0_9] : memref<1x18x18x64xbf16, #tpu.memory_space<vmem>>, vector<1x16x16x64xbf16>
    %9 = vector.shape_cast %8 : vector<1x16x16x64xbf16> to vector<16x16x64xbf16>
    %10 = vector.shape_cast %9 : vector<16x16x64xbf16> to vector<256x64xbf16>
    %c1_10 = arith.constant 1 : index
    %c0_11 = arith.constant 0 : index
    %c0_12 = arith.constant 0 : index
    %11 = vector.load %arg2[%c1_10, %c0_11, %c0_12] : memref<9x64x32xbf16, #tpu.memory_space<vmem>>, vector<1x64x32xbf16>
    %12 = vector.shape_cast %11 : vector<1x64x32xbf16> to vector<64x32xbf16>
    %cst_13 = arith.constant dense<0.000000e+00> : vector<256x32xf32>
    %13 = tpu.matmul %10, %12, %cst_13 {dimension_numbers = #tpu.dot_dimension_numbers<[1], [0], [0], [1], [0, 0, 1, 1], [], []>} : vector<256x64xbf16>, vector<64x32xbf16>, vector<256x32xf32> -> vector<256x32xf32>
    %14 = arith.addf %7, %13 : vector<256x32xf32>
    %c0_14 = arith.constant 0 : index
    %c0_15 = arith.constant 0 : index
    %c2 = arith.constant 2 : index
    %c0_16 = arith.constant 0 : index
    %15 = vector.load %arg1[%c0_14, %c0_15, %c2, %c0_16] : memref<1x18x18x64xbf16, #tpu.memory_space<vmem>>, vector<1x16x16x64xbf16>
    %16 = vector.shape_cast %15 : vector<1x16x16x64xbf16> to vector<16x16x64xbf16>
    %17 = vector.shape_cast %16 : vector<16x16x64xbf16> to vector<256x64xbf16>
    %c2_17 = arith.constant 2 : index
    %c0_18 = arith.constant 0 : index
    %c0_19 = arith.constant 0 : index
    %18 = vector.load %arg2[%c2_17, %c0_18, %c0_19] : memref<9x64x32xbf16, #tpu.memory_space<vmem>>, vector<1x64x32xbf16>
    %19 = vector.shape_cast %18 : vector<1x64x32xbf16> to vector<64x32xbf16>
    %cst_20 = arith.constant dense<0.000000e+00> : vector<256x32xf32>
    %20 = tpu.matmul %17, %19, %cst_20 {dimension_numbers = #tpu.dot_dimension_numbers<[1], [0], [0], [1], [0, 0, 1, 1], [], []>} : vector<256x64xbf16>, vector<64x32xbf16>, vector<256x32xf32> -> vector<256x32xf32>
    %21 = arith.addf %14, %20 : vector<256x32xf32>
    %c0_21 = arith.constant 0 : index
    %c1_22 = arith.constant 1 : index
    %c0_23 = arith.constant 0 : index
    %c0_24 = arith.constant 0 : index
    %22 = vector.load %arg1[%c0_21, %c1_22, %c0_23, %c0_24] : memref<1x18x18x64xbf16, #tpu.memory_space<vmem>>, vector<1x16x16x64xbf16>
    %23 = vector.shape_cast %22 : vector<1x16x16x64xbf16> to vector<16x16x64xbf16>
    %24 = vector.shape_cast %23 : vector<16x16x64xbf16> to vector<256x64xbf16>
    %c3 = arith.constant 3 : index
    %c0_25 = arith.constant 0 : index
    %c0_26 = arith.constant 0 : index
    %25 = vector.load %arg2[%c3, %c0_25, %c0_26] : memref<9x64x32xbf16, #tpu.memory_space<vmem>>, vector<1x64x32xbf16>
    %26 = vector.shape_cast %25 : vector<1x64x32xbf16> to vector<64x32xbf16>
    %cst_27 = arith.constant dense<0.000000e+00> : vector<256x32xf32>
    %27 = tpu.matmul %24, %26, %cst_27 {dimension_numbers = #tpu.dot_dimension_numbers<[1], [0], [0], [1], [0, 0, 1, 1], [], []>} : vector<256x64xbf16>, vector<64x32xbf16>, vector<256x32xf32> -> vector<256x32xf32>
    %28 = arith.addf %21, %27 : vector<256x32xf32>
    %c0_28 = arith.constant 0 : index
    %c1_29 = arith.constant 1 : index
    %c1_30 = arith.constant 1 : index
    %c0_31 = arith.constant 0 : index
    %29 = vector.load %arg1[%c0_28, %c1_29, %c1_30, %c0_31] : memref<1x18x18x64xbf16, #tpu.memory_space<vmem>>, vector<1x16x16x64xbf16>
    %30 = vector.shape_cast %29 : vector<1x16x16x64xbf16> to vector<16x16x64xbf16>
    %31 = vector.shape_cast %30 : vector<16x16x64xbf16> to vector<256x64xbf16>
    %c4 = arith.constant 4 : index
    %c0_32 = arith.constant 0 : index
    %c0_33 = arith.constant 0 : index
    %32 = vector.load %arg2[%c4, %c0_32, %c0_33] : memref<9x64x32xbf16, #tpu.memory_space<vmem>>, vector<1x64x32xbf16>
    %33 = vector.shape_cast %32 : vector<1x64x32xbf16> to vector<64x32xbf16>
    %cst_34 = arith.constant dense<0.000000e+00> : vector<256x32xf32>
    %34 = tpu.matmul %31, %33, %cst_34 {dimension_numbers = #tpu.dot_dimension_numbers<[1], [0], [0], [1], [0, 0, 1, 1], [], []>} : vector<256x64xbf16>, vector<64x32xbf16>, vector<256x32xf32> -> vector<256x32xf32>
    %35 = arith.addf %28, %34 : vector<256x32xf32>
    %c0_35 = arith.constant 0 : index
    %c1_36 = arith.constant 1 : index
    %c2_37 = arith.constant 2 : index
    %c0_38 = arith.constant 0 : index
    %36 = vector.load %arg1[%c0_35, %c1_36, %c2_37, %c0_38] : memref<1x18x18x64xbf16, #tpu.memory_space<vmem>>, vector<1x16x16x64xbf16>
    %37 = vector.shape_cast %36 : vector<1x16x16x64xbf16> to vector<16x16x64xbf16>
    %38 = vector.shape_cast %37 : vector<16x16x64xbf16> to vector<256x64xbf16>
    %c5 = arith.constant 5 : index
    %c0_39 = arith.constant 0 : index
    %c0_40 = arith.constant 0 : index
    %39 = vector.load %arg2[%c5, %c0_39, %c0_40] : memref<9x64x32xbf16, #tpu.memory_space<vmem>>, vector<1x64x32xbf16>
    %40 = vector.shape_cast %39 : vector<1x64x32xbf16> to vector<64x32xbf16>
    %cst_41 = arith.constant dense<0.000000e+00> : vector<256x32xf32>
    %41 = tpu.matmul %38, %40, %cst_41 {dimension_numbers = #tpu.dot_dimension_numbers<[1], [0], [0], [1], [0, 0, 1, 1], [], []>} : vector<256x64xbf16>, vector<64x32xbf16>, vector<256x32xf32> -> vector<256x32xf32>
    %42 = arith.addf %35, %41 : vector<256x32xf32>
    %c0_42 = arith.constant 0 : index
    %c2_43 = arith.constant 2 : index
    %c0_44 = arith.constant 0 : index
    %c0_45 = arith.constant 0 : index
    %43 = vector.load %arg1[%c0_42, %c2_43, %c0_44, %c0_45] : memref<1x18x18x64xbf16, #tpu.memory_space<vmem>>, vector<1x16x16x64xbf16>
    %44 = vector.shape_cast %43 : vector<1x16x16x64xbf16> to vector<16x16x64xbf16>
    %45 = vector.shape_cast %44 : vector<16x16x64xbf16> to vector<256x64xbf16>
    %c6 = arith.constant 6 : index
    %c0_46 = arith.constant 0 : index
    %c0_47 = arith.constant 0 : index
    %46 = vector.load %arg2[%c6, %c0_46, %c0_47] : memref<9x64x32xbf16, #tpu.memory_space<vmem>>, vector<1x64x32xbf16>
    %47 = vector.shape_cast %46 : vector<1x64x32xbf16> to vector<64x32xbf16>
    %cst_48 = arith.constant dense<0.000000e+00> : vector<256x32xf32>
    %48 = tpu.matmul %45, %47, %cst_48 {dimension_numbers = #tpu.dot_dimension_numbers<[1], [0], [0], [1], [0, 0, 1, 1], [], []>} : vector<256x64xbf16>, vector<64x32xbf16>, vector<256x32xf32> -> vector<256x32xf32>
    %49 = arith.addf %42, %48 : vector<256x32xf32>
    %c0_49 = arith.constant 0 : index
    %c2_50 = arith.constant 2 : index
    %c1_51 = arith.constant 1 : index
    %c0_52 = arith.constant 0 : index
    %50 = vector.load %arg1[%c0_49, %c2_50, %c1_51, %c0_52] : memref<1x18x18x64xbf16, #tpu.memory_space<vmem>>, vector<1x16x16x64xbf16>
    %51 = vector.shape_cast %50 : vector<1x16x16x64xbf16> to vector<16x16x64xbf16>
    %52 = vector.shape_cast %51 : vector<16x16x64xbf16> to vector<256x64xbf16>
    %c7 = arith.constant 7 : index
    %c0_53 = arith.constant 0 : index
    %c0_54 = arith.constant 0 : index
    %53 = vector.load %arg2[%c7, %c0_53, %c0_54] : memref<9x64x32xbf16, #tpu.memory_space<vmem>>, vector<1x64x32xbf16>
    %54 = vector.shape_cast %53 : vector<1x64x32xbf16> to vector<64x32xbf16>
    %cst_55 = arith.constant dense<0.000000e+00> : vector<256x32xf32>
    %55 = tpu.matmul %52, %54, %cst_55 {dimension_numbers = #tpu.dot_dimension_numbers<[1], [0], [0], [1], [0, 0, 1, 1], [], []>} : vector<256x64xbf16>, vector<64x32xbf16>, vector<256x32xf32> -> vector<256x32xf32>
    %56 = arith.addf %49, %55 : vector<256x32xf32>
    %c0_56 = arith.constant 0 : index
    %c2_57 = arith.constant 2 : index
    %c2_58 = arith.constant 2 : index
    %c0_59 = arith.constant 0 : index
    %57 = vector.load %arg1[%c0_56, %c2_57, %c2_58, %c0_59] : memref<1x18x18x64xbf16, #tpu.memory_space<vmem>>, vector<1x16x16x64xbf16>
    %58 = vector.shape_cast %57 : vector<1x16x16x64xbf16> to vector<16x16x64xbf16>
    %59 = vector.shape_cast %58 : vector<16x16x64xbf16> to vector<256x64xbf16>
    %c8 = arith.constant 8 : index
    %c0_60 = arith.constant 0 : index
    %c0_61 = arith.constant 0 : index
    %60 = vector.load %arg2[%c8, %c0_60, %c0_61] : memref<9x64x32xbf16, #tpu.memory_space<vmem>>, vector<1x64x32xbf16>
    %61 = vector.shape_cast %60 : vector<1x64x32xbf16> to vector<64x32xbf16>
    %cst_62 = arith.constant dense<0.000000e+00> : vector<256x32xf32>
    %62 = tpu.matmul %59, %61, %cst_62 {dimension_numbers = #tpu.dot_dimension_numbers<[1], [0], [0], [1], [0, 0, 1, 1], [], []>} : vector<256x64xbf16>, vector<64x32xbf16>, vector<256x32xf32> -> vector<256x32xf32>
    %63 = arith.addf %56, %62 : vector<256x32xf32>
    %c0_63 = arith.constant 0 : index
    %c0_64 = arith.constant 0 : index
    %64 = vector.load %arg3[%c0_63, %c0_64] : memref<1x32xf32, #tpu.memory_space<vmem>>, vector<1x32xf32>
    %65 = vector.broadcast %64 : vector<1x32xf32> to vector<256x32xf32>
    %66 = arith.addf %63, %65 : vector<256x32xf32>
    %cst_65 = arith.constant 0.000000e+00 : f32
    %67 = vector.broadcast %cst_65 : f32 to vector<256x32xf32>
    %68 = arith.subf %67, %66 : vector<256x32xf32>
    %69 = math.exp %68 : vector<256x32xf32>
    %cst_66 = arith.constant 1.000000e+00 : f32
    %70 = vector.broadcast %cst_66 : f32 to vector<256x32xf32>
    %71 = arith.addf %70, %69 : vector<256x32xf32>
    %72 = tpu.reciprocal %71 {approx = true} : vector<256x32xf32> -> vector<256x32xf32>
    %73 = arith.mulf %66, %72 : vector<256x32xf32>
    %cst_67 = arith.constant 0.000000e+00 : bf16
    %74 = vector.broadcast %cst_67 : bf16 to vector<18x18x32xbf16>
    %c0_68 = arith.constant 0 : index
    %c0_69 = arith.constant 0 : index
    %c0_70 = arith.constant 0 : index
    %75 = vector.load %arg7[%c0_68, %c0_69, %c0_70] : memref<18x18x32xbf16, #tpu.memory_space<vmem>>, vector<18x18x32xbf16>
    tpu.vector_store %arg7[%c0_68, %c0_69, %c0_70], %74 {strides = array<i32>} : memref<18x18x32xbf16, #tpu.memory_space<vmem>>, vector<18x18x32xbf16>,
    %76 = arith.truncf %73 : vector<256x32xf32> to vector<256x32xbf16>
    %77 = vector.shape_cast %76 : vector<256x32xbf16> to vector<16x16x32xbf16>
    %c1_71 = arith.constant 1 : index
    %c1_72 = arith.constant 1 : index
    %c0_73 = arith.constant 0 : index
    %78 = vector.load %arg7[%c1_71, %c1_72, %c0_73] : memref<18x18x32xbf16, #tpu.memory_space<vmem>>, vector<16x16x32xbf16>
    tpu.vector_store %arg7[%c1_71, %c1_72, %c0_73], %77 {strides = array<i32>} : memref<18x18x32xbf16, #tpu.memory_space<vmem>>, vector<16x16x32xbf16>,
    %cst_74 = arith.constant 0.000000e+00 : f32
    %79 = vector.broadcast %cst_74 : f32 to vector<256x64xf32>
    %c0_75 = arith.constant 0 : index
    %c0_76 = arith.constant 0 : index
    %c0_77 = arith.constant 0 : index
    %80 = vector.load %arg7[%c0_75, %c0_76, %c0_77] : memref<18x18x32xbf16, #tpu.memory_space<vmem>>, vector<16x16x32xbf16>
    %81 = vector.shape_cast %80 : vector<16x16x32xbf16> to vector<256x32xbf16>
    %c0_78 = arith.constant 0 : index
    %c0_79 = arith.constant 0 : index
    %c0_80 = arith.constant 0 : index
    %82 = vector.load %arg4[%c0_78, %c0_79, %c0_80] : memref<9x32x64xbf16, #tpu.memory_space<vmem>>, vector<1x32x64xbf16>
    %83 = vector.shape_cast %82 : vector<1x32x64xbf16> to vector<32x64xbf16>
    %cst_81 = arith.constant dense<0.000000e+00> : vector<256x64xf32>
    %84 = tpu.matmul %81, %83, %cst_81 {dimension_numbers = #tpu.dot_dimension_numbers<[1], [0], [0], [1], [0, 0, 1, 1], [], []>} : vector<256x32xbf16>, vector<32x64xbf16>, vector<256x64xf32> -> vector<256x64xf32>
    %85 = arith.addf %79, %84 : vector<256x64xf32>
    %c0_82 = arith.constant 0 : index
    %c1_83 = arith.constant 1 : index
    %c0_84 = arith.constant 0 : index
    %86 = vector.load %arg7[%c0_82, %c1_83, %c0_84] : memref<18x18x32xbf16, #tpu.memory_space<vmem>>, vector<16x16x32xbf16>
    %87 = vector.shape_cast %86 : vector<16x16x32xbf16> to vector<256x32xbf16>
    %c1_85 = arith.constant 1 : index
    %c0_86 = arith.constant 0 : index
    %c0_87 = arith.constant 0 : index
    %88 = vector.load %arg4[%c1_85, %c0_86, %c0_87] : memref<9x32x64xbf16, #tpu.memory_space<vmem>>, vector<1x32x64xbf16>
    %89 = vector.shape_cast %88 : vector<1x32x64xbf16> to vector<32x64xbf16>
    %cst_88 = arith.constant dense<0.000000e+00> : vector<256x64xf32>
    %90 = tpu.matmul %87, %89, %cst_88 {dimension_numbers = #tpu.dot_dimension_numbers<[1], [0], [0], [1], [0, 0, 1, 1], [], []>} : vector<256x32xbf16>, vector<32x64xbf16>, vector<256x64xf32> -> vector<256x64xf32>
    %91 = arith.addf %85, %90 : vector<256x64xf32>
    %c0_89 = arith.constant 0 : index
    %c2_90 = arith.constant 2 : index
    %c0_91 = arith.constant 0 : index
    %92 = vector.load %arg7[%c0_89, %c2_90, %c0_91] : memref<18x18x32xbf16, #tpu.memory_space<vmem>>, vector<16x16x32xbf16>
    %93 = vector.shape_cast %92 : vector<16x16x32xbf16> to vector<256x32xbf16>
    %c2_92 = arith.constant 2 : index
    %c0_93 = arith.constant 0 : index
    %c0_94 = arith.constant 0 : index
    %94 = vector.load %arg4[%c2_92, %c0_93, %c0_94] : memref<9x32x64xbf16, #tpu.memory_space<vmem>>, vector<1x32x64xbf16>
    %95 = vector.shape_cast %94 : vector<1x32x64xbf16> to vector<32x64xbf16>
    %cst_95 = arith.constant dense<0.000000e+00> : vector<256x64xf32>
    %96 = tpu.matmul %93, %95, %cst_95 {dimension_numbers = #tpu.dot_dimension_numbers<[1], [0], [0], [1], [0, 0, 1, 1], [], []>} : vector<256x32xbf16>, vector<32x64xbf16>, vector<256x64xf32> -> vector<256x64xf32>
    %97 = arith.addf %91, %96 : vector<256x64xf32>
    %c1_96 = arith.constant 1 : index
    %c0_97 = arith.constant 0 : index
    %c0_98 = arith.constant 0 : index
    %98 = vector.load %arg7[%c1_96, %c0_97, %c0_98] : memref<18x18x32xbf16, #tpu.memory_space<vmem>>, vector<16x16x32xbf16>
    %99 = vector.shape_cast %98 : vector<16x16x32xbf16> to vector<256x32xbf16>
    %c3_99 = arith.constant 3 : index
    %c0_100 = arith.constant 0 : index
    %c0_101 = arith.constant 0 : index
    %100 = vector.load %arg4[%c3_99, %c0_100, %c0_101] : memref<9x32x64xbf16, #tpu.memory_space<vmem>>, vector<1x32x64xbf16>
    %101 = vector.shape_cast %100 : vector<1x32x64xbf16> to vector<32x64xbf16>
    %cst_102 = arith.constant dense<0.000000e+00> : vector<256x64xf32>
    %102 = tpu.matmul %99, %101, %cst_102 {dimension_numbers = #tpu.dot_dimension_numbers<[1], [0], [0], [1], [0, 0, 1, 1], [], []>} : vector<256x32xbf16>, vector<32x64xbf16>, vector<256x64xf32> -> vector<256x64xf32>
    %103 = arith.addf %97, %102 : vector<256x64xf32>
    %c1_103 = arith.constant 1 : index
    %c1_104 = arith.constant 1 : index
    %c0_105 = arith.constant 0 : index
    %104 = vector.load %arg7[%c1_103, %c1_104, %c0_105] : memref<18x18x32xbf16, #tpu.memory_space<vmem>>, vector<16x16x32xbf16>
    %105 = vector.shape_cast %104 : vector<16x16x32xbf16> to vector<256x32xbf16>
    %c4_106 = arith.constant 4 : index
    %c0_107 = arith.constant 0 : index
    %c0_108 = arith.constant 0 : index
    %106 = vector.load %arg4[%c4_106, %c0_107, %c0_108] : memref<9x32x64xbf16, #tpu.memory_space<vmem>>, vector<1x32x64xbf16>
    %107 = vector.shape_cast %106 : vector<1x32x64xbf16> to vector<32x64xbf16>
    %cst_109 = arith.constant dense<0.000000e+00> : vector<256x64xf32>
    %108 = tpu.matmul %105, %107, %cst_109 {dimension_numbers = #tpu.dot_dimension_numbers<[1], [0], [0], [1], [0, 0, 1, 1], [], []>} : vector<256x32xbf16>, vector<32x64xbf16>, vector<256x64xf32> -> vector<256x64xf32>
    %109 = arith.addf %103, %108 : vector<256x64xf32>
    %c1_110 = arith.constant 1 : index
    %c2_111 = arith.constant 2 : index
    %c0_112 = arith.constant 0 : index
    %110 = vector.load %arg7[%c1_110, %c2_111, %c0_112] : memref<18x18x32xbf16, #tpu.memory_space<vmem>>, vector<16x16x32xbf16>
    %111 = vector.shape_cast %110 : vector<16x16x32xbf16> to vector<256x32xbf16>
    %c5_113 = arith.constant 5 : index
    %c0_114 = arith.constant 0 : index
    %c0_115 = arith.constant 0 : index
    %112 = vector.load %arg4[%c5_113, %c0_114, %c0_115] : memref<9x32x64xbf16, #tpu.memory_space<vmem>>, vector<1x32x64xbf16>
    %113 = vector.shape_cast %112 : vector<1x32x64xbf16> to vector<32x64xbf16>
    %cst_116 = arith.constant dense<0.000000e+00> : vector<256x64xf32>
    %114 = tpu.matmul %111, %113, %cst_116 {dimension_numbers = #tpu.dot_dimension_numbers<[1], [0], [0], [1], [0, 0, 1, 1], [], []>} : vector<256x32xbf16>, vector<32x64xbf16>, vector<256x64xf32> -> vector<256x64xf32>
    %115 = arith.addf %109, %114 : vector<256x64xf32>
    %c2_117 = arith.constant 2 : index
    %c0_118 = arith.constant 0 : index
    %c0_119 = arith.constant 0 : index
    %116 = vector.load %arg7[%c2_117, %c0_118, %c0_119] : memref<18x18x32xbf16, #tpu.memory_space<vmem>>, vector<16x16x32xbf16>
    %117 = vector.shape_cast %116 : vector<16x16x32xbf16> to vector<256x32xbf16>
    %c6_120 = arith.constant 6 : index
    %c0_121 = arith.constant 0 : index
    %c0_122 = arith.constant 0 : index
    %118 = vector.load %arg4[%c6_120, %c0_121, %c0_122] : memref<9x32x64xbf16, #tpu.memory_space<vmem>>, vector<1x32x64xbf16>
    %119 = vector.shape_cast %118 : vector<1x32x64xbf16> to vector<32x64xbf16>
    %cst_123 = arith.constant dense<0.000000e+00> : vector<256x64xf32>
    %120 = tpu.matmul %117, %119, %cst_123 {dimension_numbers = #tpu.dot_dimension_numbers<[1], [0], [0], [1], [0, 0, 1, 1], [], []>} : vector<256x32xbf16>, vector<32x64xbf16>, vector<256x64xf32> -> vector<256x64xf32>
    %121 = arith.addf %115, %120 : vector<256x64xf32>
    %c2_124 = arith.constant 2 : index
    %c1_125 = arith.constant 1 : index
    %c0_126 = arith.constant 0 : index
    %122 = vector.load %arg7[%c2_124, %c1_125, %c0_126] : memref<18x18x32xbf16, #tpu.memory_space<vmem>>, vector<16x16x32xbf16>
    %123 = vector.shape_cast %122 : vector<16x16x32xbf16> to vector<256x32xbf16>
    %c7_127 = arith.constant 7 : index
    %c0_128 = arith.constant 0 : index
    %c0_129 = arith.constant 0 : index
    %124 = vector.load %arg4[%c7_127, %c0_128, %c0_129] : memref<9x32x64xbf16, #tpu.memory_space<vmem>>, vector<1x32x64xbf16>
    %125 = vector.shape_cast %124 : vector<1x32x64xbf16> to vector<32x64xbf16>
    %cst_130 = arith.constant dense<0.000000e+00> : vector<256x64xf32>
    %126 = tpu.matmul %123, %125, %cst_130 {dimension_numbers = #tpu.dot_dimension_numbers<[1], [0], [0], [1], [0, 0, 1, 1], [], []>} : vector<256x32xbf16>, vector<32x64xbf16>, vector<256x64xf32> -> vector<256x64xf32>
    %127 = arith.addf %121, %126 : vector<256x64xf32>
    %c2_131 = arith.constant 2 : index
    %c2_132 = arith.constant 2 : index
    %c0_133 = arith.constant 0 : index
    %128 = vector.load %arg7[%c2_131, %c2_132, %c0_133] : memref<18x18x32xbf16, #tpu.memory_space<vmem>>, vector<16x16x32xbf16>
    %129 = vector.shape_cast %128 : vector<16x16x32xbf16> to vector<256x32xbf16>
    %c8_134 = arith.constant 8 : index
    %c0_135 = arith.constant 0 : index
    %c0_136 = arith.constant 0 : index
    %130 = vector.load %arg4[%c8_134, %c0_135, %c0_136] : memref<9x32x64xbf16, #tpu.memory_space<vmem>>, vector<1x32x64xbf16>
    %131 = vector.shape_cast %130 : vector<1x32x64xbf16> to vector<32x64xbf16>
    %cst_137 = arith.constant dense<0.000000e+00> : vector<256x64xf32>
    %132 = tpu.matmul %129, %131, %cst_137 {dimension_numbers = #tpu.dot_dimension_numbers<[1], [0], [0], [1], [0, 0, 1, 1], [], []>} : vector<256x32xbf16>, vector<32x64xbf16>, vector<256x64xf32> -> vector<256x64xf32>
    %133 = arith.addf %127, %132 : vector<256x64xf32>
    %c0_138 = arith.constant 0 : index
    %c0_139 = arith.constant 0 : index
    %134 = vector.load %arg5[%c0_138, %c0_139] : memref<1x64xf32, #tpu.memory_space<vmem>>, vector<1x64xf32>
    %135 = vector.broadcast %134 : vector<1x64xf32> to vector<256x64xf32>
    %136 = arith.addf %133, %135 : vector<256x64xf32>
    %cst_140 = arith.constant 0.000000e+00 : f32
    %137 = vector.broadcast %cst_140 : f32 to vector<256x64xf32>
    %138 = arith.subf %137, %136 : vector<256x64xf32>
    %139 = math.exp %138 : vector<256x64xf32>
    %cst_141 = arith.constant 1.000000e+00 : f32
    %140 = vector.broadcast %cst_141 : f32 to vector<256x64xf32>
    %141 = arith.addf %140, %139 : vector<256x64xf32>
    %142 = tpu.reciprocal %141 {approx = true} : vector<256x64xf32> -> vector<256x64xf32>
    %143 = arith.mulf %136, %142 : vector<256x64xf32>
    %c0_142 = arith.constant 0 : index
    %c1_143 = arith.constant 1 : index
    %c1_144 = arith.constant 1 : index
    %c0_145 = arith.constant 0 : index
    %144 = vector.load %arg1[%c0_142, %c1_143, %c1_144, %c0_145] : memref<1x18x18x64xbf16, #tpu.memory_space<vmem>>, vector<1x16x16x64xbf16>
    %145 = vector.shape_cast %144 : vector<1x16x16x64xbf16> to vector<16x16x64xbf16>
    %146 = vector.shape_cast %145 : vector<16x16x64xbf16> to vector<256x64xbf16>
    %147 = arith.extf %146 : vector<256x64xbf16> to vector<256x64xf32>
    %148 = arith.addf %143, %147 : vector<256x64xf32>
    %c0_146 = arith.constant 0 : index
    %c0_147 = arith.constant 0 : index
    %c0_148 = arith.constant 0 : index
    %149 = vector.load %arg6[%c0_146, %c0_147, %c0_148] : memref<1x256x64xf32, #tpu.memory_space<vmem>>, vector<1x256x64xf32>
    %150 = vector.shape_cast %149 : vector<1x256x64xf32> to vector<256x64xf32>
    %151 = vector.shape_cast %148 : vector<256x64xf32> to vector<1x256x64xf32>
    tpu.vector_store %arg6[%c0_146, %c0_147, %c0_148], %151 {strides = array<i32>} : memref<1x256x64xf32, #tpu.memory_space<vmem>>, vector<1x256x64xf32>,
    return
  }
  func.func @transform_0(%arg0: i32) -> (i32, i32, i32, i32) {
    %c0_i32 = arith.constant 0 : i32
    %c0_i32_0 = arith.constant 0 : i32
    %c0_i32_1 = arith.constant 0 : i32
    %c0_i32_2 = arith.constant 0 : i32
    return %arg0, %c0_i32, %c0_i32_0, %c0_i32_1 : i32, i32, i32, i32
  }
  func.func @transform_1(%arg0: i32) -> (i32, i32, i32) {
    %c0_i32 = arith.constant 0 : i32
    %c0_i32_0 = arith.constant 0 : i32
    %c0_i32_1 = arith.constant 0 : i32
    %c0_i32_2 = arith.constant 0 : i32
    return %c0_i32, %c0_i32_0, %c0_i32_1 : i32, i32, i32
  }
  func.func @transform_2(%arg0: i32) -> (i32, i32) {
    %c0_i32 = arith.constant 0 : i32
    %c0_i32_0 = arith.constant 0 : i32
    %c0_i32_1 = arith.constant 0 : i32
    return %c0_i32, %c0_i32_0 : i32, i32
  }
  func.func @transform_3(%arg0: i32) -> (i32, i32, i32) {
    %c0_i32 = arith.constant 0 : i32
    %c0_i32_0 = arith.constant 0 : i32
    %c0_i32_1 = arith.constant 0 : i32
    %c0_i32_2 = arith.constant 0 : i32
    return %c0_i32, %c0_i32_0, %c0_i32_1 : i32, i32, i32
  }
  func.func @transform_4(%arg0: i32) -> (i32, i32) {
    %c0_i32 = arith.constant 0 : i32
    %c0_i32_0 = arith.constant 0 : i32
    %c0_i32_1 = arith.constant 0 : i32
    return %c0_i32, %c0_i32_0 : i32, i32
  }
  func.func @transform_5(%arg0: i32) -> (i32, i32, i32) {
    %c0_i32 = arith.constant 0 : i32
    %c0_i32_0 = arith.constant 0 : i32
    %c0_i32_1 = arith.constant 0 : i32
    return %arg0, %c0_i32, %c0_i32_0 : i32, i32, i32
  }
}

</mosaic_0001>

<bundles_post_ra>
// kernel: bottleneck_forward.1
= control target key start
LH: loop header
LB: loop body
LE: loop exit
PB: predicated region body
PF: predicated region fallthrough
CT: control target
= control target key end

     0   :  { %10 = vsyncpa [#allocation4], 0  ;;  %s19210_s0 = inlined_call_operand.vmem [shape: bf16[2,18,18,64], index: 0, kind: input, shape index: {}]   ;;  %s19211_s1 = inlined_call_operand.vmem [shape: bf16[9,64,32], index: 1, kind: input, shape index: {}]   ;;  %s19212_s2 = inlined_call_operand.vmem [shape: f32[1,32], index: 2, kind: input, shape index: {}]   ;;  %s19213_s3 = inlined_call_operand.vmem [shape: bf16[9,32,64], index: 3, kind: input, shape index: {}]   ;;  %s19214_s4 = inlined_call_operand.vmem [shape: f32[1,64], index: 4, kind: input, shape index: {}]   ;;  %s19215_s5 = inlined_call_operand.hbm [shape: f32[2,256,64], index: 5, kind: output, shape index: {}]  }
   0x1   :  { %12 = vsyncpa [#allocation4 + $0x1], 0  ;;  %s14631_s18 = smov 0   ;;  %s14633_s19 = smov 0  }
   0x2   :  { %s14635_s20 = smov 0   ;;  %s14637_s21 = smov 0  }
   0x3 LB: > { %s14652_s22 = sadd.s32 4294967295, %s14595_s21   ;;  %s11384_s23 = sadd.s32 4294967294, %s14595_s21   ;;  %s14595_s21 = sphi %s14637_s21, %s19623_s21   ;;  %s14591_s20 = sphi %s14635_s20, %s19622_s20   ;;  %s14587_s19 = sphi %s14633_s19, %s19621_s19   ;;  %s14583_s18 = sphi %s14631_s18, %s19620_s18  }
   0x4   : > { %s14656_s24 = sadd.s32 1, %s14595_s21   ;;  %s135_s25 = sadd.s32 1, %s14591_s20 }
   0x5   : > { %s132_s26 = ssub.s32 %s14595_s21, %s14656_s24  ;;  %p145_p0 = scmp.ne.s32.totalorder %s14591_s20, %s14587_s19 }
   0x6   : > { %p133_p1 = scmp.eq.s32.totalorder %s132_s26, 0  ;;  %p146_p2 = scmp.eq.s32.totalorder %s14652_s22, 1 }
   0x7   : > { %p151_p3 = scmp.ne.s32.totalorder %s14587_s19, %s14583_s18  ;;  %p152_p4 = scmp.eq.s32.totalorder %s11384_s23, 1 }
   0x8   : > { %s14667_s27 = scalar_select %p133_p1, %s14591_s20, %s135_s25  }
   0x9   : > { %p14669_p5 = por %p146_p2, %p145_p0  ;;  %p14673_p6 = por %p152_p4, %p151_p3 }
   0xa   : > { %p11387_p7 = scmp.ge.s32.totalorder %s14595_s21, 1  ;;  %p190_p8 = scmp.lt.s32.totalorder %s14595_s21, 3 }
   0xc   : > { %p191_p9 = pnand %p11387_p7, %p190_p8 }
   0xe   : > { %194 = sbr.rel (%p191_p9) target bundleno = 1751 (0x6d7), region = 40 }
  0x15   : > { %v14105_v0 = vld [vmem:[%s19211_s1 + $0x20] sm:$0xff]   ;;  %p218_p10 = scmp.lt.s32.totalorder %s14652_s22, 1  ;;  %v14106_v1 = vld [vmem:[%s19211_s1 + $0x28] sm:$0xff]   ;;  %v14107_v2 = vld [vmem:[%s19211_s1 + $0x30] sm:$0xff]   ;;  %vm280_vm0 = vsmask.f32 3328 }
  0x16   : > { %12866 = vmatprep.subr.bf16.mxu0 %v14105_v0  ;;  %v14108_v3 = vld [vmem:[%s19211_s1 + $0x38] sm:$0xff]   ;;  %vm281_vm1 = vsmask.f32 7440  ;;  %v14109_v25 = vld [vmem:[%s19211_s1] sm:$0xff]   ;;  %vm748_vm3 = vcmask 523264   ;;  %vm1319_vm4 = vcmask 1042432  }
  0x17   : > { %s219_s9 = scalar_select %p218_p10, %s14652_s22, 1  ;;  %12867 = vmatpush3.bf16.msra.mxu0 %v14105_v0  ;;  %vm14731_vm2 = vmor %vm280_vm0, %vm281_vm1  ;;  %vm1320_vm5 = vcmask 1046532   ;;  %vm5265_vm7 = vcmask 257024   ;;  %vm5268_vm8 = vcmask 253952   ;;  %vm6359_vm9 = vcmask 261120  }
  0x18   : > { %12868 = vmatprep.subr.bf16.mxu0 %v14106_v1  ;;  %vm15047_vm6 = vmor %vm1319_vm4, %vm1320_vm5  ;;  %vm5742_vm10 = vsmask.f32 7938  ;;  %vm5417_vm11 = vsmask.f32 256  ;;  %vm5418_vm12 = vsmask.f32 4368 }
  0x19   : > { %s14062_s12 = smul.u32 216, %s219_s9  ;;  %vm16661_vm13 = vmand %vm5265_vm7, %vm5742_vm10  ;;  %s215_s30 = sand.u32 1, %s14587_s19  }
  0x1a   : > { %vm16667_vm14 = vmor %vm5417_vm11, %vm5418_vm12  ;;  %s18890_s6 = sshll.u32 %s215_s30, 8  ;;  %s14598_s13 = smov [#allocation3]  }
  0x1b   : > { %s14696_s17 = scalar_lea.vmem %s19210_s0, %s14062_s12  ;;  %12869 = vmatpush3.bf16.msra.mxu0 %v14106_v1  ;;  %vm16674_vm15 = vmand %vm5268_vm8, %vm5417_vm11  ;;  %s18912_s7 = scalar_lea.vmem [#allocation3], %s18890_s6 }
  0x1c   : > { %v14699_v4 = vld [vmem:[%s14696_s17] sm:$0xf]  ;;  %v14702_v5 = vld [vmem:[%s14696_s17 + $0x4] sm:$0xf]  ;;  %v264_v6 = vld [vmem:[%s14696_s17 + $0x8] sm:$0x1]  ;;  %12870 = vmatprep.subr.bf16.mxu0 %v14107_v2 }
  0x1d   : > { %v284_v7 = vshrl.u32 %v14699_v4, 16  ;;  %v287_v8 = vshll.u32 %v14699_v4, 16  ;;  %v293_v9 = vshll.u32 %v14702_v5, 16  ;;  %v297_v10 = vshrl.u32 %v14702_v5, 16  ;;  %v14710_v11 = vld [vmem:[%s14696_s17 + $0xc] sm:$0xf] }
  0x1e   : > { %v303_v12 = vshll.u32 %v264_v6, 16  ;;  %v14713_v13 = vld [vmem:[%s14696_s17 + $0x10] sm:$0xf]  ;;  %v14716_v14 = vld [vmem:[%s14696_s17 + $0x14] sm:$0x1]  ;;  %v308_v20 = vshrl.u32 %v14710_v11, 16 }
  0x1f   : > { %v286_v15 = vrot.slane %v284_v7, 4  ;;  %v289_v16 = vrot.slane %v287_v8, 5  ;;  %v295_v17 = vrot.slane %v293_v9, 5  ;;  %v299_v18 = vrot.slane %v297_v10, 4  ;;  %12871 = vmatpush3.bf16.msra.mxu0 %v14107_v2  ;;  %v14727_v28 = vld [vmem:[%s14696_s17 + $0x18] sm:$0xf] }
  0x20   : > { %v305_v19 = vrot.slane %v303_v12, 5  ;;  %v311_v21 = vshll.u32 %v14710_v11, 16  ;;  %v317_v22 = vshll.u32 %v14713_v13, 16  ;;  %12872 = vmatprep.subr.bf16.mxu0 %v14108_v3  ;;  %v321_v26 = vshrl.u32 %v14713_v13, 16  ;;  %v14736_v33 = vld [vmem:[%s14696_s17 + $0x1c] sm:$0xf] }
  0x21   : > { %v290_v23 = vor.u32 %v289_v16, %v286_v15  ;;  %v300_v24 = vor.u32 %v299_v18, %v295_v17  ;;  %v327_v27 = vshll.u32 %v14716_v14, 16  ;;  %v310_v30 = vrot.slane %v308_v20, 4  ;;  %v266_v40 = vld [vmem:[%s14696_s17 + $0x20] sm:$0x1]  ;;  %v14749_v47 = vld [vmem:[%s14696_s17 + $0x24] sm:$0xf] }
  0x22   : > { %v313_v31 = vrot.slane %v311_v21, 5  ;;  %v319_v32 = vrot.slane %v317_v22, 5  ;;  %v323_v36 = vrot.slane %v321_v26, 4  ;;  %v332_v41 = vshrl.u32 %v14727_v28, 16  ;;  %v14752_v52 = vld [vmem:[%s14696_s17 + $0x28] sm:$0xf] }
  0x23   : > { %v291_v34 = vrot.slane %v290_v23, 4  ;;  %v301_v35 = vrot.slane %v300_v24, 4  ;;  %12873 = vmatpush3.bf16.msra.mxu0 %v14108_v3  ;;  %v329_v39 = vrot.slane %v327_v27, 5  ;;  %v335_v42 = vshll.u32 %v14727_v28, 16  ;;  %v267_v59 = vld [vmem:[%s14696_s17 + $0x2c] sm:$0x1] }
  0x24   : > { %v314_v38 = vor.u32 %v313_v31, %v310_v30  ;;  %12906 = vmatprep.subr.bf16.mxu0 %v14109_v25  ;;  %v324_v45 = vor.u32 %v323_v36, %v319_v32  ;;  %v341_v46 = vshll.u32 %v14736_v33, 16  ;;  %v334_v50 = vrot.slane %v332_v41, 4  ;;  %v14765_v2 = vld [vmem:[%s14696_s17 + $0x30] sm:$0xf]  ;;  %v14768_v9 = vld [vmem:[%s14696_s17 + $0x34] sm:$0xf] }
  0x25   : > { %v296_v43 = vsel %vm14731_vm2, %v291_v34, %v295_v17  ;;  %v306_v44 = vsel %vm14731_vm2, %v301_v35, %v305_v19  ;;  %v337_v51 = vrot.slane %v335_v42, 5  ;;  %v345_v55 = vshrl.u32 %v14736_v33, 16  ;;  %v14110_v10 = vld [vmem:[%s19211_s1 + $0x8] sm:$0xff]   ;;  %v14778_v20 = vld [vmem:[%s14696_s17 + $0x38] sm:$0x1]  ;;  %v14111_v30 = vld [vmem:[%s19211_s1 + $0x10] sm:$0xff]  }
  0x26   : > { %v11398_v48 = vcombine.low %v296_v43, %v306_v44  ;;  %v315_v49 = vrot.slane %v314_v38, 4  ;;  %v325_v53 = vrot.slane %v324_v45, 4  ;;  %v343_v54 = vrot.slane %v341_v46, 5  ;;  %v14788_v36 = vld [vmem:[%s14696_s17 + $0x3c] sm:$0xf]  ;;  %s11322_s8 = sshll.u32 %s18912_s7, 4  ;;  %s19159_s8 = int_to_ptr.vmem [resolvable:$true] %s11322_s8 }
  0x27   : > { %v351_v56 = vshll.u32 %v266_v40, 16  ;;  %v338_v58 = vor.u32 %v337_v51, %v334_v50  ;;  %v356_v60 = vshrl.u32 %v14749_v47, 16  ;;  %v359_v61 = vshll.u32 %v14749_v47, 16  ;;  %v14794_v41 = vld [vmem:[%s14696_s17 + $0x40] sm:$0xf]  ;;  %s14533_s12 = scalar_lea.vmem %s19159_s8, 4096 }
  0x28   : > { %12874 = vmatprep.mubr.msk.bf16.mxu0 %vm748_vm3, %v11398_v48  ;;  %v320_v57 = vsel %vm14731_vm2, %v315_v49, %v319_v32  ;;  %v330_v62 = vsel %vm14731_vm2, %v325_v53, %v329_v39  ;;  %v347_v63 = vrot.slane %v345_v55, 4  ;;  %v365_v1 = vshll.u32 %v14752_v52, 16  ;;  %v14799_v46 = vld [vmem:[%s14696_s17 + $0x44] sm:$0x1]  ;;  %p14534_p11 = scmp.ne.s32.totalorder %s19159_s8, %s14533_s12  ;;  %s14537_s14 = sshll.u32 %s14598_s13, 4  ;;  %s14538_s14 = int_to_ptr.vmem [resolvable:$false] %s14537_s14 }
  0x29   : > { %v353_v0 = vrot.slane %v351_v56, 5  ;;  %v11399_v3 = vcombine.low %v320_v57, %v330_v62  ;;  %v339_v6 = vrot.slane %v338_v58, 4  ;;  %v358_v7 = vrot.slane %v356_v60, 4  ;;  %v14807_v57 = vld [vmem:[%s14696_s17 + $0x48] sm:$0xf]  ;;  %v14112_v58 = vld [vmem:[%s19211_s1 + $0x18] sm:$0xff]   ;;  %p14540_p0 = scmp.lt.s32.totalorder %s19159_s8, %s14538_s14 }
  0x2a   : > { %v361_v8 = vrot.slane %v359_v61, 5  ;;  %v348_v12 = vor.u32 %v347_v63, %v343_v54  ;;  %v367_v15 = vrot.slane %v365_v1, 5  ;;  %v369_v16 = vshrl.u32 %v14752_v52, 16  ;;  %v14816_v63 = vld [vmem:[%s14696_s17 + $0x4c] sm:$0xf]  ;;  %p14535_p12 = pnand %p14534_p11, %p14669_p5  ;;  %s14539_s15 = scalar_lea.vmem %s14538_s14, 8192 }
  0x2b   : > { %v375_v17 = vshll.u32 %v267_v59, 16  ;;  %12875 = vmatmul.mubr.msk.bf16.vlgmr.msra.gmra.mrb[0].mxu0 %vm748_vm3, %v11399_v3  ;;  %v344_v18 = vsel %vm14731_vm2, %v339_v6, %v343_v54  ;;  %v380_v21 = vshrl.u32 %v14765_v2, 16  ;;  %v383_v22 = vshll.u32 %v14765_v2, 16  ;;  %p14541_p1 = scmp.lt.s32.totalorder %s14539_s15, %s14533_s12 }
  0x2c   : > { %v362_v19 = vor.u32 %v361_v8, %v358_v7  ;;  %12907 = vmatpush3.bf16.msra.mxu0 %v14109_v25  ;;  %v349_v23 = vrot.slane %v348_v12, 4  ;;  %v371_v24 = vrot.slane %v369_v16, 4  ;;  %v389_v27 = vshll.u32 %v14768_v9, 16  ;;  %v14821_v12 = vld [vmem:[%s14696_s17 + $0x50] sm:$0x1]  ;;  %p14536_p13 = pneg %p14535_p12 }
  0x2d   : > { %v377_v26 = vrot.slane %v375_v17, 5  ;;  %v382_v32 = vrot.slane %v380_v21, 4  ;;  %v385_v34 = vrot.slane %v383_v22, 5  ;;  %v393_v35 = vshrl.u32 %v14768_v9, 16  ;;  %12908 = vmatprep.subr.bf16.mxu0 %v14110_v10  ;;  %v14831_v21 = vld [vmem:[%s14696_s17 + $0x54] sm:$0xf]  ;;  %p14542_p2 = por %p14541_p1, %p14540_p0 }
  0x2e   : > { %v363_v31 = vrot.slane %v362_v19, 4  ;;  %v354_v25 = vsel %vm14731_vm2, %v349_v23, %v353_v0  ;;  %v372_v38 = vor.u32 %v371_v24, %v367_v15  ;;  %v391_v39 = vrot.slane %v389_v27, 5  ;;  %v14836_v22 = vld [vmem:[%s19211_s1 + $0x40] sm:$0xff]  }
  0x2f   : > { %v399_v40 = vshll.u32 %v14778_v20, 16  ;;  %v11400_v42 = vcombine.low %v344_v18, %v354_v25  ;;  %v386_v44 = vor.u32 %v385_v34, %v382_v32  ;;  %v395_v45 = vrot.slane %v393_v35, 4  ;;  %v14843_v25 = vld [vmem:[%s14696_s17 + $0x5c] sm:$0x1]  ;;  %p14543_p3 = pnand %p14542_p2, %p14536_p13 }
  0x30   : > { %v368_v43 = vsel %vm14731_vm2, %v363_v31, %v367_v15  ;;  %v373_v48 = vrot.slane %v372_v38, 4  ;;  %v404_v50 = vshrl.u32 %v14788_v36, 16  ;;  %v407_v51 = vshll.u32 %v14788_v36, 16  ;;  %12909 = vmatpush3.bf16.msra.mxu0 %v14110_v10 }
  0x31   : > { %v401_v49 = vrot.slane %v399_v40, 5  ;;  %12878 = vmatprep.mubr.msk.bf16.mxu0 %vm748_vm3, %v11400_v42  ;;  %v387_v53 = vrot.slane %v386_v44, 4  ;;  %v396_v54 = vor.u32 %v395_v45, %v391_v39  ;;  %v413_v55 = vshll.u32 %v14794_v41, 16  ;;  %12910 = vmatprep.subr.bf16.mxu0 %v14111_v30 }
  0x32   : > { %v417_v56 = vshrl.u32 %v14794_v41, 16  ;;  %v378_v59 = vsel %vm14731_vm2, %v373_v48, %v377_v26  ;;  %v406_v60 = vrot.slane %v404_v50, 4  ;;  %v409_v61 = vrot.slane %v407_v51, 5 }
  0x33   : > { %v423_v62 = vshll.u32 %v14799_v46, 16  ;;  %v11401_v0 = vcombine.low %v368_v43, %v378_v59  ;;  %v392_v1 = vsel %vm14731_vm2, %v387_v53, %v391_v39  ;;  %v397_v3 = vrot.slane %v396_v54, 4  ;;  %v14851_v43 = vld [vmem:[%s14696_s17 + $0x60] sm:$0xf] }
  0x34   : > { %v415_v6 = vrot.slane %v413_v55, 5  ;;  %v410_v7 = vor.u32 %v409_v61, %v406_v60  ;;  %v419_v8 = vrot.slane %v417_v56, 4  ;;  %v428_v15 = vshrl.u32 %v14807_v57, 16  ;;  %12911 = vmatpush3.bf16.msra.mxu0 %v14111_v30  ;;  %v14839_v30 = vld [vmem:[%s14696_s17 + $0x58] sm:$0xf] }
  0x35   : > { %v425_v10 = vrot.slane %v423_v62, 5  ;;  %12879 = vmatmul.mubr.msk.bf16.gmra.mrb[4].mxu0 %vm748_vm3, %v11401_v0  ;;  %v402_v16 = vsel %vm14731_vm2, %v397_v3, %v401_v49  ;;  %v431_v17 = vshll.u32 %v14807_v57, 16  ;;  %v437_v18 = vshll.u32 %v14816_v63, 16  ;;  %12912 = vmatprep.subr.bf16.mxu0 %v14112_v58  ;;  %v14859_v55 = vld [vmem:[%s14696_s17 + $0x64] sm:$0xf] }
  0x36   : > { %v441_v19 = vshrl.u32 %v14816_v63, 16  ;;  %v11402_v23 = vcombine.low %v392_v1, %v402_v16  ;;  %v411_v24 = vrot.slane %v410_v7, 4  ;;  %v420_v26 = vor.u32 %v419_v8, %v415_v6  ;;  %v14869_v7 = vld [vmem:[%s14696_s17 + $0x68] sm:$0x1] }
  0x37   : > { %v430_v27 = vrot.slane %v428_v15, 4  ;;  %v433_v31 = vrot.slane %v431_v17, 5  ;;  %v439_v32 = vrot.slane %v437_v18, 5  ;;  %v447_v35 = vshll.u32 %v14821_v12, 16  ;;  %19324 = vst [vmem:[#allocation6_spill] sm:$0xff] %v14869_v7 }
  0x38   : > { %v443_v34 = vrot.slane %v441_v19, 4  ;;  %12882 = vmatprep.mubr.msk.bf16.mxu0 %vm748_vm3, %v11402_v23  ;;  %v416_v38 = vsel %vm14731_vm2, %v411_v24, %v415_v6  ;;  %v421_v39 = vrot.slane %v420_v26, 4  ;;  %v452_v40 = vshrl.u32 %v14831_v21, 16  ;;  %12913 = vmatpush3.bf16.msra.mxu0 %v14112_v58  ;;  %v14874_v15 = vld [vmem:[%s14696_s17 + $0x6c] sm:$0xf] }
  0x39   : > { %v455_v42 = vshll.u32 %v14831_v21, 16  ;;  %v434_v44 = vor.u32 %v433_v31, %v430_v27  ;;  %v449_v48 = vrot.slane %v447_v35, 5  ;;  %v461_v49 = vshll.u32 %v14839_v30, 16  ;;  %12946 = vmatprep.subr.bf16.mxu0 %v14836_v22  ;;  %v14877_v23 = vld [vmem:[%s14696_s17 + $0x70] sm:$0xf] }
  0x3a   : > { %v444_v45 = vor.u32 %v443_v34, %v439_v32  ;;  %v426_v50 = vsel %vm14731_vm2, %v421_v39, %v425_v10  ;;  %v454_v51 = vrot.slane %v452_v40, 4  ;;  %v465_v54 = vshrl.u32 %v14839_v30, 16  ;;  %v14889_v40 = vld [vmem:[%s14696_s17 + $0x78] sm:$0xf] }
  0x3b   : > { %v457_v53 = vrot.slane %v455_v42, 5  ;;  %v11403_v56 = vcombine.low %v416_v38, %v426_v50  ;;  %v435_v58 = vrot.slane %v434_v44, 4  ;;  %v463_v60 = vrot.slane %v461_v49, 5  ;;  %v14894_v49 = vld [vmem:[%s14696_s17 + $0x7c] sm:$0xf] }
  0x3c   : > { %v445_v59 = vrot.slane %v444_v45, 4  ;;  %v467_v62 = vrot.slane %v465_v54, 4  ;;  %v471_v0 = vshll.u32 %v14843_v25, 16  ;;  %v476_v1 = vshrl.u32 %v14851_v43, 16 }
  0x3d   : > { %v458_v61 = vor.u32 %v457_v53, %v454_v51  ;;  %12883 = vmatmul.mubr.msk.bf16.gmra.mrb[8].mxu0 %vm748_vm3, %v11403_v56  ;;  %v440_v3 = vsel %vm14731_vm2, %v435_v58, %v439_v32  ;;  %v479_v8 = vshll.u32 %v14851_v43, 16  ;;  %v485_v10 = vshll.u32 %v14859_v55, 16  ;;  %v14881_v32 = vld [vmem:[%s14696_s17 + $0x74] sm:$0x1] }
  0x3e   : > { %v450_v6 = vsel %vm14731_vm2, %v445_v59, %v449_v48  ;;  %v468_v18 = vor.u32 %v467_v62, %v463_v60  ;;  %v473_v19 = vrot.slane %v471_v0, 5  ;;  %v478_v24 = vrot.slane %v476_v1, 4  ;;  %19325 = vst [vmem:[#allocation7_spill] sm:$0xff] %v14881_v32 }
  0x3f   : > { %v11404_v16 = vcombine.low %v440_v3, %v450_v6  ;;  %v459_v17 = vrot.slane %v458_v61, 4  ;;  %v481_v26 = vrot.slane %v479_v8, 5  ;;  %v487_v27 = vrot.slane %v485_v10, 5  ;;  %v14900_v61 = vld [vmem:[%s14696_s17 + $0x80] sm:$0x1] }
  0x40   : > { %v489_v31 = vshrl.u32 %v14859_v55, 16  ;;  %v469_v35 = vrot.slane %v468_v18, 4  ;;  %v495_v38 = vshll.u32 %v14869_v7, 16  ;;  %v500_v39 = vshrl.u32 %v14874_v15, 16  ;;  %19326 = vst [vmem:[#allocation8_spill] sm:$0xff] %v14900_v61 }
  0x41   : > { %12886 = vmatprep.mubr.msk.bf16.mxu0 %vm748_vm3, %v11404_v16  ;;  %v464_v34 = vsel %vm14731_vm2, %v459_v17, %v463_v60  ;;  %v482_v42 = vor.u32 %v481_v26, %v478_v24  ;;  %v503_v45 = vshll.u32 %v14874_v15, 16  ;;  %v509_v48 = vshll.u32 %v14877_v23, 16  ;;  %v14905_v6 = vld [vmem:[%s14696_s17 + $0x84] sm:$0xf] }
  0x42   : > { %v491_v44 = vrot.slane %v489_v31, 4  ;;  %v474_v50 = vsel %vm14731_vm2, %v469_v35, %v473_v19  ;;  %v497_v51 = vrot.slane %v495_v38, 5  ;;  %v502_v53 = vrot.slane %v500_v39, 4  ;;  %v14916_v39 = vld [vmem:[%s14696_s17 + $0x88] sm:$0xf] }
  0x43   : > { %v513_v54 = vshrl.u32 %v14877_v23, 16  ;;  %v11405_v56 = vcombine.low %v464_v34, %v474_v50  ;;  %v483_v58 = vrot.slane %v482_v42, 4  ;;  %v505_v60 = vrot.slane %v503_v45, 5 }
  0x44   : > { %v492_v59 = vor.u32 %v491_v44, %v487_v27  ;;  %v511_v62 = vrot.slane %v509_v48, 5  ;;  %v519_v1 = vshll.u32 %v14881_v32, 16  ;;  %v524_v3 = vshrl.u32 %v14889_v40, 16 }
  0x45   : > { %v515_v0 = vrot.slane %v513_v54, 4  ;;  %12887 = vmatmul.mubr.msk.bf16.gmra.mrb[12].mxu0 %vm748_vm3, %v11405_v56  ;;  %v488_v8 = vsel %vm14731_vm2, %v483_v58, %v487_v27  ;;  %v506_v16 = vor.u32 %v505_v60, %v502_v53  ;;  %v527_v17 = vshll.u32 %v14889_v40, 16  ;;  %v14922_v54 = vld [vmem:[%s14696_s17 + $0x8c] sm:$0x1] }
  0x46   : > { %v493_v10 = vrot.slane %v492_v59, 4  ;;  %v521_v19 = vrot.slane %v519_v1, 5  ;;  %v526_v24 = vrot.slane %v524_v3, 4  ;;  %v533_v26 = vshll.u32 %v14894_v49, 16  ;;  %19327 = vst [vmem:[#allocation9_spill] sm:$0xff] %v14922_v54 }
  0x47   : > { %v516_v18 = vor.u32 %v515_v0, %v511_v62  ;;  %v507_v34 = vrot.slane %v506_v16, 4  ;;  %v529_v35 = vrot.slane %v527_v17, 5  ;;  %v537_v38 = vshrl.u32 %v14894_v49, 16  ;;  %v14931_v0 = vld [vmem:[%s14696_s17 + $0x90] sm:$0xf] }
  0x48   : > { %v498_v31 = vsel %vm14731_vm2, %v493_v10, %v497_v51  ;;  %v535_v44 = vrot.slane %v533_v26, 5  ;;  %v543_v45 = vshll.u32 %v14900_v61, 16  ;;  %v548_v51 = vshrl.u32 %v14905_v6, 16  ;;  %v14934_v10 = vld [vmem:[%s14696_s17 + $0x94] sm:$0xf] }
  0x49   : > { %v11406_v27 = vcombine.low %v488_v8, %v498_v31  ;;  %v517_v42 = vrot.slane %v516_v18, 4  ;;  %v512_v48 = vsel %vm14731_vm2, %v507_v34, %v511_v62  ;;  %v530_v50 = vor.u32 %v529_v35, %v526_v24  ;;  %v14939_v24 = vld [vmem:[%s14696_s17 + $0x98] sm:$0x1]  ;;  %v14996_v61 = vld [vmem:[%s14696_s17 + $0xbc] sm:$0x1] }
  0x4a   : > { %v539_v53 = vrot.slane %v537_v38, 4  ;;  %v545_v58 = vrot.slane %v543_v45, 5  ;;  %v551_v59 = vshll.u32 %v14905_v6, 16  ;;  %v557_v60 = vshll.u32 %v14916_v39, 16  ;;  %19328 = vst [vmem:[#allocation10_spill] sm:$0xff] %v14939_v24 }
  0x4b   : > { %12890 = vmatprep.mubr.msk.bf16.mxu0 %vm748_vm3, %v11406_v27  ;;  %v522_v56 = vsel %vm14731_vm2, %v517_v42, %v521_v19  ;;  %v531_v1 = vrot.slane %v530_v50, 4  ;;  %v550_v8 = vrot.slane %v548_v51, 4  ;;  %v561_v18 = vshrl.u32 %v14916_v39, 16 }
  0x4c   : > { %v11407_v62 = vcombine.low %v512_v48, %v522_v56  ;;  %v540_v3 = vor.u32 %v539_v53, %v535_v44  ;;  %v553_v16 = vrot.slane %v551_v59, 5  ;;  %v559_v17 = vrot.slane %v557_v60, 5  ;;  %v14948_v48 = vld [vmem:[%s14696_s17 + $0x9c] sm:$0xf]  ;;  %v14954_v56 = vld [vmem:[%s14696_s17 + $0xa0] sm:$0xf] }
  0x4d   : > { %v567_v19 = vshll.u32 %v14922_v54, 16  ;;  %v536_v26 = vsel %vm14731_vm2, %v531_v1, %v535_v44  ;;  %v572_v34 = vshrl.u32 %v14931_v0, 16  ;;  %v575_v35 = vshll.u32 %v14931_v0, 16 }
  0x4e   : > { %12891 = vmatmul.mubr.msk.bf16.gmra.mrb[16].mxu0 %vm748_vm3, %v11407_v62  ;;  %v541_v31 = vrot.slane %v540_v3, 4  ;;  %v554_v38 = vor.u32 %v553_v16, %v550_v8  ;;  %v563_v27 = vrot.slane %v561_v18, 4  ;;  %v581_v45 = vshll.u32 %v14934_v10, 16  ;;  %v14957_v3 = vld [vmem:[%s14696_s17 + $0xa4] sm:$0x1] }
  0x4f   : > { %v569_v42 = vrot.slane %v567_v19, 5  ;;  %v574_v53 = vrot.slane %v572_v34, 4  ;;  %v577_v51 = vrot.slane %v575_v35, 5  ;;  %v585_v44 = vshrl.u32 %v14934_v10, 16  ;;  %19329 = vst [vmem:[#allocation11_spill] sm:$0xff] %v14957_v3 }
  0x50   : > { %v546_v50 = vsel %vm14731_vm2, %v541_v31, %v545_v58  ;;  %v555_v60 = vrot.slane %v554_v38, 4  ;;  %v564_v62 = vor.u32 %v563_v27, %v559_v17  ;;  %v583_v1 = vrot.slane %v581_v45, 5 }
  0x51   : > { %v11408_v59 = vcombine.low %v536_v26, %v546_v50  ;;  %v578_v8 = vor.u32 %v577_v51, %v574_v53  ;;  %v587_v16 = vrot.slane %v585_v44, 4  ;;  %v591_v18 = vshll.u32 %v14939_v24, 16  ;;  %v14967_v50 = vld [vmem:[%s14696_s17 + $0xa8] sm:$0xf] }
  0x52   : > { %v596_v58 = vshrl.u32 %v14948_v48, 16  ;;  %v560_v19 = vsel %vm14731_vm2, %v555_v60, %v559_v17  ;;  %v565_v31 = vrot.slane %v564_v62, 4  ;;  %v599_v26 = vshll.u32 %v14948_v48, 16  ;;  %v14973_v17 = vld [vmem:[%s14696_s17 + $0xac] sm:$0xf] }
  0x53   : > { %12894 = vmatprep.mubr.msk.bf16.mxu0 %vm748_vm3, %v11408_v59  ;;  %v605_v34 = vshll.u32 %v14954_v56, 16  ;;  %v579_v35 = vrot.slane %v578_v8, 4  ;;  %v588_v38 = vor.u32 %v587_v16, %v583_v1  ;;  %v593_v27 = vrot.slane %v591_v18, 5  ;;  %v14979_v18 = vld [vmem:[%s14696_s17 + $0xb0] sm:$0x1] }
  0x54   : > { %v598_v45 = vrot.slane %v596_v58, 4  ;;  %v570_v53 = vsel %vm14731_vm2, %v565_v31, %v569_v42  ;;  %v601_v51 = vrot.slane %v599_v26, 5  ;;  %v609_v59 = vshrl.u32 %v14954_v56, 16  ;;  %19330 = vst [vmem:[#allocation12_spill] sm:$0xff] %v14979_v18 }
  0x55   : > { %v607_v44 = vrot.slane %v605_v34, 5  ;;  %v11409_v60 = vcombine.low %v560_v19, %v570_v53  ;;  %v584_v62 = vsel %vm14731_vm2, %v579_v35, %v583_v1  ;;  %v589_v8 = vrot.slane %v588_v38, 4  ;;  %v14989_v35 = vld [vmem:[%s14696_s17 + $0xb4] sm:$0xf] }
  0x56   : > { %v615_v16 = vshll.u32 %v14957_v3, 16  ;;  %v602_v58 = vor.u32 %v601_v51, %v598_v45  ;;  %v611_v37 = vrot.slane %v609_v59, 4  ;;  %v620_v42 = vshrl.u32 %v14967_v50, 16  ;;  %v14992_v59 = vld [vmem:[%s14696_s17 + $0xb8] sm:$0xf] }
  0x57   : > { %v623_v31 = vshll.u32 %v14967_v50, 16  ;;  %12895 = vmatmul.mubr.msk.bf16.gmra.mrb[20].mxu0 %vm748_vm3, %v11409_v60  ;;  %v594_v19 = vsel %vm14731_vm2, %v589_v8, %v593_v27  ;;  %v629_v1 = vshll.u32 %v14973_v17, 16  ;;  %v633_v34 = vshrl.u32 %v14973_v17, 16 }
  0x58   : > { %v617_v26 = vrot.slane %v615_v16, 5  ;;  %v11410_v38 = vcombine.low %v584_v62, %v594_v19  ;;  %v603_v45 = vrot.slane %v602_v58, 4  ;;  %v612_v53 = vor.u32 %v611_v37, %v607_v44 }
  0x59   : > { %v622_v51 = vrot.slane %v620_v42, 4  ;;  %v625_v3 = vrot.slane %v623_v31, 5  ;;  %v631_v24 = vrot.slane %v629_v1, 5  ;;  %v635_v54 = vrot.slane %v633_v34, 4 }
  0x5a   : > { %v639_v60 = vshll.u32 %v14979_v18, 16  ;;  %12898 = vmatprep.mubr.msk.bf16.mxu0 %vm748_vm3, %v11410_v38  ;;  %v608_v27 = vsel %vm14731_vm2, %v603_v45, %v607_v44  ;;  %v613_v8 = vrot.slane %v612_v53, 4  ;;  %v644_v62 = vshrl.u32 %v14989_v35, 16 }
  0x5b   : > { %v647_v37 = vshll.u32 %v14989_v35, 16  ;;  %v626_v16 = vor.u32 %v625_v3, %v622_v51  ;;  %v636_v58 = vor.u32 %v635_v54, %v631_v24  ;;  %v653_v31 = vshll.u32 %v14992_v59, 16 }
  0x5c   : > { %v641_v42 = vrot.slane %v639_v60, 5  ;;  %v618_v19 = vsel %vm14731_vm2, %v613_v8, %v617_v26  ;;  %v646_v1 = vrot.slane %v644_v62, 4  ;;  %v657_v38 = vshrl.u32 %v14992_v59, 16 }
  0x5d   : > { %v649_v34 = vrot.slane %v647_v37, 5  ;;  %v11411_v18 = vcombine.low %v608_v27, %v618_v19  ;;  %v627_v32 = vrot.slane %v626_v16, 4  ;;  %v637_v44 = vrot.slane %v636_v58, 4 }
  0x5e   : > { %v655_v45 = vrot.slane %v653_v31, 5  ;;  %v659_v7 = vrot.slane %v657_v38, 4  ;;  %v663_v3 = vshll.u32 %v14996_v61, 16  ;;  %v11435_v54 = vcombine.low %v14710_v11, %v14713_v13 }
  0x5f   : > { %v650_v53 = vor.u32 %v649_v34, %v646_v1  ;;  %v1331_v51 = vrot.slane %v14713_v13, 5  ;;  %v1334_v26 = vrot.slane %v14716_v14, 5  ;;  %12899 = vmatmul.mubr.msk.bf16.gmra.mrb[24].mxu0 %vm748_vm3, %v11411_v18  ;;  %v632_v60 = vsel %vm14731_vm2, %v627_v32, %v631_v24  ;;  %v1272_v32 = vld [vmem:[%s14696_s17 + $0xc] sm:$0xe]  ;;  %v1282_v34 = vld [vmem:[%s14696_s17 + $0x84] sm:$0xe] }
  0x60   : > { %v642_v27 = vsel %vm14731_vm2, %v637_v44, %v641_v42  ;;  %v660_v37 = vor.u32 %v659_v7, %v655_v45  ;;  %v665_v16 = vrot.slane %v663_v3, 5  ;;  %v11438_v58 = vcombine.low %v14765_v2, %v14768_v9  ;;  %v1280_v44 = vld [vmem:[%s14696_s17 + $0x6c] sm:$0xe]  ;;  %v1283_v1 = vld [vmem:[%s14696_s17 + $0x90] sm:$0xe] }
  0x61   : > { %v11412_v8 = vcombine.low %v632_v60, %v642_v27  ;;  %v651_v62 = vrot.slane %v650_v53, 4  ;;  %v11439_v11 = vcombine.low %v14788_v36, %v14794_v41  ;;  %v11440_v13 = vcombine.low %v14807_v57, %v14816_v63 }
  0x62   : > { %v661_v7 = vrot.slane %v660_v37, 4  ;;  %v11471_v60 = vrot.slane %v1272_v32, 9  ;;  %v1333_v27 = vrot.slane %v1331_v51, 4  ;;  %v1279_v32 = vld [vmem:[%s14696_s17 + $0x60] sm:$0xe]  ;;  %v19341_v57 = vcombine.low %v14831_v21, %v14839_v30 }
  0x63   : > { %12902 = vmatprep.mubr.msk.bf16.mxu0 %vm748_vm3, %v11412_v8  ;;  %v656_v24 = vsel %vm14731_vm2, %v651_v62, %v655_v45  ;;  %v1275_v8 = vld [vmem:[%s14696_s17 + $0x30] sm:$0xe]  ;;  %v19333_v62 = vcombine.low %v14699_v4, %v14702_v5  ;;  %v11436_v4 = vcombine.low %v14727_v28, %v14736_v33  ;;  %v1355_v5 = vrot.slane %v14778_v20, 5 }
  0x64   : > { %v666_v38 = vsel %vm14731_vm2, %v661_v7, %v665_v16  ;;  %v15059_v37 = vsel %vm15047_vm6, %v11471_v60, %v1331_v51  ;;  %v15063_v16 = vsel %vm15047_vm6, %v1333_v27, %v1334_v26  ;;  %v1277_v7 = vld [vmem:[%s14696_s17 + $0x48] sm:$0xe]  ;;  %v1278_v51 = vld [vmem:[%s14696_s17 + $0x54] sm:$0xe]  ;;  %v1362_v45 = vrot.slane %v14799_v46, 5 }
  0x65   : > { %v11413_v53 = vcombine.low %v656_v24, %v666_v38  ;;  %v1276_v24 = vld [vmem:[%s14696_s17 + $0x3c] sm:$0xe]  ;;  %v11474_v38 = vrot.slane %v1275_v8, 9  ;;  %v14119_v8 = vld [vmem:[%s19211_s1 + $0x48] sm:$0xff]   ;;  %v11476_v28 = vrot.slane %v1277_v7, 9  ;;  %v1366_v33 = vrot.slane %v14816_v63, 5 }
  0x66   : > { %v11475_v27 = vrot.slane %v1276_v24, 9  ;;  %v11437_v20 = vcombine.low %v14749_v47, %v14752_v52  ;;  %v1369_v52 = vrot.slane %v14821_v12, 5  ;;  %v1281_v12 = vld [vmem:[%s14696_s17 + $0x78] sm:$0xe]  ;;  %v19342_v63 = vcombine.low %v14851_v43, %v14859_v55 }
  0x67   : > { %12903 = vmatmul.mubr.msk.bf16.gmra.mrb[28].mxu0 %vm748_vm3, %v11413_v53  ;;  %v1352_v53 = vrot.slane %v14768_v9, 5  ;;  %v15101_v7 = vsel %vm15047_vm6, %v11476_v28, %v1366_v33  ;;  %v1368_v47 = vrot.slane %v1366_v33, 4  ;;  %v11478_v28 = vrot.slane %v1279_v32, 9 }
  0x68   : > { %12914 = vmatprep.mubr.msk.bf16.mxu0 %vm748_vm3, %v19333_v62  ;;  %v1359_v62 = vrot.slane %v14794_v41, 5  ;;  %v1380_v33 = vrot.slane %v14859_v55, 5  ;;  %v11479_v32 = vrot.slane %v1280_v44, 9  ;;  %v11480_v19 = vrot.slane %v1281_v12, 9  ;;  %v1284_v12 = vld [vmem:[%s14696_s17 + $0x9c] sm:$0xe] }
  0x69   : > { %v15076_v60 = vsel %vm15047_vm6, %v11474_v38, %v1352_v53  ;;  %v1354_v26 = vrot.slane %v1352_v53, 4  ;;  %v19336_v44 = vld [vmem:[#allocation8_spill] sm:$0xff]  ;;  %v19345_v21 = vcombine.low %v14905_v6, %v14916_v39  ;;  %v19346_v55 = vcombine.low %v14931_v0, %v14934_v10 }
  0x6a   : > { %v15093_v24 = vsel %vm15047_vm6, %v11475_v27, %v1359_v62  ;;  %v1361_v53 = vrot.slane %v1359_v62, 4  ;;  %v1373_v27 = vrot.slane %v14839_v30, 5  ;;  %v1376_v62 = vrot.slane %v14843_v25, 5  ;;  %v14511_v30 = vld [vmem:[%s14696_s17 + $0x8] sm:$0x1] }
  0x6b   : > { %v15089_v38 = vsel %vm15047_vm6, %v1354_v26, %v1355_v5  ;;  %v14124_v5 = vld [vmem:[%s19211_s1 + $0x50] sm:$0xff]   ;;  %v11477_v26 = vrot.slane %v1278_v51, 9  ;;  %v1397_v42 = vrot.slane %v19336_v44, 5  ;;  %v1285_v44 = vld [vmem:[%s14696_s17 + $0xa8] sm:$0xe]  ;;  %v1327_v43 = vrot.slane %v14511_v30, 5 }
  0x6c   : > { %v1375_v25 = vrot.slane %v1373_v27, 4  ;;  %v19347_v6 = vcombine.low %v14948_v48, %v14954_v56 }
  0x6d   : > { %v15127_v51 = vsel %vm15047_vm6, %v11477_v26, %v1373_v27  ;;  %v19335_v26 = vld [vmem:[#allocation7_spill] sm:$0xff] }
  0x6e   : > { %v1390_v27 = vrot.slane %v19335_v26, 5 }
  0x6f   : > { %12915 = vmatmul.mubr.msk.bf16.vlgmr.msra.gmra.mrb[0].mxu0 %vm748_vm3, %v11435_v54  ;;  %v15111_v54 = vsel %vm15047_vm6, %v1361_v53, %v1362_v45  ;;  %v19334_v53 = vld [vmem:[#allocation6_spill] sm:$0xff]  ;;  %v15139_v45 = vsel %vm15047_vm6, %v1375_v25, %v1376_v62 }
  0x70   : > { %12947 = vmatpush3.bf16.msra.mxu0 %v14836_v22  ;;  %12918 = vmatprep.mubr.msk.bf16.mxu0 %vm748_vm3, %v11436_v4  ;;  %v15120_v4 = vsel %vm15047_vm6, %v1368_v47, %v1369_v52  ;;  %v1383_v46 = vrot.slane %v19334_v53, 5  ;;  %v15133_v22 = vsel %vm15047_vm6, %v11478_v28, %v1380_v33  ;;  %v1382_v47 = vrot.slane %v1380_v33, 4  ;;  %v14129_v28 = vld [vmem:[%s19211_s1 + $0x58] sm:$0xff]  }
  0x71   : > { %12948 = vmatprep.subr.bf16.mxu0 %v14119_v8  ;;  %v1387_v52 = vrot.slane %v14877_v23, 5  ;;  %v1394_v53 = vrot.slane %v14894_v49, 5 }
  0x73   : > { %v15154_v62 = vsel %vm15047_vm6, %v11479_v32, %v1387_v52  ;;  %v1389_v33 = vrot.slane %v1387_v52, 4  ;;  %v15161_v26 = vsel %vm15047_vm6, %v11480_v19, %v1394_v53  ;;  %v1396_v31 = vrot.slane %v1394_v53, 4  ;;  %v19337_v19 = vld [vmem:[#allocation9_spill] sm:$0xff] }
  0x74   : > { %12949 = vmatpush3.bf16.msra.mxu0 %v14119_v8  ;;  %v15150_v8 = vsel %vm15047_vm6, %v1382_v47, %v1383_v46  ;;  %v15168_v46 = vld [vmem:[%s19211_s1 + $0x60] sm:$0xff]   ;;  %v11481_v32 = vrot.slane %v1282_v34, 9  ;;  %v1401_v52 = vrot.slane %v14916_v39, 5  ;;  %v1404_v25 = vrot.slane %v19337_v19, 5  ;;  %v1286_v19 = vld [vmem:[%s14696_s17 + $0xb4] sm:$0xe] }
  0x75   : > { %12950 = vmatprep.subr.bf16.mxu0 %v14124_v5  ;;  %v15172_v47 = vsel %vm15047_vm6, %v1389_v33, %v1390_v27  ;;  %v15184_v53 = vsel %vm15047_vm6, %v1396_v31, %v1397_v42  ;;  %v11482_v27 = vrot.slane %v1283_v1, 9  ;;  %v1408_v34 = vrot.slane %v14934_v10, 5  ;;  %v19339_v33 = vld [vmem:[#allocation11_spill] sm:$0xff] }
  0x76   : > { %v15192_v2 = vsel %vm15047_vm6, %v11481_v32, %v1401_v52  ;;  %v1403_v9 = vrot.slane %v1401_v52, 4  ;;  %v11483_v1 = vrot.slane %v1284_v12, 9  ;;  %v1418_v14 = vrot.slane %v19339_v33, 5  ;;  %v19340_v33 = vld [vmem:[#allocation12_spill] sm:$0xff] }
  0x77   : > { %12919 = vmatmul.mubr.msk.bf16.gmra.mrb[4].mxu0 %vm748_vm3, %v11437_v20  ;;  %v15198_v42 = vsel %vm15047_vm6, %v11482_v27, %v1408_v34  ;;  %v1410_v31 = vrot.slane %v1408_v34, 4  ;;  %v1415_v20 = vrot.slane %v14954_v56, 5  ;;  %v11484_v32 = vrot.slane %v1285_v44, 9 }
  0x78   : > { %12922 = vmatprep.mubr.msk.bf16.mxu0 %vm748_vm3, %v11438_v58  ;;  %12951 = vmatpush3.bf16.msra.mxu0 %v14124_v5  ;;  %v19338_v58 = vld [vmem:[#allocation10_spill] sm:$0xff]  ;;  %v15203_v18 = vsel %vm15047_vm6, %v1403_v9, %v1404_v25  ;;  %v1422_v52 = vrot.slane %v14973_v17, 5  ;;  %v1425_v9 = vrot.slane %v19340_v33, 5  ;;  %v19348_v39 = vcombine.low %v14967_v50, %v14973_v17  ;;  %v14515_v17 = vld [vmem:[%s14696_s17 + $0x28] sm:$0xf] }
  0x79   : > { %12952 = vmatprep.subr.bf16.mxu0 %v14129_v28  ;;  %v1411_v5 = vrot.slane %v19338_v58, 5  ;;  %v11505_v58 = vcombine.low %v15192_v2, %v15203_v18  ;;  %v15215_v12 = vsel %vm15047_vm6, %v11483_v1, %v1415_v20  ;;  %v1417_v34 = vrot.slane %v1415_v20, 4  ;;  %v14137_v18 = vld [vmem:[%s14696_s17 + $0xc] sm:$0xff]  }
  0x7a   : > { %v1424_v44 = vrot.slane %v1422_v52, 4  ;;  %v1429_v1 = vrot.slane %v14992_v59, 5  ;;  %v1432_v20 = vrot.slane %v14996_v61, 5  ;;  %v19349_v50 = vcombine.low %v14989_v35, %v14992_v59  ;;  %v14134_v35 = vld [vmem:[%s19211_s1 + $0x68] sm:$0xff]  }
  0x7b   : > { %v15211_v27 = vsel %vm15047_vm6, %v1410_v31, %v1411_v5  ;;  %v15227_v5 = vsel %vm15047_vm6, %v1417_v34, %v1418_v14  ;;  %v11485_v31 = vrot.slane %v1286_v19, 9  ;;  %v19344_v19 = vcombine.low %v14889_v40, %v14894_v49 }
  0x7c   : > { %12953 = vmatpush3.bf16.msra.mxu0 %v14129_v28  ;;  %v11506_v25 = vcombine.low %v15198_v42, %v15211_v27  ;;  %v15222_v28 = vsel %vm15047_vm6, %v11484_v32, %v1422_v52  ;;  %v11507_v32 = vcombine.low %v15215_v12, %v15227_v5  ;;  %v15239_v52 = vsel %vm15047_vm6, %v1424_v44, %v1425_v9  ;;  %v14513_v44 = vld [vmem:[%s14696_s17 + $0x1c] sm:$0xf]  ;;  %v1273_v9 = vld [vmem:[%s14696_s17 + $0x18] sm:$0xe] }
  0x7d   : > { %12986 = vmatprep.subr.bf16.mxu0 %v15168_v46  ;;  %v11508_v61 = vcombine.low %v15222_v28, %v15239_v52  ;;  %v15249_v36 = vsel %vm15047_vm6, %v11485_v31, %v1429_v1  ;;  %v1431_v41 = vrot.slane %v1429_v1, 4  ;;  %v1338_v33 = vrot.slane %v14513_v44, 5  ;;  %v14514_v1 = vld [vmem:[%s14696_s17 + $0x20] sm:$0x1]  ;;  %v14145_v5 = vld [vmem:[%s14696_s17 + $0x54] sm:$0xff]  }
  0x7e   : > { %v11472_v48 = vrot.slane %v1273_v9, 9  ;;  %v19350_v59 = vcombine.low %v15059_v37, %v15063_v16  ;;  %v14136_v37 = vld [vmem:[%s19211_s1 + $0x78] sm:$0xff]   ;;  %v19351_v16 = vcombine.low %v15076_v60, %v15089_v38  ;;  %v19353_v60 = vcombine.low %v15101_v7, %v15120_v4  ;;  %v14143_v4 = vld [vmem:[%s19211_s1 + $0x88] sm:$0xff]   ;;  %v14146_v44 = vld [vmem:[%s14696_s17 + $0x60] sm:$0xff]  }
  0x7f   : > { %12923 = vmatmul.mubr.msk.bf16.gmra.mrb[8].mxu0 %vm748_vm3, %v11439_v11  ;;  %v15253_v11 = vsel %vm15047_vm6, %v1431_v41, %v1432_v20  ;;  %v1340_v56 = vrot.slane %v1338_v33, 4  ;;  %v1341_v20 = vrot.slane %v14514_v1, 5  ;;  %v1345_v41 = vrot.slane %v14515_v17, 5  ;;  %v15442_v9 = vld [vmem:[%s14696_s17 + $0x10] sm:$0xf] }
  0x80   : > { %12926 = vmatprep.mubr.msk.bf16.mxu0 %vm748_vm3, %v11440_v13  ;;  %v11509_v14 = vcombine.low %v15249_v36, %v15253_v11  ;;  %v19343_v13 = vcombine.low %v14874_v15, %v14877_v23  ;;  %v1271_v15 = vld [vmem:[%s14696_s17] sm:$0xe]  ;;  %v14512_v23 = vld [vmem:[%s14696_s17 + $0x4] sm:$0xf]  ;;  %v19354_v38 = vcombine.low %v15127_v51, %v15139_v45  ;;  %v19357_v7 = vcombine.low %v15161_v26, %v15184_v53  ;;  %v14148_v45 = vld [vmem:[%s19211_s1 + $0x90] sm:$0xff]  }
  0x81   : > { %v1324_v34 = vrot.slane %v14512_v23, 5  ;;  %v11470_v40 = vrot.slane %v1271_v15, 9  ;;  %v1347_v30 = vrot.slane %v1345_v41, 4  ;;  %v14141_v51 = vld [vmem:[%s14696_s17 + $0x30] sm:$0xff]   ;;  %v15401_v26 = vld [vmem:[%s14696_s17 + $0x4c] sm:$0xf] }
  0x82   : > { %v11703_v53 = vld [vmem:[%s14696_s17 + $0x48] sm:$0xe]  ;;  %v2998_v2 = vrot.slane %v15401_v26, 5  ;;  %v15433_v36 = vld [vmem:[%s14696_s17 + $0x68] sm:$0x1] }
  0x83   : > { %v1326_v49 = vrot.slane %v1324_v34, 4  ;;  %v1325_v0 = vsel %vm15047_vm6, %v11470_v40, %v1324_v34  ;;  %v14135_v34 = vld [vmem:[%s19211_s1 + $0x70] sm:$0xff]   ;;  %v11719_v27 = vrot.slane %v11703_v53, 9  ;;  %v11705_v11 = vld [vmem:[%s14696_s17 + $0x60] sm:$0xe] }
  0x84   : > { %v3000_v12 = vrot.slane %v2998_v2, 4  ;;  %v15499_v53 = vld [vmem:[%s14696_s17 + $0x28] sm:$0xf] }
  0x85   : > { %v1328_v10 = vsel %vm15047_vm6, %v1326_v49, %v1327_v43  ;;  %v14516_v43 = vld [vmem:[%s14696_s17 + $0x2c] sm:$0x1]  ;;  %v19352_v49 = vcombine.low %v15093_v24, %v15111_v54  ;;  %v19356_v24 = vcombine.low %v15154_v62, %v15172_v47  ;;  %v14139_v54 = vld [vmem:[%s14696_s17 + $0x18] sm:$0xff]   ;;  %v15404_v47 = vld [vmem:[%s14696_s17 + $0x50] sm:$0x1]  ;;  %v15418_v28 = vsel %vm15047_vm6, %v11719_v27, %v2998_v2 }
  0x86   : > { %v11494_v31 = vcombine.low %v1325_v0, %v1328_v10  ;;  %v14153_v62 = vld [vmem:[%s19211_s1 + $0x98] sm:$0xff]   ;;  %v3001_v42 = vrot.slane %v15404_v47, 5  ;;  %v11721_v0 = vrot.slane %v11705_v11, 9  ;;  %v15502_v2 = vld [vmem:[%s14696_s17 + $0x94] sm:$0xf] }
  0x87   : > { %12927 = vmatmul.mubr.msk.bf16.gmra.mrb[12].mxu0 %vm748_vm3, %v19341_v57  ;;  %v1339_v57 = vsel %vm15047_vm6, %v11472_v48, %v1338_v33  ;;  %v11606_v33 = vld [vmem:[%s14696_s17 + $0xc] sm:$0xf]  ;;  %v15601_v52 = vld [vmem:[%s14696_s17 + $0xc8] sm:$0x1] }
  0x88   : > { %12930 = vmatprep.mubr.msk.bf16.mxu0 %vm748_vm3, %v19342_v63  ;;  %v1342_v63 = vsel %vm15047_vm6, %v1340_v56, %v1341_v20  ;;  %v14147_v48 = vld [vmem:[%s14696_s17 + $0x6c] sm:$0xff]   ;;  %v11609_v56 = vld [vmem:[%s14696_s17 + $0x18] sm:$0xf]  ;;  %v2195_v17 = vshll.u32 %v11606_v33, 16  ;;  %v15598_v20 = vld [vmem:[%s14696_s17 + $0xc4] sm:$0xf] }
  0x8f   : > { %12931 = vmatmul.mubr.msk.bf16.gmra.mrb[16].mxu0 %vm748_vm3, %v19343_v13  ;;  %v1274_v13 = vld [vmem:[%s14696_s17 + $0x24] sm:$0xe] }
  0x90   : > { %12934 = vmatprep.mubr.msk.bf16.mxu0 %vm748_vm3, %v19344_v19  ;;  %v11496_v19 = vcombine.low %v1339_v57, %v1342_v63  ;;  %v2205_v57 = vshrl.u32 %v15442_v9, 16  ;;  %v2216_v63 = vshrl.u32 %v11609_v56, 16 }
  0x97   : > { %12935 = vmatmul.mubr.msk.bf16.gmra.mrb[20].mxu0 %vm748_vm3, %v19345_v21  ;;  %v11473_v21 = vrot.slane %v1274_v13, 9  ;;  %v2219_v13 = vshll.u32 %v11609_v56, 16  ;;  %v15518_v56 = vld [vmem:[%s14696_s17 + $0x34] sm:$0xf] }
  0x98   : > { %12938 = vmatprep.mubr.msk.bf16.mxu0 %vm748_vm3, %v19346_v55  ;;  %v1348_v55 = vrot.slane %v14516_v43, 5 }
  0x99   : > { %v1346_v15 = vsel %vm15047_vm6, %v11473_v21, %v1345_v41  ;;  %v2201_v41 = vshll.u32 %v15442_v9, 16  ;;  %v15463_v21 = vld [vmem:[%s14696_s17 + $0x80] sm:$0x1] }
  0x9a   : > { %v1349_v23 = vsel %vm15047_vm6, %v1347_v30, %v1348_v55  ;;  %v11707_v30 = vld [vmem:[%s14696_s17 + $0x78] sm:$0xe]  ;;  %v3029_v55 = vrot.slane %v15463_v21, 5 }
  0x9b   : > { %v11497_v40 = vcombine.low %v1346_v15, %v1349_v23  ;;  %v2197_v15 = vrot.slane %v2195_v17, 5  ;;  %v15469_v23 = vrot.slane %v2201_v41, 5  ;;  %v14151_v17 = vld [vmem:[%s14696_s17 + $0x90] sm:$0xff]  }
  0x9f   : > { %12939 = vmatmul.mubr.msk.bf16.gmra.mrb[24].mxu0 %vm748_vm3, %v19347_v6  ;;  %v19355_v6 = vcombine.low %v15133_v22, %v15150_v8  ;;  %v14140_v22 = vld [vmem:[%s14696_s17 + $0x24] sm:$0xff]   ;;  %v14142_v8 = vld [vmem:[%s14696_s17 + $0x3c] sm:$0xff]  }
  0xa0   : > { %12942 = vmatprep.mubr.msk.bf16.mxu0 %vm748_vm3, %v19348_v39  ;;  %v3015_v39 = vrot.slane %v15433_v36, 5 }
  0xa7   : > { %12943 = vmatmul.mubr.msk.bf16.gmra.mrb[28].mxu0 %vm748_vm3, %v19349_v50  ;;  %v2192_v50 = vshrl.u32 %v11606_v33, 16  ;;  %v2249_v33 = vshll.u32 %v15499_v53, 16 }
  0xa8   : > { %12954 = vmatprep.mubr.msk.bf16.mxu0 %vm748_vm3, %v11494_v31 }
  0xaf   : > { %12955 = vmatmul.mubr.msk.bf16.vlgmr.msra.gmra.mrb[0].mxu0 %vm748_vm3, %v19350_v59  ;;  %v2194_v59 = vrot.slane %v2192_v50, 4 }
  0xb0   : > { %12987 = vmatpush3.bf16.msra.mxu0 %v15168_v46  ;;  %12958 = vmatprep.mubr.msk.bf16.mxu0 %vm748_vm3, %v11496_v19  ;;  %v14138_v46 = vld [vmem:[%s19211_s1 + $0x80] sm:$0xff]   ;;  %v15460_v19 = vld [vmem:[%s14696_s17 + $0x7c] sm:$0xf] }
  0xb1   : > { %12988 = vmatprep.subr.bf16.mxu0 %v14134_v35  ;;  %v3026_v43 = vrot.slane %v15460_v19, 5 }
  0xb4   : > { %12989 = vmatpush3.bf16.msra.mxu0 %v14134_v35  ;;  %v11723_v35 = vrot.slane %v11707_v30, 9  ;;  %v14152_v30 = vld [vmem:[%s14696_s17 + $0x9c] sm:$0xff]  }
  0xb5   : > { %12990 = vmatprep.subr.bf16.mxu0 %v14135_v34 }
  0xb7   : > { %12959 = vmatmul.mubr.msk.bf16.gmra.mrb[4].mxu0 %vm748_vm3, %v11497_v40  ;;  %v3028_v40 = vrot.slane %v3026_v43, 4 }
  0xb8   : > { %12962 = vmatprep.mubr.msk.bf16.mxu0 %vm748_vm3, %v19351_v16  ;;  %12991 = vmatpush3.bf16.msra.mxu0 %v14135_v34  ;;  %v15472_v34 = vld [vmem:[%s14696_s17 + $0x1c] sm:$0xf]  ;;  %v15476_v16 = vld [vmem:[%s14696_s17 + $0x14] sm:$0x1] }
  0xb9   : > { %12992 = vmatprep.subr.bf16.mxu0 %v14136_v37 }
  0xbc   : > { %12993 = vmatpush3.bf16.msra.mxu0 %v14136_v37  ;;  %v14149_v37 = vld [vmem:[%s14696_s17 + $0x78] sm:$0xff]  }
  0xbd   : > { %13026 = vmatprep.subr.bf16.mxu0 %v14138_v46 }
  0xbf   : > { %12963 = vmatmul.mubr.msk.bf16.gmra.mrb[8].mxu0 %vm748_vm3, %v19352_v49  ;;  %v2218_v49 = vrot.slane %v2216_v63, 4 }
  0xc0   : > { %12966 = vmatprep.mubr.msk.bf16.mxu0 %vm748_vm3, %v19353_v60  ;;  %v2221_v60 = vrot.slane %v2219_v13, 5 }
  0xc7   : > { %12967 = vmatmul.mubr.msk.bf16.gmra.mrb[12].mxu0 %vm748_vm3, %v19354_v38  ;;  %v15480_v38 = vsel %vm15047_vm6, %v11723_v35, %v3026_v43 }
  0xc8   : > { %12970 = vmatprep.mubr.msk.bf16.mxu0 %vm748_vm3, %v19355_v6  ;;  %v14150_v6 = vld [vmem:[%s14696_s17 + $0x84] sm:$0xff]  }
  0xcf   : > { %12971 = vmatmul.mubr.msk.bf16.gmra.mrb[16].mxu0 %vm748_vm3, %v19356_v24  ;;  %v15485_v24 = vsel %vm15047_vm6, %v3028_v40, %v3029_v55 }
  0xd0   : > { %12974 = vmatprep.mubr.msk.bf16.mxu0 %vm748_vm3, %v19357_v7  ;;  %19358 = vst [vmem:[#allocation6_spill] sm:$0xff] %v15485_v24  ;;  %v2225_v7 = vshll.u32 %v15472_v34, 16  ;;  %v15625_v24 = vld [vmem:[%s14696_s17 + $0x58] sm:$0xf] }
  0xd7   : > { %12975 = vmatmul.mubr.msk.bf16.gmra.mrb[20].mxu0 %vm748_vm3, %v11505_v58  ;;  %v15413_v58 = vld [vmem:[%s19211_s1 + $0xa0] sm:$0xff]  }
  0xd8   : > { %12978 = vmatprep.mubr.msk.bf16.mxu0 %vm748_vm3, %v11506_v25  ;;  %v14144_v25 = vld [vmem:[%s14696_s17 + $0x48] sm:$0xff]  }
  0xdf   : > { %12979 = vmatmul.mubr.msk.bf16.gmra.mrb[24].mxu0 %vm748_vm3, %v11507_v32  ;;  %v15423_v32 = vsel %vm15047_vm6, %v3000_v12, %v3001_v42  ;;  %v15505_v42 = vld [vmem:[%s14696_s17 + $0x98] sm:$0x1] }
  0xe0   : > { %12982 = vmatprep.mubr.msk.bf16.mxu0 %vm748_vm3, %v11508_v61  ;;  %v15430_v61 = vld [vmem:[%s14696_s17 + $0x64] sm:$0xf]  ;;  %v3043_v11 = vrot.slane %v15505_v42, 5 }
  0xe7   : > { %12983 = vmatmul.mubr.msk.bf16.gmra.mrb[28].mxu0 %vm748_vm3, %v11509_v14  ;;  %v3012_v14 = vrot.slane %v15430_v61, 5 }
  0xe8   : > { %12994 = vmatprep.mubr.msk.bf16.mxu0 %vm748_vm3, %v14137_v18  ;;  %v2229_v18 = vshrl.u32 %v15472_v34, 16 }
  0xe9   : > { %v3014_v10 = vrot.slane %v3012_v14, 4  ;;  %v15446_v31 = vsel %vm15047_vm6, %v11721_v0, %v3012_v14  ;;  %v15511_v14 = vrot.slane %v2225_v7, 5  ;;  %v11615_v0 = vld [vmem:[%s14696_s17 + $0x30] sm:$0xf] }
  0xea   : > { %v2264_v40 = vshrl.u32 %v11615_v0, 16 }
  0xeb   : > { %v15452_v1 = vsel %vm15047_vm6, %v3014_v10, %v3015_v39  ;;  %v2231_v39 = vrot.slane %v2229_v18, 4  ;;  %v2277_v18 = vshrl.u32 %v15518_v56, 16 }
  0xef   : > { %12995 = vmatmul.mubr.msk.bf16.vlgmr.msra.gmra.mrb[0].mxu0 %vm748_vm3, %v14139_v54  ;;  %v11612_v54 = vld [vmem:[%s14696_s17 + $0x24] sm:$0xf] }
  0xf0   : > { %13027 = vmatpush3.bf16.msra.mxu0 %v14138_v46  ;;  %12998 = vmatprep.mubr.msk.bf16.mxu0 %vm748_vm3, %v14140_v22  ;;  %v2207_v46 = vrot.slane %v2205_v57, 4  ;;  %v2240_v27 = vshrl.u32 %v11612_v54, 16  ;;  %v2243_v12 = vshll.u32 %v11612_v54, 16  ;;  %v2232_v54 = vor.u32 %v2231_v39, %v15511_v14  ;;  %v11621_v22 = vld [vmem:[%s14696_s17 + $0x48] sm:$0xf] }
  0xf1   : > { %13028 = vmatprep.subr.bf16.mxu0 %v14143_v4  ;;  %v2266_v39 = vrot.slane %v2264_v40, 4 }
  0xf2   : > { %v2242_v55 = vrot.slane %v2240_v27, 4  ;;  %v2245_v35 = vrot.slane %v2243_v12, 5  ;;  %v11711_v12 = vld [vmem:[%s14696_s17 + $0xa8] sm:$0xe] }
  0xf4   : > { %13029 = vmatpush3.bf16.msra.mxu0 %v14143_v4  ;;  %v2211_v4 = vshll.u32 %v15476_v16, 16 }
  0xf5   : > { %13030 = vmatprep.subr.bf16.mxu0 %v14148_v45 }
  0xf6   : > { %v2213_v63 = vrot.slane %v2211_v4, 5  ;;  %v11618_v4 = vld [vmem:[%s14696_s17 + $0x3c] sm:$0xf] }
  0xf7   : > { %12999 = vmatmul.mubr.msk.bf16.gmra.mrb[4].mxu0 %vm748_vm3, %v14141_v51  ;;  %v2198_v51 = vor.u32 %v2197_v15, %v2194_v59  ;;  %v15533_v15 = vld [vmem:[%s14696_s17 + $0x2c] sm:$0x1] }
  0xf8   : > { %13002 = vmatprep.mubr.msk.bf16.mxu0 %vm748_vm3, %v14142_v8  ;;  %13031 = vmatpush3.bf16.msra.mxu0 %v14148_v45  ;;  %v15494_v45 = vld [vmem:[%s14696_s17 + $0x20] sm:$0x1]  ;;  %v2208_v8 = vor.u32 %v2207_v46, %v15469_v23  ;;  %v2273_v46 = vshll.u32 %v15518_v56, 16  ;;  %v2259_v27 = vshll.u32 %v15533_v15, 16 }
  0xf9   : > { %13032 = vmatprep.subr.bf16.mxu0 %v14153_v62  ;;  %v2199_v41 = vrot.slane %v2198_v51, 4  ;;  %v15547_v51 = vld [vmem:[%s14696_s17 + $0xac] sm:$0xf] }
  0xfa   : > { %v2209_v57 = vrot.slane %v2208_v8, 4  ;;  %v15550_v8 = vld [vmem:[%s14696_s17 + $0xb0] sm:$0x1] }
  0xfc   : > { %13033 = vmatpush3.bf16.msra.mxu0 %v14153_v62  ;;  %v2222_v62 = vor.u32 %v2221_v60, %v2218_v49  ;;  %v2214_v40 = vsel %vm14731_vm2, %v2209_v57, %v2213_v63  ;;  %v15581_v49 = vrot.slane %v2259_v27, 5 }
  0xfd   : > { %13066 = vmatprep.subr.bf16.mxu0 %v15413_v58 }
  0xfe   : > { %v15526_v43 = vrot.slane %v2222_v62, 4  ;;  %v2246_v62 = vor.u32 %v2245_v35, %v2242_v55  ;;  %v14154_v55 = vld [vmem:[%s14696_s17 + $0xa8] sm:$0xff]   ;;  %v2204_v35 = vsel %vm14731_vm2, %v2199_v41, %v15469_v23 }
  0xff   : > { %13003 = vmatmul.mubr.msk.bf16.gmra.mrb[8].mxu0 %vm748_vm3, %v14144_v25  ;;  %v11709_v25 = vld [vmem:[%s14696_s17 + $0x90] sm:$0xe] }
 0x100   : > { %13006 = vmatprep.mubr.msk.bf16.mxu0 %vm748_vm3, %v14145_v5  ;;  %v3040_v5 = vrot.slane %v15502_v2, 5  ;;  %v11725_v10 = vrot.slane %v11709_v25, 9  ;;  %v3054_v25 = vrot.slane %v15547_v51, 5 }
 0x102   : > { %v3042_v50 = vrot.slane %v3040_v5, 4  ;;  %v15523_v13 = vsel %vm15047_vm6, %v11725_v10, %v3040_v5  ;;  %v3057_v5 = vrot.slane %v15550_v8, 5  ;;  %v15560_v10 = vrot.slane %v2273_v46, 5 }
 0x103   : > { %19359 = vst [vmem:[#allocation7_spill] sm:$0xff] %v15523_v13  ;;  %v2321_v13 = vshll.u32 %v15401_v26, 16 }
 0x104   : > { %v15530_v59 = vsel %vm15047_vm6, %v3042_v50, %v3043_v11  ;;  %v15558_v11 = vld [vmem:[%s14696_s17 + $0x38] sm:$0x1]  ;;  %v15564_v50 = vld [vmem:[%s14696_s17 + $0x40] sm:$0xf] }
 0x105   : > { %19360 = vst [vmem:[#allocation8_spill] sm:$0xff] %v15530_v59  ;;  %v2283_v41 = vshll.u32 %v15558_v11, 16  ;;  %v2297_v57 = vshll.u32 %v15564_v50, 16  ;;  %v2301_v63 = vshrl.u32 %v15564_v50, 16  ;;  %v14156_v59 = vld [vmem:[%s14696_s17 + $0xc0] sm:$0xff]  }
 0x107   : > { %13007 = vmatmul.mubr.msk.bf16.gmra.mrb[12].mxu0 %vm748_vm3, %v14146_v44  ;;  %v2235_v44 = vshll.u32 %v15494_v45, 16 }
 0x108   : > { %13010 = vmatprep.mubr.msk.bf16.mxu0 %vm748_vm3, %v14147_v48  ;;  %v2253_v48 = vshrl.u32 %v15499_v53, 16 }
 0x109   : > { %v15538_v60 = vrot.slane %v2235_v44, 5  ;;  %v11727_v44 = vrot.slane %v11711_v12, 9  ;;  %v14155_v12 = vld [vmem:[%s14696_s17 + $0xb4] sm:$0xff]  }
 0x10a   : > { %v2255_v7 = vrot.slane %v2253_v48, 4  ;;  %v2279_v48 = vrot.slane %v2277_v18, 4  ;;  %v15579_v18 = vrot.slane %v2246_v62, 4 }
 0x10b   : > { %v15574_v46 = vsel %vm15047_vm6, %v11727_v44, %v3054_v25 }
 0x10c   : > { %19361 = vst [vmem:[#allocation9_spill] sm:$0xff] %v15574_v46  ;;  %v2280_v27 = vor.u32 %v2279_v48, %v15560_v10  ;;  %v11713_v48 = vld [vmem:[%s14696_s17 + $0xc0] sm:$0xe] }
 0x10f   : > { %13011 = vmatmul.mubr.msk.bf16.gmra.mrb[16].mxu0 %vm748_vm3, %v14149_v37  ;;  %v2267_v37 = vshll.u32 %v11615_v0, 16 }
 0x110   : > { %13014 = vmatprep.mubr.msk.bf16.mxu0 %vm748_vm3, %v14150_v6  ;;  %v15540_v6 = vrot.slane %v2249_v33, 5 }
 0x111   : > { %v2269_v0 = vrot.slane %v2267_v37, 5  ;;  %v2291_v37 = vshll.u32 %v11618_v4, 16 }
 0x112   : > { %v2256_v33 = vor.u32 %v2255_v7, %v15540_v6  ;;  %v15577_v7 = vrot.slane %v2232_v54, 4  ;;  %v11729_v54 = vrot.slane %v11713_v48, 9 }
 0x113   : > { %v2270_v62 = vor.u32 %v2269_v0, %v2266_v39  ;;  %v2293_v44 = vrot.slane %v2291_v37, 5  ;;  %v2228_v39 = vsel %vm14731_vm2, %v15526_v43, %v15511_v14  ;;  %v2315_v37 = vshll.u32 %v11621_v22, 16 }
 0x114   : > { %v2238_v0 = vsel %vm14731_vm2, %v15577_v7, %v15538_v60  ;;  %v2281_v43 = vrot.slane %v2280_v27, 4 }
 0x115   : > { %v2271_v14 = vrot.slane %v2270_v62, 4 }
 0x117   : > { %13015 = vmatmul.mubr.msk.bf16.gmra.mrb[20].mxu0 %vm748_vm3, %v14151_v17  ;;  %v2288_v17 = vshrl.u32 %v11618_v4, 16  ;;  %v15593_v4 = vrot.slane %v2256_v33, 4  ;;  %v15613_v33 = vld [vmem:[%s14696_s17 + $0x44] sm:$0x1] }
 0x118   : > { %13018 = vmatprep.mubr.msk.bf16.mxu0 %vm748_vm3, %v14152_v30  ;;  %v3056_v30 = vrot.slane %v3054_v25, 4  ;;  %v2307_v7 = vshll.u32 %v15613_v33, 16 }
 0x119   : > { %v2290_v25 = vrot.slane %v2288_v17, 4  ;;  %v3068_v17 = vrot.slane %v15598_v20, 5 }
 0x11a   : > { %v15586_v23 = vsel %vm15047_vm6, %v3056_v30, %v3057_v5  ;;  %v11662_v5 = vcombine.low %v2204_v35, %v2214_v40  ;;  %v2312_v30 = vshrl.u32 %v11621_v22, 16  ;;  %v15618_v35 = vrot.slane %v2297_v57, 5 }
 0x11b   : > { %19362 = vst [vmem:[#allocation10_spill] sm:$0xff] %v15586_v23  ;;  %v2303_v40 = vrot.slane %v2301_v63, 4  ;;  %v2285_v23 = vrot.slane %v2283_v41, 5  ;;  %v3070_v46 = vrot.slane %v3068_v17, 4  ;;  %v2294_v60 = vor.u32 %v2293_v44, %v2290_v25 }
 0x11c   : > { %v15629_v57 = vsel %vm15047_vm6, %v11729_v54, %v3068_v17  ;;  %v2325_v22 = vshrl.u32 %v15401_v26, 16  ;;  %v2314_v25 = vrot.slane %v2312_v30, 4  ;;  %v2317_v44 = vrot.slane %v2315_v37, 5 }
 0x11d   : > { %19363 = vst [vmem:[#allocation11_spill] sm:$0xff] %v15629_v57  ;;  %v2304_v27 = vor.u32 %v2303_v40, %v15618_v35  ;;  %v2252_v54 = vsel %vm14731_vm2, %v15579_v18, %v15540_v6  ;;  %v2262_v26 = vsel %vm14731_vm2, %v15593_v4, %v15581_v49  ;;  %v2349_v17 = vshrl.u32 %v15625_v24, 16 }
 0x11e   : > { %v2276_v30 = vsel %vm14731_vm2, %v2271_v14, %v15560_v10  ;;  %v2286_v6 = vsel %vm14731_vm2, %v2281_v43, %v2285_v23  ;;  %v2295_v18 = vrot.slane %v2294_v60, 4  ;;  %v15656_v40 = vrot.slane %v2321_v13, 5  ;;  %v15661_v14 = vld [vmem:[%s14696_s17 + $0x5c] sm:$0x1] }
 0x11f   : > { %13019 = vmatmul.mubr.msk.bf16.gmra.mrb[24].mxu0 %vm748_vm3, %v14154_v55  ;;  %v3071_v55 = vrot.slane %v15601_v52, 5  ;;  %v2327_v49 = vrot.slane %v2325_v22, 4  ;;  %v2331_v4 = vshll.u32 %v15404_v47, 16  ;;  %v2305_v48 = vrot.slane %v2304_v27, 4  ;;  %v15675_v27 = vld [vmem:[%s14696_s17 + $0x70] sm:$0xf] }
 0x120   : > { %13022 = vmatprep.mubr.msk.bf16.mxu0 %vm748_vm3, %v14155_v12  ;;  %v11624_v12 = vld [vmem:[%s14696_s17 + $0x54] sm:$0xf]  ;;  %v11663_v10 = vcombine.low %v2228_v39, %v2238_v0  ;;  %v2351_v13 = vrot.slane %v2349_v17, 4  ;;  %v11665_v60 = vcombine.low %v2276_v30, %v2286_v6  ;;  %v2369_v47 = vshll.u32 %v15430_v61, 16 }
 0x121   : > { %v2336_v63 = vshrl.u32 %v11624_v12, 16  ;;  %v2339_v62 = vshll.u32 %v11624_v12, 16  ;;  %v15634_v41 = vsel %vm15047_vm6, %v3070_v46, %v3071_v55  ;;  %v2345_v46 = vshll.u32 %v15625_v24, 16  ;;  %v11627_v55 = vld [vmem:[%s14696_s17 + $0x60] sm:$0xf] }
 0x122   : > { %19364 = vst [vmem:[#allocation12_spill] sm:$0xff] %v15634_v41  ;;  %v2318_v41 = vor.u32 %v2317_v44, %v2314_v25  ;;  %v2360_v57 = vshrl.u32 %v11627_v55, 16  ;;  %v2363_v43 = vshll.u32 %v11627_v55, 16  ;;  %v2373_v22 = vshrl.u32 %v15430_v61, 16  ;;  %v14158_v44 = vld [vmem:[%s19211_s1 + $0xa8] sm:$0xff]  }
 0x123   : > { %v2338_v37 = vrot.slane %v2336_v63, 4  ;;  %v2341_v12 = vrot.slane %v2339_v62, 5  ;;  %v15663_v23 = vrot.slane %v2345_v46, 5  ;;  %v11630_v63 = vld [vmem:[%s14696_s17 + $0x6c] sm:$0xf]  ;;  %v2328_v39 = vor.u32 %v2327_v49, %v15656_v40 }
 0x124   : > { %v15672_v0 = vrot.slane %v2331_v4, 5  ;;  %v2319_v61 = vrot.slane %v2318_v41, 4  ;;  %v11633_v46 = vld [vmem:[%s14696_s17 + $0x78] sm:$0xf]  ;;  %v2365_v17 = vrot.slane %v2363_v43, 5  ;;  %v2384_v55 = vshrl.u32 %v11630_v63, 16 }
 0x125   : > { %v2342_v62 = vor.u32 %v2341_v12, %v2338_v37  ;;  %v2387_v30 = vshll.u32 %v11630_v63, 16  ;;  %v15686_v6 = vrot.slane %v2369_v47, 5  ;;  %v2397_v49 = vshrl.u32 %v15675_v27, 16 }
 0x126   : > { %v2379_v4 = vshll.u32 %v15433_v36, 16  ;;  %v2408_v37 = vshrl.u32 %v11633_v46, 16  ;;  %v2386_v47 = vrot.slane %v2384_v55, 4 }
 0x127   : > { %13023 = vmatmul.mubr.msk.bf16.gmra.mrb[28].mxu0 %vm748_vm3, %v14156_v59  ;;  %v2309_v59 = vrot.slane %v2307_v7, 5  ;;  %v2300_v7 = vsel %vm14731_vm2, %v2295_v18, %v15618_v35  ;;  %v2352_v35 = vor.u32 %v2351_v13, %v15663_v23  ;;  %v2375_v18 = vrot.slane %v2373_v22, 4 }
 0x128   : > { %13034 = vmatprep.mubr.msk.bf16.mxu0 %vm748_vm3, %v11662_v5  ;;  %v11664_v5 = vcombine.low %v2252_v54, %v2262_v26  ;;  %v2355_v54 = vshll.u32 %v15661_v14, 16  ;;  %v2362_v26 = vrot.slane %v2360_v57, 4  ;;  %v2329_v57 = vrot.slane %v2328_v39, 4  ;;  %v15700_v39 = vld [vmem:[%s14696_s17 + $0x74] sm:$0x1] }
 0x129   : > { %v2310_v25 = vsel %vm14731_vm2, %v2305_v48, %v2309_v59  ;;  %v2393_v48 = vshll.u32 %v15675_v27, 16  ;;  %v2343_v41 = vrot.slane %v2342_v62, 4  ;;  %v14159_v59 = vld [vmem:[%s19211_s1 + $0xb0] sm:$0xff]   ;;  %v2417_v13 = vshll.u32 %v15460_v19, 16 }
 0x12a   : > { %v2357_v12 = vrot.slane %v2355_v54, 5  ;;  %v2353_v43 = vrot.slane %v2352_v35, 4  ;;  %v2389_v22 = vrot.slane %v2387_v30, 5  ;;  %v11666_v63 = vcombine.low %v2300_v7, %v2310_v25  ;;  %v11636_v25 = vld [vmem:[%s14696_s17 + $0x84] sm:$0xf] }
 0x12b   : > { %v2376_v36 = vor.u32 %v2375_v18, %v15686_v6  ;;  %v15702_v62 = vrot.slane %v2393_v48, 5  ;;  %v2399_v54 = vrot.slane %v2397_v49, 4  ;;  %v2410_v7 = vrot.slane %v2408_v37, 4  ;;  %v15719_v18 = vld [vmem:[%s14696_s17 + $0x88] sm:$0xf] }
 0x12c   : > { %v2348_v35 = vsel %vm14731_vm2, %v2343_v41, %v15663_v23  ;;  %v15716_v55 = vrot.slane %v2417_v13, 5  ;;  %v2403_v48 = vshll.u32 %v15700_v39, 16  ;;  %v2435_v41 = vshll.u32 %v11636_v25, 16 }
 0x12d   : > { %v2377_v23 = vrot.slane %v2376_v36, 4  ;;  %v2400_v49 = vor.u32 %v2399_v54, %v15702_v62  ;;  %v2445_v37 = vshrl.u32 %v15719_v18, 16 }
 0x12f   : > { %13035 = vmatmul.mubr.msk.bf16.vlgmr.msra.gmra.mrb[0].mxu0 %vm748_vm3, %v11663_v10  ;;  %v2411_v10 = vshll.u32 %v11633_v46, 16  ;;  %v2324_v46 = vsel %vm14731_vm2, %v2319_v61, %v15656_v40  ;;  %v14160_v40 = vld [vmem:[%s19211_s1 + $0xb8] sm:$0xff]   ;;  %v2390_v61 = vor.u32 %v2389_v22, %v2386_v47  ;;  %v2405_v22 = vrot.slane %v2403_v48, 5 }
 0x130   : > { %13067 = vmatpush3.bf16.msra.mxu0 %v15413_v58  ;;  %13038 = vmatprep.mubr.msk.bf16.mxu0 %vm748_vm3, %v11664_v5  ;;  %v2421_v58 = vshrl.u32 %v15460_v19, 16  ;;  %v2366_v5 = vor.u32 %v2365_v17, %v2362_v26  ;;  %v2334_v19 = vsel %vm14731_vm2, %v2329_v57, %v15672_v0  ;;  %v15710_v26 = vrot.slane %v2379_v4, 5 }
 0x131   : > { %13068 = vmatprep.subr.bf16.mxu0 %v14158_v44  ;;  %v2413_v17 = vrot.slane %v2411_v10, 5  ;;  %v2358_v0 = vsel %vm14731_vm2, %v2353_v43, %v2357_v12  ;;  %v2432_v57 = vshrl.u32 %v11636_v25, 16  ;;  %v2441_v4 = vshll.u32 %v15719_v18, 16  ;;  %v15738_v43 = vld [vmem:[%s19211_s1 + $0xc0] sm:$0xff]  }
 0x132   : > { %v2423_v30 = vrot.slane %v2421_v58, 4  ;;  %v11667_v12 = vcombine.low %v2324_v46, %v2334_v19  ;;  %v11639_v58 = vld [vmem:[%s14696_s17 + $0x90] sm:$0xf]  ;;  %v2391_v47 = vrot.slane %v2390_v61, 4  ;;  %v2401_v36 = vrot.slane %v2400_v49, 4 }
 0x133   : > { %v2414_v10 = vor.u32 %v2413_v17, %v2410_v7  ;;  %v2434_v54 = vrot.slane %v2432_v57, 4  ;;  %v2437_v46 = vrot.slane %v2435_v41, 5  ;;  %v11642_v19 = vld [vmem:[%s14696_s17 + $0x9c] sm:$0xf]  ;;  %v15750_v7 = vrot.slane %v2441_v4, 5 }
 0x134   : > { %13069 = vmatpush3.bf16.msra.mxu0 %v14158_v44  ;;  %v2367_v44 = vrot.slane %v2366_v5, 4  ;;  %v2424_v13 = vor.u32 %v2423_v30, %v15716_v55  ;;  %v2447_v25 = vrot.slane %v2445_v37, 4  ;;  %v2459_v17 = vshll.u32 %v11639_v58, 16  ;;  %v15753_v30 = vld [vmem:[%s14696_s17 + $0xa0] sm:$0xf] }
 0x135   : > { %13070 = vmatprep.subr.bf16.mxu0 %v14159_v59  ;;  %v2469_v48 = vshrl.u32 %v15502_v2, 16  ;;  %v2483_v49 = vshll.u32 %v11642_v19, 16  ;;  %v2396_v57 = vsel %vm14731_vm2, %v2391_v47, %v15702_v62  ;;  %v2489_v41 = vshll.u32 %v15753_v30, 16 }
 0x136   : > { %v2372_v5 = vsel %vm14731_vm2, %v2367_v44, %v15686_v6  ;;  %v2415_v6 = vrot.slane %v2414_v10, 4  ;;  %v2493_v4 = vshrl.u32 %v15753_v30, 16  ;;  %v2438_v37 = vor.u32 %v2437_v46, %v2434_v54  ;;  %v15777_v46 = vld [vmem:[%s14696_s17 + $0xa4] sm:$0x1] }
 0x137   : > { %13039 = vmatmul.mubr.msk.bf16.gmra.mrb[4].mxu0 %vm748_vm3, %v11665_v60  ;;  %v2427_v60 = vshll.u32 %v15463_v21, 16  ;;  %v2382_v21 = vsel %vm14731_vm2, %v2377_v23, %v15710_v26  ;;  %v2465_v26 = vshll.u32 %v15502_v2, 16  ;;  %v2480_v23 = vshrl.u32 %v11642_v19, 16 }
 0x138   : > { %13042 = vmatprep.mubr.msk.bf16.mxu0 %vm748_vm3, %v11666_v63  ;;  %13071 = vmatpush3.bf16.msra.mxu0 %v14159_v59  ;;  %v11668_v59 = vcombine.low %v2348_v35, %v2358_v0  ;;  %v15744_v63 = vld [vmem:[%s14696_s17 + $0x8c] sm:$0x1]  ;;  %v2456_v35 = vshrl.u32 %v11639_v58, 16  ;;  %v2425_v0 = vrot.slane %v2424_v13, 4  ;;  %v2448_v2 = vor.u32 %v2447_v25, %v15750_v7 }
 0x139   : > { %13072 = vmatprep.subr.bf16.mxu0 %v14160_v40  ;;  %v2429_v44 = vrot.slane %v2427_v60, 5  ;;  %v2451_v61 = vshll.u32 %v15744_v63, 16  ;;  %v2420_v62 = vsel %vm14731_vm2, %v2415_v6, %v15716_v55  ;;  %v15774_v58 = vrot.slane %v2465_v26, 5 }
 0x13a   : > { %v2458_v10 = vrot.slane %v2456_v35, 4  ;;  %v2471_v47 = vrot.slane %v2469_v48, 4  ;;  %v2491_v19 = vrot.slane %v2489_v41, 5  ;;  %v2495_v25 = vrot.slane %v2493_v4, 4  ;;  %v11645_v35 = vld [vmem:[%s14696_s17 + $0xa8] sm:$0xf] }
 0x13b   : > { %v2430_v13 = vsel %vm14731_vm2, %v2425_v0, %v2429_v44  ;;  %v2453_v60 = vrot.slane %v2451_v61, 5  ;;  %v2449_v55 = vrot.slane %v2448_v2, 4  ;;  %v2475_v0 = vshll.u32 %v15505_v42, 16 }
 0x13c   : > { %13073 = vmatpush3.bf16.msra.mxu0 %v14160_v40  ;;  %v2406_v40 = vsel %vm14731_vm2, %v2401_v36, %v2405_v22  ;;  %v2482_v22 = vrot.slane %v2480_v23, 4  ;;  %v2485_v36 = vrot.slane %v2483_v49, 5  ;;  %v11671_v44 = vcombine.low %v2420_v62, %v2430_v13 }
 0x13d   : > { %13106 = vmatprep.subr.bf16.mxu0 %v15738_v43  ;;  %v11670_v54 = vcombine.low %v2396_v57, %v2406_v40  ;;  %v2472_v61 = vor.u32 %v2471_v47, %v15774_v58  ;;  %v2499_v48 = vshll.u32 %v15777_v46, 16  ;;  %v2504_v23 = vshrl.u32 %v11645_v35, 16 }
 0x13e   : > { %v2486_v26 = vor.u32 %v2485_v36, %v2482_v22  ;;  %v2496_v49 = vor.u32 %v2495_v25, %v2491_v19  ;;  %v2507_v57 = vshll.u32 %v11645_v35, 16  ;;  %v2513_v40 = vshll.u32 %v15547_v51, 16 }
 0x13f   : > { %13043 = vmatmul.mubr.msk.bf16.gmra.mrb[8].mxu0 %vm748_vm3, %v11667_v12  ;;  %v2461_v12 = vrot.slane %v2459_v17, 5  ;;  %v2439_v17 = vrot.slane %v2438_v37, 4  ;;  %v2517_v41 = vshrl.u32 %v15547_v51, 16  ;;  %v2454_v4 = vsel %vm14731_vm2, %v2449_v55, %v2453_v60 }
 0x140   : > { %13046 = vmatprep.mubr.msk.bf16.mxu0 %vm748_vm3, %v11668_v59  ;;  %v11669_v59 = vcombine.low %v2372_v5, %v2382_v21  ;;  %v11648_v5 = vld [vmem:[%s14696_s17 + $0xb4] sm:$0xf]  ;;  %v15785_v21 = vld [vmem:[%s14696_s17 + $0xb8] sm:$0xf]  ;;  %v2477_v2 = vrot.slane %v2475_v0, 5  ;;  %v2473_v47 = vrot.slane %v2472_v61, 4 }
 0x141   : > { %v2462_v6 = vor.u32 %v2461_v12, %v2458_v10  ;;  %v2444_v42 = vsel %vm14731_vm2, %v2439_v17, %v15750_v7  ;;  %v2528_v10 = vshrl.u32 %v11648_v5, 16  ;;  %v2531_v12 = vshll.u32 %v11648_v5, 16  ;;  %v11651_v0 = vld [vmem:[%s14696_s17 + $0xc0] sm:$0xf] }
 0x142   : > { %v2537_v62 = vshll.u32 %v15785_v21, 16  ;;  %v2541_v13 = vshrl.u32 %v15785_v21, 16  ;;  %v2487_v51 = vrot.slane %v2486_v26, 4  ;;  %v2501_v22 = vrot.slane %v2499_v48, 5  ;;  %v15806_v48 = vld [vmem:[%s14696_s17 + $0xbc] sm:$0x1] }
 0x143   : > { %v2463_v37 = vrot.slane %v2462_v6, 4  ;;  %v2506_v36 = vrot.slane %v2504_v23, 4  ;;  %v2515_v7 = vrot.slane %v2513_v40, 5  ;;  %v2519_v25 = vrot.slane %v2517_v41, 4 }
 0x144   : > { %v11672_v35 = vcombine.low %v2444_v42, %v2454_v4  ;;  %v2530_v60 = vrot.slane %v2528_v10, 4  ;;  %v2533_v17 = vrot.slane %v2531_v12, 5  ;;  %v2539_v55 = vrot.slane %v2537_v62, 5 }
 0x145   : > { %v2543_v6 = vrot.slane %v2541_v13, 4  ;;  %v2468_v5 = vsel %vm14731_vm2, %v2463_v37, %v15774_v58  ;;  %v2478_v61 = vsel %vm14731_vm2, %v2473_v47, %v2477_v2  ;;  %v2523_v26 = vshll.u32 %v15550_v8, 16 }
 0x146   : > { %v2492_v23 = vsel %vm14731_vm2, %v2487_v51, %v2491_v19  ;;  %v2520_v40 = vor.u32 %v2519_v25, %v2515_v7  ;;  %v2552_v58 = vshrl.u32 %v11651_v0, 16  ;;  %v2555_v41 = vshll.u32 %v11651_v0, 16 }
 0x147   : > { %13047 = vmatmul.mubr.msk.bf16.gmra.mrb[12].mxu0 %vm748_vm3, %v11669_v59  ;;  %v2497_v59 = vrot.slane %v2496_v49, 4  ;;  %v2561_v42 = vshll.u32 %v15598_v20, 16  ;;  %v2565_v8 = vshrl.u32 %v15598_v20, 16  ;;  %v2534_v4 = vor.u32 %v2533_v17, %v2530_v60 }
 0x148   : > { %13050 = vmatprep.mubr.msk.bf16.mxu0 %vm748_vm3, %v11670_v54  ;;  %v2509_v54 = vrot.slane %v2507_v57, 5  ;;  %v2544_v37 = vor.u32 %v2543_v6, %v2539_v55  ;;  %v11673_v2 = vcombine.low %v2468_v5, %v2478_v61  ;;  %v2521_v12 = vrot.slane %v2520_v40, 4  ;;  %v11698_v61 = vld [vmem:[%s14696_s17 + $0xc] sm:$0xe] }
 0x149   : > { %v2502_v49 = vsel %vm14731_vm2, %v2497_v59, %v2501_v22  ;;  %v2525_v62 = vrot.slane %v2523_v26, 5  ;;  %v2554_v13 = vrot.slane %v2552_v58, 4  ;;  %v2557_v47 = vrot.slane %v2555_v41, 5 }
 0x14a   : > { %v2510_v57 = vor.u32 %v2509_v54, %v2506_v36  ;;  %v11674_v10 = vcombine.low %v2492_v23, %v2502_v49  ;;  %v2563_v51 = vrot.slane %v2561_v42, 5  ;;  %v2567_v22 = vrot.slane %v2565_v8, 4 }
 0x14b   : > { %v2535_v36 = vrot.slane %v2534_v4, 4  ;;  %v2545_v59 = vrot.slane %v2544_v37, 4  ;;  %v2526_v25 = vsel %vm14731_vm2, %v2521_v12, %v2525_v62  ;;  %v2571_v17 = vshll.u32 %v15601_v52, 16  ;;  %v11699_v4 = vld [vmem:[%s14696_s17 + $0x18] sm:$0xe] }
 0x14c   : > { %v2511_v19 = vrot.slane %v2510_v57, 4  ;;  %v2568_v60 = vor.u32 %v2567_v22, %v2563_v51  ;;  %v2963_v5 = vrot.slane %v15442_v9, 5  ;;  %v11714_v40 = vrot.slane %v11698_v61, 9  ;;  %v11700_v37 = vld [vmem:[%s14696_s17 + $0x24] sm:$0xe] }
 0x14d   : > { %v2540_v6 = vsel %vm14731_vm2, %v2535_v36, %v2539_v55  ;;  %v2573_v57 = vrot.slane %v2571_v17, 5  ;;  %v2966_v52 = vrot.slane %v15476_v16, 5  ;;  %v2970_v41 = vrot.slane %v15472_v34, 5  ;;  %v11701_v36 = vld [vmem:[%s14696_s17 + $0x30] sm:$0xe] }
 0x14e   : > { %v2516_v20 = vsel %vm14731_vm2, %v2511_v19, %v2515_v7  ;;  %v2569_v49 = vrot.slane %v2568_v60, 4  ;;  %v2965_v58 = vrot.slane %v2963_v5, 4  ;;  %v2964_v42 = vsel %vm15047_vm6, %v11714_v40, %v2963_v5 }
 0x14f   : > { %13051 = vmatmul.mubr.msk.bf16.gmra.mrb[16].mxu0 %vm748_vm3, %v11671_v44  ;;  %v2547_v44 = vshll.u32 %v15806_v48, 16  ;;  %v11675_v7 = vcombine.low %v2516_v20, %v2526_v25  ;;  %v2977_v16 = vrot.slane %v15499_v53, 5  ;;  %v2972_v19 = vrot.slane %v2970_v41, 4 }
 0x150   : > { %13054 = vmatprep.mubr.msk.bf16.mxu0 %vm748_vm3, %v11672_v35  ;;  %v2558_v35 = vor.u32 %v2557_v47, %v2554_v13  ;;  %v2574_v9 = vsel %vm14731_vm2, %v2569_v49, %v2573_v57  ;;  %v2967_v8 = vsel %vm15047_vm6, %v2965_v58, %v2966_v52  ;;  %v2973_v12 = vrot.slane %v15494_v45, 5  ;;  %v14164_v58 = vld [vmem:[%s19211_s1 + $0xd8] sm:$0xff]  }
 0x151   : > { %v2549_v54 = vrot.slane %v2547_v44, 5  ;;  %v11716_v62 = vrot.slane %v11700_v37, 9  ;;  %v2979_v34 = vrot.slane %v2977_v16, 4  ;;  %v2980_v13 = vrot.slane %v15533_v15, 5 }
 0x152   : > { %v2559_v23 = vrot.slane %v2558_v35, 4  ;;  %v2974_v47 = vsel %vm15047_vm6, %v2972_v19, %v2973_v12  ;;  %v2991_v15 = vrot.slane %v15564_v50, 5  ;;  %v11717_v25 = vrot.slane %v11701_v36, 9 }
 0x153   : > { %v2550_v0 = vsel %vm14731_vm2, %v2545_v59, %v2549_v54  ;;  %v2978_v22 = vsel %vm15047_vm6, %v11716_v62, %v2977_v16  ;;  %v2981_v45 = vsel %vm15047_vm6, %v2979_v34, %v2980_v13  ;;  %v11702_v59 = vld [vmem:[%s14696_s17 + $0x3c] sm:$0xe]  ;;  %v2987_v60 = vrot.slane %v15558_v11, 5 }
 0x154   : > { %v11676_v26 = vcombine.low %v2540_v6, %v2550_v0  ;;  %v2564_v55 = vsel %vm14731_vm2, %v2559_v23, %v2563_v51  ;;  %v2984_v51 = vrot.slane %v15518_v56, 5  ;;  %v11740_v20 = vcombine.low %v2978_v22, %v2981_v45  ;;  %v14162_v0 = vld [vmem:[%s19211_s1 + $0xc8] sm:$0xff]   ;;  %v11710_v34 = vld [vmem:[%s14696_s17 + $0x9c] sm:$0xe]  ;;  %v11712_v45 = vld [vmem:[%s14696_s17 + $0xb4] sm:$0xe] }
 0x155   : > { %v11677_v44 = vcombine.low %v2564_v55, %v2574_v9  ;;  %v11718_v17 = vrot.slane %v11702_v59, 9  ;;  %v2993_v6 = vrot.slane %v2991_v15, 4  ;;  %v2994_v56 = vrot.slane %v15613_v33, 5  ;;  %v11706_v9 = vld [vmem:[%s14696_s17 + $0x6c] sm:$0xe]  ;;  %v19369_v59 = vld [vmem:[#allocation7_spill] sm:$0xff] }
 0x156   : > { %v2986_v35 = vrot.slane %v2984_v51, 4  ;;  %v2985_v50 = vsel %vm15047_vm6, %v11717_v25, %v2984_v51  ;;  %v3005_v61 = vrot.slane %v15625_v24, 5  ;;  %v3008_v40 = vrot.slane %v15661_v14, 5  ;;  %v14166_v14 = vld [vmem:[%s19211_s1 + $0xe0] sm:$0xff]  }
 0x157   : > { %13055 = vmatmul.mubr.msk.bf16.gmra.mrb[20].mxu0 %vm748_vm3, %v11673_v2  ;;  %v11738_v2 = vcombine.low %v2964_v42, %v2967_v8  ;;  %v2992_v5 = vsel %vm15047_vm6, %v11718_v17, %v2991_v15  ;;  %v2995_v33 = vsel %vm15047_vm6, %v2993_v6, %v2994_v56  ;;  %v3019_v55 = vrot.slane %v15675_v27, 5  ;;  %v19373_v17 = vld [vmem:[#allocation10_spill] sm:$0xff]  ;;  %v19375_v56 = vld [vmem:[#allocation11_spill] sm:$0xff] }
 0x158   : > { %13058 = vmatprep.mubr.msk.bf16.mxu0 %vm748_vm3, %v11674_v10  ;;  %v11715_v10 = vrot.slane %v11699_v4, 9  ;;  %v2988_v11 = vsel %vm15047_vm6, %v2986_v35, %v2987_v60  ;;  %v11742_v23 = vcombine.low %v2992_v5, %v2995_v33  ;;  %v3007_v57 = vrot.slane %v3005_v61, 4  ;;  %v19372_v60 = vld [vmem:[#allocation9_spill] sm:$0xff]  ;;  %v14171_v33 = vld [vmem:[%s19211_s1 + $0xe8] sm:$0xff]  }
 0x159   : > { %v11722_v42 = vrot.slane %v11706_v9, 9  ;;  %v3021_v8 = vrot.slane %v3019_v55, 4  ;;  %v3022_v4 = vrot.slane %v15700_v39, 5  ;;  %v19365_v16 = vcombine.low %v15418_v28, %v15423_v32  ;;  %v14168_v5 = vld [vmem:[%s14696_s17 + $0x30] sm:$0xff]  }
 0x15a   : > { %v2971_v53 = vsel %vm15047_vm6, %v11715_v10, %v2970_v41  ;;  %v3009_v52 = vsel %vm15047_vm6, %v3007_v57, %v3008_v40  ;;  %v3036_v12 = vrot.slane %v15744_v63, 5  ;;  %v19366_v28 = vcombine.low %v15446_v31, %v15452_v1  ;;  %v19367_v31 = vld [vmem:[#allocation6_spill] sm:$0xff]  ;;  %v11947_v57 = vld [vmem:[%s14696_s17 + $0x54] sm:$0xe] }
 0x15b   : > { %v11739_v54 = vcombine.low %v2971_v53, %v2974_v47  ;;  %v3020_v27 = vsel %vm15047_vm6, %v11722_v42, %v3019_v55  ;;  %v3023_v37 = vsel %vm15047_vm6, %v3021_v8, %v3022_v4  ;;  %v3047_v62 = vrot.slane %v15753_v30, 5  ;;  %v16000_v4 = vld [vmem:[%s14696_s17 + $0x70] sm:$0xf]  ;;  %v16171_v8 = vld [vmem:[%s14696_s17 + $0xd4] sm:$0x1] }
 0x15c   : > { %v11746_v10 = vcombine.low %v3020_v27, %v3023_v37  ;;  %v11726_v53 = vrot.slane %v11710_v34, 9  ;;  %v3050_v47 = vrot.slane %v15777_v46, 5  ;;  %v19368_v1 = vcombine.low %v15480_v38, %v19367_v31  ;;  %v11949_v27 = vld [vmem:[%s14696_s17 + $0x6c] sm:$0xe]  ;;  %v16168_v34 = vld [vmem:[%s14696_s17 + $0xd0] sm:$0xf] }
 0x15d   : > { %v3049_v63 = vrot.slane %v3047_v62, 4  ;;  %v3061_v22 = vrot.slane %v15785_v21, 5  ;;  %v11728_v36 = vrot.slane %v11712_v45, 9  ;;  %v3064_v38 = vrot.slane %v15806_v48, 5  ;;  %v14165_v48 = vld [vmem:[%s14696_s17 + $0x18] sm:$0xff]  }
 0x15e   : > { %v3048_v51 = vsel %vm15047_vm6, %v11726_v53, %v3047_v62  ;;  %v19374_v6 = vcombine.low %v19372_v60, %v19373_v17  ;;  %v4651_v37 = vrot.slane %v16000_v4, 5 }
 0x15f   : > { %13059 = vmatmul.mubr.msk.bf16.gmra.mrb[24].mxu0 %vm748_vm3, %v11675_v7  ;;  %v11704_v7 = vld [vmem:[%s14696_s17 + $0x54] sm:$0xe]  ;;  %v3051_v30 = vsel %vm15047_vm6, %v3049_v63, %v3050_v47  ;;  %v3063_v15 = vrot.slane %v3061_v22, 4  ;;  %v3062_v25 = vsel %vm15047_vm6, %v11728_v36, %v3061_v22  ;;  %v11951_v22 = vld [vmem:[%s14696_s17 + $0x84] sm:$0xe] }
 0x160   : > { %13062 = vmatprep.mubr.msk.bf16.mxu0 %vm748_vm3, %v11676_v26  ;;  %v11741_v26 = vcombine.low %v2985_v50, %v2988_v11  ;;  %v11720_v49 = vrot.slane %v11704_v7, 9  ;;  %v11750_v46 = vcombine.low %v3048_v51, %v3051_v30  ;;  %v14167_v11 = vld [vmem:[%s14696_s17 + $0x24] sm:$0xff]   ;;  %v16033_v30 = vld [vmem:[%s14696_s17 + $0x8c] sm:$0x1]  ;;  %v11967_v36 = vrot.slane %v11951_v22, 9 }
 0x161   : > { %v3065_v21 = vsel %vm15047_vm6, %v3063_v15, %v3064_v38  ;;  %v14170_v7 = vld [vmem:[%s14696_s17 + $0x48] sm:$0xff]  }
 0x162   : > { %v3006_v24 = vsel %vm15047_vm6, %v11720_v49, %v3005_v61  ;;  %v11752_v35 = vcombine.low %v3062_v25, %v3065_v21  ;;  %v14176_v61 = vld [vmem:[%s19211_s1 + $0xf0] sm:$0xff]   ;;  %v15974_v49 = vld [vmem:[%s14696_s17 + $0x5c] sm:$0x1]  ;;  %v16030_v51 = vld [vmem:[%s14696_s17 + $0x88] sm:$0xf] }
 0x163   : > { %v11744_v41 = vcombine.low %v3006_v24, %v3009_v52  ;;  %v15983_v24 = vld [vmem:[%s19211_s1 + $0x100] sm:$0xff]   ;;  %v11963_v52 = vrot.slane %v11947_v57, 9  ;;  %v4665_v45 = vrot.slane %v16030_v51, 5  ;;  %v16069_v57 = vld [vmem:[%s14696_s17 + $0x34] sm:$0xf]  ;;  %v14180_v22 = vld [vmem:[%s14696_s17 + $0xa8] sm:$0xff]  }
 0x164   : > { %v14177_v25 = vld [vmem:[%s14696_s17 + $0x84] sm:$0xff]   ;;  %v16046_v21 = vld [vmem:[%s14696_s17 + $0x20] sm:$0x1] }
 0x167   : > { %13063 = vmatmul.mubr.msk.bf16.gmra.mrb[28].mxu0 %vm748_vm3, %v11677_v44  ;;  %v3033_v44 = vrot.slane %v15719_v18, 5 }
 0x168   : > { %13074 = vmatprep.mubr.msk.bf16.mxu0 %vm748_vm3, %v11738_v2  ;;  %v11708_v2 = vld [vmem:[%s14696_s17 + $0x84] sm:$0xe] }
 0x169   : > { %v11724_v39 = vrot.slane %v11708_v2, 9  ;;  %v3035_v19 = vrot.slane %v3033_v44, 4  ;;  %v11965_v2 = vrot.slane %v11949_v27, 9 }
 0x16b   : > { %v3034_v32 = vsel %vm15047_vm6, %v11724_v39, %v3033_v44  ;;  %v3037_v18 = vsel %vm15047_vm6, %v3035_v19, %v3036_v12  ;;  %v14174_v39 = vld [vmem:[%s14696_s17 + $0x6c] sm:$0xff]   ;;  %v11850_v19 = vld [vmem:[%s14696_s17 + $0x18] sm:$0xf]  ;;  %v16012_v12 = vld [vmem:[%s14696_s17 + $0x1c] sm:$0xf] }
 0x16c   : > { %v11748_v13 = vcombine.low %v3034_v32, %v3037_v18  ;;  %v14175_v32 = vld [vmem:[%s14696_s17 + $0x78] sm:$0xff]   ;;  %v11853_v18 = vld [vmem:[%s14696_s17 + $0x24] sm:$0xf]  ;;  %v3834_v53 = vshll.u32 %v11850_v19, 16  ;;  %v3840_v63 = vshll.u32 %v16012_v12, 16  ;;  %v3844_v47 = vshrl.u32 %v16012_v12, 16 }
 0x16d   : > { %v3855_v31 = vshrl.u32 %v11853_v18, 16 }
 0x16e   : > { %v3836_v38 = vrot.slane %v3834_v53, 5  ;;  %v14179_v53 = vld [vmem:[%s14696_s17 + $0x9c] sm:$0xff]  }
 0x16f   : > { %13075 = vmatmul.mubr.msk.bf16.vlgmr.msra.gmra.mrb[0].mxu0 %vm748_vm3, %v11739_v54  ;;  %v19370_v54 = vld [vmem:[#allocation8_spill] sm:$0xff]  ;;  %v3857_v60 = vrot.slane %v3855_v31, 4 }
 0x170   : > { %13107 = vmatpush3.bf16.msra.mxu0 %v15738_v43  ;;  %13078 = vmatprep.mubr.msk.bf16.mxu0 %vm748_vm3, %v11740_v20  ;;  %v14163_v43 = vld [vmem:[%s19211_s1 + $0xd0] sm:$0xff]   ;;  %v19371_v20 = vcombine.low %v19369_v59, %v19370_v54  ;;  %v16039_v59 = vrot.slane %v3840_v63, 5  ;;  %v16042_v54 = vld [vmem:[%s14696_s17 + $0x28] sm:$0xf] }
 0x171   : > { %13108 = vmatprep.subr.bf16.mxu0 %v14162_v0 }
 0x174   : > { %13109 = vmatpush3.bf16.msra.mxu0 %v14162_v0  ;;  %v19376_v0 = vld [vmem:[#allocation12_spill] sm:$0xff] }
 0x175   : > { %13110 = vmatprep.subr.bf16.mxu0 %v14163_v43  ;;  %v19377_v50 = vcombine.low %v19375_v56, %v19376_v0  ;;  %v3864_v0 = vshll.u32 %v16042_v54, 16 }
 0x177   : > { %13079 = vmatmul.mubr.msk.bf16.gmra.mrb[4].mxu0 %vm748_vm3, %v11741_v26  ;;  %v14181_v26 = vld [vmem:[%s19211_s1 + $0xf8] sm:$0xff]  }
 0x178   : > { %13082 = vmatprep.mubr.msk.bf16.mxu0 %vm748_vm3, %v11742_v23  ;;  %13111 = vmatpush3.bf16.msra.mxu0 %v14163_v43  ;;  %v14169_v43 = vld [vmem:[%s14696_s17 + $0x3c] sm:$0xff]   ;;  %v15971_v23 = vld [vmem:[%s14696_s17 + $0x58] sm:$0xf] }
 0x179   : > { %13112 = vmatprep.subr.bf16.mxu0 %v14164_v58  ;;  %v4637_v40 = vrot.slane %v15971_v23, 5 }
 0x17b   : > { %v4639_v55 = vrot.slane %v4637_v40, 4  ;;  %v15988_v9 = vsel %vm15047_vm6, %v11963_v52, %v4637_v40  ;;  %v16072_v40 = vld [vmem:[%s14696_s17 + $0xa0] sm:$0xf] }
 0x17c   : > { %13113 = vmatpush3.bf16.msra.mxu0 %v14164_v58  ;;  %v4640_v58 = vrot.slane %v15974_v49, 5 }
 0x17d   : > { %13146 = vmatprep.subr.bf16.mxu0 %v14166_v14 }
 0x17e   : > { %v15993_v42 = vsel %vm15047_vm6, %v4639_v55, %v4640_v58  ;;  %v16075_v58 = vld [vmem:[%s14696_s17 + $0xa4] sm:$0x1] }
 0x17f   : > { %13083 = vmatmul.mubr.msk.bf16.gmra.mrb[8].mxu0 %vm748_vm3, %v19365_v16  ;;  %v16003_v16 = vld [vmem:[%s14696_s17 + $0x74] sm:$0x1]  ;;  %v4682_v27 = vrot.slane %v16075_v58, 5 }
 0x180   : > { %13086 = vmatprep.mubr.msk.bf16.mxu0 %vm748_vm3, %v11744_v41  ;;  %v14173_v41 = vld [vmem:[%s14696_s17 + $0x60] sm:$0xff]   ;;  %v4654_v44 = vrot.slane %v16003_v16, 5 }
 0x187   : > { %13087 = vmatmul.mubr.msk.bf16.gmra.mrb[12].mxu0 %vm748_vm3, %v19366_v28  ;;  %v16016_v28 = vsel %vm15047_vm6, %v11965_v2, %v4651_v37  ;;  %v11859_v2 = vld [vmem:[%s14696_s17 + $0x3c] sm:$0xf] }
 0x188   : > { %13090 = vmatprep.mubr.msk.bf16.mxu0 %vm748_vm3, %v11746_v10  ;;  %v4653_v10 = vrot.slane %v4651_v37, 4  ;;  %v16081_v37 = vrot.slane %v3864_v0, 5 }
 0x18a   : > { %v16022_v62 = vsel %vm15047_vm6, %v4653_v10, %v4654_v44 }
 0x18f   : > { %13091 = vmatmul.mubr.msk.bf16.gmra.mrb[16].mxu0 %vm748_vm3, %v19368_v1  ;;  %v3858_v1 = vshll.u32 %v11853_v18, 16  ;;  %v16088_v18 = vld [vmem:[%s14696_s17 + $0x40] sm:$0xf] }
 0x190   : > { %13094 = vmatprep.mubr.msk.bf16.mxu0 %vm748_vm3, %v11748_v13  ;;  %v3831_v13 = vshrl.u32 %v11850_v19, 16  ;;  %v3888_v19 = vshll.u32 %v16069_v57, 16 }
 0x191   : > { %v3860_v17 = vrot.slane %v3858_v1, 5 }
 0x192   : > { %v3833_v15 = vrot.slane %v3831_v13, 4 }
 0x197   : > { %13095 = vmatmul.mubr.msk.bf16.gmra.mrb[20].mxu0 %vm748_vm3, %v19371_v20  ;;  %v4667_v20 = vrot.slane %v4665_v45, 4 }
 0x198   : > { %13098 = vmatprep.mubr.msk.bf16.mxu0 %vm748_vm3, %v11750_v46  ;;  %v4668_v46 = vrot.slane %v16033_v30, 5 }
 0x19a   : > { %v16055_v56 = vsel %vm15047_vm6, %v4667_v20, %v4668_v46  ;;  %v3903_v20 = vshrl.u32 %v11859_v2, 16 }
 0x19b   : > { %19378 = vst [vmem:[#allocation6_spill] sm:$0xff] %v16055_v56  ;;  %v16195_v56 = vld [vmem:[%s14696_s17 + $0x64] sm:$0xf] }
 0x19f   : > { %13099 = vmatmul.mubr.msk.bf16.gmra.mrb[24].mxu0 %vm748_vm3, %v19374_v6  ;;  %v16050_v6 = vsel %vm15047_vm6, %v11967_v36, %v4665_v45 }
 0x1a0   : > { %13102 = vmatprep.mubr.msk.bf16.mxu0 %vm748_vm3, %v11752_v35  ;;  %v3846_v35 = vrot.slane %v3844_v47, 4 }
 0x1a7   : > { %13103 = vmatmul.mubr.msk.bf16.gmra.mrb[28].mxu0 %vm748_vm3, %v19377_v50  ;;  %v3868_v50 = vshrl.u32 %v16042_v54, 16 }
 0x1a8   : > { %13114 = vmatprep.mubr.msk.bf16.mxu0 %vm748_vm3, %v14165_v48  ;;  %v14178_v48 = vld [vmem:[%s14696_s17 + $0x90] sm:$0xff]  }
 0x1a9   : > { %v3870_v44 = vrot.slane %v3868_v50, 4  ;;  %v3916_v50 = vshrl.u32 %v16088_v18, 16 }
 0x1af   : > { %13115 = vmatmul.mubr.msk.bf16.vlgmr.msra.gmra.mrb[0].mxu0 %vm748_vm3, %v14167_v11  ;;  %v11856_v11 = vld [vmem:[%s14696_s17 + $0x30] sm:$0xf] }
 0x1b0   : > { %13147 = vmatpush3.bf16.msra.mxu0 %v14166_v14  ;;  %13118 = vmatprep.mubr.msk.bf16.mxu0 %vm748_vm3, %v14168_v5  ;;  %v14172_v14 = vld [vmem:[%s14696_s17 + $0x54] sm:$0xff]   ;;  %v3879_v52 = vshrl.u32 %v11856_v11, 16  ;;  %v3882_v55 = vshll.u32 %v11856_v11, 16  ;;  %v3871_v11 = vor.u32 %v3870_v44, %v16081_v37  ;;  %v3905_v44 = vrot.slane %v3903_v20, 4 }
 0x1b1   : > { %13148 = vmatprep.subr.bf16.mxu0 %v14171_v33  ;;  %v11865_v5 = vld [vmem:[%s14696_s17 + $0x54] sm:$0xf] }
 0x1b2   : > { %v3881_v46 = vrot.slane %v3879_v52, 4  ;;  %v3884_v36 = vrot.slane %v3882_v55, 5  ;;  %v11955_v55 = vld [vmem:[%s14696_s17 + $0xb4] sm:$0xe] }
 0x1b4   : > { %13149 = vmatpush3.bf16.msra.mxu0 %v14171_v33  ;;  %v3850_v33 = vshll.u32 %v16046_v21, 16 }
 0x1b5   : > { %13150 = vmatprep.subr.bf16.mxu0 %v14176_v61 }
 0x1b6   : > { %v3852_v31 = vrot.slane %v3850_v33, 5  ;;  %v11862_v33 = vld [vmem:[%s14696_s17 + $0x48] sm:$0xf] }
 0x1b7   : > { %13119 = vmatmul.mubr.msk.bf16.gmra.mrb[4].mxu0 %vm748_vm3, %v14169_v43  ;;  %v3837_v43 = vor.u32 %v3836_v38, %v3833_v15  ;;  %v16103_v38 = vld [vmem:[%s14696_s17 + $0x38] sm:$0x1] }
 0x1b8   : > { %13122 = vmatprep.mubr.msk.bf16.mxu0 %vm748_vm3, %v14170_v7  ;;  %13151 = vmatpush3.bf16.msra.mxu0 %v14176_v61  ;;  %v16064_v61 = vld [vmem:[%s14696_s17 + $0x2c] sm:$0x1]  ;;  %v3847_v7 = vor.u32 %v3846_v35, %v16039_v59  ;;  %v3912_v35 = vshll.u32 %v16088_v18, 16  ;;  %v3898_v52 = vshll.u32 %v16103_v38, 16 }
 0x1b9   : > { %13152 = vmatprep.subr.bf16.mxu0 %v14181_v26  ;;  %v3838_v63 = vrot.slane %v3837_v43, 4  ;;  %v16117_v43 = vld [vmem:[%s14696_s17 + $0xb8] sm:$0xf] }
 0x1ba   : > { %v3848_v47 = vrot.slane %v3847_v7, 4  ;;  %v16120_v7 = vld [vmem:[%s14696_s17 + $0xbc] sm:$0x1] }
 0x1bc   : > { %13153 = vmatpush3.bf16.msra.mxu0 %v14181_v26  ;;  %v3861_v26 = vor.u32 %v3860_v17, %v3857_v60  ;;  %v3853_v20 = vsel %vm14731_vm2, %v3848_v47, %v3852_v31  ;;  %v16151_v60 = vrot.slane %v3898_v52, 5 }
 0x1bd   : > { %13186 = vmatprep.subr.bf16.mxu0 %v15983_v24 }
 0x1be   : > { %v16096_v45 = vrot.slane %v3861_v26, 4  ;;  %v3885_v26 = vor.u32 %v3884_v36, %v3881_v46  ;;  %v14182_v46 = vld [vmem:[%s14696_s17 + $0xb4] sm:$0xff]   ;;  %v3843_v36 = vsel %vm14731_vm2, %v3838_v63, %v16039_v59 }
 0x1bf   : > { %13123 = vmatmul.mubr.msk.bf16.gmra.mrb[8].mxu0 %vm748_vm3, %v14172_v14  ;;  %v11953_v14 = vld [vmem:[%s14696_s17 + $0x9c] sm:$0xe] }
 0x1c0   : > { %13126 = vmatprep.mubr.msk.bf16.mxu0 %vm748_vm3, %v14173_v41  ;;  %v4679_v41 = vrot.slane %v16072_v40, 5  ;;  %v11969_v10 = vrot.slane %v11953_v14, 9  ;;  %v4693_v14 = vrot.slane %v16117_v43, 5 }
 0x1c2   : > { %v4681_v13 = vrot.slane %v4679_v41, 4  ;;  %v16093_v1 = vsel %vm15047_vm6, %v11969_v10, %v4679_v41  ;;  %v4696_v41 = vrot.slane %v16120_v7, 5  ;;  %v16130_v10 = vrot.slane %v3912_v35, 5 }
 0x1c3   : > { %19379 = vst [vmem:[#allocation7_spill] sm:$0xff] %v16093_v1  ;;  %v3960_v1 = vshll.u32 %v15971_v23, 16 }
 0x1c4   : > { %v16100_v15 = vsel %vm15047_vm6, %v4681_v13, %v4682_v27  ;;  %v16128_v27 = vld [vmem:[%s14696_s17 + $0x44] sm:$0x1]  ;;  %v16134_v13 = vld [vmem:[%s14696_s17 + $0x4c] sm:$0xf] }
 0x1c5   : > { %19380 = vst [vmem:[#allocation8_spill] sm:$0xff] %v16100_v15  ;;  %v3922_v63 = vshll.u32 %v16128_v27, 16  ;;  %v3936_v47 = vshll.u32 %v16134_v13, 16  ;;  %v3940_v31 = vshrl.u32 %v16134_v13, 16  ;;  %v14184_v15 = vld [vmem:[%s14696_s17 + $0xcc] sm:$0xff]  }
 0x1c7   : > { %13127 = vmatmul.mubr.msk.bf16.gmra.mrb[12].mxu0 %vm748_vm3, %v14174_v39  ;;  %v3874_v39 = vshll.u32 %v16064_v61, 16 }
 0x1c8   : > { %13130 = vmatprep.mubr.msk.bf16.mxu0 %vm748_vm3, %v14175_v32  ;;  %v3892_v32 = vshrl.u32 %v16069_v57, 16 }
 0x1c9   : > { %v16108_v17 = vrot.slane %v3874_v39, 5  ;;  %v11971_v39 = vrot.slane %v11955_v55, 9  ;;  %v14183_v55 = vld [vmem:[%s14696_s17 + $0xc0] sm:$0xff]  }
 0x1ca   : > { %v3894_v0 = vrot.slane %v3892_v32, 4  ;;  %v3918_v32 = vrot.slane %v3916_v50, 4  ;;  %v16149_v50 = vrot.slane %v3885_v26, 4 }
 0x1cb   : > { %v16144_v35 = vsel %vm15047_vm6, %v11971_v39, %v4693_v14 }
 0x1cc   : > { %19381 = vst [vmem:[#allocation9_spill] sm:$0xff] %v16144_v35  ;;  %v3919_v52 = vor.u32 %v3918_v32, %v16130_v10  ;;  %v11957_v32 = vld [vmem:[%s14696_s17 + $0xcc] sm:$0xe] }
 0x1cf   : > { %13131 = vmatmul.mubr.msk.bf16.gmra.mrb[16].mxu0 %vm748_vm3, %v14177_v25  ;;  %v3906_v25 = vshll.u32 %v11859_v2, 16 }
 0x1d0   : > { %13134 = vmatprep.mubr.msk.bf16.mxu0 %vm748_vm3, %v14178_v48  ;;  %v16110_v48 = vrot.slane %v3888_v19, 5 }
 0x1d1   : > { %v3908_v2 = vrot.slane %v3906_v25, 5  ;;  %v3930_v25 = vshll.u32 %v11862_v33, 16 }
 0x1d2   : > { %v3895_v19 = vor.u32 %v3894_v0, %v16110_v48  ;;  %v16147_v0 = vrot.slane %v3871_v11, 4  ;;  %v11973_v11 = vrot.slane %v11957_v32, 9 }
 0x1d3   : > { %v3909_v26 = vor.u32 %v3908_v2, %v3905_v44  ;;  %v3932_v39 = vrot.slane %v3930_v25, 5  ;;  %v3867_v44 = vsel %vm14731_vm2, %v16096_v45, %v16081_v37  ;;  %v3954_v25 = vshll.u32 %v11865_v5, 16 }
 0x1d4   : > { %v3877_v2 = vsel %vm14731_vm2, %v16147_v0, %v16108_v17  ;;  %v3920_v45 = vrot.slane %v3919_v52, 4 }
 0x1d5   : > { %v3910_v37 = vrot.slane %v3909_v26, 4 }
 0x1d7   : > { %13135 = vmatmul.mubr.msk.bf16.gmra.mrb[20].mxu0 %vm748_vm3, %v14179_v53  ;;  %v3927_v53 = vshrl.u32 %v11862_v33, 16  ;;  %v16163_v33 = vrot.slane %v3895_v19, 4  ;;  %v16183_v19 = vld [vmem:[%s14696_s17 + $0x50] sm:$0x1] }
 0x1d8   : > { %13138 = vmatprep.mubr.msk.bf16.mxu0 %vm748_vm3, %v14180_v22  ;;  %v4695_v22 = vrot.slane %v4693_v14, 4  ;;  %v3946_v0 = vshll.u32 %v16183_v19, 16 }
 0x1d9   : > { %v3929_v14 = vrot.slane %v3927_v53, 4  ;;  %v4707_v53 = vrot.slane %v16168_v34, 5 }
 0x1da   : > { %v16156_v59 = vsel %vm15047_vm6, %v4695_v22, %v4696_v41  ;;  %v11906_v41 = vcombine.low %v3843_v36, %v3853_v20  ;;  %v3951_v22 = vshrl.u32 %v11865_v5, 16  ;;  %v16188_v36 = vrot.slane %v3936_v47, 5 }
 0x1db   : > { %19382 = vst [vmem:[#allocation10_spill] sm:$0xff] %v16156_v59  ;;  %v3942_v20 = vrot.slane %v3940_v31, 4  ;;  %v3924_v59 = vrot.slane %v3922_v63, 5  ;;  %v4709_v35 = vrot.slane %v4707_v53, 4  ;;  %v3933_v17 = vor.u32 %v3932_v39, %v3929_v14 }
 0x1dc   : > { %v16199_v47 = vsel %vm15047_vm6, %v11973_v11, %v4707_v53  ;;  %v3964_v5 = vshrl.u32 %v15971_v23, 16  ;;  %v3953_v14 = vrot.slane %v3951_v22, 4  ;;  %v3956_v39 = vrot.slane %v3954_v25, 5 }
 0x1dd   : > { %19383 = vst [vmem:[#allocation11_spill] sm:$0xff] %v16199_v47  ;;  %v3943_v52 = vor.u32 %v3942_v20, %v16188_v36  ;;  %v3891_v11 = vsel %vm14731_vm2, %v16149_v50, %v16110_v48  ;;  %v3901_v23 = vsel %vm14731_vm2, %v16163_v33, %v16151_v60  ;;  %v3988_v53 = vshrl.u32 %v16195_v56, 16 }
 0x1de   : > { %v3915_v22 = vsel %vm14731_vm2, %v3910_v37, %v16130_v10  ;;  %v3925_v48 = vsel %vm14731_vm2, %v3920_v45, %v3924_v59  ;;  %v3934_v50 = vrot.slane %v3933_v17, 4  ;;  %v16226_v20 = vrot.slane %v3960_v1, 5  ;;  %v16231_v37 = vld [vmem:[%s14696_s17 + $0x68] sm:$0x1] }
 0x1df   : > { %13139 = vmatmul.mubr.msk.bf16.gmra.mrb[24].mxu0 %vm748_vm3, %v14182_v46  ;;  %v4710_v46 = vrot.slane %v16171_v8, 5  ;;  %v3966_v60 = vrot.slane %v3964_v5, 4  ;;  %v3970_v33 = vshll.u32 %v15974_v49, 16  ;;  %v3944_v32 = vrot.slane %v3943_v52, 4  ;;  %v16245_v52 = vld [vmem:[%s14696_s17 + $0x7c] sm:$0xf] }
 0x1e0   : > { %13142 = vmatprep.mubr.msk.bf16.mxu0 %vm748_vm3, %v14183_v55  ;;  %v11868_v55 = vld [vmem:[%s14696_s17 + $0x60] sm:$0xf]  ;;  %v11907_v10 = vcombine.low %v3867_v44, %v3877_v2  ;;  %v3990_v1 = vrot.slane %v3988_v53, 4  ;;  %v11909_v17 = vcombine.low %v3915_v22, %v3925_v48  ;;  %v4008_v49 = vshll.u32 %v16000_v4, 16 }
 0x1e1   : > { %v3975_v31 = vshrl.u32 %v11868_v55, 16  ;;  %v3978_v26 = vshll.u32 %v11868_v55, 16  ;;  %v16204_v63 = vsel %vm15047_vm6, %v4709_v35, %v4710_v46  ;;  %v3984_v35 = vshll.u32 %v16195_v56, 16  ;;  %v11871_v46 = vld [vmem:[%s14696_s17 + $0x6c] sm:$0xf] }
 0x1e2   : > { %19384 = vst [vmem:[#allocation12_spill] sm:$0xff] %v16204_v63  ;;  %v3957_v63 = vor.u32 %v3956_v39, %v3953_v14  ;;  %v3999_v47 = vshrl.u32 %v11871_v46, 16  ;;  %v4002_v45 = vshll.u32 %v11871_v46, 16  ;;  %v4012_v5 = vshrl.u32 %v16000_v4, 16  ;;  %v14186_v39 = vld [vmem:[%s19211_s1 + $0x108] sm:$0xff]  }
 0x1e3   : > { %v3977_v25 = vrot.slane %v3975_v31, 4  ;;  %v3980_v55 = vrot.slane %v3978_v26, 5  ;;  %v16233_v59 = vrot.slane %v3984_v35, 5  ;;  %v11874_v31 = vld [vmem:[%s14696_s17 + $0x78] sm:$0xf]  ;;  %v3967_v44 = vor.u32 %v3966_v60, %v16226_v20 }
 0x1e4   : > { %v16242_v2 = vrot.slane %v3970_v33, 5  ;;  %v3958_v4 = vrot.slane %v3957_v63, 4  ;;  %v11877_v35 = vld [vmem:[%s14696_s17 + $0x84] sm:$0xf]  ;;  %v4004_v53 = vrot.slane %v4002_v45, 5  ;;  %v4023_v46 = vshrl.u32 %v11874_v31, 16 }
 0x1e5   : > { %v3981_v26 = vor.u32 %v3980_v55, %v3977_v25  ;;  %v4026_v22 = vshll.u32 %v11874_v31, 16  ;;  %v16256_v48 = vrot.slane %v4008_v49, 5  ;;  %v4036_v60 = vshrl.u32 %v16245_v52, 16 }
 0x1e6   : > { %v4018_v33 = vshll.u32 %v16003_v16, 16  ;;  %v4047_v25 = vshrl.u32 %v11877_v35, 16  ;;  %v4025_v49 = vrot.slane %v4023_v46, 4 }
 0x1e7   : > { %13143 = vmatmul.mubr.msk.bf16.gmra.mrb[28].mxu0 %vm748_vm3, %v14184_v15  ;;  %v3948_v15 = vrot.slane %v3946_v0, 5  ;;  %v3939_v0 = vsel %vm14731_vm2, %v3934_v50, %v16188_v36  ;;  %v3991_v36 = vor.u32 %v3990_v1, %v16233_v59  ;;  %v4014_v50 = vrot.slane %v4012_v5, 4 }
 0x1e8   : > { %13154 = vmatprep.mubr.msk.bf16.mxu0 %vm748_vm3, %v11906_v41  ;;  %v11908_v41 = vcombine.low %v3891_v11, %v3901_v23  ;;  %v3994_v11 = vshll.u32 %v16231_v37, 16  ;;  %v4001_v23 = vrot.slane %v3999_v47, 4  ;;  %v3968_v47 = vrot.slane %v3967_v44, 4  ;;  %v16270_v44 = vld [vmem:[%s14696_s17 + $0x80] sm:$0x1] }
 0x1e9   : > { %v3949_v14 = vsel %vm14731_vm2, %v3944_v32, %v3948_v15  ;;  %v4032_v32 = vshll.u32 %v16245_v52, 16  ;;  %v3982_v63 = vrot.slane %v3981_v26, 4  ;;  %v14187_v15 = vld [vmem:[%s19211_s1 + $0x110] sm:$0xff]   ;;  %v4056_v1 = vshll.u32 %v16030_v51, 16 }
 0x1ea   : > { %v3996_v55 = vrot.slane %v3994_v11, 5  ;;  %v3992_v45 = vrot.slane %v3991_v36, 4  ;;  %v4028_v5 = vrot.slane %v4026_v22, 5  ;;  %v11910_v31 = vcombine.low %v3939_v0, %v3949_v14  ;;  %v11880_v14 = vld [vmem:[%s14696_s17 + $0x90] sm:$0xf] }
 0x1eb   : > { %v4015_v16 = vor.u32 %v4014_v50, %v16256_v48  ;;  %v16272_v26 = vrot.slane %v4032_v32, 5  ;;  %v4038_v11 = vrot.slane %v4036_v60, 4  ;;  %v4049_v0 = vrot.slane %v4047_v25, 4  ;;  %v16289_v50 = vld [vmem:[%s14696_s17 + $0x94] sm:$0xf] }
 0x1ec   : > { %v3987_v36 = vsel %vm14731_vm2, %v3982_v63, %v16233_v59  ;;  %v16286_v46 = vrot.slane %v4056_v1, 5  ;;  %v4042_v32 = vshll.u32 %v16270_v44, 16  ;;  %v4074_v63 = vshll.u32 %v11880_v14, 16 }
 0x1ed   : > { %v4016_v59 = vrot.slane %v4015_v16, 4  ;;  %v4039_v60 = vor.u32 %v4038_v11, %v16272_v26  ;;  %v4084_v25 = vshrl.u32 %v16289_v50, 16 }
 0x1ef   : > { %13155 = vmatmul.mubr.msk.bf16.vlgmr.msra.gmra.mrb[0].mxu0 %vm748_vm3, %v11907_v10  ;;  %v4050_v10 = vshll.u32 %v11877_v35, 16  ;;  %v3963_v35 = vsel %vm14731_vm2, %v3958_v4, %v16226_v20  ;;  %v14188_v20 = vld [vmem:[%s19211_s1 + $0x118] sm:$0xff]   ;;  %v4029_v4 = vor.u32 %v4028_v5, %v4025_v49  ;;  %v4044_v49 = vrot.slane %v4042_v32, 5 }
 0x1f0   : > { %13187 = vmatpush3.bf16.msra.mxu0 %v15983_v24  ;;  %13158 = vmatprep.mubr.msk.bf16.mxu0 %vm748_vm3, %v11908_v41  ;;  %v4060_v24 = vshrl.u32 %v16030_v51, 16  ;;  %v4005_v41 = vor.u32 %v4004_v53, %v4001_v23  ;;  %v3973_v51 = vsel %vm14731_vm2, %v3968_v47, %v16242_v2  ;;  %v16280_v23 = vrot.slane %v4018_v33, 5  ;;  %v16309_v5 = vld [vmem:[%s14696_s17 + $0x98] sm:$0x1] }
 0x1f1   : > { %13188 = vmatprep.subr.bf16.mxu0 %v14186_v39  ;;  %v4052_v53 = vrot.slane %v4050_v10, 5  ;;  %v3997_v2 = vsel %vm14731_vm2, %v3992_v45, %v3996_v55  ;;  %v4071_v47 = vshrl.u32 %v11880_v14, 16  ;;  %v4080_v33 = vshll.u32 %v16289_v50, 16 }
 0x1f2   : > { %v4062_v22 = vrot.slane %v4060_v24, 4  ;;  %v11911_v55 = vcombine.low %v3963_v35, %v3973_v51  ;;  %v11883_v24 = vld [vmem:[%s14696_s17 + $0x9c] sm:$0xf]  ;;  %v11912_v45 = vcombine.low %v3987_v36, %v3997_v2  ;;  %v4040_v16 = vrot.slane %v4039_v60, 4 }
 0x1f3   : > { %v4053_v10 = vor.u32 %v4052_v53, %v4049_v0  ;;  %v4073_v11 = vrot.slane %v4071_v47, 4  ;;  %v4076_v35 = vrot.slane %v4074_v63, 5  ;;  %v16315_v51 = vrot.slane %v4080_v33, 5  ;;  %v16318_v53 = vld [vmem:[%s14696_s17 + $0xac] sm:$0xf] }
 0x1f4   : > { %13189 = vmatpush3.bf16.msra.mxu0 %v14186_v39  ;;  %v4006_v39 = vrot.slane %v4005_v41, 4  ;;  %v4063_v1 = vor.u32 %v4062_v22, %v16286_v46  ;;  %v4086_v0 = vrot.slane %v4084_v25, 4  ;;  %v4095_v14 = vshrl.u32 %v11883_v24, 16 }
 0x1f5   : > { %13190 = vmatprep.subr.bf16.mxu0 %v14187_v15  ;;  %v4098_v36 = vshll.u32 %v11883_v24, 16  ;;  %v4128_v47 = vshll.u32 %v16318_v53, 16  ;;  %v4132_v63 = vshrl.u32 %v16318_v53, 16  ;;  %v4077_v33 = vor.u32 %v4076_v35, %v4073_v11  ;;  %v16341_v11 = vld [vmem:[%s14696_s17 + $0xb0] sm:$0x1] }
 0x1f6   : > { %v4011_v41 = vsel %vm14731_vm2, %v4006_v39, %v16256_v48  ;;  %v4054_v48 = vrot.slane %v4053_v10, 4  ;;  %v4064_v22 = vrot.slane %v4063_v1, 4  ;;  %v4090_v39 = vshll.u32 %v16309_v5, 16 }
 0x1f7   : > { %13159 = vmatmul.mubr.msk.bf16.gmra.mrb[4].mxu0 %vm748_vm3, %v11909_v17  ;;  %v4066_v17 = vshll.u32 %v16033_v30, 16  ;;  %v11886_v30 = vld [vmem:[%s14696_s17 + $0xa8] sm:$0xf]  ;;  %v4097_v25 = vrot.slane %v4095_v14, 4  ;;  %v4130_v35 = vrot.slane %v4128_v47, 5  ;;  %v4078_v14 = vrot.slane %v4077_v33, 4 }
 0x1f8   : > { %13162 = vmatprep.mubr.msk.bf16.mxu0 %vm748_vm3, %v11910_v31  ;;  %13191 = vmatpush3.bf16.msra.mxu0 %v14187_v15  ;;  %v4030_v15 = vrot.slane %v4029_v4, 4  ;;  %v4021_v31 = vsel %vm14731_vm2, %v4016_v59, %v16280_v23  ;;  %v4104_v4 = vshll.u32 %v16072_v40, 16  ;;  %v4108_v23 = vshrl.u32 %v16072_v40, 16 }
 0x1f9   : > { %13192 = vmatprep.subr.bf16.mxu0 %v14188_v20  ;;  %v4068_v2 = vrot.slane %v4066_v17, 5  ;;  %v4119_v32 = vshrl.u32 %v11886_v30, 16  ;;  %v4122_v59 = vshll.u32 %v11886_v30, 16  ;;  %v4087_v40 = vor.u32 %v4086_v0, %v16315_v51  ;;  %v11889_v0 = vld [vmem:[%s14696_s17 + $0xb4] sm:$0xf] }
 0x1fa   : > { %v4035_v60 = vsel %vm14731_vm2, %v4030_v15, %v16272_v26  ;;  %v4059_v26 = vsel %vm14731_vm2, %v4054_v48, %v16286_v46  ;;  %v4092_v1 = vrot.slane %v4090_v39, 5  ;;  %v16338_v17 = vrot.slane %v4104_v4, 5 }
 0x1fb   : > { %v4069_v10 = vsel %vm14731_vm2, %v4064_v22, %v4068_v2  ;;  %v4110_v24 = vrot.slane %v4108_v23, 4  ;;  %v4121_v15 = vrot.slane %v4119_v32, 4  ;;  %v4134_v30 = vrot.slane %v4132_v63, 4 }
 0x1fc   : > { %13193 = vmatpush3.bf16.msra.mxu0 %v14188_v20  ;;  %v4045_v20 = vsel %vm14731_vm2, %v4040_v16, %v4044_v49  ;;  %v4124_v49 = vrot.slane %v4122_v59, 5  ;;  %v4088_v46 = vrot.slane %v4087_v40, 4  ;;  %v4114_v48 = vshll.u32 %v16075_v58, 16 }
 0x1fd   : > { %v11914_v16 = vcombine.low %v4035_v60, %v4045_v20  ;;  %v11915_v22 = vcombine.low %v4059_v26, %v4069_v10  ;;  %v4111_v2 = vor.u32 %v4110_v24, %v16338_v17  ;;  %v4138_v4 = vshll.u32 %v16341_v11, 16 }
 0x1fe   : > { %v4125_v39 = vor.u32 %v4124_v49, %v4121_v15  ;;  %v4143_v23 = vshrl.u32 %v11889_v0, 16  ;;  %v4135_v32 = vor.u32 %v4134_v30, %v4130_v35  ;;  %v4146_v59 = vshll.u32 %v11889_v0, 16 }
 0x1ff   : > { %13163 = vmatmul.mubr.msk.bf16.gmra.mrb[8].mxu0 %vm748_vm3, %v11911_v55  ;;  %v4100_v55 = vrot.slane %v4098_v36, 5  ;;  %v4152_v60 = vshll.u32 %v16117_v43, 16  ;;  %v4156_v20 = vshrl.u32 %v16117_v43, 16  ;;  %v4083_v58 = vsel %vm14731_vm2, %v4078_v14, %v16315_v51 }
 0x200   : > { %13166 = vmatprep.mubr.msk.bf16.mxu0 %vm748_vm3, %v11912_v45  ;;  %v11913_v45 = vcombine.low %v4011_v41, %v4021_v31  ;;  %v11892_v41 = vld [vmem:[%s14696_s17 + $0xc0] sm:$0xf]  ;;  %v16349_v31 = vld [vmem:[%s14696_s17 + $0xc4] sm:$0xf]  ;;  %v4093_v47 = vsel %vm14731_vm2, %v4088_v46, %v4092_v1  ;;  %v4116_v33 = vrot.slane %v4114_v48, 5  ;;  %v4112_v10 = vrot.slane %v4111_v2, 4 }
 0x201   : > { %v4101_v36 = vor.u32 %v4100_v55, %v4097_v25  ;;  %v4167_v40 = vshrl.u32 %v11892_v41, 16  ;;  %v4170_v25 = vshll.u32 %v11892_v41, 16  ;;  %v4176_v55 = vshll.u32 %v16349_v31, 16 }
 0x202   : > { %v4180_v26 = vshrl.u32 %v16349_v31, 16  ;;  %v4126_v43 = vrot.slane %v4125_v39, 4  ;;  %v4140_v24 = vrot.slane %v4138_v4, 5  ;;  %v4145_v15 = vrot.slane %v4143_v23, 4  ;;  %v16370_v4 = vld [vmem:[%s14696_s17 + $0xc8] sm:$0x1] }
 0x203   : > { %v4102_v63 = vrot.slane %v4101_v36, 4  ;;  %v4136_v49 = vrot.slane %v4135_v32, 4  ;;  %v4154_v51 = vrot.slane %v4152_v60, 5  ;;  %v11916_v30 = vcombine.low %v4083_v58, %v4093_v47  ;;  %v11895_v36 = vld [vmem:[%s14696_s17 + $0xcc] sm:$0xf] }
 0x204   : > { %v4169_v1 = vrot.slane %v4167_v40, 4  ;;  %v4172_v0 = vrot.slane %v4170_v25, 5  ;;  %v4178_v14 = vrot.slane %v4176_v55, 5  ;;  %v4182_v46 = vrot.slane %v4180_v26, 4 }
 0x205   : > { %v4107_v48 = vsel %vm14731_vm2, %v4102_v63, %v16338_v17  ;;  %v4117_v2 = vsel %vm14731_vm2, %v4112_v10, %v4116_v33  ;;  %v4162_v39 = vshll.u32 %v16120_v7, 16  ;;  %v4131_v23 = vsel %vm14731_vm2, %v4126_v43, %v4130_v35 }
 0x206   : > { %v4141_v41 = vsel %vm14731_vm2, %v4136_v49, %v4140_v24  ;;  %v4191_v17 = vshrl.u32 %v11895_v36, 16  ;;  %v4194_v60 = vshll.u32 %v11895_v36, 16  ;;  %v4204_v7 = vshrl.u32 %v16168_v34, 16 }
 0x207   : > { %13167 = vmatmul.mubr.msk.bf16.gmra.mrb[12].mxu0 %vm748_vm3, %v11913_v45  ;;  %v4148_v45 = vrot.slane %v4146_v59, 5  ;;  %v4173_v58 = vor.u32 %v4172_v0, %v4169_v1  ;;  %v4183_v47 = vor.u32 %v4182_v46, %v4178_v14  ;;  %v11917_v63 = vcombine.low %v4107_v48, %v4117_v2  ;;  %v11942_v48 = vld [vmem:[%s14696_s17 + $0x18] sm:$0xe] }
 0x208   : > { %13170 = vmatprep.mubr.msk.bf16.mxu0 %vm748_vm3, %v11914_v16  ;;  %v4158_v16 = vrot.slane %v4156_v20, 4  ;;  %v4200_v20 = vshll.u32 %v16168_v34, 16  ;;  %v11918_v33 = vcombine.low %v4131_v23, %v4141_v41  ;;  %v4164_v25 = vrot.slane %v4162_v39, 5 }
 0x209   : > { %v4149_v32 = vor.u32 %v4148_v45, %v4145_v15  ;;  %v4193_v55 = vrot.slane %v4191_v17, 4  ;;  %v4196_v26 = vrot.slane %v4194_v60, 5  ;;  %v4206_v43 = vrot.slane %v4204_v7, 4  ;;  %v11943_v7 = vld [vmem:[%s14696_s17 + $0x24] sm:$0xe] }
 0x20a   : > { %v4159_v59 = vor.u32 %v4158_v16, %v4154_v51  ;;  %v4202_v10 = vrot.slane %v4200_v20, 5  ;;  %v4174_v24 = vrot.slane %v4173_v58, 4  ;;  %v4184_v15 = vrot.slane %v4183_v47, 4  ;;  %v11944_v58 = vld [vmem:[%s14696_s17 + $0x30] sm:$0xe] }
 0x20b   : > { %v4150_v35 = vrot.slane %v4149_v32, 4  ;;  %v4197_v16 = vor.u32 %v4196_v26, %v4193_v55  ;;  %v4210_v1 = vshll.u32 %v16171_v8, 16  ;;  %v4602_v36 = vrot.slane %v16012_v12, 5 }
 0x20c   : > { %v4160_v40 = vrot.slane %v4159_v59, 4  ;;  %v4179_v0 = vsel %vm14731_vm2, %v4174_v24, %v4178_v14  ;;  %v11958_v32 = vrot.slane %v11942_v48, 9  ;;  %v4605_v8 = vrot.slane %v16046_v21, 5  ;;  %v11946_v24 = vld [vmem:[%s14696_s17 + $0x48] sm:$0xe] }
 0x20d   : > { %v4155_v34 = vsel %vm14731_vm2, %v4150_v35, %v4154_v51  ;;  %v4198_v39 = vrot.slane %v4197_v16, 4  ;;  %v4212_v41 = vrot.slane %v4210_v1, 5  ;;  %v4604_v59 = vrot.slane %v4602_v36, 4 }
 0x20e   : > { %v4165_v45 = vsel %vm14731_vm2, %v4160_v40, %v4164_v25  ;;  %v4609_v17 = vrot.slane %v16042_v54, 5  ;;  %v4603_v60 = vsel %vm15047_vm6, %v11958_v32, %v4602_v36  ;;  %v4616_v21 = vrot.slane %v16069_v57, 5 }
 0x20f   : > { %13171 = vmatmul.mubr.msk.bf16.gmra.mrb[16].mxu0 %vm748_vm3, %v11915_v22  ;;  %v4186_v22 = vshll.u32 %v16370_v4, 16  ;;  %v11919_v51 = vcombine.low %v4155_v34, %v4165_v45  ;;  %v4203_v14 = vsel %vm14731_vm2, %v4198_v39, %v4202_v10  ;;  %v4606_v20 = vsel %vm15047_vm6, %v4604_v59, %v4605_v8  ;;  %v11950_v59 = vld [vmem:[%s14696_s17 + $0x78] sm:$0xe] }
 0x210   : > { %13174 = vmatprep.mubr.msk.bf16.mxu0 %vm748_vm3, %v11916_v30  ;;  %v4207_v30 = vor.u32 %v4206_v43, %v4202_v10  ;;  %v4612_v35 = vrot.slane %v16064_v61, 5  ;;  %v11960_v40 = vrot.slane %v11944_v58, 9  ;;  %v4618_v54 = vrot.slane %v4616_v21, 4  ;;  %v11945_v43 = vld [vmem:[%s14696_s17 + $0x3c] sm:$0xe] }
 0x211   : > { %v4188_v49 = vrot.slane %v4186_v22, 5  ;;  %v11982_v22 = vcombine.low %v4603_v60, %v4606_v20  ;;  %v4619_v25 = vrot.slane %v16103_v38, 5  ;;  %v4623_v26 = vrot.slane %v16088_v18, 5 }
 0x212   : > { %v4208_v23 = vrot.slane %v4207_v30, 4  ;;  %v4617_v10 = vsel %vm15047_vm6, %v11960_v40, %v4616_v21  ;;  %v4630_v38 = vrot.slane %v16134_v13, 5  ;;  %v11961_v34 = vrot.slane %v11945_v43, 9 }
 0x213   : > { %v4189_v46 = vsel %vm14731_vm2, %v4184_v15, %v4188_v49  ;;  %v4620_v61 = vsel %vm15047_vm6, %v4618_v54, %v4619_v25  ;;  %v4625_v45 = vrot.slane %v4623_v26, 4  ;;  %v4626_v16 = vrot.slane %v16128_v27, 5 }
 0x214   : > { %v11920_v2 = vcombine.low %v4179_v0, %v4189_v46  ;;  %v4213_v12 = vsel %vm14731_vm2, %v4208_v23, %v4212_v41  ;;  %v11984_v49 = vcombine.low %v4617_v10, %v4620_v61  ;;  %v11962_v30 = vrot.slane %v11946_v24, 9  ;;  %v19389_v61 = vld [vmem:[#allocation7_spill] sm:$0xff] }
 0x215   : > { %v11921_v47 = vcombine.low %v4203_v14, %v4213_v12  ;;  %v4632_v1 = vrot.slane %v4630_v38, 4  ;;  %v4633_v18 = vrot.slane %v16183_v19, 5  ;;  %v4624_v0 = vsel %vm15047_vm6, %v11961_v34, %v4623_v26  ;;  %v11948_v19 = vld [vmem:[%s14696_s17 + $0x60] sm:$0xe] }
 0x216   : > { %v4627_v13 = vsel %vm15047_vm6, %v4625_v45, %v4626_v16  ;;  %v4631_v46 = vsel %vm15047_vm6, %v11962_v30, %v4630_v38  ;;  %v4644_v36 = vrot.slane %v16195_v56, 5  ;;  %v4647_v23 = vrot.slane %v16231_v37, 5  ;;  %v19396_v45 = vld [vmem:[#allocation12_spill] sm:$0xff] }
 0x217   : > { %13175 = vmatmul.mubr.msk.bf16.gmra.mrb[20].mxu0 %vm748_vm3, %v11917_v63  ;;  %v11959_v63 = vrot.slane %v11943_v7, 9  ;;  %v4634_v27 = vsel %vm15047_vm6, %v4632_v1, %v4633_v18  ;;  %v11985_v48 = vcombine.low %v4624_v0, %v4627_v13  ;;  %v4658_v56 = vrot.slane %v16245_v52, 5  ;;  %v11952_v7 = vld [vmem:[%s14696_s17 + $0x90] sm:$0xe] }
 0x218   : > { %13178 = vmatprep.mubr.msk.bf16.mxu0 %vm748_vm3, %v11918_v33  ;;  %v4611_v33 = vrot.slane %v4609_v17, 4  ;;  %v4646_v39 = vrot.slane %v4644_v36, 4  ;;  %v11966_v14 = vrot.slane %v11950_v59, 9  ;;  %v19385_v37 = vcombine.low %v15988_v9, %v15993_v42  ;;  %v14189_v1 = vld [vmem:[%s19213_s3 + $0x10] sm:$0xff]  }
 0x219   : > { %v4610_v57 = vsel %vm15047_vm6, %v11959_v63, %v4609_v17  ;;  %v4660_v12 = vrot.slane %v4658_v56, 4  ;;  %v4661_v17 = vrot.slane %v16270_v44, 5  ;;  %v4672_v20 = vrot.slane %v16289_v50, 5  ;;  %v11954_v63 = vld [vmem:[%s14696_s17 + $0xa8] sm:$0xe]  ;;  %13226 = vmatprep.subr.bf16.mxu1 %v14189_v1 }
 0x21a   : > { %v4613_v55 = vsel %vm15047_vm6, %v4611_v33, %v4612_v35  ;;  %v4648_v32 = vsel %vm15047_vm6, %v4646_v39, %v4647_v23  ;;  %v4659_v60 = vsel %vm15047_vm6, %v11966_v14, %v4658_v56  ;;  %v11968_v58 = vrot.slane %v11952_v7, 9  ;;  %13227 = vmatpush3.bf16.msra.mxu1 %v14189_v1  ;;  %v14190_v56 = vld [vmem:[%s19213_s3 + $0x18] sm:$0xff]  }
 0x21b   : > { %v11983_v15 = vcombine.low %v4610_v57, %v4613_v55  ;;  %v4662_v52 = vsel %vm15047_vm6, %v4660_v12, %v4661_v17  ;;  %v4674_v44 = vrot.slane %v4672_v20, 4  ;;  %v19386_v9 = vcombine.low %v16016_v28, %v16022_v62  ;;  %v19387_v28 = vld [vmem:[#allocation6_spill] sm:$0xff]  ;;  %v11956_v57 = vld [vmem:[%s14696_s17 + $0xc0] sm:$0xe]  ;;  %13228 = vmatprep.subr.bf16.mxu1 %v14190_v56 }
 0x21c   : > { %v11990_v21 = vcombine.low %v4659_v60, %v4662_v52  ;;  %v4673_v42 = vsel %vm15047_vm6, %v11968_v58, %v4672_v20  ;;  %v11970_v35 = vrot.slane %v11954_v63, 9  ;;  %v4689_v40 = vrot.slane %v16341_v11, 5  ;;  %v16571_v60 = vld [vmem:[%s19212_s2] ss:$0 sm:$0xff] }
 0x21d   : > { %v19388_v62 = vcombine.low %v16050_v6, %v19387_v28  ;;  %v11972_v26 = vrot.slane %v11956_v57, 9  ;;  %v4703_v11 = vrot.slane %v16370_v4, 5  ;;  %v19390_v6 = vld [vmem:[#allocation8_spill] sm:$0xff]  ;;  %v19395_v4 = vld [vmem:[#allocation11_spill] sm:$0xff]  ;;  %v14597_v30 = vmov 0  }
 0x21e   : > { %v19391_v43 = vcombine.low %v19389_v61, %v19390_v6  ;;  %v19397_v16 = vcombine.low %v19395_v4, %v19396_v45  ;;  %5273 = vst.msk [vmem:[#allocation2 + $0x18] sm:$0xf] %vm5265_vm7, %v14597_v30  ;;  %5266 = vst.msk [vmem:[#allocation2] sm:$0xf] %vm5265_vm7, %v14597_v30  ;;  %13229 = vmatpush3.bf16.msra.mxu1 %v14190_v56 }
 0x21f   : > { %13179 = vmatmul.mubr.msk.bf16.gmra.mrb[24].mxu0 %vm748_vm3, %v11919_v51  ;;  %v11986_v51 = vcombine.low %v4631_v46, %v4634_v27  ;;  %5267 = vst.msk [vmem:[#allocation2 + $0x4] sm:$0xf] %vm5265_vm7, %v14597_v30  ;;  %5270 = vst.msk [vmem:[#allocation2 + $0xc] sm:$0xf] %vm5265_vm7, %v14597_v30 }
 0x220   : > { %13182 = vmatprep.mubr.msk.bf16.mxu0 %vm748_vm3, %v11920_v2  ;;  %v11964_v2 = vrot.slane %v11948_v19, 9  ;;  %5271 = vst.msk [vmem:[#allocation2 + $0x10] sm:$0xf] %vm5265_vm7, %v14597_v30  ;;  %5274 = vst.msk [vmem:[#allocation2 + $0x1c] sm:$0xf] %vm5265_vm7, %v14597_v30 }
 0x221   : > { %5276 = vst.msk [vmem:[#allocation2 + $0x24] sm:$0xf] %vm5265_vm7, %v14597_v30  ;;  %5277 = vst.msk [vmem:[#allocation2 + $0x28] sm:$0xf] %vm5265_vm7, %v14597_v30 }
 0x222   : > { %v4645_v41 = vsel %vm15047_vm6, %v11964_v2, %v4644_v36  ;;  %5279 = vst.msk [vmem:[#allocation2 + $0x30] sm:$0xf] %vm5265_vm7, %v14597_v30  ;;  %5280 = vst.msk [vmem:[#allocation2 + $0x34] sm:$0xf] %vm5265_vm7, %v14597_v30 }
 0x223   : > { %v11988_v8 = vcombine.low %v4645_v41, %v4648_v32  ;;  %5282 = vst.msk [vmem:[#allocation2 + $0x3c] sm:$0xf] %vm5265_vm7, %v14597_v30  ;;  %5283 = vst.msk [vmem:[#allocation2 + $0x40] sm:$0xf] %vm5265_vm7, %v14597_v30 }
 0x224   : > { %5285 = vst.msk [vmem:[#allocation2 + $0x48] sm:$0xf] %vm5265_vm7, %v14597_v30  ;;  %5286 = vst.msk [vmem:[#allocation2 + $0x4c] sm:$0xf] %vm5265_vm7, %v14597_v30 }
 0x225   : > { %5288 = vst.msk [vmem:[#allocation2 + $0x54] sm:$0xf] %vm5265_vm7, %v14597_v30  ;;  %5289 = vst.msk [vmem:[#allocation2 + $0x58] sm:$0xf] %vm5265_vm7, %v14597_v30  ;;  %v5858_v18 = vld [vmem:[#allocation2] sm:$0xf] }
 0x226   : > { %5291 = vst.msk [vmem:[#allocation2 + $0x60] sm:$0xf] %vm5265_vm7, %v14597_v30  ;;  %5292 = vst.msk [vmem:[#allocation2 + $0x64] sm:$0xf] %vm5265_vm7, %v14597_v30  ;;  %v5859_v0 = vld [vmem:[#allocation2 + $0x4] sm:$0xf] }
 0x227   : > { %13183 = vmatmul.mubr.msk.bf16.gmra.mrb[28].mxu0 %vm748_vm3, %v11921_v47  ;;  %v4675_v47 = vrot.slane %v16309_v5, 5  ;;  %5294 = vst.msk [vmem:[#allocation2 + $0x6c] sm:$0xf] %vm5265_vm7, %v14597_v30  ;;  %5295 = vst.msk [vmem:[#allocation2 + $0x70] sm:$0xf] %vm5265_vm7, %v14597_v30  ;;  %v5911_v13 = vshrl.u32 %v5858_v18, 16 }
 0x228   : > { %13194 = vmatprep.mubr.msk.bf16.mxu0 %vm748_vm3, %v11982_v22  ;;  %v4686_v22 = vrot.slane %v16318_v53, 5  ;;  %v4700_v53 = vrot.slane %v16349_v31, 5  ;;  %5297 = vst.msk [vmem:[#allocation2 + $0x78] sm:$0xf] %vm5265_vm7, %v14597_v30  ;;  %5298 = vst.msk [vmem:[#allocation2 + $0x7c] sm:$0xf] %vm5265_vm7, %v14597_v30 }
 0x229   : > { %v4676_v50 = vsel %vm15047_vm6, %v4674_v44, %v4675_v47  ;;  %5300 = vst.msk [vmem:[#allocation2 + $0x84] sm:$0xf] %vm5265_vm7, %v14597_v30  ;;  %5301 = vst.msk [vmem:[#allocation2 + $0x88] sm:$0xf] %vm5265_vm7, %v14597_v30  ;;  %v5914_v46 = vshll.u32 %v5858_v18, 16  ;;  %v5920_v27 = vshll.u32 %v5859_v0, 16 }
 0x22a   : > { %v11992_v33 = vcombine.low %v4673_v42, %v4676_v50  ;;  %v4688_v5 = vrot.slane %v4686_v22, 4  ;;  %v4687_v54 = vsel %vm15047_vm6, %v11970_v35, %v4686_v22  ;;  %v4702_v10 = vrot.slane %v4700_v53, 4  ;;  %5303 = vst.msk [vmem:[#allocation2 + $0x90] sm:$0xf] %vm5265_vm7, %v14597_v30  ;;  %5304 = vst.msk [vmem:[#allocation2 + $0x94] sm:$0xf] %vm5265_vm7, %v14597_v30 }
 0x22b   : > { %v4701_v38 = vsel %vm15047_vm6, %v11972_v26, %v4700_v53  ;;  %5306 = vst.msk [vmem:[#allocation2 + $0x9c] sm:$0xf] %vm5265_vm7, %v14597_v30  ;;  %5307 = vst.msk [vmem:[#allocation2 + $0xa0] sm:$0xf] %vm5265_vm7, %v14597_v30  ;;  %v5924_v36 = vshrl.u32 %v5859_v0, 16  ;;  %v5913_v19 = vrot.slane %v5911_v13, 4 }
 0x22c   : > { %v4690_v25 = vsel %vm15047_vm6, %v4688_v5, %v4689_v40  ;;  %v4704_v24 = vsel %vm15047_vm6, %v4702_v10, %v4703_v11  ;;  %5309 = vst.msk [vmem:[#allocation2 + $0xa8] sm:$0xf] %vm5265_vm7, %v14597_v30  ;;  %5310 = vst.msk [vmem:[#allocation2 + $0xac] sm:$0xf] %vm5265_vm7, %v14597_v30 }
 0x22d   : > { %v11994_v55 = vcombine.low %v4687_v54, %v4690_v25  ;;  %v11996_v31 = vcombine.low %v4701_v38, %v4704_v24  ;;  %5312 = vst.msk [vmem:[#allocation2 + $0xb4] sm:$0xf] %vm5265_vm7, %v14597_v30  ;;  %5313 = vst.msk [vmem:[#allocation2 + $0xb8] sm:$0xf] %vm5265_vm7, %v14597_v30  ;;  %v5926_v2 = vrot.slane %v5924_v36, 4 }
 0x22e   : > { %5315 = vst.msk [vmem:[#allocation2 + $0xc0] sm:$0xf] %vm5265_vm7, %v14597_v30  ;;  %5316 = vst.msk [vmem:[#allocation2 + $0xc4] sm:$0xf] %vm5265_vm7, %v14597_v30 }
 0x22f   : > { %13195 = vmatmul.mubr.msk.bf16.vlgmr.msra.gmra.mrb[0].mxu0 %vm748_vm3, %v11983_v15  ;;  %v19392_v15 = vld [vmem:[#allocation9_spill] sm:$0xff]  ;;  %5318 = vst.msk [vmem:[#allocation2 + $0xcc] sm:$0xf] %vm5265_vm7, %v14597_v30  ;;  %5319 = vst.msk [vmem:[#allocation2 + $0xd0] sm:$0xf] %vm5265_vm7, %v14597_v30 }
 0x230   : > { %13198 = vmatprep.mubr.msk.bf16.mxu0 %vm748_vm3, %v11984_v49  ;;  %v19393_v49 = vld [vmem:[#allocation10_spill] sm:$0xff]  ;;  %5275 = vst.msk [vmem:[#allocation2 + $0x20] sm:$0x1] %vm5268_vm8, %v14597_v30  ;;  %5269 = vst.msk [vmem:[#allocation2 + $0x8] sm:$0x1] %vm5268_vm8, %v14597_v30 }
 0x231   : > { %v19394_v34 = vcombine.low %v19392_v15, %v19393_v49  ;;  %5272 = vst.msk [vmem:[#allocation2 + $0x14] sm:$0x1] %vm5268_vm8, %v14597_v30  ;;  %5278 = vst.msk [vmem:[#allocation2 + $0x2c] sm:$0x1] %vm5268_vm8, %v14597_v30 }
 0x232   : > { %5281 = vst.msk [vmem:[#allocation2 + $0x38] sm:$0x1] %vm5268_vm8, %v14597_v30  ;;  %5284 = vst.msk [vmem:[#allocation2 + $0x44] sm:$0x1] %vm5268_vm8, %v14597_v30 }
 0x233   : > { %5287 = vst.msk [vmem:[#allocation2 + $0x50] sm:$0x1] %vm5268_vm8, %v14597_v30  ;;  %5290 = vst.msk [vmem:[#allocation2 + $0x5c] sm:$0x1] %vm5268_vm8, %v14597_v30 }
 0x234   : > { %5293 = vst.msk [vmem:[#allocation2 + $0x68] sm:$0x1] %vm5268_vm8, %v14597_v30  ;;  %5296 = vst.msk [vmem:[#allocation2 + $0x74] sm:$0x1] %vm5268_vm8, %v14597_v30 }
 0x235   : > { %5299 = vst.msk [vmem:[#allocation2 + $0x80] sm:$0x1] %vm5268_vm8, %v14597_v30  ;;  %5302 = vst.msk [vmem:[#allocation2 + $0x8c] sm:$0x1] %vm5268_vm8, %v14597_v30 }
 0x236   : > { %5305 = vst.msk [vmem:[#allocation2 + $0x98] sm:$0x1] %vm5268_vm8, %v14597_v30  ;;  %5308 = vst.msk [vmem:[#allocation2 + $0xa4] sm:$0x1] %vm5268_vm8, %v14597_v30 }
 0x237   : > { %13199 = vmatmul.mubr.msk.bf16.gmra.mrb[4].mxu0 %vm748_vm3, %v11985_v48  ;;  %5311 = vst.msk [vmem:[#allocation2 + $0xb0] sm:$0x1] %vm5268_vm8, %v14597_v30  ;;  %5314 = vst.msk [vmem:[#allocation2 + $0xbc] sm:$0x1] %vm5268_vm8, %v14597_v30  ;;  %v5916_v48 = vrot.slane %v5914_v46, 5 }
 0x238   : > { %13202 = vmatprep.mubr.msk.bf16.mxu0 %vm748_vm3, %v11986_v51  ;;  %5317 = vst.msk [vmem:[#allocation2 + $0xc8] sm:$0x1] %vm5268_vm8, %v14597_v30  ;;  %5320 = vst.msk [vmem:[#allocation2 + $0xd4] sm:$0x1] %vm5268_vm8, %v14597_v30  ;;  %v5922_v51 = vrot.slane %v5920_v27, 5 }
 0x239   : > { %v5894_v39 = vld [vmem:[#allocation2 + $0x8] sm:$0x1]  ;;  %v5917_v23 = vor.u32 %v5916_v48, %v5913_v19 }
 0x23a   : > { %v5927_v41 = vor.u32 %v5926_v2, %v5922_v51  ;;  %v5930_v32 = vshll.u32 %v5894_v39, 16 }
 0x23b   : > { %v5918_v59 = vrot.slane %v5917_v23, 4 }
 0x23c   : > { %v5932_v14 = vrot.slane %v5930_v32, 5 }
 0x23d   : > { %v5923_v12 = vsel %vm14731_vm2, %v5918_v59, %v5922_v51  ;;  %v14191_v59 = vld [vmem:[%s19213_s3] sm:$0xff]  }
 0x23e   : > { %13262 = vmatprep.subr.bf16.mxu1 %v14191_v59 }
 0x23f   : > { %13203 = vmatmul.mubr.msk.bf16.gmra.mrb[8].mxu0 %vm748_vm3, %v19385_v37 }
 0x240   : > { %13206 = vmatprep.mubr.msk.bf16.mxu0 %vm748_vm3, %v11988_v8  ;;  %v5928_v8 = vrot.slane %v5927_v41, 4 }
 0x242   : > { %v5933_v17 = vsel %vm14731_vm2, %v5928_v8, %v5932_v14 }
 0x243   : > { %v12055_v37 = vcombine.low %v5923_v12, %v5933_v17 }
 0x245   : > { %13230 = vmatprep.mubr.msk.bf16.mxu1 %vm6359_vm9, %v12055_v37 }
 0x247   : > { %13207 = vmatmul.mubr.msk.bf16.gmra.mrb[12].mxu0 %vm748_vm3, %v19386_v9 }
 0x248   : > { %13210 = vmatprep.mubr.msk.bf16.mxu0 %vm748_vm3, %v11990_v21 }
 0x24f   : > { %13211 = vmatmul.mubr.msk.bf16.gmra.mrb[16].mxu0 %vm748_vm3, %v19388_v62 }
 0x250   : > { %13214 = vmatprep.mubr.msk.bf16.mxu0 %vm748_vm3, %v11992_v33 }
 0x257   : > { %13215 = vmatmul.mubr.msk.bf16.gmra.mrb[20].mxu0 %vm748_vm3, %v19391_v43 }
 0x258   : > { %13218 = vmatprep.mubr.msk.bf16.mxu0 %vm748_vm3, %v11994_v55 }
 0x25f   : > { %13219 = vmatmul.mubr.msk.bf16.gmra.mrb[24].mxu0 %vm748_vm3, %v19394_v34 }
 0x260   : > { %13222 = vmatprep.mubr.msk.bf16.mxu0 %vm748_vm3, %v11996_v31 }
 0x267   : > { %13223 = vmatmul.mubr.msk.bf16.gmra.mrb[28].mxu0 %vm748_vm3, %v19397_v16 }
 0x302   : > { %v13196_v52 = vpop.f32.mrb[0].mxu0 }
 0x303   : > { %v16574_v20 = vadd.f32 %v13196_v52, %v16571_v60  ;;  %v4875_v7 = vpop.f32.mrb[1].mxu0 }
 0x304   : > { %v16577_v21 = vadd.f32 %v16571_v60, %v4875_v7  ;;  %v13197_v58 = vpop.f32.mrb[2].mxu0 }
 0x305   : > { %v5075_v44 = vsub.f32 0.0, %v16574_v20  ;;  %v16581_v47 = vadd.f32 %v13197_v58, %v16571_v60  ;;  %v4878_v9 = vpop.f32.mrb[3].mxu0 }
 0x306   : > { %v5073_v42 = vsub.f32 0.0, %v16577_v21  ;;  %v16585_v50 = vadd.f32 %v16571_v60, %v4878_v9 }
 0x307   : > { %v5109_v22 = vmul.f32 1.442695, %v5075_v44  ;;  %v5076_v63 = vsub.f32 0.0, %v16581_v47 }
 0x308   : > { %v5105_v33 = vmul.f32 1.442695, %v5073_v42  ;;  %v5074_v35 = vsub.f32 0.0, %v16585_v50 }
 0x309   : > { %14255 = vpow2.f32 %v5109_v22  ;;  %v5111_v5 = vmul.f32 1.442695, %v5076_v63 }
 0x30a   : > { %14257 = vpow2.f32 %v5105_v33  ;;  %v5107_v40 = vmul.f32 1.442695, %v5074_v35  ;;  %v13200_v28 = vpop.f32.mrb[4].mxu0 }
 0x30b   : > { %14259 = vpow2.f32 %v5111_v5  ;;  %v16590_v62 = vadd.f32 %v13200_v28, %v16571_v60  ;;  %v4891_v54 = vpop.f32.mrb[5].mxu0 }
 0x30c   : > { %14261 = vpow2.f32 %v5107_v40  ;;  %v16593_v25 = vadd.f32 %v16571_v60, %v4891_v54  ;;  %v13201_v53 = vpop.f32.mrb[6].mxu0 }
 0x30d   : > { %v5079_v57 = vsub.f32 0.0, %v16590_v62  ;;  %v16597_v55 = vadd.f32 %v13201_v53, %v16571_v60  ;;  %v4894_v26 = vpop.f32.mrb[7].mxu0 }
 0x30e   : > { %v5077_v10 = vsub.f32 0.0, %v16593_v25  ;;  %v16601_v11 = vadd.f32 %v16571_v60, %v4894_v26 }
 0x30f   : > { %v5117_v61 = vmul.f32 1.442695, %v5079_v57  ;;  %v5080_v6 = vsub.f32 0.0, %v16597_v55 }
 0x310   : > { %v5113_v43 = vmul.f32 1.442695, %v5077_v10  ;;  %v5078_v38 = vsub.f32 0.0, %v16601_v11 }
 0x311   : > { %14263 = vpow2.f32 %v5117_v61  ;;  %v5119_v24 = vmul.f32 1.442695, %v5080_v6 }
 0x312   : > { %14265 = vpow2.f32 %v5113_v43  ;;  %v5115_v31 = vmul.f32 1.442695, %v5078_v38  ;;  %v13204_v15 = vpop.f32.mrb[8].mxu0 }
 0x313   : > { %v14256_v49 = vpop.eup %14255  ;;  %14267 = vpow2.f32 %v5119_v24  ;;  %v16606_v34 = vadd.f32 %v13204_v15, %v16571_v60  ;;  %v4907_v4 = vpop.f32.mrb[9].mxu0 }
 0x314   : > { %v14258_v45 = vpop.eup %14257  ;;  %v5171_v16 = vadd.f32 1.0, %v14256_v49  ;;  %14269 = vpow2.f32 %v5115_v31  ;;  %v16609_v30 = vadd.f32 %v16571_v60, %v4907_v4  ;;  %v13205_v1 = vpop.f32.mrb[10].mxu0 }
 0x315   : > { %v14260_v18 = vpop.eup %14259  ;;  %v5169_v0 = vadd.f32 1.0, %v14258_v45  ;;  %v5083_v13 = vsub.f32 0.0, %v16606_v34  ;;  %v16613_v46 = vadd.f32 %v13205_v1, %v16571_v60  ;;  %v4910_v27 = vpop.f32.mrb[11].mxu0 }
 0x316   : > { %v14262_v36 = vpop.eup %14261  ;;  %14271 = vrcp.f32 %v5171_v16  ;;  %v5172_v19 = vadd.f32 1.0, %v14260_v18  ;;  %v5081_v48 = vsub.f32 0.0, %v16609_v30  ;;  %v16617_v51 = vadd.f32 %v16571_v60, %v4910_v27 }
 0x317   : > { %14273 = vrcp.f32 %v5169_v0  ;;  %v5170_v2 = vadd.f32 1.0, %v14262_v36  ;;  %v5125_v39 = vmul.f32 1.442695, %v5083_v13  ;;  %v5084_v23 = vsub.f32 0.0, %v16613_v46 }
 0x318   : > { %14275 = vrcp.f32 %v5172_v19  ;;  %v5121_v41 = vmul.f32 1.442695, %v5081_v48  ;;  %v5082_v32 = vsub.f32 0.0, %v16617_v51 }
 0x319   : > { %14277 = vrcp.f32 %v5170_v2  ;;  %v5127_v56 = vmul.f32 1.442695, %v5084_v23 }
 0x31a   : > { %14279 = vpow2.f32 %v5125_v39  ;;  %v5123_v8 = vmul.f32 1.442695, %v5082_v32  ;;  %v13208_v14 = vpop.f32.mrb[12].mxu0 }
 0x31b   : > { %v14264_v12 = vpop.eup %14263  ;;  %14281 = vpow2.f32 %v5121_v41  ;;  %v16625_v17 = vadd.f32 %v13208_v14, %v16571_v60  ;;  %v4923_v37 = vpop.f32.mrb[13].mxu0 }
 0x31c   : > { %v14266_v52 = vpop.eup %14265  ;;  %v5175_v7 = vadd.f32 1.0, %v14264_v12  ;;  %14283 = vpow2.f32 %v5127_v56  ;;  %v16628_v58 = vadd.f32 %v16571_v60, %v4923_v37  ;;  %v13209_v44 = vpop.f32.mrb[14].mxu0 }
 0x31d   : > { %v14268_v9 = vpop.eup %14267  ;;  %v5173_v42 = vadd.f32 1.0, %v14266_v52  ;;  %14285 = vpow2.f32 %v5123_v8  ;;  %v5087_v22 = vsub.f32 0.0, %v16625_v17  ;;  %v16632_v63 = vadd.f32 %v13209_v44, %v16571_v60  ;;  %v4926_v33 = vpop.f32.mrb[15].mxu0  ;;  %v5753_v52 = vld [vmem:[#allocation2 + $0x18] sm:$0xf] }
 0x31e   : > { %v14270_v35 = vpop.eup %14269  ;;  %14287 = vrcp.f32 %v5175_v7  ;;  %v5176_v5 = vadd.f32 1.0, %v14268_v9  ;;  %v5085_v40 = vsub.f32 0.0, %v16628_v58  ;;  %v16636_v28 = vadd.f32 %v16571_v60, %v4926_v33 }
 0x31f   : > { %14289 = vrcp.f32 %v5173_v42  ;;  %v5174_v54 = vadd.f32 1.0, %v14270_v35  ;;  %v5133_v53 = vmul.f32 1.442695, %v5087_v22  ;;  %v5088_v57 = vsub.f32 0.0, %v16632_v63  ;;  %v5744_v35 = vld [vmem:[#allocation2 + $0xc] sm:$0xf] }
 0x320   : > { %v14272_v26 = vpop.eup %14271  ;;  %14291 = vrcp.f32 %v5176_v5  ;;  %v5129_v10 = vmul.f32 1.442695, %v5085_v40  ;;  %v5086_v61 = vsub.f32 0.0, %v16636_v28 }
 0x321   : > { %v14274_v6 = vpop.eup %14273  ;;  %v5235_v43 = vmul.f32 %v14272_v26, %v16574_v20  ;;  %14293 = vrcp.f32 %v5174_v54  ;;  %v5135_v38 = vmul.f32 1.442695, %v5088_v57 }
 0x322   : > { %v14276_v24 = vpop.eup %14275  ;;  %v5233_v31 = vmul.f32 %v14274_v6, %v16577_v21  ;;  %14295 = vpow2.f32 %v5133_v53  ;;  %v13212_v15 = vpop.f32.mrb[16].mxu0  ;;  %v16643_v16 = vmul.f32 1.442695, %v5086_v61  ;;  %v5757_v61 = vld [vmem:[#allocation2 + $0x20] sm:$0x1] }
 0x323   : > { %v14278_v49 = vpop.eup %14277  ;;  %v12493_v4 = vpack.c.bf16 %v5235_v43, %v5235_v43  ;;  %v5236_v45 = vmul.f32 %v14276_v24, %v16581_v47  ;;  %14297 = vpow2.f32 %v5129_v10  ;;  %v16645_v1 = vpop.f32.mrb[17].mxu0  ;;  %v16649_v21 = vadd.f32 %v13212_v15, %v16571_v60 }
 0x324   : > { %v14280_v20 = vpop.eup %14279  ;;  %v12491_v18 = vpack.c.bf16 %v5233_v31, %v5233_v31  ;;  %v5234_v0 = vmul.f32 %v14278_v49, %v16585_v50  ;;  %14299 = vpow2.f32 %v5135_v38  ;;  %v16651_v13 = vpop.f32.mrb[18].mxu0  ;;  %v5750_v49 = vld [vmem:[#allocation2 + $0x14] sm:$0x1] }
 0x325   : > { %v14282_v27 = vpop.eup %14281  ;;  %v5438_v36 = vshrl.u32 %v12493_v4, 16  ;;  %v5441_v19 = vshll.u32 %v12493_v4, 16  ;;  %v12494_v48 = vpack.c.bf16 %v5236_v45, %v5236_v45  ;;  %v5179_v47 = vadd.f32 1.0, %v14280_v20  ;;  %v16653_v2 = vpop.f32.mrb[19].mxu0 }
 0x326   : > { %v16655_v39 = vpop.eup %14283  ;;  %v5421_v23 = vshrl.u32 %v12491_v18, 16  ;;  %v5424_v41 = vshll.u32 %v12491_v18, 16  ;;  %v12492_v32 = vpack.c.bf16 %v5234_v0, %v5234_v0  ;;  %v5177_v56 = vadd.f32 1.0, %v14282_v27 }
 0x327   : > { %v16657_v50 = vpop.eup %14285  ;;  %v5440_v59 = vrot.slane %v5438_v36, 7  ;;  %v5446_v8 = vshrl.u32 %v12494_v48, 16  ;;  %v5449_v14 = vshll.u32 %v12494_v48, 16  ;;  %14301 = vrcp.f32 %v5179_v47 }
 0x328   : > { %v14288_v12 = vpop.eup %14287  ;;  %v5423_v7 = vrot.slane %v5421_v23, 7  ;;  %v5429_v44 = vshrl.u32 %v12492_v32, 16  ;;  %v5432_v9 = vshll.u32 %v12492_v32, 16  ;;  %14303 = vrcp.f32 %v5177_v56 }
 0x329   : > { %v14290_v42 = vpop.eup %14289  ;;  %v5443_v22 = vor.u32 %v5441_v19, %v5440_v59  ;;  %v5444_v33 = vrot.slane %v5440_v59, 4  ;;  %v5448_v40 = vrot.slane %v5446_v8, 7  ;;  %v5239_v54 = vmul.f32 %v14288_v12, %v16590_v62 }
 0x32a   : > { %v14292_v53 = vpop.eup %14291  ;;  %v5426_v57 = vor.u32 %v5424_v41, %v5423_v7  ;;  %v5427_v26 = vrot.slane %v5423_v7, 4  ;;  %v5431_v6 = vrot.slane %v5429_v44, 7  ;;  %v5237_v43 = vmul.f32 %v14290_v42, %v16593_v25  ;;  %v16679_v38 = vpop.f32.mrb[20].mxu0 }
 0x32b   : > { %v14294_v24 = vpop.eup %14293  ;;  %v5754_v31 = vsel %vm16661_vm13, %v5443_v22, %v5753_v52  ;;  %v5451_v62 = vor.u32 %v5449_v14, %v5448_v40  ;;  %v5453_v15 = vrot.slane %v5448_v40, 4  ;;  %v12497_v4 = vpack.c.bf16 %v5239_v54, %v5239_v54  ;;  %v16683_v45 = vpop.f32.mrb[21].mxu0 }
 0x32c   : > { %v14296_v20 = vpop.eup %14295  ;;  %5755 = vst [vmem:[#allocation2 + $0x18] sm:$0xf] %v5754_v31  ;;  %v5745_v18 = vsel %vm16661_vm13, %v5426_v57, %v5744_v35  ;;  %v5434_v0 = vor.u32 %v5432_v9, %v5431_v6  ;;  %v5436_v27 = vrot.slane %v5431_v6, 4  ;;  %v12495_v25 = vpack.c.bf16 %v5237_v43, %v5237_v43  ;;  %v16687_v36 = vpop.f32.mrb[22].mxu0  ;;  %v5767_v9 = vld [vmem:[#allocation2 + $0x30] sm:$0xf] }
 0x32d   : > { %v14298_v19 = vpop.eup %14297  ;;  %5746 = vst [vmem:[#allocation2 + $0xc] sm:$0xf] %v5745_v18  ;;  %v5452_v48 = vsel %vm16667_vm14, %v5444_v33, %v5451_v62  ;;  %v5758_v47 = vsel %vm16674_vm15, %v5453_v15, %v5757_v61  ;;  %v5472_v23 = vshrl.u32 %v12497_v4, 16  ;;  %v16695_v41 = vadd.f32 %v16571_v60, %v16645_v1  ;;  %v16697_v32 = vpop.f32.mrb[23].mxu0  ;;  %v5760_v57 = vld [vmem:[#allocation2 + $0x24] sm:$0xf] }
 0x32e   : > { %v14300_v56 = vpop.eup %14299  ;;  %5756 = vst.msk [vmem:[#allocation2 + $0x1c] sm:$0xf] %vm5265_vm7, %v5452_v48  ;;  %5759 = vst [vmem:[#allocation2 + $0x20] sm:$0x1] %v5758_v47  ;;  %v5435_v59 = vsel %vm16667_vm14, %v5427_v26, %v5434_v0  ;;  %v5751_v8 = vsel %vm16674_vm15, %v5436_v27, %v5750_v49  ;;  %v5475_v14 = vshll.u32 %v12497_v4, 16  ;;  %v5455_v12 = vshrl.u32 %v12495_v25, 16 }
 0x32f   : > { %5747 = vst.msk [vmem:[#allocation2 + $0x10] sm:$0xf] %vm5265_vm7, %v5435_v59  ;;  %5752 = vst [vmem:[#allocation2 + $0x14] sm:$0x1] %v5751_v8  ;;  %v5474_v52 = vrot.slane %v5472_v23, 7  ;;  %v5240_v1 = vmul.f32 %v14292_v53, %v16597_v55  ;;  %v5238_v7 = vmul.f32 %v14294_v24, %v16601_v11  ;;  %v5180_v44 = vadd.f32 1.0, %v16655_v39 }
 0x330   : > { %v5457_v42 = vrot.slane %v5455_v12, 7  ;;  %v5458_v22 = vshll.u32 %v12495_v25, 16  ;;  %v5178_v33 = vadd.f32 1.0, %v16657_v50  ;;  %v5183_v35 = vadd.f32 1.0, %v14296_v20  ;;  %v5771_v48 = vld [vmem:[#allocation2 + $0x38] sm:$0x1] }
 0x331   : > { %v14302_v40 = vpop.eup %14301  ;;  %v5477_v54 = vor.u32 %v5475_v14, %v5474_v52  ;;  %v12498_v26 = vpack.c.bf16 %v5240_v1, %v5240_v1  ;;  %v12496_v61 = vpack.c.bf16 %v5238_v7, %v5238_v7  ;;  %v5181_v6 = vadd.f32 1.0, %v14298_v19  ;;  %v5764_v47 = vld [vmem:[#allocation2 + $0x2c] sm:$0x1] }
 0x332   : > { %v14304_v43 = vpop.eup %14303  ;;  %v5478_v31 = vrot.slane %v5474_v52, 4  ;;  %v5460_v62 = vor.u32 %v5458_v22, %v5457_v42  ;;  %v5243_v55 = vmul.f32 %v14302_v40, %v16606_v34  ;;  %14305 = vrcp.f32 %v5180_v44  ;;  %v16710_v11 = vpop.f32.mrb[24].mxu0 }
 0x333   : > { %v5768_v39 = vsel %vm16661_vm13, %v5477_v54, %v5767_v9  ;;  %v5461_v53 = vrot.slane %v5457_v42, 4  ;;  %v5480_v50 = vshrl.u32 %v12498_v26, 16  ;;  %v5463_v24 = vshrl.u32 %v12496_v61, 16  ;;  %v16714_v15 = vpop.f32.mrb[25].mxu0 }
 0x334   : > { %5769 = vst [vmem:[#allocation2 + $0x30] sm:$0xf] %v5768_v39  ;;  %v5761_v49 = vsel %vm16661_vm13, %v5460_v62, %v5760_v57  ;;  %v5483_v4 = vshll.u32 %v12498_v26, 16  ;;  %v12501_v20 = vpack.c.bf16 %v5243_v55, %v5243_v55  ;;  %v5241_v18 = vmul.f32 %v14304_v43, %v16609_v30  ;;  %v16719_v34 = vpop.f32.mrb[26].mxu0  ;;  %v5781_v30 = vld [vmem:[#allocation2 + $0x48] sm:$0xf] }
 0x335   : > { %5762 = vst [vmem:[#allocation2 + $0x24] sm:$0xf] %v5761_v49  ;;  %v5482_v0 = vrot.slane %v5480_v50, 7  ;;  %v5465_v27 = vrot.slane %v5463_v24, 7  ;;  %v5466_v25 = vshll.u32 %v12496_v61, 16  ;;  %14307 = vrcp.f32 %v5178_v33  ;;  %v16721_v19 = vpop.f32.mrb[27].mxu0 }
 0x336   : > { %v5506_v23 = vshrl.u32 %v12501_v20, 16  ;;  %v12499_v59 = vpack.c.bf16 %v5241_v18, %v5241_v18  ;;  %14309 = vrcp.f32 %v5183_v35  ;;  %v5184_v8 = vadd.f32 1.0, %v14300_v56  ;;  %v5774_v26 = vld [vmem:[#allocation2 + $0x3c] sm:$0xf] }
 0x337   : > { %v5485_v14 = vor.u32 %v5483_v4, %v5482_v0  ;;  %v5487_v12 = vrot.slane %v5482_v0, 4  ;;  %v5468_v52 = vor.u32 %v5466_v25, %v5465_v27  ;;  %v5470_v1 = vrot.slane %v5465_v27, 4 }
 0x338   : > { %v16723_v7 = vrot.slane %v5506_v23, 7  ;;  %v5509_v44 = vshll.u32 %v12501_v20, 16  ;;  %v5489_v9 = vshrl.u32 %v12499_v59, 16  ;;  %14311 = vrcp.f32 %v5181_v6 }
 0x339   : > { %v5486_v42 = vsel %vm16667_vm14, %v5478_v31, %v5485_v14  ;;  %v5772_v22 = vsel %vm16674_vm15, %v5487_v12, %v5771_v48  ;;  %v5469_v33 = vsel %vm16667_vm14, %v5461_v53, %v5468_v52  ;;  %v5765_v56 = vsel %vm16674_vm15, %v5470_v1, %v5764_v47 }
 0x33a   : > { %5770 = vst.msk [vmem:[#allocation2 + $0x34] sm:$0xf] %vm5265_vm7, %v5486_v42  ;;  %5773 = vst [vmem:[#allocation2 + $0x38] sm:$0x1] %v5772_v22  ;;  %v5511_v35 = vor.u32 %v5509_v44, %v16723_v7  ;;  %v16736_v40 = vrot.slane %v5489_v9, 7  ;;  %v5492_v54 = vshll.u32 %v12499_v59, 16  ;;  %14313 = vrcp.f32 %v5184_v8 }
 0x33b   : > { %5763 = vst.msk [vmem:[#allocation2 + $0x28] sm:$0xf] %vm5265_vm7, %v5469_v33  ;;  %5766 = vst [vmem:[#allocation2 + $0x2c] sm:$0x1] %v5765_v56  ;;  %v16738_v57 = vpop.f32.mrb[28].mxu0  ;;  %14315 = vpow2.f32 %v16643_v16  ;;  %v5091_v61 = vsub.f32 0.0, %v16649_v21  ;;  %v16745_v43 = vadd.f32 %v16651_v13, %v16571_v60  ;;  %v16755_v16 = vadd.f32 %v16571_v60, %v16653_v2 }
 0x33c   : > { %v5089_v6 = vsub.f32 0.0, %v16695_v41  ;;  %v16747_v31 = vpop.f32.mrb[29].mxu0  ;;  %v14306_v62 = vpop.eup %14305  ;;  %v5512_v55 = vrot.slane %v16723_v7, 4  ;;  %v5782_v39 = vsel %vm16661_vm13, %v5511_v35, %v5781_v30  ;;  %v5494_v53 = vor.u32 %v5492_v54, %v16736_v40  ;;  %v5785_v33 = vld [vmem:[#allocation2 + $0x50] sm:$0x1] }
 0x33d   : > { %v16757_v50 = vpop.f32.mrb[30].mxu0  ;;  %5783 = vst [vmem:[#allocation2 + $0x48] sm:$0xf] %v5782_v39  ;;  %v5244_v13 = vmul.f32 %v14306_v62, %v16613_v46  ;;  %v5141_v24 = vmul.f32 1.442695, %v5091_v61  ;;  %v5092_v4 = vsub.f32 0.0, %v16745_v43  ;;  %v16768_v2 = vadd.f32 %v16679_v38, %v16571_v60 }
 0x33e   : > { %v5137_v49 = vmul.f32 1.442695, %v5089_v6  ;;  %v16761_v20 = vpop.f32.mrb[31].mxu0  ;;  %v5775_v18 = vsel %vm16661_vm13, %v5494_v53, %v5774_v26  ;;  %v5090_v0 = vsub.f32 0.0, %v16755_v16  ;;  %v16772_v27 = vadd.f32 %v16571_v60, %v16683_v45  ;;  %v5778_v62 = vld [vmem:[#allocation2 + $0x44] sm:$0x1] }
 0x33f   : > { %v14308_v46 = vpop.eup %14307  ;;  %v5495_v25 = vrot.slane %v16736_v40, 4  ;;  %5776 = vst [vmem:[#allocation2 + $0x3c] sm:$0xf] %v5775_v18  ;;  %v12502_v48 = vpack.c.bf16 %v5244_v13, %v5244_v13  ;;  %14317 = vpow2.f32 %v5141_v24  ;;  %v5143_v47 = vmul.f32 1.442695, %v5092_v4 }
 0x340   : > { %v14310_v23 = vpop.eup %14309  ;;  %v5242_v59 = vmul.f32 %v14308_v46, %v16617_v51  ;;  %14319 = vpow2.f32 %v5137_v49  ;;  %v5139_v8 = vmul.f32 1.442695, %v5090_v0  ;;  %v5095_v14 = vsub.f32 0.0, %v16768_v2  ;;  %v5795_v0 = vld [vmem:[#allocation2 + $0x60] sm:$0xf] }
 0x341   : > { %v5514_v38 = vshrl.u32 %v12502_v48, 16  ;;  %v5247_v12 = vmul.f32 %v14310_v23, %v16625_v17  ;;  %14321 = vpow2.f32 %v5143_v47  ;;  %v16780_v45 = vadd.f32 %v16687_v36, %v16571_v60 }
 0x342   : > { %v14312_v52 = vpop.eup %14311  ;;  %v12500_v1 = vpack.c.bf16 %v5242_v59, %v5242_v59  ;;  %14323 = vpow2.f32 %v5139_v8  ;;  %v5149_v30 = vmul.f32 1.442695, %v5095_v14  ;;  %v5093_v7 = vsub.f32 0.0, %v16772_v27 }
 0x343   : > { %v5516_v44 = vrot.slane %v5514_v38, 7  ;;  %v5517_v51 = vshll.u32 %v12502_v48, 16  ;;  %v12505_v9 = vpack.c.bf16 %v5247_v12, %v5247_v12  ;;  %v5245_v42 = vmul.f32 %v14312_v52, %v16628_v58 }
 0x344   : > { %v14314_v22 = vpop.eup %14313  ;;  %v5497_v56 = vshrl.u32 %v12500_v1, 16  ;;  %v5500_v17 = vshll.u32 %v12500_v1, 16  ;;  %14325 = vpow2.f32 %v5149_v30  ;;  %v5145_v35 = vmul.f32 1.442695, %v5093_v7  ;;  %v5788_v7 = vld [vmem:[#allocation2 + $0x54] sm:$0xf] }
 0x345   : > { %v14316_v40 = vpop.eup %14315  ;;  %v5519_v36 = vor.u32 %v5517_v51, %v5516_v44  ;;  %v5521_v54 = vrot.slane %v5516_v44, 4  ;;  %v5540_v26 = vshrl.u32 %v12505_v9, 16  ;;  %v5543_v61 = vshll.u32 %v12505_v9, 16 }
 0x346   : > { %v5499_v6 = vrot.slane %v5497_v56, 7  ;;  %v12503_v39 = vpack.c.bf16 %v5245_v42, %v5245_v42  ;;  %v5248_v53 = vmul.f32 %v14314_v22, %v16632_v63  ;;  %v5182_v13 = vadd.f32 1.0, %v14316_v40 }
 0x347   : > { %v5520_v58 = vsel %vm16667_vm14, %v5512_v55, %v5519_v36  ;;  %v5786_v24 = vsel %vm16674_vm15, %v5521_v54, %v5785_v33  ;;  %v5542_v49 = vrot.slane %v5540_v26, 7  ;;  %14327 = vpow2.f32 %v5145_v35  ;;  %v5799_v36 = vld [vmem:[#allocation2 + $0x68] sm:$0x1] }
 0x348   : > { %5784 = vst.msk [vmem:[#allocation2 + $0x4c] sm:$0xf] %vm5265_vm7, %v5520_v58  ;;  %5787 = vst [vmem:[#allocation2 + $0x50] sm:$0x1] %v5786_v24  ;;  %v5502_v4 = vor.u32 %v5500_v17, %v5499_v6  ;;  %v5504_v18 = vrot.slane %v5499_v6, 4  ;;  %v5523_v46 = vshrl.u32 %v12503_v39, 16  ;;  %v12506_v59 = vpack.c.bf16 %v5248_v53, %v5248_v53 }
 0x349   : > { %v5096_v48 = vsub.f32 0.0, %v16780_v45  ;;  %v14318_v47 = vpop.eup %14317  ;;  %v5545_v63 = vor.u32 %v5543_v61, %v5542_v49  ;;  %v5526_v23 = vshll.u32 %v12503_v39, 16  ;;  %14329 = vrcp.f32 %v5182_v13 }
 0x34a   : > { %v14320_v55 = vpop.eup %14319  ;;  %v5503_v8 = vsel %vm16667_vm14, %v5495_v25, %v5502_v4  ;;  %v5779_v14 = vsel %vm16674_vm15, %v5504_v18, %v5778_v62  ;;  %v16795_v38 = vrot.slane %v5523_v46, 7  ;;  %v5187_v12 = vadd.f32 1.0, %v14318_v47 }
 0x34b   : > { %v14322_v52 = vpop.eup %14321  ;;  %5777 = vst.msk [vmem:[#allocation2 + $0x40] sm:$0xf] %vm5265_vm7, %v5503_v8  ;;  %5780 = vst [vmem:[#allocation2 + $0x44] sm:$0x1] %v5779_v14  ;;  %v5546_v1 = vrot.slane %v5542_v49, 4  ;;  %v5796_v30 = vsel %vm16661_vm13, %v5545_v63, %v5795_v0  ;;  %v5548_v44 = vshrl.u32 %v12506_v59, 16  ;;  %v16805_v54 = vadd.f32 %v16571_v60, %v16697_v32 }
 0x34c   : > { %v5185_v51 = vadd.f32 1.0, %v14320_v55  ;;  %v14324_v9 = vpop.eup %14323  ;;  %5797 = vst [vmem:[#allocation2 + $0x60] sm:$0xf] %v5796_v30  ;;  %v5528_v25 = vor.u32 %v5526_v23, %v16795_v38  ;;  %v5551_v42 = vshll.u32 %v12506_v59, 16  ;;  %14331 = vrcp.f32 %v5187_v12 }
 0x34d   : > { %v5188_v22 = vadd.f32 1.0, %v14322_v52  ;;  %v5550_v33 = vrot.slane %v5548_v44, 7  ;;  %v5186_v56 = vadd.f32 1.0, %v14324_v9  ;;  %v5151_v17 = vmul.f32 1.442695, %v5096_v48 }
 0x34e   : > { %14333 = vrcp.f32 %v5185_v51  ;;  %v14326_v35 = vpop.eup %14325  ;;  %v5789_v40 = vsel %vm16661_vm13, %v5528_v25, %v5788_v7  ;;  %v16809_v26 = vadd.f32 %v16710_v11, %v16571_v60  ;;  %v5094_v39 = vsub.f32 0.0, %v16805_v54 }
 0x34f   : > { %14335 = vrcp.f32 %v5188_v22  ;;  %5790 = vst [vmem:[#allocation2 + $0x54] sm:$0xf] %v5789_v40  ;;  %v5553_v61 = vor.u32 %v5551_v42, %v5550_v33  ;;  %v5555_v6 = vrot.slane %v5550_v33, 4  ;;  %v5191_v62 = vadd.f32 1.0, %v14326_v35  ;;  %v5792_v22 = vld [vmem:[#allocation2 + $0x5c] sm:$0x1] }
 0x350   : > { %14337 = vrcp.f32 %v5186_v56  ;;  %v5099_v53 = vsub.f32 0.0, %v16809_v26  ;;  %v16815_v13 = vadd.f32 %v16571_v60, %v16714_v15  ;;  %v16823_v24 = vadd.f32 %v16719_v34, %v16571_v60 }
 0x351   : > { %14339 = vpow2.f32 %v5151_v17  ;;  %v14328_v32 = vpop.eup %14327  ;;  %v5554_v58 = vsel %vm16667_vm14, %v5546_v1, %v5553_v61  ;;  %v5800_v11 = vsel %vm16674_vm15, %v5555_v6, %v5799_v36  ;;  %v5147_v4 = vmul.f32 1.442695, %v5094_v39 }
 0x352   : > { %14341 = vrcp.f32 %v5191_v62  ;;  %5798 = vst.msk [vmem:[#allocation2 + $0x64] sm:$0xf] %vm5265_vm7, %v5554_v58  ;;  %5801 = vst [vmem:[#allocation2 + $0x68] sm:$0x1] %v5800_v11  ;;  %v5189_v49 = vadd.f32 1.0, %v14328_v32  ;;  %v5097_v15 = vsub.f32 0.0, %v16815_v13  ;;  %v16830_v48 = vadd.f32 %v16571_v60, %v16721_v19 }
 0x353   : > { %v5157_v18 = vmul.f32 1.442695, %v5099_v53  ;;  %v14330_v0 = vpop.eup %14329  ;;  %v5100_v46 = vsub.f32 0.0, %v16823_v24  ;;  %v16834_v47 = vadd.f32 %v16738_v57, %v16571_v60  ;;  %v16839_v23 = vadd.f32 %v16571_v60, %v16747_v31  ;;  %v9315_v3 = vld [vmem:[#allocation2 + $0x60] sm:$0xf] }
 0x354   : > { %v5246_v34 = vmul.f32 %v14330_v0, %v16636_v28  ;;  %14343 = vrcp.f32 %v5189_v49  ;;  %v5153_v63 = vmul.f32 1.442695, %v5097_v15  ;;  %v5098_v55 = vsub.f32 0.0, %v16830_v48  ;;  %v5809_v49 = vld [vmem:[#allocation2 + $0x78] sm:$0xf] }
 0x355   : > { %14345 = vpow2.f32 %v5147_v4  ;;  %v5159_v59 = vmul.f32 1.442695, %v5100_v46  ;;  %v5103_v8 = vsub.f32 0.0, %v16834_v47  ;;  %v5529_v14 = vrot.slane %v16795_v38, 4 }
 0x356   : > { %v14332_v19 = vpop.eup %14331  ;;  %v12504_v12 = vpack.c.bf16 %v5246_v34, %v5246_v34  ;;  %14347 = vpow2.f32 %v5157_v18  ;;  %v16846_v28 = vadd.f32 %v16757_v50, %v16571_v60  ;;  %v5155_v31 = vmul.f32 1.442695, %v5098_v55  ;;  %v5802_v34 = vld [vmem:[#allocation2 + $0x6c] sm:$0xf] }
 0x357   : > { %v5251_v52 = vmul.f32 %v14332_v19, %v16649_v21  ;;  %14349 = vpow2.f32 %v5153_v63  ;;  %v5165_v1 = vmul.f32 1.442695, %v5103_v8  ;;  %v5101_v51 = vsub.f32 0.0, %v16839_v23 }
 0x358   : > { %v14334_v57 = vpop.eup %14333  ;;  %v5531_v7 = vshrl.u32 %v12504_v12, 16  ;;  %14351 = vpow2.f32 %v5159_v59  ;;  %v5534_v9 = vshll.u32 %v12504_v12, 16 }
 0x359   : > { %v14336_v30 = vpop.eup %14335  ;;  %v5249_v44 = vmul.f32 %v14334_v57, %v16695_v41  ;;  %v12509_v25 = vpack.c.bf16 %v5251_v52, %v5251_v52  ;;  %14353 = vpow2.f32 %v5155_v31 }
 0x35a   : > { %v14338_v38 = vpop.eup %14337  ;;  %v5252_v42 = vmul.f32 %v14336_v30, %v16745_v43  ;;  %v5533_v50 = vrot.slane %v5531_v7, 7  ;;  %14355 = vpow2.f32 %v5165_v1 }
 0x35b   : > { %v14340_v60 = vpop.eup %14339  ;;  %v12507_v21 = vpack.c.bf16 %v5249_v44, %v5249_v44  ;;  %v5250_v33 = vmul.f32 %v14338_v38, %v16755_v16  ;;  %v5574_v17 = vshrl.u32 %v12509_v25, 16  ;;  %v5577_v35 = vshll.u32 %v12509_v25, 16  ;;  %v5806_v38 = vld [vmem:[#allocation2 + $0x74] sm:$0x1] }
 0x35c   : > { %v14342_v56 = vpop.eup %14341  ;;  %v12510_v41 = vpack.c.bf16 %v5252_v42, %v5252_v42  ;;  %v5192_v40 = vadd.f32 1.0, %v14340_v60  ;;  %v5536_v36 = vor.u32 %v5534_v9, %v5533_v50  ;;  %v5538_v61 = vrot.slane %v5533_v50, 4 }
 0x35d   : > { %v5557_v6 = vshrl.u32 %v12507_v21, 16  ;;  %v5560_v62 = vshll.u32 %v12507_v21, 16  ;;  %v5576_v39 = vrot.slane %v5574_v17, 7  ;;  %v12508_v32 = vpack.c.bf16 %v5250_v33, %v5250_v33 }
 0x35e   : > { %v5582_v53 = vshrl.u32 %v12510_v41, 16  ;;  %v5585_v43 = vshll.u32 %v12510_v41, 16  ;;  %v14344_v58 = vpop.eup %14343  ;;  %v5537_v11 = vsel %vm16667_vm14, %v5529_v14, %v5536_v36  ;;  %v5793_v16 = vsel %vm16674_vm15, %v5538_v61, %v5792_v22  ;;  %v5813_v14 = vld [vmem:[#allocation2 + $0x80] sm:$0x1]  ;;  %v5823_v61 = vld [vmem:[#allocation2 + $0x90] sm:$0xf] }
 0x35f   : > { %v5559_v4 = vrot.slane %v5557_v6, 7  ;;  %v5255_v18 = vmul.f32 %v14342_v56, %v16768_v2  ;;  %v14346_v15 = vpop.eup %14345  ;;  %5791 = vst.msk [vmem:[#allocation2 + $0x58] sm:$0xf] %vm5265_vm7, %v5537_v11  ;;  %5794 = vst [vmem:[#allocation2 + $0x5c] sm:$0x1] %v5793_v16  ;;  %v5579_v0 = vor.u32 %v5577_v35, %v5576_v39  ;;  %v5580_v46 = vrot.slane %v5576_v39, 4 }
 0x360   : > { %v5584_v63 = vrot.slane %v5582_v53, 7  ;;  %v5565_v59 = vshrl.u32 %v12508_v32, 16  ;;  %v14348_v55 = vpop.eup %14347  ;;  %v5568_v12 = vshll.u32 %v12508_v32, 16  ;;  %v5253_v42 = vmul.f32 %v14344_v58, %v16772_v27  ;;  %v5860_v32 = vld [vmem:[#allocation2 + $0xc] sm:$0xf] }
 0x361   : > { %v5562_v8 = vor.u32 %v5560_v62, %v5559_v4  ;;  %v5563_v19 = vrot.slane %v5559_v4, 4  ;;  %v12513_v57 = vpack.c.bf16 %v5255_v18, %v5255_v18  ;;  %v14350_v52 = vpop.eup %14349  ;;  %v5810_v31 = vsel %vm16661_vm13, %v5579_v0, %v5809_v49  ;;  %v5861_v49 = vld [vmem:[#allocation2 + $0x10] sm:$0xf]  ;;  %v5816_v0 = vld [vmem:[#allocation2 + $0x84] sm:$0xf] }
 0x362   : > { %v5587_v2 = vor.u32 %v5585_v43, %v5584_v63  ;;  %v5589_v1 = vrot.slane %v5584_v63, 4  ;;  %v5567_v30 = vrot.slane %v5565_v59, 7  ;;  %v14352_v7 = vpop.eup %14351  ;;  %5811 = vst [vmem:[#allocation2 + $0x78] sm:$0xf] %v5810_v31  ;;  %v12511_v35 = vpack.c.bf16 %v5253_v42, %v5253_v42 }
 0x363   : > { %v5803_v44 = vsel %vm16661_vm13, %v5562_v8, %v5802_v34  ;;  %v5608_v9 = vshrl.u32 %v12513_v57, 16  ;;  %v5611_v25 = vshll.u32 %v12513_v57, 16  ;;  %v14354_v60 = vpop.eup %14353  ;;  %14357 = vrcp.f32 %v5192_v40  ;;  %v5895_v8 = vld [vmem:[#allocation2 + $0x14] sm:$0x1] }
 0x364   : > { %5804 = vst [vmem:[#allocation2 + $0x6c] sm:$0xf] %v5803_v44  ;;  %v5588_v50 = vsel %vm16667_vm14, %v5580_v46, %v5587_v2  ;;  %v5814_v22 = vsel %vm16674_vm15, %v5589_v1, %v5813_v14  ;;  %v5570_v21 = vor.u32 %v5568_v12, %v5567_v30  ;;  %v5572_v33 = vrot.slane %v5567_v30, 4  ;;  %v14356_v56 = vpop.eup %14355  ;;  %v16894_v2 = vld [vmem:[#allocation2 + $0x18] sm:$0xf] }
 0x365   : > { %5812 = vst.msk [vmem:[#allocation2 + $0x7c] sm:$0xf] %vm5265_vm7, %v5588_v50  ;;  %5815 = vst [vmem:[#allocation2 + $0x80] sm:$0x1] %v5814_v22  ;;  %v16869_v17 = vrot.slane %v5608_v9, 7  ;;  %v5190_v41 = vadd.f32 1.0, %v14346_v15 }
 0x366   : > { %v5571_v27 = vsel %vm16667_vm14, %v5563_v19, %v5570_v21  ;;  %v5807_v36 = vsel %vm16674_vm15, %v5572_v33, %v5806_v38  ;;  %v5195_v6 = vadd.f32 1.0, %v14348_v55  ;;  %v5193_v62 = vadd.f32 1.0, %v14350_v52  ;;  %v16896_v44 = vld [vmem:[#allocation2 + $0x1c] sm:$0xf] }
 0x367   : > { %5805 = vst.msk [vmem:[#allocation2 + $0x70] sm:$0xf] %vm5265_vm7, %v5571_v27  ;;  %5808 = vst [vmem:[#allocation2 + $0x74] sm:$0x1] %v5807_v36  ;;  %v5613_v39 = vor.u32 %v5611_v25, %v16869_v17  ;;  %v5591_v53 = vshrl.u32 %v12511_v35, 16  ;;  %v5104_v40 = vsub.f32 0.0, %v16846_v28  ;;  %14359 = vrcp.f32 %v5190_v41 }
 0x368   : > { %v5161_v43 = vmul.f32 1.442695, %v5101_v51  ;;  %v5594_v58 = vshll.u32 %v12511_v35, 16  ;;  %v5196_v11 = vadd.f32 1.0, %v14352_v7  ;;  %v5194_v16 = vadd.f32 1.0, %v14354_v60 }
 0x369   : > { %v5824_v4 = vsel %vm16661_vm13, %v5613_v39, %v5823_v61  ;;  %v16882_v18 = vrot.slane %v5591_v53, 7  ;;  %14361 = vrcp.f32 %v5195_v6  ;;  %v5199_v15 = vadd.f32 1.0, %v14356_v56  ;;  %v14517_v51 = vld [vmem:[%s19212_s2] ss:$0 sm:$0xff] }
 0x36a   : > { %5825 = vst [vmem:[#allocation2 + $0x90] sm:$0xf] %v5824_v4  ;;  %14363 = vrcp.f32 %v5193_v62  ;;  %v16888_v46 = vadd.f32 %v14517_v51, %v16761_v20  ;;  %v5935_v34 = vshrl.u32 %v5860_v32, 16  ;;  %v5938_v63 = vshll.u32 %v5860_v32, 16  ;;  %v16900_v60 = vld [vmem:[#allocation2 + $0x20] sm:$0x1] }
 0x36b   : > { %v5596_v59 = vor.u32 %v5594_v58, %v16882_v18  ;;  %14365 = vrcp.f32 %v5196_v11  ;;  %v5167_v55 = vmul.f32 1.442695, %v5104_v40  ;;  %v5944_v19 = vshll.u32 %v5861_v49, 16 }
 0x36c   : > { %14367 = vrcp.f32 %v5194_v16  ;;  %v5102_v14 = vsub.f32 0.0, %v16888_v46  ;;  %v5937_v12 = vrot.slane %v5935_v34, 4  ;;  %v5940_v57 = vrot.slane %v5938_v63, 5 }
 0x36d   : > { %v5817_v52 = vsel %vm16661_vm13, %v5596_v59, %v5816_v0  ;;  %14369 = vrcp.f32 %v5199_v15  ;;  %v5946_v31 = vrot.slane %v5944_v19, 5  ;;  %v5948_v20 = vshrl.u32 %v5861_v49, 16  ;;  %v14358_v38 = vpop.eup %14357  ;;  %v5827_v19 = vld [vmem:[#allocation2 + $0x98] sm:$0x1] }
 0x36e   : > { %5818 = vst [vmem:[#allocation2 + $0x84] sm:$0xf] %v5817_v52  ;;  %14371 = vpow2.f32 %v5161_v43  ;;  %v5163_v1 = vmul.f32 1.442695, %v5102_v14  ;;  %v5941_v30 = vor.u32 %v5940_v57, %v5937_v12  ;;  %v5954_v7 = vshll.u32 %v5895_v8, 16 }
 0x36f   : > { %v5614_v9 = vrot.slane %v16869_v17, 4  ;;  %v5597_v25 = vrot.slane %v16882_v18, 4  ;;  %14373 = vpow2.f32 %v5167_v55  ;;  %v5950_v42 = vrot.slane %v5948_v20, 4 }
 0x370   : > { %v5256_v50 = vmul.f32 %v14358_v38, %v16780_v45  ;;  %14375 = vpow2.f32 %v5163_v1  ;;  %v5942_v22 = vrot.slane %v5941_v30, 4  ;;  %v5956_v21 = vrot.slane %v5954_v7, 5 }
 0x371   : > { %v5951_v33 = vor.u32 %v5950_v42, %v5946_v31  ;;  %v5959_v56 = vshrl.u32 %v16894_v2, 16  ;;  %v5962_v35 = vshll.u32 %v16894_v2, 16  ;;  %v5968_v41 = vshll.u32 %v16896_v44, 16  ;;  %v14360_v27 = vpop.eup %14359 }
 0x372   : > { %v12514_v17 = vpack.c.bf16 %v5256_v50, %v5256_v50  ;;  %v5947_v36 = vsel %vm14731_vm2, %v5942_v22, %v5946_v31  ;;  %v5972_v61 = vshrl.u32 %v16896_v44, 16  ;;  %v5978_v6 = vshll.u32 %v16900_v60, 16  ;;  %v14518_v22 = vld [vmem:[%s19213_s3] sm:$0xff]  }
 0x373   : > { %v14362_v45 = vpop.eup %14361  ;;  %v5254_v62 = vmul.f32 %v14360_v27, %v16805_v54  ;;  %v5952_v39 = vrot.slane %v5951_v33, 4  ;;  %v16911_v53 = vrot.slane %v5959_v56, 4  ;;  %v16913_v43 = vrot.slane %v5962_v35, 5  ;;  %v5820_v56 = vld [vmem:[#allocation2 + $0x8c] sm:$0x1]  ;;  %v16939_v27 = vld [vmem:[%s19213_s3 + $0x20] sm:$0xff]  }
 0x374   : > { %v14364_v40 = vpop.eup %14363  ;;  %v5616_v32 = vshrl.u32 %v12514_v17, 16  ;;  %v5619_v58 = vshll.u32 %v12514_v17, 16  ;;  %v5259_v11 = vmul.f32 %v14362_v45, %v16809_v26  ;;  %v16916_v16 = vrot.slane %v5968_v41, 5  ;;  %v14192_v26 = vld [vmem:[%s19213_s3 + $0x8] sm:$0xff]  }
 0x375   : > { %v14366_v49 = vpop.eup %14365  ;;  %v12512_v4 = vpack.c.bf16 %v5254_v62, %v5254_v62  ;;  %v5257_v15 = vmul.f32 %v14364_v40, %v16815_v13  ;;  %v5957_v0 = vsel %vm14731_vm2, %v5952_v39, %v5956_v21  ;;  %v5965_v54 = vor.u32 %v16913_v43, %v16911_v53  ;;  %v5837_v45 = vld [vmem:[#allocation2 + $0xa8] sm:$0xf] }
 0x376   : > { %v14368_v51 = vpop.eup %14367  ;;  %v5618_v34 = vrot.slane %v5616_v32, 7  ;;  %v12517_v63 = vpack.c.bf16 %v5259_v11, %v5259_v11  ;;  %v5260_v59 = vmul.f32 %v14366_v49, %v16823_v24  ;;  %v12056_v55 = vcombine.low %v5947_v36, %v5957_v0  ;;  %v5830_v32 = vld [vmem:[#allocation2 + $0x9c] sm:$0xf] }
 0x377   : > { %v14370_v8 = vpop.eup %14369  ;;  %v5599_v14 = vshrl.u32 %v12512_v4, 16  ;;  %v5602_v13 = vshll.u32 %v12512_v4, 16  ;;  %v12515_v12 = vpack.c.bf16 %v5257_v15, %v5257_v15  ;;  %v5258_v57 = vmul.f32 %v14368_v51, %v16830_v48 }
 0x378   : > { %v14372_v52 = vpop.eup %14371  ;;  %v5621_v31 = vor.u32 %v5619_v58, %v5618_v34  ;;  %v5623_v20 = vrot.slane %v5618_v34, 4  ;;  %v5642_v1 = vshrl.u32 %v12517_v63, 16  ;;  %v5645_v30 = vshll.u32 %v12517_v63, 16  ;;  %13231 = vmatmul.mubr.msk.bf16.vlgmr.msra.gmra.mrb[0].mxu1 %vm6359_vm9, %v12056_v55  ;;  %v5841_v63 = vld [vmem:[#allocation2 + $0xb0] sm:$0x1] }
 0x379   : > { %v14374_v24 = vpop.eup %14373  ;;  %v5601_v7 = vrot.slane %v5599_v14, 7  ;;  %v5625_v38 = vshrl.u32 %v12515_v12, 16  ;;  %v5628_v42 = vshll.u32 %v12515_v12, 16  ;;  %v12518_v50 = vpack.c.bf16 %v5260_v59, %v5260_v59  ;;  %13263 = vmatpush3.bf16.msra.mxu1 %v14518_v22 }
 0x37a   : > { %v14376_v21 = vpop.eup %14375  ;;  %v5622_v48 = vsel %vm16667_vm14, %v5614_v9, %v5621_v31  ;;  %v5828_v33 = vsel %vm16674_vm15, %v5623_v20, %v5827_v19  ;;  %v5644_v35 = vrot.slane %v5642_v1, 7  ;;  %v12516_v41 = vpack.c.bf16 %v5258_v57, %v5258_v57  ;;  %13264 = vmatprep.subr.bf16.mxu1 %v14192_v26 }
 0x37b   : > { %5826 = vst.msk [vmem:[#allocation2 + $0x94] sm:$0xf] %vm5265_vm7, %v5622_v48  ;;  %5829 = vst [vmem:[#allocation2 + $0x98] sm:$0x1] %v5828_v33  ;;  %v5604_v17 = vor.u32 %v5602_v13, %v5601_v7  ;;  %v5606_v36 = vrot.slane %v5601_v7, 4  ;;  %v5627_v62 = vrot.slane %v5625_v38, 7  ;;  %v5263_v19 = vmul.f32 %v14370_v8, %v16834_v47 }
 0x37c   : > { %v5650_v9 = vshrl.u32 %v12518_v50, 16  ;;  %v5647_v39 = vor.u32 %v5645_v30, %v5644_v35  ;;  %v5648_v40 = vrot.slane %v5644_v35, 4  ;;  %v5653_v58 = vshll.u32 %v12518_v50, 16  ;;  %v16958_v7 = vld [vmem:[#allocation2 + $0x24] sm:$0xf] }
 0x37d   : > { %v5633_v11 = vshrl.u32 %v12516_v41, 16  ;;  %v5605_v49 = vsel %vm16667_vm14, %v5597_v25, %v5604_v17  ;;  %v5821_v4 = vsel %vm16674_vm15, %v5606_v36, %v5820_v56  ;;  %v5630_v15 = vor.u32 %v5628_v42, %v5627_v62  ;;  %13265 = vmatpush3.bf16.msra.mxu1 %v14192_v26  ;;  %v5834_v25 = vld [vmem:[#allocation2 + $0xa4] sm:$0x1]  ;;  %v16975_v42 = vld [vmem:[#allocation2 + $0x2c] sm:$0x1] }
 0x37e   : > { %v5631_v0 = vrot.slane %v5627_v62, 4  ;;  %5819 = vst.msk [vmem:[#allocation2 + $0x88] sm:$0xf] %vm5265_vm7, %v5605_v49  ;;  %5822 = vst [vmem:[#allocation2 + $0x8c] sm:$0x1] %v5821_v4  ;;  %v5838_v51 = vsel %vm16661_vm13, %v5647_v39, %v5837_v45  ;;  %v5652_v34 = vrot.slane %v5650_v9, 7  ;;  %13298 = vmatprep.subr.bf16.mxu1 %v16939_v27  ;;  %v12521_v20 = vpack.c.bf16 %v5263_v19, %v5263_v19 }
 0x37f   : > { %v5635_v59 = vrot.slane %v5633_v11, 7  ;;  %v5636_v55 = vshll.u32 %v12516_v41, 16  ;;  %5839 = vst [vmem:[#allocation2 + $0xa8] sm:$0xf] %v5838_v51  ;;  %v5831_v18 = vsel %vm16661_vm13, %v5630_v15, %v5830_v32  ;;  %v5197_v26 = vadd.f32 1.0, %v14372_v52  ;;  %19404 = vst [vmem:[#allocation6_spill] sm:$0xff] %v16975_v42 }
 0x380   : > { %v5200_v14 = vadd.f32 1.0, %v14374_v24  ;;  %5832 = vst [vmem:[#allocation2 + $0x9c] sm:$0xf] %v5831_v18  ;;  %v5655_v13 = vor.u32 %v5653_v58, %v5652_v34  ;;  %v5657_v12 = vrot.slane %v5652_v34, 4  ;;  %v5198_v1 = vadd.f32 1.0, %v14376_v21 }
 0x381   : > { %v5638_v57 = vor.u32 %v5636_v55, %v5635_v59  ;;  %v5640_v31 = vrot.slane %v5635_v59, 4  ;;  %14377 = vrcp.f32 %v5197_v26  ;;  %v5966_v30 = vrot.slane %v5965_v54, 4  ;;  %v16968_v24 = vld [vmem:[#allocation2 + $0x28] sm:$0xf]  ;;  %v16977_v50 = vld [vmem:[#allocation2 + $0x30] sm:$0xf] }
 0x382   : > { %v5656_v38 = vsel %vm16667_vm14, %v5648_v40, %v5655_v13  ;;  %v5842_v47 = vsel %vm16674_vm15, %v5657_v12, %v5841_v63  ;;  %v5676_v53 = vshrl.u32 %v12521_v20, 16  ;;  %v5679_v43 = vshll.u32 %v12521_v20, 16  ;;  %v5851_v56 = vld [vmem:[#allocation2 + $0xc0] sm:$0xf]  ;;  %v16996_v32 = vld [vmem:[#allocation2 + $0x38] sm:$0x1] }
 0x383   : > { %v5639_v8 = vsel %vm16667_vm14, %v5631_v0, %v5638_v57  ;;  %v5835_v52 = vsel %vm16674_vm15, %v5640_v31, %v5834_v25  ;;  %5840 = vst.msk [vmem:[#allocation2 + $0xac] sm:$0xf] %vm5265_vm7, %v5656_v38  ;;  %5843 = vst [vmem:[#allocation2 + $0xb0] sm:$0x1] %v5842_v47  ;;  %14379 = vrcp.f32 %v5200_v14  ;;  %v5971_v54 = vsel %vm14731_vm2, %v5966_v30, %v16916_v16  ;;  %v17006_v18 = vld [vmem:[#allocation2 + $0x3c] sm:$0xf] }
 0x384   : > { %5833 = vst.msk [vmem:[#allocation2 + $0xa0] sm:$0xf] %vm5265_vm7, %v5639_v8  ;;  %5836 = vst [vmem:[#allocation2 + $0xa4] sm:$0x1] %v5835_v52  ;;  %14381 = vrcp.f32 %v5198_v1  ;;  %v5974_v22 = vrot.slane %v5972_v61, 4  ;;  %v5980_v21 = vrot.slane %v5978_v6, 5 }
 0x385   : > { %v5983_v48 = vshrl.u32 %v16958_v7, 16  ;;  %v16984_v33 = vrot.slane %v5676_v53, 7  ;;  %v5986_v35 = vshll.u32 %v16958_v7, 16  ;;  %v5992_v41 = vshll.u32 %v16968_v24, 16  ;;  %v16991_v61 = vld [vmem:[#allocation2 + $0x34] sm:$0xf] }
 0x386   : > { %v5996_v17 = vshrl.u32 %v16968_v24, 16  ;;  %v5975_v36 = vor.u32 %v5974_v22, %v16916_v16  ;;  %v6002_v62 = vshll.u32 %v16975_v42, 16  ;;  %v6007_v60 = vshrl.u32 %v16977_v50, 16  ;;  %19405 = vst [vmem:[#allocation7_spill] sm:$0xff] %v16996_v32  ;;  %v17012_v47 = vld [vmem:[#allocation2 + $0x40] sm:$0xf] }
 0x387   : > { %v5985_v45 = vrot.slane %v5983_v48, 4  ;;  %v5681_v6 = vor.u32 %v5679_v43, %v16984_v33  ;;  %v5682_v9 = vrot.slane %v16984_v33, 4  ;;  %v5988_v39 = vrot.slane %v5986_v35, 5 }
 0x388   : > { %v5994_v40 = vrot.slane %v5992_v41, 5  ;;  %v5976_v58 = vrot.slane %v5975_v36, 4  ;;  %v5998_v11 = vrot.slane %v5996_v17, 4  ;;  %v6004_v49 = vrot.slane %v6002_v62, 5 }
 0x389   : > { %v6009_v4 = vrot.slane %v6007_v60, 4  ;;  %v5852_v16 = vsel %vm16661_vm13, %v5681_v6, %v5851_v56  ;;  %v5989_v15 = vor.u32 %v5988_v39, %v5985_v45  ;;  %v6010_v0 = vshll.u32 %v16977_v50, 16 }
 0x38a   : > { %v6016_v51 = vshll.u32 %v16991_v61, 16  ;;  %5853 = vst [vmem:[#allocation2 + $0xc0] sm:$0xf] %v5852_v16  ;;  %v5981_v34 = vsel %vm14731_vm2, %v5976_v58, %v5980_v21  ;;  %v5999_v63 = vor.u32 %v5998_v11, %v5994_v40  ;;  %v6020_v59 = vshrl.u32 %v16991_v61, 16  ;;  %v17026_v11 = vld [vmem:[#allocation2 + $0x44] sm:$0x1] }
 0x38b   : > { %v6026_v55 = vshll.u32 %v16996_v32, 16  ;;  %v14378_v25 = vpop.eup %14377  ;;  %v12057_v19 = vcombine.low %v5971_v54, %v5981_v34  ;;  %v5990_v26 = vrot.slane %v5989_v15, 4  ;;  %v6012_v14 = vrot.slane %v6010_v0, 5 }
 0x38c   : > { %v6018_v13 = vrot.slane %v6016_v51, 5  ;;  %v5261_v12 = vmul.f32 %v14378_v25, %v16839_v23  ;;  %v6000_v57 = vrot.slane %v5999_v63, 4  ;;  %v6022_v31 = vrot.slane %v6020_v59, 4  ;;  %v17028_v51 = vld [vmem:[#allocation2 + $0x48] sm:$0xf] }
 0x38d   : > { %v6028_v20 = vrot.slane %v6026_v55, 5  ;;  %v14380_v1 = vpop.eup %14379  ;;  %13234 = vmatprep.mubr.msk.bf16.mxu1 %vm6359_vm9, %v12057_v19  ;;  %v5995_v30 = vsel %vm14731_vm2, %v5990_v26, %v5994_v40  ;;  %v6013_v38 = vor.u32 %v6012_v14, %v6009_v4  ;;  %v6031_v8 = vshrl.u32 %v17006_v18, 16  ;;  %v5855_v25 = vld [vmem:[#allocation2 + $0xc8] sm:$0x1] }
 0x38e   : > { %v6034_v52 = vshll.u32 %v17006_v18, 16  ;;  %v14382_v53 = vpop.eup %14381  ;;  %v12519_v43 = vpack.c.bf16 %v5261_v12, %v5261_v12  ;;  %v5264_v23 = vmul.f32 %v14380_v1, %v16846_v28  ;;  %v6005_v54 = vsel %vm14731_vm2, %v6000_v57, %v6004_v49  ;;  %v5844_v49 = vld [vmem:[#allocation2 + $0xb4] sm:$0xf]  ;;  %v17035_v1 = vld [vmem:[#allocation2 + $0x4c] sm:$0xf] }
 0x38f   : > { %v6023_v22 = vor.u32 %v6022_v31, %v6018_v13  ;;  %v5262_v21 = vmul.f32 %v14382_v53, %v16888_v46  ;;  %v12058_v48 = vcombine.low %v5995_v30, %v6005_v54  ;;  %v6014_v56 = vrot.slane %v6013_v38, 4 }
 0x390   : > { %v6033_v35 = vrot.slane %v6031_v8, 4  ;;  %v5659_v41 = vshrl.u32 %v12519_v43, 16  ;;  %v5662_v17 = vshll.u32 %v12519_v43, 16  ;;  %v12522_v36 = vpack.c.bf16 %v5264_v23, %v5264_v23  ;;  %v17040_v43 = vld [vmem:[#allocation2 + $0x50] sm:$0x1] }
 0x391   : > { %v6024_v45 = vrot.slane %v6023_v22, 4  ;;  %v12520_v62 = vpack.c.bf16 %v5262_v21, %v5262_v21  ;;  %13235 = vmatmul.mubr.msk.bf16.gmra.mrb[4].mxu1 %vm6359_vm9, %v12058_v48  ;;  %v6019_v60 = vsel %vm14731_vm2, %v6014_v56, %v6018_v13  ;;  %v6036_v28 = vrot.slane %v6034_v52, 5  ;;  %v17042_v23 = vld [vmem:[#allocation2 + $0x54] sm:$0xf]  ;;  %v17050_v48 = vld [vmem:[#allocation2 + $0x58] sm:$0xf] }
 0x392   : > { %v6040_v6 = vshll.u32 %v17012_v47, 16  ;;  %v5661_v39 = vrot.slane %v5659_v41, 7  ;;  %v5684_v40 = vshrl.u32 %v12522_v36, 16  ;;  %v5687_v58 = vshll.u32 %v12522_v36, 16 }
 0x393   : > { %v6029_v46 = vsel %vm14731_vm2, %v6024_v45, %v6028_v20  ;;  %v5667_v4 = vshrl.u32 %v12520_v62, 16  ;;  %v5670_v16 = vshll.u32 %v12520_v62, 16  ;;  %v6037_v0 = vor.u32 %v6036_v28, %v6033_v35  ;;  %v5848_v20 = vld [vmem:[#allocation2 + $0xbc] sm:$0x1] }
 0x394   : > { %v12059_v15 = vcombine.low %v6019_v60, %v6029_v46  ;;  %v5664_v34 = vor.u32 %v5662_v17, %v5661_v39  ;;  %v5665_v63 = vrot.slane %v5661_v39, 4  ;;  %v5686_v59 = vrot.slane %v5684_v40, 7  ;;  %v17063_v60 = vld [vmem:[#allocation2 + $0x5c] sm:$0x1]  ;;  %v17067_v46 = vld [vmem:[#allocation2 + $0x60] sm:$0xf] }
 0x395   : > { %v6042_v55 = vrot.slane %v6040_v6, 5  ;;  %v5669_v19 = vrot.slane %v5667_v4, 7  ;;  %v6038_v26 = vrot.slane %v6037_v0, 4  ;;  %v6044_v14 = vshrl.u32 %v17012_v47, 16  ;;  %v17071_v0 = vld [vmem:[#allocation2 + $0x64] sm:$0xf] }
 0x396   : > { %13238 = vmatprep.mubr.msk.bf16.mxu1 %vm6359_vm9, %v12059_v15  ;;  %v6050_v13 = vshll.u32 %v17026_v11, 16  ;;  %v5845_v12 = vsel %vm16661_vm13, %v5664_v34, %v5844_v49  ;;  %v5689_v57 = vor.u32 %v5687_v58, %v5686_v59  ;;  %v5691_v31 = vrot.slane %v5686_v59, 4 }
 0x397   : > { %v6055_v30 = vshrl.u32 %v17028_v51, 16  ;;  %5846 = vst [vmem:[#allocation2 + $0xb4] sm:$0xf] %v5845_v12  ;;  %v5672_v38 = vor.u32 %v5670_v16, %v5669_v19  ;;  %v5674_v8 = vrot.slane %v5669_v19, 4  ;;  %v6043_v52 = vsel %vm14731_vm2, %v6038_v26, %v6042_v55 }
 0x398   : > { %v6046_v53 = vrot.slane %v6044_v14, 4  ;;  %v5690_v37 = vsel %vm16667_vm14, %v5682_v9, %v5689_v57  ;;  %v5856_v54 = vsel %vm16674_vm15, %v5691_v31, %v5855_v25  ;;  %v6052_v22 = vrot.slane %v6050_v13, 5  ;;  %v17075_v25 = vld [vmem:[#allocation2 + $0x68] sm:$0x1] }
 0x399   : > { %v6057_v21 = vrot.slane %v6055_v30, 4  ;;  %5854 = vst.msk [vmem:[#allocation2 + $0xc4] sm:$0xf] %vm5265_vm7, %v5690_v37  ;;  %5857 = vst [vmem:[#allocation2 + $0xc8] sm:$0x1] %v5856_v54  ;;  %v5673_v56 = vsel %vm16667_vm14, %v5665_v63, %v5672_v38  ;;  %v5849_v35 = vsel %vm16674_vm15, %v5674_v8, %v5848_v20  ;;  %v6058_v41 = vshll.u32 %v17028_v51, 16 }
 0x39a   : > { %v6047_v33 = vor.u32 %v6046_v53, %v6042_v55  ;;  %5847 = vst.msk [vmem:[#allocation2 + $0xb8] sm:$0xf] %vm5265_vm7, %v5673_v56  ;;  %5850 = vst [vmem:[#allocation2 + $0xbc] sm:$0x1] %v5849_v35  ;;  %v6064_v9 = vshll.u32 %v17035_v1, 16  ;;  %v6068_v17 = vshrl.u32 %v17035_v1, 16 }
 0x39b   : > { %v6074_v36 = vshll.u32 %v17040_v43, 16  ;;  %v6079_v45 = vshrl.u32 %v17042_v23, 16  ;;  %v6060_v5 = vrot.slane %v6058_v41, 5  ;;  %v6082_v10 = vshll.u32 %v17042_v23, 16  ;;  %v17083_v53 = vld [vmem:[#allocation2 + $0x6c] sm:$0xf] }
 0x39c   : > { %v6048_v62 = vrot.slane %v6047_v33, 4  ;;  %v6088_v28 = vshll.u32 %v17050_v48, 16  ;;  %v6066_v6 = vrot.slane %v6064_v9, 5  ;;  %v6070_v39 = vrot.slane %v6068_v17, 4  ;;  %v17088_v56 = vld [vmem:[#allocation2 + $0x70] sm:$0xf] }
 0x39d   : > { %v6076_v40 = vrot.slane %v6074_v36, 5  ;;  %v6081_v58 = vrot.slane %v6079_v45, 4  ;;  %v6061_v4 = vor.u32 %v6060_v5, %v6057_v21  ;;  %v6084_v16 = vrot.slane %v6082_v10, 5  ;;  %v17095_v5 = vld [vmem:[#allocation2 + $0x78] sm:$0xf] }
 0x39e   : > { %v6053_v49 = vsel %vm14731_vm2, %v6048_v62, %v6052_v22  ;;  %v6090_v15 = vrot.slane %v6088_v28, 5  ;;  %v6071_v63 = vor.u32 %v6070_v39, %v6066_v6  ;;  %v6092_v59 = vshrl.u32 %v17050_v48, 16 }
 0x39f   : > { %v12060_v34 = vcombine.low %v6043_v52, %v6053_v49  ;;  %v6098_v55 = vshll.u32 %v17063_v60, 16  ;;  %v6062_v19 = vrot.slane %v6061_v4, 4  ;;  %v6085_v26 = vor.u32 %v6084_v16, %v6081_v58 }
 0x3a0   : > { %v6103_v14 = vshrl.u32 %v17067_v46, 16  ;;  %v6106_v13 = vshll.u32 %v17067_v46, 16  ;;  %v6072_v12 = vrot.slane %v6071_v63, 4  ;;  %v6094_v57 = vrot.slane %v6092_v59, 4 }
 0x3a1   : > { %13239 = vmatmul.mubr.msk.bf16.gmra.mrb[8].mxu1 %vm6359_vm9, %v12060_v34  ;;  %v6100_v31 = vrot.slane %v6098_v55, 5  ;;  %v6112_v20 = vshll.u32 %v17071_v0, 16  ;;  %v6067_v30 = vsel %vm14731_vm2, %v6062_v19, %v6066_v6  ;;  %v6086_v38 = vrot.slane %v6085_v26, 4  ;;  %v17098_v6 = vld [vmem:[#allocation2 + $0x74] sm:$0x1] }
 0x3a2   : > { %v6105_v8 = vrot.slane %v6103_v14, 4  ;;  %v6108_v52 = vrot.slane %v6106_v13, 5  ;;  %v6077_v37 = vsel %vm14731_vm2, %v6072_v12, %v6076_v40  ;;  %v6095_v54 = vor.u32 %v6094_v57, %v6090_v15  ;;  %v17108_v19 = vld [vmem:[#allocation2 + $0x80] sm:$0x1]  ;;  %v17110_v26 = vld [vmem:[#allocation2 + $0x84] sm:$0xf] }
 0x3a3   : > { %v6114_v22 = vrot.slane %v6112_v20, 5  ;;  %v6116_v21 = vshrl.u32 %v17071_v0, 16  ;;  %v12061_v35 = vcombine.low %v6067_v30, %v6077_v37  ;;  %v6091_v33 = vsel %vm14731_vm2, %v6086_v38, %v6090_v15  ;;  %v17104_v15 = vld [vmem:[#allocation2 + $0x7c] sm:$0xf] }
 0x3a4   : > { %v6109_v41 = vor.u32 %v6108_v52, %v6105_v8  ;;  %v6122_v9 = vshll.u32 %v17075_v25, 16  ;;  %v6096_v17 = vrot.slane %v6095_v54, 4  ;;  %v6127_v45 = vshrl.u32 %v17083_v53, 16 }
 0x3a5   : > { %v6118_v36 = vrot.slane %v6116_v21, 4  ;;  %v6130_v62 = vshll.u32 %v17083_v53, 16  ;;  %13242 = vmatprep.mubr.msk.bf16.mxu1 %vm6359_vm9, %v12061_v35  ;;  %v6136_v39 = vshll.u32 %v17088_v56, 16  ;;  %v6140_v40 = vshrl.u32 %v17088_v56, 16 }
 0x3a6   : > { %v6110_v10 = vrot.slane %v6109_v41, 4  ;;  %v6124_v28 = vrot.slane %v6122_v9, 5  ;;  %v6101_v58 = vsel %vm14731_vm2, %v6096_v17, %v6100_v31  ;;  %v6129_v4 = vrot.slane %v6127_v45, 4  ;;  %v17114_v31 = vld [vmem:[#allocation2 + $0x88] sm:$0xf] }
 0x3a7   : > { %v6119_v49 = vor.u32 %v6118_v36, %v6114_v22  ;;  %v6132_v16 = vrot.slane %v6130_v62, 5  ;;  %v12062_v34 = vcombine.low %v6091_v33, %v6101_v58  ;;  %v6138_v59 = vrot.slane %v6136_v39, 5  ;;  %v17122_v9 = vld [vmem:[#allocation2 + $0x8c] sm:$0x1]  ;;  %v17124_v17 = vld [vmem:[#allocation2 + $0x90] sm:$0xf] }
 0x3a8   : > { %v6115_v63 = vsel %vm14731_vm2, %v6110_v10, %v6114_v22  ;;  %v6142_v55 = vrot.slane %v6140_v40, 4  ;;  %v6146_v12 = vshll.u32 %v17098_v6, 16  ;;  %v6151_v57 = vshrl.u32 %v17095_v5, 16 }
 0x3a9   : > { %v6120_v14 = vrot.slane %v6119_v49, 4  ;;  %v6133_v13 = vor.u32 %v6132_v16, %v6129_v4  ;;  %13243 = vmatmul.mubr.msk.bf16.gmra.mrb[12].mxu1 %vm6359_vm9, %v12062_v34  ;;  %v6154_v30 = vshll.u32 %v17095_v5, 16  ;;  %v6160_v38 = vshll.u32 %v17104_v15, 16 }
 0x3aa   : > { %v6143_v20 = vor.u32 %v6142_v55, %v6138_v59  ;;  %v6164_v8 = vshrl.u32 %v17104_v15, 16  ;;  %v6148_v54 = vrot.slane %v6146_v12, 5  ;;  %v6153_v22 = vrot.slane %v6151_v57, 4  ;;  %v17138_v12 = vld [vmem:[#allocation2 + $0x98] sm:$0x1] }
 0x3ab   : > { %v6125_v52 = vsel %vm14731_vm2, %v6120_v14, %v6124_v28  ;;  %v6134_v37 = vrot.slane %v6133_v13, 4  ;;  %v6156_v33 = vrot.slane %v6154_v30, 5  ;;  %v6162_v41 = vrot.slane %v6160_v38, 5  ;;  %v17130_v28 = vld [vmem:[#allocation2 + $0x94] sm:$0xf] }
 0x3ac   : > { %v12063_v21 = vcombine.low %v6115_v63, %v6125_v52  ;;  %v6144_v35 = vrot.slane %v6143_v20, 4  ;;  %v6166_v45 = vrot.slane %v6164_v8, 4  ;;  %v6170_v62 = vshll.u32 %v17108_v19, 16  ;;  %v17143_v8 = vld [vmem:[#allocation2 + $0x9c] sm:$0xf] }
 0x3ad   : > { %v6139_v36 = vsel %vm14731_vm2, %v6134_v37, %v6138_v59  ;;  %v6175_v10 = vshrl.u32 %v17110_v26, 16  ;;  %v6157_v40 = vor.u32 %v6156_v33, %v6153_v22  ;;  %v6178_v58 = vshll.u32 %v17110_v26, 16 }
 0x3ae   : > { %13246 = vmatprep.mubr.msk.bf16.mxu1 %vm6359_vm9, %v12063_v21  ;;  %v6149_v39 = vsel %vm14731_vm2, %v6144_v35, %v6148_v54  ;;  %v6184_v49 = vshll.u32 %v17114_v31, 16  ;;  %v6167_v16 = vor.u32 %v6166_v45, %v6162_v41  ;;  %v6172_v34 = vrot.slane %v6170_v62, 5  ;;  %v17149_v21 = vld [vmem:[#allocation2 + $0xa0] sm:$0xf] }
 0x3af   : > { %v12064_v4 = vcombine.low %v6139_v36, %v6149_v39  ;;  %v6177_v63 = vrot.slane %v6175_v10, 4  ;;  %v6158_v59 = vrot.slane %v6157_v40, 4  ;;  %v6180_v55 = vrot.slane %v6178_v58, 5 }
 0x3b0   : > { %v6186_v14 = vrot.slane %v6184_v49, 5  ;;  %v6188_v13 = vshrl.u32 %v17114_v31, 16  ;;  %v6168_v57 = vrot.slane %v6167_v16, 4  ;;  %v6194_v20 = vshll.u32 %v17122_v9, 16 }
 0x3b1   : > { %v6199_v30 = vshrl.u32 %v17124_v17, 16  ;;  %v6202_v38 = vshll.u32 %v17124_v17, 16  ;;  %13247 = vmatmul.mubr.msk.bf16.gmra.mrb[16].mxu1 %vm6359_vm9, %v12064_v4  ;;  %v6163_v52 = vsel %vm14731_vm2, %v6158_v59, %v6162_v41  ;;  %v6181_v37 = vor.u32 %v6180_v55, %v6177_v63  ;;  %v17159_v63 = vld [vmem:[#allocation2 + $0xa4] sm:$0x1] }
 0x3b2   : > { %v6190_v54 = vrot.slane %v6188_v13, 4  ;;  %v6208_v22 = vshll.u32 %v17130_v28, 16  ;;  %v6173_v35 = vsel %vm14731_vm2, %v6168_v57, %v6172_v34  ;;  %v6196_v33 = vrot.slane %v6194_v20, 5 }
 0x3b3   : > { %v6201_v36 = vrot.slane %v6199_v30, 4  ;;  %v6204_v45 = vrot.slane %v6202_v38, 5  ;;  %v12065_v62 = vcombine.low %v6163_v52, %v6173_v35  ;;  %v6182_v10 = vrot.slane %v6181_v37, 4  ;;  %v17163_v38 = vld [vmem:[#allocation2 + $0xa8] sm:$0xf] }
 0x3b4   : > { %v6191_v39 = vor.u32 %v6190_v54, %v6186_v14  ;;  %v6210_v40 = vrot.slane %v6208_v22, 5  ;;  %v6212_v49 = vshrl.u32 %v17130_v28, 16  ;;  %v6218_v41 = vshll.u32 %v17138_v12, 16  ;;  %v17168_v22 = vld [vmem:[#allocation2 + $0xac] sm:$0xf] }
 0x3b5   : > { %v6205_v58 = vor.u32 %v6204_v45, %v6201_v36  ;;  %v6223_v4 = vshrl.u32 %v17143_v8, 16  ;;  %13250 = vmatprep.mubr.msk.bf16.mxu1 %vm6359_vm9, %v12065_v62  ;;  %v6187_v16 = vsel %vm14731_vm2, %v6182_v10, %v6186_v14  ;;  %v6226_v59 = vshll.u32 %v17143_v8, 16 }
 0x3b6   : > { %v6192_v34 = vrot.slane %v6191_v39, 4  ;;  %v6232_v55 = vshll.u32 %v17149_v21, 16  ;;  %v6214_v57 = vrot.slane %v6212_v49, 4  ;;  %v6220_v20 = vrot.slane %v6218_v41, 5 }
 0x3b7   : > { %v6206_v13 = vrot.slane %v6205_v58, 4  ;;  %v6225_v30 = vrot.slane %v6223_v4, 4  ;;  %v6228_v37 = vrot.slane %v6226_v59, 5  ;;  %v6236_v14 = vshrl.u32 %v17149_v21, 16  ;;  %v17173_v58 = vld [vmem:[#allocation2 + $0xb0] sm:$0x1] }
 0x3b8   : > { %v6197_v52 = vsel %vm14731_vm2, %v6192_v34, %v6196_v33  ;;  %v6234_v54 = vrot.slane %v6232_v55, 5  ;;  %v6215_v45 = vor.u32 %v6214_v57, %v6210_v40  ;;  %v6242_v62 = vshll.u32 %v17159_v63, 16  ;;  %19406 = vst [vmem:[#allocation8_spill] sm:$0xff] %v17173_v58  ;;  %v17180_v57 = vld [vmem:[#allocation2 + $0xb4] sm:$0xf] }
 0x3b9   : > { %v12066_v35 = vcombine.low %v6187_v16, %v6197_v52  ;;  %v6211_v36 = vsel %vm14731_vm2, %v6206_v13, %v6210_v40  ;;  %v6229_v10 = vor.u32 %v6228_v37, %v6225_v30  ;;  %v6238_v39 = vrot.slane %v6236_v14, 4 }
 0x3ba   : > { %v6247_v49 = vshrl.u32 %v17163_v38, 16  ;;  %v6250_v33 = vshll.u32 %v17163_v38, 16  ;;  %v6216_v41 = vrot.slane %v6215_v45, 4  ;;  %v6244_v4 = vrot.slane %v6242_v62, 5 }
 0x3bb   : > { %13251 = vmatmul.mubr.msk.bf16.gmra.mrb[20].mxu1 %vm6359_vm9, %v12066_v35  ;;  %v6256_v16 = vshll.u32 %v17168_v22, 16  ;;  %v6260_v34 = vshrl.u32 %v17168_v22, 16  ;;  %v6230_v59 = vrot.slane %v6229_v10, 4  ;;  %v6239_v40 = vor.u32 %v6238_v39, %v6234_v54  ;;  %v17185_v35 = vld [vmem:[#allocation2 + $0xb8] sm:$0xf] }
 0x3bc   : > { %v6249_v55 = vrot.slane %v6247_v49, 4  ;;  %v6252_v13 = vrot.slane %v6250_v33, 5  ;;  %v6221_v30 = vsel %vm14731_vm2, %v6216_v41, %v6220_v20  ;;  %v6266_v14 = vshll.u32 %v17173_v58, 16  ;;  %v17189_v33 = vld [vmem:[#allocation2 + $0xbc] sm:$0x1] }
 0x3bd   : > { %v6258_v52 = vrot.slane %v6256_v16, 5  ;;  %v6262_v37 = vrot.slane %v6260_v34, 4  ;;  %v12067_v45 = vcombine.low %v6211_v36, %v6221_v30  ;;  %v6235_v62 = vsel %vm14731_vm2, %v6230_v59, %v6234_v54 }
 0x3be   : > { %v6240_v32 = vrot.slane %v6239_v40, 4  ;;  %v6253_v10 = vor.u32 %v6252_v13, %v6249_v55  ;;  %v6268_v49 = vrot.slane %v6266_v14, 5  ;;  %v6271_v42 = vshrl.u32 %v17180_v57, 16 }
 0x3bf   : > { %v6263_v39 = vor.u32 %v6262_v37, %v6258_v52  ;;  %v6274_v20 = vshll.u32 %v17180_v57, 16  ;;  %13254 = vmatprep.mubr.msk.bf16.mxu1 %vm6359_vm9, %v12067_v45  ;;  %v6280_v36 = vshll.u32 %v17185_v35, 16  ;;  %v6284_v54 = vshrl.u32 %v17185_v35, 16 }
 0x3c0   : > { %v6245_v41 = vsel %vm14731_vm2, %v6240_v32, %v6244_v4  ;;  %v6254_v16 = vrot.slane %v6253_v10, 4  ;;  %v6273_v40 = vrot.slane %v6271_v42, 4  ;;  %v6290_v37 = vshll.u32 %v17189_v33, 16  ;;  %v17204_v42 = vld [vmem:[#allocation2 + $0x4] sm:$0xf] }
 0x3c1   : > { %v12068_v34 = vcombine.low %v6235_v62, %v6245_v41  ;;  %v6264_v59 = vrot.slane %v6263_v39, 4  ;;  %v6276_v55 = vrot.slane %v6274_v20, 5  ;;  %v6282_v13 = vrot.slane %v6280_v36, 5  ;;  %v14519_v39 = vld [vmem:[#allocation2] sm:$0xf] }
 0x3c2   : > { %v6286_v30 = vrot.slane %v6284_v54, 4  ;;  %v6259_v14 = vsel %vm14731_vm2, %v6254_v16, %v6258_v52  ;;  %v6292_v62 = vrot.slane %v6290_v37, 5  ;;  %v12089_v20 = vcombine.low %v14519_v39, %v17204_v42 }
 0x3c3   : > { %13255 = vmatmul.mubr.msk.bf16.gmra.mrb[24].mxu1 %vm6359_vm9, %v12068_v34  ;;  %v6269_v32 = vsel %vm14731_vm2, %v6264_v59, %v6268_v49  ;;  %v6277_v4 = vor.u32 %v6276_v55, %v6273_v40  ;;  %v12094_v41 = vcombine.low %v17006_v18, %v17012_v47  ;;  %v6965_v59 = vrot.slane %v17040_v43, 5  ;;  %v17269_v43 = vld [vmem:[%s19213_s3 + $0x30] sm:$0xff]  }
 0x3c4   : > { %v12069_v45 = vcombine.low %v6259_v14, %v6269_v32  ;;  %v6287_v10 = vor.u32 %v6286_v30, %v6282_v13  ;;  %v6875_v32 = vld [vmem:[#allocation2 + $0x3c] sm:$0xe]  ;;  %v6877_v14 = vld [vmem:[#allocation2 + $0x54] sm:$0xe]  ;;  %v6878_v30 = vld [vmem:[#allocation2 + $0x60] sm:$0xe] }
 0x3c5   : > { %v6278_v58 = vrot.slane %v6277_v4, 4  ;;  %v6876_v4 = vld [vmem:[#allocation2 + $0x48] sm:$0xe]  ;;  %v6882_v34 = vld [vmem:[#allocation2 + $0x90] sm:$0xe]  ;;  %v7014_v16 = vrot.slane %v17159_v63, 5 }
 0x3c6   : > { %13258 = vmatprep.mubr.msk.bf16.mxu1 %vm6359_vm9, %v12069_v45  ;;  %v6288_v36 = vrot.slane %v6287_v10, 4  ;;  %v6955_v45 = vrot.slane %v17012_v47, 5  ;;  %v14521_v10 = vld [vmem:[#allocation2 + $0xc] sm:$0xf]  ;;  %v12129_v37 = vrot.slane %v6876_v4, 9  ;;  %v12131_v4 = vrot.slane %v6878_v30, 9 }
 0x3c7   : > { %v6283_v54 = vsel %vm14731_vm2, %v6278_v58, %v6282_v13  ;;  %v6958_v58 = vrot.slane %v17026_v11, 5  ;;  %v6969_v11 = vrot.slane %v17050_v48, 5  ;;  %v6979_v30 = vrot.slane %v17075_v25, 5  ;;  %v8455_v18 = vld [vmem:[#allocation2 + $0x90] sm:$0xe] }
 0x3c8   : > { %v6293_v55 = vsel %vm14731_vm2, %v6288_v36, %v6292_v62  ;;  %v17237_v62 = vld [vmem:[#allocation2 + $0x10] sm:$0xf]  ;;  %v14203_v36 = vld [vmem:[%s19213_s3 + $0x28] sm:$0xff]  }
 0x3c9   : > { %v12070_v13 = vcombine.low %v6283_v54, %v6293_v55  ;;  %v12090_v39 = vcombine.low %v14521_v10, %v17237_v62  ;;  %v12128_v54 = vrot.slane %v6875_v32, 9  ;;  %v6962_v55 = vrot.slane %v17035_v1, 5  ;;  %v17627_v63 = vld [vmem:[#allocation2 + $0xac] sm:$0xf] }
 0x3ca   : > { %v12092_v10 = vcombine.low %v16958_v7, %v16968_v24  ;;  %v12130_v7 = vrot.slane %v6877_v14, 9 }
 0x3cb   : > { %13259 = vmatmul.mubr.msk.bf16.gmra.mrb[28].mxu1 %vm6359_vm9, %v12070_v13  ;;  %v6957_v13 = vrot.slane %v6955_v45, 4  ;;  %v17252_v40 = vsel %vm15047_vm6, %v12128_v54, %v6955_v45  ;;  %v6964_v32 = vrot.slane %v6962_v55, 4  ;;  %v6879_v45 = vld [vmem:[#allocation2 + $0x6c] sm:$0xe]  ;;  %v6971_v54 = vrot.slane %v6969_v11, 4 }
 0x3cc   : > { %13266 = vmatprep.mubr.msk.bf16.mxu1 %vm6359_vm9, %v12089_v20  ;;  %v12091_v20 = vcombine.low %v16894_v2, %v16896_v44  ;;  %v17263_v44 = vsel %vm15047_vm6, %v12129_v37, %v6962_v55  ;;  %v6976_v37 = vrot.slane %v17071_v0, 5  ;;  %v6972_v55 = vrot.slane %v17063_v60, 5 }
 0x3cd   : > { %v17259_v2 = vsel %vm15047_vm6, %v6957_v13, %v6958_v58  ;;  %v17275_v58 = vsel %vm15047_vm6, %v6964_v32, %v6965_v59  ;;  %v6983_v32 = vrot.slane %v17088_v56, 5  ;;  %v6990_v60 = vrot.slane %v17104_v15, 5 }
 0x3ce   : > { %v17287_v13 = vsel %vm15047_vm6, %v12131_v4, %v6976_v37  ;;  %v6978_v59 = vrot.slane %v6976_v37, 4  ;;  %v17293_v14 = vsel %vm15047_vm6, %v6971_v54, %v6972_v55  ;;  %v12093_v54 = vcombine.low %v16977_v50, %v16991_v61 }
 0x3cf   : > { %v6985_v37 = vrot.slane %v6983_v32, 4  ;;  %v6993_v55 = vrot.slane %v17108_v19, 5 }
 0x3d0   : > { %v17302_v25 = vsel %vm15047_vm6, %v6978_v59, %v6979_v30  ;;  %v6997_v59 = vrot.slane %v17114_v31, 5 }
 0x3d3   : > { %13267 = vmatmul.mubr.msk.bf16.vlgmr.msra.gmra.mrb[0].mxu1 %vm6359_vm9, %v12090_v39  ;;  %v17282_v39 = vsel %vm15047_vm6, %v12130_v7, %v6969_v11  ;;  %v12132_v7 = vrot.slane %v6879_v45, 9  ;;  %v6986_v11 = vrot.slane %v17098_v6, 5  ;;  %v6992_v45 = vrot.slane %v6990_v60, 4 }
 0x3d4   : > { %13299 = vmatpush3.bf16.msra.mxu1 %v16939_v27  ;;  %13270 = vmatprep.mubr.msk.bf16.mxu1 %vm6359_vm9, %v12091_v20  ;;  %v6880_v20 = vld [vmem:[#allocation2 + $0x78] sm:$0xe]  ;;  %v6881_v27 = vld [vmem:[#allocation2 + $0x84] sm:$0xe]  ;;  %v7007_v6 = vrot.slane %v17138_v12, 5 }
 0x3d5   : > { %13300 = vmatprep.subr.bf16.mxu1 %v14203_v36  ;;  %v17312_v4 = vsel %vm15047_vm6, %v12132_v7, %v6983_v32  ;;  %v12134_v30 = vrot.slane %v6881_v27, 9  ;;  %v7004_v32 = vrot.slane %v17130_v28, 5  ;;  %v6883_v7 = vld [vmem:[#allocation2 + $0x9c] sm:$0xe]  ;;  %v6884_v27 = vld [vmem:[#allocation2 + $0xa8] sm:$0xe] }
 0x3d7   : > { %v7006_v19 = vrot.slane %v7004_v32, 4 }
 0x3d8   : > { %13301 = vmatpush3.bf16.msra.mxu1 %v14203_v36  ;;  %v12133_v36 = vrot.slane %v6880_v20, 9  ;;  %v17316_v20 = vsel %vm15047_vm6, %v6985_v37, %v6986_v11  ;;  %v7000_v37 = vrot.slane %v17122_v9, 5  ;;  %v12136_v9 = vrot.slane %v6883_v7, 9  ;;  %v6885_v7 = vld [vmem:[#allocation2 + $0xb4] sm:$0xe] }
 0x3d9   : > { %13334 = vmatprep.subr.bf16.mxu1 %v17269_v43  ;;  %v17353_v12 = vsel %vm15047_vm6, %v7006_v19, %v7007_v6  ;;  %v7025_v6 = vrot.slane %v17185_v35, 5  ;;  %v12138_v47 = vrot.slane %v6885_v7, 9 }
 0x3da   : > { %v17320_v50 = vsel %vm15047_vm6, %v12133_v36, %v6990_v60  ;;  %v6999_v60 = vrot.slane %v6997_v59, 4  ;;  %v12135_v36 = vrot.slane %v6882_v34, 9  ;;  %v7018_v34 = vrot.slane %v17168_v22, 5 }
 0x3db   : > { %13271 = vmatmul.mubr.msk.bf16.gmra.mrb[4].mxu1 %vm6359_vm9, %v12092_v10  ;;  %v17328_v10 = vsel %vm15047_vm6, %v6992_v45, %v6993_v55  ;;  %v7011_v45 = vrot.slane %v17149_v21, 5 }
 0x3dc   : > { %13274 = vmatprep.mubr.msk.bf16.mxu1 %vm6359_vm9, %v12093_v54  ;;  %v17336_v54 = vsel %vm15047_vm6, %v12134_v30, %v6997_v59  ;;  %v17342_v55 = vsel %vm15047_vm6, %v6999_v60, %v7000_v37  ;;  %v17346_v11 = vsel %vm15047_vm6, %v12135_v36, %v7004_v32  ;;  %v12137_v37 = vrot.slane %v6884_v27, 9  ;;  %v19407_v32 = vld [vmem:[#allocation8_spill] sm:$0xff]  ;;  %v8456_v60 = vld [vmem:[#allocation2 + $0x9c] sm:$0xe] }
 0x3dd   : > { %v7013_v30 = vrot.slane %v7011_v45, 4  ;;  %v7020_v49 = vrot.slane %v7018_v34, 4  ;;  %v7021_v36 = vrot.slane %v19407_v32, 5  ;;  %v17361_v52 = vsel %vm15047_vm6, %v12136_v9, %v7011_v45 }
 0x3de   : > { %v17376_v19 = vsel %vm15047_vm6, %v12137_v37, %v7018_v34  ;;  %v7028_v27 = vrot.slane %v17189_v33, 5  ;;  %v17391_v9 = vsel %vm15047_vm6, %v12138_v47, %v7025_v6  ;;  %v19410_v34 = vcombine.low %v17067_v46, %v17071_v0  ;;  %v6870_v0 = vld [vmem:[#allocation2] sm:$0xe]  ;;  %v14526_v47 = vld [vmem:[#allocation2 + $0x20] sm:$0x1] }
 0x3df   : > { %v17365_v59 = vsel %vm15047_vm6, %v7013_v30, %v7014_v16  ;;  %v17380_v45 = vsel %vm15047_vm6, %v7020_v49, %v7021_v36  ;;  %v19408_v16 = vcombine.low %v17028_v51, %v17035_v1  ;;  %v19409_v1 = vcombine.low %v17042_v23, %v17050_v48 }
 0x3e0   : > { %v19411_v33 = vcombine.low %v17083_v53, %v17088_v56  ;;  %v19412_v30 = vcombine.low %v17095_v5, %v17104_v15  ;;  %v19413_v23 = vcombine.low %v17110_v26, %v17114_v31  ;;  %v19414_v48 = vcombine.low %v17124_v17, %v17130_v28  ;;  %v14523_v53 = vld [vmem:[#allocation2 + $0x8] sm:$0x1]  ;;  %v14524_v28 = vld [vmem:[#allocation2 + $0x1c] sm:$0xf] }
 0x3e1   : > { %v6920_v46 = vrot.slane %v17204_v42, 5  ;;  %v6923_v56 = vrot.slane %v14523_v53, 5  ;;  %v12123_v37 = vrot.slane %v6870_v0, 9  ;;  %v19415_v5 = vcombine.low %v17143_v8, %v17149_v21  ;;  %v6871_v21 = vld [vmem:[#allocation2 + $0xc] sm:$0xe] }
 0x3e2   : > { %v19416_v15 = vcombine.low %v17163_v38, %v17168_v22  ;;  %v6927_v17 = vrot.slane %v17237_v62, 5  ;;  %v6934_v42 = vrot.slane %v14524_v28, 5  ;;  %v19417_v8 = vcombine.low %v17180_v57, %v17185_v35  ;;  %v14525_v22 = vld [vmem:[#allocation2 + $0x14] sm:$0x1] }
 0x3e3   : > { %13275 = vmatmul.mubr.msk.bf16.gmra.mrb[8].mxu1 %vm6359_vm9, %v12094_v41  ;;  %v7027_v41 = vrot.slane %v7025_v6, 4  ;;  %v6922_v32 = vrot.slane %v6920_v46, 4  ;;  %v6921_v26 = vsel %vm15047_vm6, %v12123_v37, %v6920_v46  ;;  %v6930_v6 = vrot.slane %v14525_v22, 5  ;;  %v6874_v37 = vld [vmem:[#allocation2 + $0x30] sm:$0xe] }
 0x3e4   : > { %13278 = vmatprep.mubr.msk.bf16.mxu1 %vm6359_vm9, %v19408_v16  ;;  %v6929_v7 = vrot.slane %v6927_v17, 4  ;;  %v6936_v38 = vrot.slane %v6934_v42, 4  ;;  %v6872_v16 = vld [vmem:[#allocation2 + $0x18] sm:$0xe]  ;;  %v6948_v35 = vrot.slane %v16991_v61, 5 }
 0x3e5   : > { %v17395_v49 = vsel %vm15047_vm6, %v7027_v41, %v7028_v27  ;;  %v6924_v31 = vsel %vm15047_vm6, %v6922_v32, %v6923_v56  ;;  %v6937_v41 = vrot.slane %v14526_v47, 5  ;;  %v12124_v27 = vrot.slane %v6871_v21, 9  ;;  %v19418_v61 = vld [vmem:[#allocation6_spill] sm:$0xff]  ;;  %v19419_v32 = vld [vmem:[#allocation7_spill] sm:$0xff]  ;;  %v17486_v22 = vld [vmem:[#allocation2 + $0x2c] sm:$0x1] }
 0x3e6   : > { %v12143_v36 = vcombine.low %v6921_v26, %v6924_v31  ;;  %v6931_v62 = vsel %vm15047_vm6, %v6929_v7, %v6930_v6  ;;  %v6950_v53 = vrot.slane %v6948_v35, 4  ;;  %v6944_v56 = vrot.slane %v19418_v61, 5  ;;  %v8446_v6 = vld [vmem:[#allocation2 + $0x24] sm:$0xe] }
 0x3e7   : > { %v6938_v57 = vsel %vm15047_vm6, %v6936_v38, %v6937_v41  ;;  %v19421_v21 = vcombine.low %v17263_v44, %v17275_v58  ;;  %v17484_v38 = vld [vmem:[#allocation2 + $0x28] sm:$0xf]  ;;  %v8447_v41 = vld [vmem:[#allocation2 + $0x30] sm:$0xe]  ;;  %v17497_v44 = vld [vmem:[#allocation2 + $0x40] sm:$0xf] }
 0x3e8   : > { %v8524_v47 = vrot.slane %v17484_v38, 5  ;;  %v8448_v58 = vld [vmem:[#allocation2 + $0x3c] sm:$0xe] }
 0x3eb   : > { %13279 = vmatmul.mubr.msk.bf16.gmra.mrb[12].mxu1 %vm6359_vm9, %v19409_v1  ;;  %v6941_v1 = vrot.slane %v16968_v24, 5  ;;  %v6873_v24 = vld [vmem:[#allocation2 + $0x24] sm:$0xe] }
 0x3ec   : > { %13282 = vmatprep.mubr.msk.bf16.mxu1 %vm6359_vm9, %v19410_v34  ;;  %v12125_v34 = vrot.slane %v6872_v16, 9  ;;  %v12126_v26 = vrot.slane %v6873_v24, 9  ;;  %v17488_v16 = vld [vmem:[#allocation2 + $0x34] sm:$0xf] }
 0x3ed   : > { %v6943_v0 = vrot.slane %v6941_v1, 4 }
 0x3ee   : > { %v6942_v28 = vsel %vm15047_vm6, %v12126_v26, %v6941_v1  ;;  %v12255_v1 = vrot.slane %v8446_v6, 9 }
 0x3ef   : > { %v6945_v31 = vsel %vm15047_vm6, %v6943_v0, %v6944_v56  ;;  %v17522_v0 = vld [vmem:[#allocation2 + $0x64] sm:$0xf] }
 0x3f3   : > { %13283 = vmatmul.mubr.msk.bf16.gmra.mrb[16].mxu1 %vm6359_vm9, %v19411_v33  ;;  %v6928_v33 = vsel %vm15047_vm6, %v12124_v27, %v6927_v17  ;;  %v12127_v17 = vrot.slane %v6874_v37, 9  ;;  %v19423_v27 = vcombine.low %v17287_v13, %v17302_v25  ;;  %v17515_v13 = vsel %vm15047_vm6, %v12255_v1, %v8524_v47  ;;  %v8450_v37 = vld [vmem:[#allocation2 + $0x54] sm:$0xe]  ;;  %v17559_v1 = vld [vmem:[#allocation2 + $0x74] sm:$0x1] }
 0x3f4   : > { %13286 = vmatprep.mubr.msk.bf16.mxu1 %vm6359_vm9, %v19412_v30  ;;  %v12144_v30 = vcombine.low %v6928_v33, %v6931_v62  ;;  %v17503_v62 = vld [vmem:[#allocation2 + $0x44] sm:$0x1]  ;;  %v8531_v33 = vrot.slane %v17488_v16, 5  ;;  %19424 = vst [vmem:[#allocation9_spill] sm:$0xff] %v17515_v13 }
 0x3f6   : > { %v8533_v61 = vrot.slane %v8531_v33, 4 }
 0x3fb   : > { %13287 = vmatmul.mubr.msk.bf16.gmra.mrb[20].mxu1 %vm6359_vm9, %v19413_v23  ;;  %v6935_v23 = vsel %vm15047_vm6, %v12125_v34, %v6934_v42  ;;  %v12146_v42 = vcombine.low %v6942_v28, %v6945_v31  ;;  %v8526_v34 = vrot.slane %v8524_v47, 4  ;;  %v8541_v31 = vrot.slane %v17503_v62, 5 }
 0x3fc   : > { %13290 = vmatprep.mubr.msk.bf16.mxu1 %vm6359_vm9, %v19414_v48  ;;  %v14212_v48 = vld [vmem:[%s19213_s3 + $0x38] sm:$0xff]   ;;  %v12145_v46 = vcombine.low %v6935_v23, %v6938_v57  ;;  %v8527_v57 = vrot.slane %v17486_v22, 5  ;;  %v12257_v23 = vrot.slane %v8448_v58, 9  ;;  %v19430_v58 = vcombine.low %v17312_v4, %v17316_v20  ;;  %v17574_v20 = vld [vmem:[#allocation2 + $0x80] sm:$0x1] }
 0x3fd   : > { %v17572_v4 = vld [vmem:[#allocation2 + $0x7c] sm:$0xf] }
 0x3fe   : > { %v17519_v25 = vsel %vm15047_vm6, %v8526_v34, %v8527_v57 }
 0x3ff   : > { %19425 = vst [vmem:[#allocation10_spill] sm:$0xff] %v17519_v25 }
 0x403   : > { %13291 = vmatmul.mubr.msk.bf16.gmra.mrb[24].mxu1 %vm6359_vm9, %v19415_v5  ;;  %v6951_v5 = vrot.slane %v19419_v32, 5  ;;  %v17531_v32 = vld [vmem:[#allocation2 + $0x5c] sm:$0x1] }
 0x404   : > { %13294 = vmatprep.mubr.msk.bf16.mxu1 %vm6359_vm9, %v19416_v15  ;;  %v17463_v15 = vld [vmem:[%s19213_s3 + $0x40] sm:$0xff]  }
 0x40b   : > { %13295 = vmatmul.mubr.msk.bf16.gmra.mrb[28].mxu1 %vm6359_vm9, %v19417_v8  ;;  %v19420_v8 = vcombine.low %v17252_v40, %v17259_v2  ;;  %v19422_v40 = vcombine.low %v17282_v39, %v17293_v14  ;;  %v17495_v2 = vld [vmem:[#allocation2 + $0x38] sm:$0x1]  ;;  %v17508_v14 = vld [vmem:[#allocation2 + $0x50] sm:$0x1]  ;;  %v12256_v39 = vrot.slane %v8447_v41, 9  ;;  %v12259_v41 = vrot.slane %v8450_v37, 9 }
 0x40c   : > { %13302 = vmatprep.mubr.msk.bf16.mxu1 %vm6359_vm9, %v12143_v36  ;;  %v6949_v36 = vsel %vm15047_vm6, %v12127_v17, %v6948_v35  ;;  %v17506_v35 = vld [vmem:[#allocation2 + $0x4c] sm:$0xf]  ;;  %v8534_v56 = vrot.slane %v17495_v2, 5  ;;  %v17585_v37 = vld [vmem:[#allocation2 + $0x88] sm:$0xf] }
 0x40d   : > { %v8545_v17 = vrot.slane %v17506_v35, 5  ;;  %v8580_v34 = vrot.slane %v17585_v37, 5 }
 0x40f   : > { %v8547_v47 = vrot.slane %v8545_v17, 4 }
 0x413   : > { %13303 = vmatmul.mubr.msk.bf16.vlgmr.msra.gmra.mrb[0].mxu1 %vm6359_vm9, %v12144_v30  ;;  %v17511_v30 = vld [vmem:[#allocation2 + $0x58] sm:$0xf] }
 0x414   : > { %13335 = vmatpush3.bf16.msra.mxu1 %v17269_v43  ;;  %13306 = vmatprep.mubr.msk.bf16.mxu1 %vm6359_vm9, %v12145_v46  ;;  %v6952_v43 = vsel %vm15047_vm6, %v6950_v53, %v6951_v5  ;;  %v8449_v46 = vld [vmem:[#allocation2 + $0x48] sm:$0xe]  ;;  %v17528_v53 = vsel %vm15047_vm6, %v12256_v39, %v8531_v33  ;;  %v8555_v33 = vrot.slane %v17531_v32, 5 }
 0x415   : > { %13336 = vmatprep.subr.bf16.mxu1 %v14212_v48  ;;  %v12147_v7 = vcombine.low %v6949_v36, %v6952_v43  ;;  %19426 = vst [vmem:[#allocation11_spill] sm:$0xff] %v17528_v53  ;;  %v17541_v43 = vsel %vm15047_vm6, %v8533_v61, %v8534_v56  ;;  %v12258_v28 = vrot.slane %v8449_v46, 9  ;;  %v8552_v36 = vrot.slane %v17511_v30, 5 }
 0x416   : > { %19428 = vst [vmem:[#allocation8_spill] sm:$0xff] %v17541_v43  ;;  %v8559_v56 = vrot.slane %v17522_v0, 5 }
 0x417   : > { %v17565_v57 = vsel %vm15047_vm6, %v12258_v28, %v8545_v17  ;;  %v8554_v39 = vrot.slane %v8552_v36, 4  ;;  %v17582_v46 = vsel %vm15047_vm6, %v12259_v41, %v8552_v36  ;;  %v8453_v17 = vld [vmem:[#allocation2 + $0x78] sm:$0xe]  ;;  %v17594_v28 = vld [vmem:[#allocation2 + $0x8c] sm:$0x1] }
 0x418   : > { %13337 = vmatpush3.bf16.msra.mxu1 %v14212_v48  ;;  %v8538_v48 = vrot.slane %v17497_v44, 5  ;;  %19431 = vst [vmem:[#allocation7_spill] sm:$0xff] %v17565_v57  ;;  %19434 = vst [vmem:[#allocation14_spill] sm:$0xff] %v17582_v46  ;;  %v8454_v41 = vld [vmem:[#allocation2 + $0x84] sm:$0xe] }
 0x419   : > { %13370 = vmatprep.subr.bf16.mxu1 %v17463_v15  ;;  %v12263_v51 = vrot.slane %v8454_v41, 9  ;;  %v7718_v57 = vld [vmem:[#allocation2 + $0x3c] sm:$0xf] }
 0x41a   : > { %v17535_v5 = vsel %vm15047_vm6, %v12257_v23, %v8538_v48  ;;  %v8540_v26 = vrot.slane %v8538_v48, 4  ;;  %v19432_v23 = vcombine.low %v17320_v50, %v17328_v10  ;;  %v17591_v10 = vsel %vm15047_vm6, %v8554_v39, %v8555_v33 }
 0x41b   : > { %13307 = vmatmul.mubr.msk.bf16.gmra.mrb[4].mxu1 %vm6359_vm9, %v12146_v42  ;;  %19427 = vst [vmem:[#allocation12_spill] sm:$0xff] %v17535_v5  ;;  %v8548_v42 = vrot.slane %v17508_v14, 5  ;;  %19435 = vst [vmem:[#allocation15_spill] sm:$0xff] %v17591_v10  ;;  %v8569_v33 = vrot.slane %v17559_v1, 5  ;;  %v8576_v50 = vrot.slane %v17574_v20, 5  ;;  %v19440_v10 = vcombine.low %v17336_v54, %v17342_v55 }
 0x41c   : > { %13310 = vmatprep.mubr.msk.bf16.mxu1 %vm6359_vm9, %v12147_v7  ;;  %v8451_v7 = vld [vmem:[#allocation2 + $0x60] sm:$0xe]  ;;  %v17551_v6 = vsel %vm15047_vm6, %v8540_v26, %v8541_v31  ;;  %v19444_v54 = vcombine.low %v17346_v11, %v17353_v12  ;;  %v17655_v55 = vld [vmem:[#allocation2 + $0xb8] sm:$0xf]  ;;  %v7851_v5 = vshrl.u32 %v7718_v57, 16 }
 0x41d   : > { %19429 = vst [vmem:[#allocation6_spill] sm:$0xff] %v17551_v6  ;;  %v17578_v48 = vsel %vm15047_vm6, %v8547_v47, %v8548_v42  ;;  %v12260_v61 = vrot.slane %v8451_v7, 9  ;;  %v8561_v7 = vrot.slane %v8559_v56, 4  ;;  %v17611_v42 = vld [vmem:[#allocation2 + $0x98] sm:$0x1]  ;;  %v14221_v6 = vld [vmem:[#allocation2 + $0x60] sm:$0xff]  }
 0x41e   : > { %19433 = vst [vmem:[#allocation13_spill] sm:$0xff] %v17578_v48 }
 0x41f   : > { %v17600_v36 = vsel %vm15047_vm6, %v12260_v61, %v8559_v56  ;;  %v12262_v56 = vrot.slane %v8453_v17, 9  ;;  %v17648_v17 = vsel %vm15047_vm6, %v12263_v51, %v8580_v34 }
 0x420   : > { %19436 = vst [vmem:[#allocation16_spill] sm:$0xff] %v17600_v36  ;;  %19443 = vst [vmem:[#allocation22_spill] sm:$0xff] %v17648_v17 }
 0x423   : > { %13311 = vmatmul.mubr.msk.bf16.gmra.mrb[8].mxu1 %vm6359_vm9, %v19420_v8  ;;  %v17545_v8 = vld [vmem:[#allocation2 + $0x70] sm:$0xf] }
 0x424   : > { %13314 = vmatprep.mubr.msk.bf16.mxu1 %vm6359_vm9, %v19421_v21  ;;  %v8566_v31 = vrot.slane %v17545_v8, 5  ;;  %v17619_v21 = vld [vmem:[#allocation2 + $0xa0] sm:$0xf] }
 0x425   : > { %v8594_v51 = vrot.slane %v17619_v21, 5 }
 0x426   : > { %v8568_v39 = vrot.slane %v8566_v31, 4 }
 0x42b   : > { %13315 = vmatmul.mubr.msk.bf16.gmra.mrb[12].mxu1 %vm6359_vm9, %v19422_v40  ;;  %v8452_v40 = vld [vmem:[#allocation2 + $0x6c] sm:$0xe] }
 0x42c   : > { %13318 = vmatprep.mubr.msk.bf16.mxu1 %vm6359_vm9, %v19423_v27  ;;  %v17557_v27 = vld [vmem:[#allocation2 + $0x68] sm:$0x1]  ;;  %v12261_v26 = vrot.slane %v8452_v40, 9 }
 0x42d   : > { %v8562_v47 = vrot.slane %v17557_v27, 5 }
 0x42e   : > { %v17607_v40 = vsel %vm15047_vm6, %v12261_v26, %v8566_v31  ;;  %v17625_v31 = vsel %vm15047_vm6, %v8568_v39, %v8569_v33  ;;  %v17636_v26 = vld [vmem:[#allocation2 + $0xa4] sm:$0x1]  ;;  %v7747_v39 = vld [vmem:[#allocation2 + $0xb0] sm:$0x1] }
 0x42f   : > { %19437 = vst [vmem:[#allocation17_spill] sm:$0xff] %v17607_v40  ;;  %v17615_v61 = vsel %vm15047_vm6, %v8561_v7, %v8562_v47  ;;  %19439 = vst [vmem:[#allocation19_spill] sm:$0xff] %v17625_v31  ;;  %v8582_v7 = vrot.slane %v8580_v34, 4  ;;  %v8583_v47 = vrot.slane %v17594_v28, 5  ;;  %v8457_v34 = vld [vmem:[#allocation2 + $0xa8] sm:$0xe] }
 0x430   : > { %19438 = vst [vmem:[#allocation18_spill] sm:$0xff] %v17615_v61  ;;  %v8604_v36 = vrot.slane %v7747_v39, 5  ;;  %v19452_v39 = vcombine.low %v17361_v52, %v17365_v59  ;;  %v17759_v52 = vld [vmem:[#allocation2 + $0x14] sm:$0x1] }
 0x433   : > { %13319 = vmatmul.mubr.msk.bf16.gmra.mrb[16].mxu1 %vm6359_vm9, %v19430_v58  ;;  %v17603_v58 = vld [vmem:[#allocation2 + $0x94] sm:$0xf] }
 0x434   : > { %13322 = vmatprep.mubr.msk.bf16.mxu1 %vm6359_vm9, %v19432_v23  ;;  %v8573_v23 = vrot.slane %v17572_v4, 5  ;;  %v8587_v31 = vrot.slane %v17603_v58, 5 }
 0x436   : > { %v8575_v24 = vrot.slane %v8573_v23, 4  ;;  %v17640_v41 = vsel %vm15047_vm6, %v12262_v56, %v8573_v23  ;;  %v17664_v23 = vld [vmem:[#allocation2 + $0xbc] sm:$0x1]  ;;  %v8589_v12 = vrot.slane %v8587_v31, 4  ;;  %v8590_v56 = vrot.slane %v17611_v42, 5 }
 0x437   : > { %19441 = vst [vmem:[#allocation20_spill] sm:$0xff] %v17640_v41  ;;  %v17675_v41 = vld [vmem:[#allocation2 + $0xc4] sm:$0xf] }
 0x438   : > { %v17644_v33 = vsel %vm15047_vm6, %v8575_v24, %v8576_v50  ;;  %v17661_v24 = vsel %vm15047_vm6, %v8582_v7, %v8583_v47  ;;  %v12264_v50 = vrot.slane %v8455_v18, 9  ;;  %v8597_v7 = vrot.slane %v17636_v26, 5  ;;  %v8458_v47 = vld [vmem:[#allocation2 + $0xb4] sm:$0xe] }
 0x439   : > { %19442 = vst [vmem:[#allocation21_spill] sm:$0xff] %v17644_v33  ;;  %19445 = vst [vmem:[#allocation23_spill] sm:$0xff] %v17661_v24  ;;  %v8596_v33 = vrot.slane %v8594_v51, 4  ;;  %v8601_v18 = vrot.slane %v17627_v63, 5  ;;  %v17679_v40 = vsel %vm15047_vm6, %v8589_v12, %v8590_v56  ;;  %v12267_v56 = vrot.slane %v8458_v47, 9 }
 0x43a   : > { %19447 = vst [vmem:[#allocation25_spill] sm:$0xff] %v17679_v40 }
 0x43b   : > { %13323 = vmatmul.mubr.msk.bf16.gmra.mrb[20].mxu1 %vm6359_vm9, %v19440_v10  ;;  %v17671_v10 = vsel %vm15047_vm6, %v12264_v50, %v8587_v31  ;;  %v8608_v31 = vrot.slane %v17655_v55, 5  ;;  %v7753_v50 = vld [vmem:[#allocation2 + $0xc8] sm:$0x1]  ;;  %v17690_v17 = vsel %vm15047_vm6, %v8596_v33, %v8597_v7  ;;  %v8603_v61 = vrot.slane %v8601_v18, 4 }
 0x43c   : > { %13326 = vmatprep.mubr.msk.bf16.mxu1 %vm6359_vm9, %v19444_v54  ;;  %v12265_v54 = vrot.slane %v8456_v60, 9  ;;  %19446 = vst [vmem:[#allocation24_spill] sm:$0xff] %v17671_v10  ;;  %v12266_v60 = vrot.slane %v8457_v34, 9  ;;  %19449 = vst [vmem:[#allocation27_spill] sm:$0xff] %v17690_v17  ;;  %v8459_v34 = vld [vmem:[#allocation2 + $0xc0] sm:$0xe] }
 0x43d   : > { %v8610_v46 = vrot.slane %v8608_v31, 4  ;;  %v17701_v24 = vsel %vm15047_vm6, %v8603_v61, %v8604_v36  ;;  %v8615_v33 = vrot.slane %v17675_v41, 5  ;;  %v17712_v47 = vsel %vm15047_vm6, %v12267_v56, %v8608_v31  ;;  %v14223_v56 = vld [vmem:[%s19213_s3 + $0x48] sm:$0xff]  }
 0x43e   : > { %v17683_v11 = vsel %vm15047_vm6, %v12265_v54, %v8594_v51  ;;  %v8611_v51 = vrot.slane %v17664_v23, 5  ;;  %v17697_v54 = vsel %vm15047_vm6, %v12266_v60, %v8601_v18  ;;  %19451 = vst [vmem:[#allocation29_spill] sm:$0xff] %v17701_v24  ;;  %19453 = vst [vmem:[#allocation30_spill] sm:$0xff] %v17712_v47  ;;  %v19455_v36 = vcombine.low %v17376_v19, %v17380_v45  ;;  %v14213_v19 = vld [vmem:[#allocation2 + $0xc] sm:$0xff]   ;;  %v14220_v47 = vld [vmem:[#allocation2 + $0x54] sm:$0xff]  }
 0x43f   : > { %19448 = vst [vmem:[#allocation26_spill] sm:$0xff] %v17683_v11  ;;  %19450 = vst [vmem:[#allocation28_spill] sm:$0xff] %v17697_v54  ;;  %v12268_v59 = vrot.slane %v8459_v34, 9  ;;  %v8617_v61 = vrot.slane %v8615_v33, 4  ;;  %v8618_v60 = vrot.slane %v7753_v50, 5  ;;  %v19458_v45 = vcombine.low %v17391_v9, %v17395_v49  ;;  %v14215_v50 = vld [vmem:[#allocation2 + $0x18] sm:$0xff]  }
 0x440   : > { %v17716_v18 = vsel %vm15047_vm6, %v8610_v46, %v8611_v51  ;;  %v14216_v51 = vld [vmem:[#allocation2 + $0x24] sm:$0xff]   ;;  %v7706_v34 = vld [vmem:[#allocation2 + $0xc] sm:$0xf]  ;;  %v17748_v9 = vld [vmem:[%s19213_s3 + $0x50] sm:$0xff]   ;;  %v7816_v54 = vshrl.u32 %v17484_v38, 16 }
 0x441   : > { %19454 = vst [vmem:[#allocation31_spill] sm:$0xff] %v17716_v18  ;;  %v17730_v31 = vsel %vm15047_vm6, %v8617_v61, %v8618_v60  ;;  %v17750_v49 = vld [vmem:[#allocation2 + $0x10] sm:$0xf]  ;;  %v7709_v61 = vld [vmem:[#allocation2 + $0x18] sm:$0xf]  ;;  %v14218_v60 = vld [vmem:[#allocation2 + $0x3c] sm:$0xff]  }
 0x442   : > { %19457 = vst [vmem:[#allocation33_spill] sm:$0xff] %v17730_v31  ;;  %v17757_v46 = vld [vmem:[#allocation2 + $0x1c] sm:$0xf] }
 0x443   : > { %13327 = vmatmul.mubr.msk.bf16.gmra.mrb[24].mxu1 %vm6359_vm9, %v19452_v39  ;;  %v17726_v39 = vsel %vm15047_vm6, %v12268_v59, %v8615_v33  ;;  %v7755_v33 = vshrl.u32 %v7706_v34, 16  ;;  %v14217_v59 = vld [vmem:[#allocation2 + $0x30] sm:$0xff]   ;;  %19459 = vst [vmem:[#allocation34_spill] sm:$0xff] %v17757_v46 }
 0x444   : > { %13330 = vmatprep.mubr.msk.bf16.mxu1 %vm6359_vm9, %v19455_v36  ;;  %19456 = vst [vmem:[#allocation32_spill] sm:$0xff] %v17726_v39  ;;  %v7758_v36 = vshll.u32 %v7706_v34, 16  ;;  %v7712_v34 = vld [vmem:[#allocation2 + $0x24] sm:$0xf]  ;;  %v14219_v39 = vld [vmem:[#allocation2 + $0x48] sm:$0xff]  }
 0x445   : > { %v7806_v24 = vshll.u32 %v7712_v34, 16 }
 0x447   : > { %v7808_v40 = vrot.slane %v7806_v24, 5 }
 0x44b   : > { %13331 = vmatmul.mubr.msk.bf16.gmra.mrb[28].mxu1 %vm6359_vm9, %v19458_v45  ;;  %v7760_v45 = vrot.slane %v7758_v36, 5  ;;  %v7803_v36 = vshrl.u32 %v7712_v34, 16 }
 0x44c   : > { %13338 = vmatprep.mubr.msk.bf16.mxu1 %vm6359_vm9, %v14213_v19  ;;  %v7757_v19 = vrot.slane %v7755_v33, 4  ;;  %v7792_v33 = vshrl.u32 %v17757_v46, 16 }
 0x44d   : > { %v7805_v11 = vrot.slane %v7803_v36, 4 }
 0x44e   : > { %v7761_v7 = vor.u32 %v7760_v45, %v7757_v19  ;;  %v7715_v19 = vld [vmem:[#allocation2 + $0x30] sm:$0xf]  ;;  %v7794_v34 = vrot.slane %v7792_v33, 4 }
 0x44f   : > { %v7827_v10 = vshrl.u32 %v7715_v19, 16  ;;  %v7830_v48 = vshll.u32 %v7715_v19, 16  ;;  %v7809_v33 = vor.u32 %v7808_v40, %v7805_v11  ;;  %v7836_v19 = vshll.u32 %v17488_v16, 16 }
 0x450   : > { %v7860_v11 = vshll.u32 %v17497_v44, 16 }
 0x452   : > { %v17811_v25 = vrot.slane %v7860_v11, 5  ;;  %v7870_v11 = vshll.u32 %v17503_v62, 16 }
 0x453   : > { %13339 = vmatmul.mubr.msk.bf16.vlgmr.msra.gmra.mrb[0].mxu1 %vm6359_vm9, %v14215_v50  ;;  %v7768_v50 = vshrl.u32 %v17750_v49, 16 }
 0x454   : > { %13371 = vmatpush3.bf16.msra.mxu1 %v17463_v15  ;;  %13342 = vmatprep.mubr.msk.bf16.mxu1 %vm6359_vm9, %v14216_v51  ;;  %v7764_v15 = vshll.u32 %v17750_v49, 16  ;;  %v7782_v51 = vshll.u32 %v7709_v61, 16 }
 0x455   : > { %13372 = vmatprep.subr.bf16.mxu1 %v14223_v56  ;;  %v7770_v31 = vrot.slane %v7768_v50, 4  ;;  %v7774_v50 = vshll.u32 %v17759_v52, 16 }
 0x456   : > { %v17761_v12 = vrot.slane %v7764_v15, 5  ;;  %v7784_v18 = vrot.slane %v7782_v51, 5  ;;  %v17769_v15 = vrot.slane %v7761_v7, 4 }
 0x457   : > { %v17781_v7 = vrot.slane %v7774_v50, 5  ;;  %v7840_v50 = vshrl.u32 %v17488_v16, 16 }
 0x458   : > { %13373 = vmatpush3.bf16.msra.mxu1 %v14223_v56  ;;  %v7779_v56 = vshrl.u32 %v7709_v61, 16  ;;  %v7812_v61 = vshll.u32 %v17484_v38, 16  ;;  %v7771_v45 = vor.u32 %v7770_v31, %v17761_v12  ;;  %v19461_v62 = vsel %vm14731_vm2, %v17769_v15, %v17761_v12 }
 0x459   : > { %13406 = vmatprep.subr.bf16.mxu1 %v17748_v9  ;;  %v7842_v43 = vrot.slane %v7840_v50, 4 }
 0x45a   : > { %v17777_v38 = vrot.slane %v7812_v61, 5  ;;  %v7829_v61 = vrot.slane %v7827_v10, 4  ;;  %v7864_v10 = vshrl.u32 %v17497_v44, 16  ;;  %v7853_v44 = vrot.slane %v7851_v5, 4 }
 0x45b   : > { %13343 = vmatmul.mubr.msk.bf16.gmra.mrb[4].mxu1 %vm6359_vm9, %v14217_v59  ;;  %v7781_v59 = vrot.slane %v7779_v56, 4  ;;  %v17773_v56 = vld [vmem:[#allocation2 + $0x20] sm:$0x1]  ;;  %v7908_v5 = vshll.u32 %v17511_v30, 16 }
 0x45c   : > { %13346 = vmatprep.mubr.msk.bf16.mxu1 %vm6359_vm9, %v14218_v60  ;;  %v7788_v60 = vshll.u32 %v17757_v46, 16  ;;  %19460 = vst [vmem:[#allocation35_spill] sm:$0xff] %v17773_v56  ;;  %v7798_v31 = vshll.u32 %v17773_v56, 16  ;;  %v7866_v13 = vrot.slane %v7864_v10, 4 }
 0x45d   : > { %v7785_v51 = vor.u32 %v7784_v18, %v7781_v59  ;;  %v7854_v18 = vshll.u32 %v7718_v57, 16  ;;  %v7884_v57 = vshll.u32 %v17506_v35, 16 }
 0x45e   : > { %v17775_v17 = vrot.slane %v7788_v60, 5  ;;  %v14222_v60 = vld [vmem:[#allocation2 + $0x6c] sm:$0xff]   ;;  %v7800_v40 = vrot.slane %v7798_v31, 5 }
 0x45f   : > { %v17788_v59 = vrot.slane %v7785_v51, 4  ;;  %v7888_v51 = vshrl.u32 %v17506_v35, 16  ;;  %v7856_v53 = vrot.slane %v7854_v18, 5  ;;  %v17813_v56 = vrot.slane %v7884_v57, 5 }
 0x460   : > { %v7795_v24 = vor.u32 %v7794_v34, %v17775_v17  ;;  %v7810_v34 = vrot.slane %v7809_v33, 4  ;;  %v7912_v18 = vshrl.u32 %v17511_v30, 16 }
 0x461   : > { %v7890_v46 = vrot.slane %v7888_v51, 4  ;;  %v7857_v10 = vor.u32 %v7856_v53, %v7853_v44  ;;  %v7872_v44 = vrot.slane %v7870_v11, 5 }
 0x462   : > { %v7796_v16 = vrot.slane %v7795_v24, 4  ;;  %v14224_v24 = vld [vmem:[#allocation2 + $0x78] sm:$0xff]  }
 0x463   : > { %13347 = vmatmul.mubr.msk.bf16.gmra.mrb[8].mxu1 %vm6359_vm9, %v14219_v39  ;;  %v7818_v39 = vrot.slane %v7816_v54, 4  ;;  %v7822_v54 = vshll.u32 %v17486_v22, 16  ;;  %v7891_v57 = vor.u32 %v7890_v46, %v17813_v56 }
 0x464   : > { %13350 = vmatprep.mubr.msk.bf16.mxu1 %vm6359_vm9, %v14220_v47  ;;  %v17779_v47 = vrot.slane %v7771_v45, 4  ;;  %v7832_v45 = vrot.slane %v7830_v48, 5  ;;  %v7721_v48 = vld [vmem:[#allocation2 + $0x48] sm:$0xf] }
 0x465   : > { %v7819_v36 = vor.u32 %v7818_v39, %v17777_v38  ;;  %v7892_v15 = vrot.slane %v7891_v57, 4 }
 0x466   : > { %v7777_v22 = vsel %vm14731_vm2, %v17779_v47, %v17781_v7  ;;  %v17809_v47 = vrot.slane %v7836_v19, 5  ;;  %v7724_v7 = vld [vmem:[#allocation2 + $0x54] sm:$0xf]  ;;  %v7833_v31 = vor.u32 %v7832_v45, %v7829_v61  ;;  %v7846_v61 = vshll.u32 %v17495_v2, 16 }
 0x467   : > { %v7820_v39 = vrot.slane %v7819_v36, 4  ;;  %v7899_v35 = vshrl.u32 %v7724_v7, 16  ;;  %v7902_v33 = vshll.u32 %v7724_v7, 16  ;;  %v14225_v36 = vld [vmem:[#allocation2 + $0x84] sm:$0xff]   ;;  %v7815_v19 = vsel %vm14731_vm2, %v7810_v34, %v17777_v38 }
 0x468   : > { %v7843_v50 = vor.u32 %v7842_v43, %v17809_v47  ;;  %v7834_v2 = vrot.slane %v7833_v31, 4  ;;  %v17831_v34 = vrot.slane %v7908_v5, 5  ;;  %v17838_v7 = vcombine.low %v19461_v62, %v7777_v22  ;;  %v14227_v22 = vld [vmem:[#allocation2 + $0x9c] sm:$0xff]  }
 0x469   : > { %v7901_v51 = vrot.slane %v7899_v35, 4  ;;  %v7904_v38 = vrot.slane %v7902_v33, 5  ;;  %v14226_v35 = vld [vmem:[#allocation2 + $0x90] sm:$0xff]  }
 0x46a   : > { %v7844_v46 = vrot.slane %v7843_v50, 4  ;;  %v7839_v33 = vsel %vm14731_vm2, %v7834_v2, %v17809_v47 }
 0x46b   : > { %13351 = vmatmul.mubr.msk.bf16.gmra.mrb[12].mxu1 %vm6359_vm9, %v14221_v6  ;;  %v7791_v6 = vsel %vm14731_vm2, %v17788_v59, %v17775_v17  ;;  %v7875_v17 = vshrl.u32 %v7721_v48, 16  ;;  %v7878_v59 = vshll.u32 %v7721_v48, 16  ;;  %v7867_v48 = vor.u32 %v7866_v13, %v17811_v25 }
 0x46c   : > { %13354 = vmatprep.mubr.msk.bf16.mxu1 %vm6359_vm9, %v14222_v60  ;;  %v7824_v60 = vrot.slane %v7822_v54, 5  ;;  %v7801_v54 = vsel %vm14731_vm2, %v7796_v16, %v7800_v40  ;;  %v7727_v40 = vld [vmem:[#allocation2 + $0x60] sm:$0xf]  ;;  %v7848_v13 = vrot.slane %v7846_v61, 5 }
 0x46d   : > { %v7877_v16 = vrot.slane %v7875_v17, 4  ;;  %v7880_v30 = vrot.slane %v7878_v59, 5  ;;  %v7926_v43 = vshll.u32 %v7727_v40, 16  ;;  %v17840_v53 = vcombine.low %v7791_v6, %v7801_v54 }
 0x46e   : > { %v7825_v45 = vsel %vm14731_vm2, %v7820_v39, %v7824_v60  ;;  %v7914_v39 = vrot.slane %v7912_v18, 4  ;;  %v7923_v60 = vshrl.u32 %v7727_v40, 16  ;;  %v7894_v59 = vshll.u32 %v17508_v14, 16 }
 0x46f   : > { %v17842_v31 = vcombine.low %v7815_v19, %v7825_v45  ;;  %v7881_v17 = vor.u32 %v7880_v30, %v7877_v16  ;;  %v7868_v12 = vrot.slane %v7867_v48, 4  ;;  %v7905_v6 = vor.u32 %v7904_v38, %v7901_v51 }
 0x470   : > { %v7915_v54 = vor.u32 %v7914_v39, %v17831_v34  ;;  %v7925_v5 = vrot.slane %v7923_v60, 4  ;;  %v7928_v61 = vrot.slane %v7926_v43, 5  ;;  %v7932_v18 = vshll.u32 %v17522_v0, 16  ;;  %v17879_v43 = vld [vmem:[#allocation2 + $0x1c] sm:$0xf] }
 0x471   : > { %v7936_v14 = vshrl.u32 %v17522_v0, 16  ;;  %v7849_v47 = vsel %vm14731_vm2, %v7844_v46, %v7848_v13  ;;  %v7882_v50 = vrot.slane %v7881_v17, 4  ;;  %v7896_v11 = vrot.slane %v7894_v59, 5  ;;  %19462 = vst [vmem:[#allocation36_spill] sm:$0xff] %v17879_v43  ;;  %v17890_v17 = vld [vmem:[#allocation2 + $0x20] sm:$0x1] }
 0x472   : > { %v7918_v40 = vshll.u32 %v17531_v32, 16  ;;  %v7956_v0 = vshll.u32 %v17545_v8, 16  ;;  %v7960_v16 = vshrl.u32 %v17545_v8, 16  ;;  %v17865_v48 = vrot.slane %v7905_v6, 4  ;;  %v17869_v32 = vld [vmem:[#allocation2 + $0x78] sm:$0xf] }
 0x473   : > { %13355 = vmatmul.mubr.msk.bf16.gmra.mrb[16].mxu1 %vm6359_vm9, %v14224_v24  ;;  %v7730_v24 = vld [vmem:[#allocation2 + $0x6c] sm:$0xf]  ;;  %v7897_v30 = vsel %vm14731_vm2, %v7892_v15, %v7896_v11  ;;  %v17867_v57 = vrot.slane %v7915_v54, 4  ;;  %v7929_v51 = vor.u32 %v7928_v61, %v7925_v5  ;;  %v17871_v38 = vrot.slane %v7932_v18, 5  ;;  %19463 = vst [vmem:[#allocation37_spill] sm:$0xff] %v17890_v17 }
 0x474   : > { %13358 = vmatprep.mubr.msk.bf16.mxu1 %vm6359_vm9, %v14225_v36  ;;  %v7858_v36 = vrot.slane %v7857_v10, 4  ;;  %v7947_v19 = vshrl.u32 %v7730_v24, 16  ;;  %v7950_v45 = vshll.u32 %v7730_v24, 16  ;;  %v7873_v10 = vsel %vm14731_vm2, %v7868_v12, %v7872_v44  ;;  %v14228_v8 = vld [vmem:[#allocation2 + $0xa8] sm:$0xff]   ;;  %v10035_v59 = vld [vmem:[#allocation2 + $0x18] sm:$0xe] }
 0x475   : > { %v17881_v62 = vcombine.low %v7839_v33, %v7849_v47  ;;  %v7887_v46 = vsel %vm14731_vm2, %v7882_v50, %v17813_v56  ;;  %v17888_v44 = vrot.slane %v7918_v40, 5  ;;  %v14229_v24 = vld [vmem:[#allocation2 + $0xb4] sm:$0xff]   ;;  %v17895_v12 = vrot.slane %v7956_v0, 5  ;;  %v17911_v54 = vld [vmem:[#allocation2 + $0x28] sm:$0xf] }
 0x476   : > { %v7863_v2 = vsel %vm14731_vm2, %v7858_v36, %v17811_v25  ;;  %v17873_v25 = vrot.slane %v7936_v14, 4  ;;  %v17875_v39 = vrot.slane %v7947_v19, 4  ;;  %v17877_v60 = vrot.slane %v7950_v45, 5  ;;  %v17899_v15 = vld [vmem:[#allocation2 + $0x34] sm:$0xf]  ;;  %19465 = vst [vmem:[#allocation39_spill] sm:$0xff] %v17911_v54 }
 0x477   : > { %v17883_v13 = vcombine.low %v7863_v2, %v7873_v10  ;;  %v17897_v33 = vrot.slane %v7960_v16, 4  ;;  %19464 = vst [vmem:[#allocation38_spill] sm:$0xff] %v17899_v15  ;;  %v17909_v6 = vrot.slane %v7929_v51, 4  ;;  %v17913_v5 = vld [vmem:[#allocation2 + $0x2c] sm:$0x1]  ;;  %v10101_v61 = vrot.slane %v17879_v43, 5 }
 0x478   : > { %19466 = vst [vmem:[#allocation40_spill] sm:$0xff] %v17913_v5  ;;  %v17923_v47 = vld [vmem:[#allocation2 + $0x38] sm:$0x1]  ;;  %v10036_v50 = vld [vmem:[#allocation2 + $0x24] sm:$0xe]  ;;  %v7980_v11 = vshll.u32 %v17572_v4, 16 }
 0x479   : > { %19467 = vst [vmem:[#allocation41_spill] sm:$0xff] %v17923_v47  ;;  %v12383_v40 = vrot.slane %v10035_v59, 9  ;;  %v10103_v2 = vrot.slane %v10101_v61, 4  ;;  %v10104_v10 = vrot.slane %v17890_v17, 5  ;;  %v10037_v0 = vld [vmem:[#allocation2 + $0x30] sm:$0xe] }
 0x47a   : > { %v17937_v19 = vld [vmem:[#allocation2 + $0x44] sm:$0x1]  ;;  %v12384_v56 = vrot.slane %v10036_v50, 9  ;;  %v10038_v16 = vld [vmem:[#allocation2 + $0x3c] sm:$0xe]  ;;  %v10111_v45 = vrot.slane %v17913_v5, 5 }
 0x47b   : > { %13359 = vmatmul.mubr.msk.bf16.gmra.mrb[20].mxu1 %vm6359_vm9, %v14226_v35  ;;  %v17892_v35 = vcombine.low %v7887_v46, %v7897_v30  ;;  %v17934_v46 = vld [vmem:[#allocation2 + $0x4c] sm:$0xf]  ;;  %19469 = vst [vmem:[#allocation43_spill] sm:$0xff] %v17937_v19  ;;  %v17941_v59 = vsel %vm15047_vm6, %v12383_v40, %v10101_v61  ;;  %v17945_v36 = vsel %vm15047_vm6, %v10103_v2, %v10104_v10  ;;  %v17948_v14 = vld [vmem:[#allocation2 + $0x50] sm:$0x1]  ;;  %v12385_v51 = vrot.slane %v10037_v0, 9 }
 0x47c   : > { %13362 = vmatprep.mubr.msk.bf16.mxu1 %vm6359_vm9, %v14227_v22  ;;  %19470 = vst [vmem:[#allocation44_spill] sm:$0xff] %v17941_v59  ;;  %19471 = vst [vmem:[#allocation45_spill] sm:$0xff] %v17945_v36  ;;  %v10115_v22 = vrot.slane %v17899_v15, 5  ;;  %v14230_v17 = vld [vmem:[#allocation2 + $0xc0] sm:$0xff]   ;;  %v17953_v61 = vrot.slane %v7980_v11, 5  ;;  %v10118_v10 = vrot.slane %v17923_v47, 5 }
 0x47d   : > { %19472 = vst [vmem:[#allocation46_spill] sm:$0xff] %v17948_v14  ;;  %v17955_v40 = vld [vmem:[#allocation2 + $0x64] sm:$0xf]  ;;  %v10039_v15 = vld [vmem:[#allocation2 + $0x48] sm:$0xe]  ;;  %v12386_v0 = vrot.slane %v10038_v16, 9 }
 0x47e   : > { %19473 = vst [vmem:[#allocation47_spill] sm:$0xff] %v17955_v40  ;;  %v10117_v2 = vrot.slane %v10115_v22, 4  ;;  %v17970_v11 = vsel %vm15047_vm6, %v12385_v51, %v10115_v22  ;;  %v10040_v59 = vld [vmem:[#allocation2 + $0x54] sm:$0xe]  ;;  %v10129_v22 = vrot.slane %v17934_v46, 5  ;;  %v12387_v51 = vrot.slane %v10039_v15, 9 }
 0x47f   : > { %19477 = vst [vmem:[#allocation51_spill] sm:$0xff] %v17970_v11  ;;  %v10041_v43 = vld [vmem:[#allocation2 + $0x60] sm:$0xe]  ;;  %v17991_v47 = vld [vmem:[#allocation2 + $0x7c] sm:$0xf] }
 0x480   : > { %v17981_v5 = vsel %vm15047_vm6, %v10117_v2, %v10118_v10  ;;  %19481 = vst [vmem:[#allocation55_spill] sm:$0xff] %v17991_v47  ;;  %v10131_v10 = vrot.slane %v10129_v22, 4  ;;  %v18006_v16 = vsel %vm15047_vm6, %v12387_v51, %v10129_v22  ;;  %v18020_v22 = vld [vmem:[#allocation2 + $0x94] sm:$0xf]  ;;  %v18029_v11 = vld [vmem:[#allocation2 + $0x88] sm:$0xf] }
 0x481   : > { %19480 = vst [vmem:[#allocation54_spill] sm:$0xff] %v17981_v5  ;;  %19485 = vst [vmem:[#allocation59_spill] sm:$0xff] %v18006_v16  ;;  %v10143_v5 = vrot.slane %v17955_v40, 5  ;;  %v18045_v16 = vld [vmem:[#allocation2 + $0x98] sm:$0x1] }
 0x482   : > { %19489 = vst [vmem:[#allocation63_spill] sm:$0xff] %v18020_v22  ;;  %19491 = vst [vmem:[#allocation65_spill] sm:$0xff] %v18029_v11 }
 0x483   : > { %13363 = vmatmul.mubr.msk.bf16.gmra.mrb[24].mxu1 %vm6359_vm9, %v14228_v8  ;;  %v17932_v8 = vld [vmem:[#allocation2 + $0x40] sm:$0xf]  ;;  %v10145_v40 = vrot.slane %v10143_v5, 4 }
 0x484   : > { %13366 = vmatprep.mubr.msk.bf16.mxu1 %vm6359_vm9, %v14229_v24  ;;  %19468 = vst [vmem:[#allocation42_spill] sm:$0xff] %v17932_v8  ;;  %v10108_v24 = vrot.slane %v17911_v54, 5  ;;  %v17962_v54 = vld [vmem:[#allocation2 + $0x58] sm:$0xf]  ;;  %v10122_v36 = vrot.slane %v17932_v8, 5  ;;  %v10132_v8 = vrot.slane %v17948_v14, 5 }
 0x485   : > { %19475 = vst [vmem:[#allocation49_spill] sm:$0xff] %v17962_v54  ;;  %v12389_v14 = vrot.slane %v10041_v43, 9 }
 0x486   : > { %v10110_v30 = vrot.slane %v10108_v24, 4  ;;  %v17959_v50 = vsel %vm15047_vm6, %v12384_v56, %v10108_v24  ;;  %v17973_v56 = vld [vmem:[#allocation2 + $0x5c] sm:$0x1]  ;;  %v17975_v24 = vld [vmem:[#allocation2 + $0x68] sm:$0x1]  ;;  %v17995_v2 = vsel %vm15047_vm6, %v12386_v0, %v10122_v36 }
 0x487   : > { %19474 = vst [vmem:[#allocation48_spill] sm:$0xff] %v17959_v50  ;;  %19478 = vst [vmem:[#allocation52_spill] sm:$0xff] %v17973_v56  ;;  %v17998_v50 = vld [vmem:[#allocation2 + $0x70] sm:$0xf]  ;;  %v18010_v0 = vld [vmem:[#allocation2 + $0x74] sm:$0x1]  ;;  %v18037_v43 = vsel %vm15047_vm6, %v12389_v14, %v10143_v5 }
 0x488   : > { %v17966_v18 = vsel %vm15047_vm6, %v10110_v30, %v10111_v45  ;;  %19479 = vst [vmem:[#allocation53_spill] sm:$0xff] %v17975_v24  ;;  %v10125_v45 = vrot.slane %v17937_v19, 5  ;;  %v10124_v30 = vrot.slane %v10122_v36, 4  ;;  %19482 = vst [vmem:[#allocation56_spill] sm:$0xff] %v17995_v2  ;;  %v10042_v36 = vld [vmem:[#allocation2 + $0x6c] sm:$0xe] }
 0x489   : > { %19476 = vst [vmem:[#allocation50_spill] sm:$0xff] %v17966_v18  ;;  %v12388_v18 = vrot.slane %v10040_v59, 9  ;;  %19483 = vst [vmem:[#allocation57_spill] sm:$0xff] %v17998_v50  ;;  %v18012_v59 = vld [vmem:[#allocation2 + $0x80] sm:$0x1]  ;;  %v10146_v19 = vrot.slane %v17975_v24, 5 }
 0x48a   : > { %v18002_v15 = vsel %vm15047_vm6, %v10124_v30, %v10125_v45  ;;  %19486 = vst [vmem:[#allocation60_spill] sm:$0xff] %v18010_v0  ;;  %19487 = vst [vmem:[#allocation61_spill] sm:$0xff] %v18012_v59  ;;  %v18018_v45 = vsel %vm15047_vm6, %v10131_v10, %v10132_v8  ;;  %v12390_v10 = vrot.slane %v10042_v36, 9  ;;  %v10150_v51 = vrot.slane %v17998_v50, 5  ;;  %v10045_v50 = vld [vmem:[#allocation2 + $0x90] sm:$0xe] }
 0x48b   : > { %13367 = vmatmul.mubr.msk.bf16.gmra.mrb[28].mxu1 %vm6359_vm9, %v14230_v17  ;;  %v10136_v17 = vrot.slane %v17962_v54, 5  ;;  %19484 = vst [vmem:[#allocation58_spill] sm:$0xff] %v18002_v15  ;;  %19488 = vst [vmem:[#allocation62_spill] sm:$0xff] %v18018_v45  ;;  %v10043_v54 = vld [vmem:[#allocation2 + $0x78] sm:$0xe]  ;;  %v10153_v5 = vrot.slane %v18010_v0, 5 }
 0x48c   : > { %13374 = vmatprep.mubr.msk.bf16.mxu1 %vm6359_vm9, %v17838_v7  ;;  %v10139_v7 = vrot.slane %v17973_v56, 5  ;;  %19493 = vst [vmem:[#allocation67_spill] sm:$0xff] %v18037_v43  ;;  %v10044_v45 = vld [vmem:[#allocation2 + $0x84] sm:$0xe]  ;;  %v10157_v14 = vrot.slane %v17991_v47, 5  ;;  %v10152_v15 = vrot.slane %v10150_v51, 4 }
 0x48d   : > { %v10138_v30 = vrot.slane %v10136_v17, 4  ;;  %v18026_v56 = vsel %vm15047_vm6, %v12388_v18, %v10136_v17  ;;  %v14232_v18 = vld [vmem:[%s19213_s3 + $0x58] sm:$0xff]   ;;  %v18043_v17 = vld [vmem:[#allocation2 + $0x8c] sm:$0x1]  ;;  %v12391_v2 = vrot.slane %v10043_v54, 9  ;;  %v10160_v24 = vrot.slane %v18012_v59, 5 }
 0x48e   : > { %19490 = vst [vmem:[#allocation64_spill] sm:$0xff] %v18026_v56  ;;  %19494 = vst [vmem:[#allocation68_spill] sm:$0xff] %v18043_v17  ;;  %v10164_v56 = vrot.slane %v18029_v11, 5  ;;  %v18070_v54 = vld [vmem:[#allocation2 + $0xa0] sm:$0xf]  ;;  %v19498_v43 = vshrl.u32 %v17572_v4, 16 }
 0x48f   : > { %v18033_v8 = vsel %vm15047_vm6, %v10138_v30, %v10139_v7  ;;  %v18051_v30 = vsel %vm15047_vm6, %v10145_v40, %v10146_v19  ;;  %v18060_v7 = vld [vmem:[#allocation2 + $0xac] sm:$0xf]  ;;  %v18064_v19 = vsel %vm15047_vm6, %v12390_v10, %v10150_v51  ;;  %v10159_v40 = vrot.slane %v10157_v14, 4  ;;  %v9332_v36 = vld [vmem:[#allocation2 + $0xa4] sm:$0x1] }
 0x490   : > { %19492 = vst [vmem:[#allocation66_spill] sm:$0xff] %v18033_v8  ;;  %19495 = vst [vmem:[#allocation69_spill] sm:$0xff] %v18051_v30  ;;  %v12392_v8 = vrot.slane %v10044_v45, 9  ;;  %v18078_v51 = vsel %vm15047_vm6, %v12391_v2, %v10157_v14  ;;  %v10167_v45 = vrot.slane %v18043_v17, 5  ;;  %v10171_v10 = vrot.slane %v18020_v22, 5 }
 0x491   : > { %19496 = vst [vmem:[#allocation70_spill] sm:$0xff] %v18078_v51  ;;  %v10166_v2 = vrot.slane %v10164_v56, 4  ;;  %v10046_v14 = vld [vmem:[#allocation2 + $0x9c] sm:$0xe]  ;;  %v18095_v17 = vrot.slane %v19498_v43, 4  ;;  %v10174_v11 = vrot.slane %v18045_v16, 5 }
 0x492   : > { %v10173_v22 = vrot.slane %v10171_v10, 4  ;;  %v10047_v0 = vld [vmem:[#allocation2 + $0xa8] sm:$0xe]  ;;  %v18100_v47 = vld [vmem:[#allocation2 + $0xb8] sm:$0xf]  ;;  %v10178_v43 = vrot.slane %v18070_v54, 5 }
 0x493   : > { %13375 = vmatmul.mubr.msk.bf16.vlgmr.msra.gmra.mrb[0].mxu1 %vm6359_vm9, %v17840_v53  ;;  %v18074_v53 = vsel %vm15047_vm6, %v10152_v15, %v10153_v5  ;;  %v18091_v15 = vsel %vm15047_vm6, %v10159_v40, %v10160_v24  ;;  %v12393_v5 = vrot.slane %v10045_v50, 9  ;;  %v18102_v30 = vld [vmem:[#allocation2 + $0xc4] sm:$0xf]  ;;  %v18106_v24 = vsel %vm15047_vm6, %v12392_v8, %v10164_v56  ;;  %v9338_v40 = vld [vmem:[#allocation2 + $0xbc] sm:$0x1] }
 0x494   : > { %13407 = vmatpush3.bf16.msra.mxu1 %v17748_v9  ;;  %13378 = vmatprep.mubr.msk.bf16.mxu1 %vm6359_vm9, %v17842_v31  ;;  %v18085_v9 = vld [vmem:[%s19213_s3 + $0x60] sm:$0xff]   ;;  %v9335_v31 = vld [vmem:[#allocation2 + $0xb0] sm:$0x1]  ;;  %19497 = vst [vmem:[#allocation71_spill] sm:$0xff] %v18091_v15  ;;  %19499 = vst [vmem:[#allocation72_spill] sm:$0xff] %v18106_v24  ;;  %v18110_v4 = vsel %vm15047_vm6, %v10166_v2, %v10167_v45  ;;  %v18121_v15 = vsel %vm15047_vm6, %v10173_v22, %v10174_v11  ;;  %v12394_v56 = vrot.slane %v10046_v14, 9 }
 0x495   : > { %13408 = vmatprep.subr.bf16.mxu1 %v14232_v18  ;;  %19500 = vst [vmem:[#allocation73_spill] sm:$0xff] %v18110_v4  ;;  %v18114_v50 = vsel %vm15047_vm6, %v12393_v5, %v10171_v10  ;;  %19502 = vst [vmem:[#allocation75_spill] sm:$0xff] %v18121_v15  ;;  %v10185_v8 = vrot.slane %v18060_v7, 5  ;;  %v10048_v45 = vld [vmem:[#allocation2 + $0xb4] sm:$0xe]  ;;  %v10180_v5 = vrot.slane %v10178_v43, 4 }
 0x496   : > { %19501 = vst [vmem:[#allocation74_spill] sm:$0xff] %v18114_v50  ;;  %v9341_v2 = vld [vmem:[#allocation2 + $0xc8] sm:$0x1]  ;;  %v12395_v51 = vrot.slane %v10047_v0, 9  ;;  %v18129_v59 = vsel %vm15047_vm6, %v12394_v56, %v10178_v43  ;;  %v10188_v11 = vrot.slane %v9335_v31, 5  ;;  %v10192_v22 = vrot.slane %v18100_v47, 5 }
 0x497   : > { %v10187_v4 = vrot.slane %v10185_v8, 4  ;;  %v10049_v14 = vld [vmem:[#allocation2 + $0xc0] sm:$0xe]  ;;  %v12396_v0 = vrot.slane %v10048_v45, 9  ;;  %v10199_v43 = vrot.slane %v18102_v30, 5  ;;  %v10202_v10 = vrot.slane %v9341_v2, 5 }
 0x498   : > { %13409 = vmatpush3.bf16.msra.mxu1 %v14232_v18  ;;  %v10181_v18 = vrot.slane %v9332_v36, 5  ;;  %v18140_v36 = vsel %vm15047_vm6, %v12395_v51, %v10185_v8  ;;  %v10194_v56 = vrot.slane %v10192_v22, 4  ;;  %v12397_v8 = vrot.slane %v10049_v14, 9 }
 0x499   : > { %13442 = vmatprep.subr.bf16.mxu1 %v18085_v9  ;;  %v10201_v45 = vrot.slane %v10199_v43, 4  ;;  %v19503_v15 = vshrl.u32 %v17869_v32, 16  ;;  %v18158_v31 = vsel %vm15047_vm6, %v12396_v0, %v10192_v22  ;;  %v19504_v22 = vshll.u32 %v17869_v32, 16 }
 0x49a   : > { %v18136_v24 = vsel %vm15047_vm6, %v10180_v5, %v10181_v18  ;;  %v10195_v5 = vrot.slane %v9338_v40, 5  ;;  %v7736_v18 = vld [vmem:[#allocation2 + $0x84] sm:$0xf]  ;;  %v8008_v40 = vshrl.u32 %v17585_v37, 16  ;;  %v18169_v2 = vsel %vm15047_vm6, %v12397_v8, %v10199_v43 }
 0x49b   : > { %13379 = vmatmul.mubr.msk.bf16.gmra.mrb[4].mxu1 %vm6359_vm9, %v17881_v62  ;;  %v18149_v62 = vsel %vm15047_vm6, %v10187_v4, %v10188_v11  ;;  %v7973_v50 = vrot.slane %v19503_v15, 4  ;;  %v18173_v15 = vsel %vm15047_vm6, %v10201_v45, %v10202_v10  ;;  %v7976_v14 = vrot.slane %v19504_v22, 5 }
 0x49c   : > { %13382 = vmatprep.mubr.msk.bf16.mxu1 %vm6359_vm9, %v17883_v13  ;;  %v8004_v13 = vshll.u32 %v17585_v37, 16  ;;  %v18162_v4 = vsel %vm15047_vm6, %v10194_v56, %v10195_v5  ;;  %v7995_v0 = vshrl.u32 %v7736_v18, 16  ;;  %v7998_v51 = vshll.u32 %v7736_v18, 16 }
 0x49d   : > { %v12416_v11 = vcombine.low %v18158_v31, %v18162_v4  ;;  %v12417_v56 = vcombine.low %v18169_v2, %v18173_v15  ;;  %v19505_v37 = vor.u32 %v17873_v25, %v17871_v38  ;;  %v19506_v43 = vor.u32 %v17877_v60, %v17875_v39  ;;  %v12447_v4 = vld [vmem:[%s14696_s17 + $0x30] sm:$0xf]  ;;  %v12444_v15 = vld [vmem:[%s14696_s17 + $0x24] sm:$0xf] }
 0x49e   : > { %v19507_v10 = vor.u32 %v17897_v33, %v17895_v12  ;;  %v7987_v32 = vor.u32 %v18095_v17, %v17953_v61  ;;  %v19508_v18 = vsel %vm14731_vm2, %v17867_v57, %v17888_v44  ;;  %v19509_v25 = vsel %vm14731_vm2, %v17865_v48, %v17831_v34  ;;  %v7739_v44 = vld [vmem:[#allocation2 + $0x90] sm:$0xf] }
 0x49f   : > { %v7940_v5 = vrot.slane %v19505_v37, 4  ;;  %v7954_v8 = vrot.slane %v19506_v43, 4  ;;  %v12225_v22 = vcombine.low %v19509_v25, %v19508_v18  ;;  %v19510_v39 = vshll.u32 %v17557_v27, 16 }
 0x4a0   : > { %v7964_v45 = vrot.slane %v19507_v10, 4  ;;  %v19511_v33 = vshll.u32 %v17559_v1, 16  ;;  %v7990_v37 = vshll.u32 %v17574_v20, 16  ;;  %v18207_v43 = vrot.slane %v8004_v13, 5 }
 0x4a1   : > { %v7944_v60 = vrot.slane %v19510_v39, 5  ;;  %v8010_v57 = vrot.slane %v8008_v40, 4  ;;  %v7935_v27 = vsel %vm14731_vm2, %v17909_v6, %v17871_v38  ;;  %v7977_v34 = vor.u32 %v7976_v14, %v7973_v50  ;;  %v7742_v6 = vld [vmem:[#allocation2 + $0x9c] sm:$0xf] }
 0x4a2   : > { %v7968_v17 = vrot.slane %v19511_v33, 5  ;;  %v7997_v48 = vrot.slane %v7995_v0, 4  ;;  %v8000_v10 = vrot.slane %v7998_v51, 5  ;;  %v7959_v20 = vsel %vm14731_vm2, %v7954_v8, %v17895_v12 }
 0x4a3   : > { %13383 = vmatmul.mubr.msk.bf16.gmra.mrb[8].mxu1 %vm6359_vm9, %v17892_v35  ;;  %v7945_v1 = vsel %vm14731_vm2, %v7940_v5, %v7944_v60  ;;  %v7988_v13 = vrot.slane %v7987_v32, 4  ;;  %v8019_v40 = vshrl.u32 %v7739_v44, 16  ;;  %v8022_v18 = vshll.u32 %v7739_v44, 16 }
 0x4a4   : > { %13386 = vmatprep.mubr.msk.bf16.mxu1 %vm6359_vm9, %v12225_v22  ;;  %v7969_v35 = vsel %vm14731_vm2, %v7964_v45, %v7968_v17  ;;  %v8028_v25 = vshll.u32 %v17603_v58, 16  ;;  %v8032_v38 = vshrl.u32 %v17603_v58, 16  ;;  %v7992_v50 = vrot.slane %v7990_v37, 5 }
 0x4a5   : > { %v8011_v51 = vor.u32 %v8010_v57, %v18207_v43  ;;  %v8052_v14 = vshll.u32 %v17619_v21, 16  ;;  %v8056_v0 = vshrl.u32 %v17619_v21, 16  ;;  %v12226_v5 = vcombine.low %v7935_v27, %v7945_v1 }
 0x4a6   : > { %v12227_v12 = vcombine.low %v7959_v20, %v7969_v35  ;;  %v7978_v8 = vrot.slane %v7977_v34, 4  ;;  %v8001_v22 = vor.u32 %v8000_v10, %v7997_v48  ;;  %v7993_v45 = vsel %vm14731_vm2, %v7988_v13, %v7992_v50  ;;  %v7745_v20 = vld [vmem:[#allocation2 + $0xa8] sm:$0xf] }
 0x4a7   : > { %v8014_v32 = vshll.u32 %v17594_v28, 16  ;;  %v8043_v39 = vshrl.u32 %v7742_v6, 16  ;;  %v8046_v60 = vshll.u32 %v7742_v6, 16  ;;  %v8021_v58 = vrot.slane %v8019_v40, 4 }
 0x4a8   : > { %v8024_v33 = vrot.slane %v8022_v18, 5  ;;  %v8030_v17 = vrot.slane %v8028_v25, 5  ;;  %v8034_v37 = vrot.slane %v8032_v38, 4  ;;  %v8012_v57 = vrot.slane %v8011_v51, 4  ;;  %v7748_v25 = vld [vmem:[#allocation2 + $0xb4] sm:$0xf] }
 0x4a9   : > { %v8054_v44 = vrot.slane %v8052_v14, 5  ;;  %v8058_v21 = vrot.slane %v8056_v0, 4  ;;  %v7983_v27 = vsel %vm14731_vm2, %v7978_v8, %v17953_v61  ;;  %v8002_v34 = vrot.slane %v8001_v22, 4 }
 0x4aa   : > { %v12228_v48 = vcombine.low %v7983_v27, %v7993_v45  ;;  %v8016_v28 = vrot.slane %v8014_v32, 5  ;;  %v8045_v10 = vrot.slane %v8043_v39, 4  ;;  %v8048_v1 = vrot.slane %v8046_v60, 5 }
 0x4ab   : > { %13387 = vmatmul.mubr.msk.bf16.gmra.mrb[12].mxu1 %vm6359_vm9, %v12226_v5  ;;  %v8025_v35 = vor.u32 %v8024_v33, %v8021_v58  ;;  %v8035_v13 = vor.u32 %v8034_v37, %v8030_v17  ;;  %v8076_v40 = vshll.u32 %v17627_v63, 16  ;;  %v8080_v18 = vshrl.u32 %v17627_v63, 16 }
 0x4ac   : > { %13390 = vmatprep.mubr.msk.bf16.mxu1 %vm6359_vm9, %v12227_v12  ;;  %v8017_v38 = vsel %vm14731_vm2, %v8012_v57, %v8016_v28  ;;  %v8059_v6 = vor.u32 %v8058_v21, %v8054_v44  ;;  %v8100_v50 = vshll.u32 %v17655_v55, 16  ;;  %v8104_v61 = vshrl.u32 %v17655_v55, 16  ;;  %v7751_v28 = vld [vmem:[#allocation2 + $0xc0] sm:$0xf] }
 0x4ad   : > { %v8007_v51 = vsel %vm14731_vm2, %v8002_v34, %v18207_v43  ;;  %v8038_v14 = vshll.u32 %v17611_v42, 16  ;;  %v8067_v0 = vshrl.u32 %v7745_v20, 16  ;;  %v8070_v5 = vshll.u32 %v7745_v20, 16 }
 0x4ae   : > { %v8049_v12 = vor.u32 %v8048_v1, %v8045_v10  ;;  %v8062_v63 = vshll.u32 %v17636_v26, 16  ;;  %v8091_v8 = vshrl.u32 %v7748_v25, 16  ;;  %v8094_v22 = vshll.u32 %v7748_v25, 16  ;;  %v14527_v25 = vld [vmem:[#allocation2 + $0xb0] sm:$0x1] }
 0x4af   : > { %v12229_v45 = vcombine.low %v8007_v51, %v8017_v38  ;;  %v8036_v32 = vrot.slane %v8035_v13, 4  ;;  %v8078_v39 = vrot.slane %v8076_v40, 5  ;;  %v8082_v60 = vrot.slane %v8080_v18, 4 }
 0x4b0   : > { %v8026_v55 = vrot.slane %v8025_v35, 4  ;;  %v8060_v58 = vrot.slane %v8059_v6, 4  ;;  %v8102_v33 = vrot.slane %v8100_v50, 5  ;;  %v8106_v37 = vrot.slane %v8104_v61, 4 }
 0x4b1   : > { %v8040_v42 = vrot.slane %v8038_v14, 5  ;;  %v8069_v43 = vrot.slane %v8067_v0, 4  ;;  %v8072_v57 = vrot.slane %v8070_v5, 5  ;;  %v8050_v21 = vrot.slane %v8049_v12, 4 }
 0x4b2   : > { %v8064_v27 = vrot.slane %v8062_v63, 5  ;;  %v8093_v26 = vrot.slane %v8091_v8, 4  ;;  %v8096_v34 = vrot.slane %v8094_v22, 5  ;;  %v8083_v1 = vor.u32 %v8082_v60, %v8078_v39 }
 0x4b3   : > { %13391 = vmatmul.mubr.msk.bf16.gmra.mrb[16].mxu1 %vm6359_vm9, %v12228_v48  ;;  %v8041_v10 = vsel %vm14731_vm2, %v8036_v32, %v8040_v42  ;;  %v8124_v48 = vshll.u32 %v17675_v41, 16  ;;  %v8128_v20 = vshrl.u32 %v17675_v41, 16  ;;  %v8031_v35 = vsel %vm14731_vm2, %v8026_v55, %v8030_v17 }
 0x4b4   : > { %13394 = vmatprep.mubr.msk.bf16.mxu1 %vm6359_vm9, %v12229_v45  ;;  %v8065_v13 = vsel %vm14731_vm2, %v8060_v58, %v8064_v27  ;;  %v8107_v40 = vor.u32 %v8106_v37, %v8102_v33  ;;  %v8073_v18 = vor.u32 %v8072_v57, %v8069_v43  ;;  %v8086_v38 = vshll.u32 %v14527_v25, 16  ;;  %v14528_v57 = vld [vmem:[#allocation2 + $0xc8] sm:$0x1] }
 0x4b5   : > { %v8115_v6 = vshrl.u32 %v7751_v28, 16  ;;  %v8118_v50 = vshll.u32 %v7751_v28, 16  ;;  %v12230_v61 = vcombine.low %v8031_v35, %v8041_v10  ;;  %v8055_v51 = vsel %vm14731_vm2, %v8050_v21, %v8054_v44  ;;  %v19512_v35 = vld [vmem:[#allocation34_spill] sm:$0xff] }
 0x4b6   : > { %v8097_v14 = vor.u32 %v8096_v34, %v8093_v26  ;;  %v8110_v0 = vshll.u32 %v17664_v23, 16  ;;  %v12231_v41 = vcombine.low %v8055_v51, %v8065_v13  ;;  %v8084_v5 = vrot.slane %v8083_v1, 4 }
 0x4b7   : > { %v8126_v12 = vrot.slane %v8124_v48, 5  ;;  %v8130_v17 = vrot.slane %v8128_v20, 4  ;;  %v8108_v63 = vrot.slane %v8107_v40, 4  ;;  %v8074_v8 = vrot.slane %v8073_v18, 4 }
 0x4b8   : > { %v8088_v22 = vrot.slane %v8086_v38, 5  ;;  %v8117_v45 = vrot.slane %v8115_v6, 4  ;;  %v8120_v32 = vrot.slane %v8118_v50, 5  ;;  %v8098_v60 = vrot.slane %v8097_v14, 4 }
 0x4b9   : > { %v8112_v55 = vrot.slane %v8110_v0, 5  ;;  %v8131_v58 = vor.u32 %v8130_v17, %v8126_v12  ;;  %v8510_v37 = vrot.slane %v17750_v49, 5  ;;  %v8079_v42 = vsel %vm14731_vm2, %v8074_v8, %v8078_v39  ;;  %v8444_v49 = vld [vmem:[#allocation2 + $0xc] sm:$0xe]  ;;  %v19514_v17 = vld [vmem:[#allocation9_spill] sm:$0xff] }
 0x4ba   : > { %v8089_v44 = vsel %vm14731_vm2, %v8084_v5, %v8088_v22  ;;  %v8121_v43 = vor.u32 %v8120_v32, %v8117_v45  ;;  %v8134_v21 = vshll.u32 %v14528_v57, 16  ;;  %v8103_v26 = vsel %vm14731_vm2, %v8098_v60, %v8102_v33  ;;  %v14236_v22 = vld [vmem:[%s19213_s3 + $0x70] sm:$0xff]   ;;  %v19517_v45 = vld [vmem:[#allocation11_spill] sm:$0xff]  ;;  %v19518_v32 = vld [vmem:[#allocation8_spill] sm:$0xff] }
 0x4bb   : > { %13395 = vmatmul.mubr.msk.bf16.gmra.mrb[20].mxu1 %vm6359_vm9, %v12230_v61  ;;  %v8113_v23 = vsel %vm14731_vm2, %v8108_v63, %v8112_v55  ;;  %v12232_v27 = vcombine.low %v8079_v42, %v8089_v44  ;;  %v8132_v28 = vrot.slane %v8131_v58, 4  ;;  %v8512_v10 = vrot.slane %v8510_v37, 4  ;;  %v19513_v61 = vld [vmem:[#allocation35_spill] sm:$0xff]  ;;  %v19515_v63 = vld [vmem:[#allocation10_spill] sm:$0xff]  ;;  %v19520_v55 = vld [vmem:[#allocation12_spill] sm:$0xff] }
 0x4bc   : > { %13398 = vmatprep.mubr.msk.bf16.mxu1 %vm6359_vm9, %v12231_v41  ;;  %v12233_v34 = vcombine.low %v8103_v26, %v8113_v23  ;;  %v8122_v1 = vrot.slane %v8121_v43, 4  ;;  %v8136_v48 = vrot.slane %v8134_v21, 5  ;;  %v8513_v20 = vrot.slane %v17759_v52, 5  ;;  %v8445_v52 = vld [vmem:[#allocation2 + $0x18] sm:$0xe]  ;;  %v19523_v58 = vld [vmem:[#allocation7_spill] sm:$0xff] }
 0x4bd   : > { %v8517_v13 = vrot.slane %v19512_v35, 5  ;;  %v12253_v40 = vrot.slane %v8444_v49, 9  ;;  %v8520_v51 = vrot.slane %v19513_v61, 5  ;;  %v12254_v14 = vrot.slane %v8445_v52, 9  ;;  %v19521_v44 = vld [vmem:[#allocation6_spill] sm:$0xff]  ;;  %v19524_v23 = vld [vmem:[#allocation13_spill] sm:$0xff] }
 0x4be   : > { %v8137_v39 = vsel %vm14731_vm2, %v8132_v28, %v8136_v48  ;;  %v8514_v33 = vsel %vm15047_vm6, %v8512_v10, %v8513_v20  ;;  %v8127_v18 = vsel %vm14731_vm2, %v8122_v1, %v8126_v12  ;;  %v14234_v12 = vld [vmem:[%s19213_s3 + $0x68] sm:$0xff]   ;;  %v19516_v8 = vcombine.low %v19514_v17, %v19515_v63  ;;  %v19526_v42 = vld [vmem:[#allocation14_spill] sm:$0xff]  ;;  %v19527_v43 = vld [vmem:[#allocation15_spill] sm:$0xff] }
 0x4bf   : > { %v12234_v25 = vcombine.low %v8127_v18, %v8137_v39  ;;  %v8511_v38 = vsel %vm15047_vm6, %v12253_v40, %v8510_v37  ;;  %v8519_v50 = vrot.slane %v8517_v13, 4  ;;  %v8518_v41 = vsel %vm15047_vm6, %v12254_v14, %v8517_v13  ;;  %v19529_v21 = vld [vmem:[#allocation16_spill] sm:$0xff]  ;;  %v19533_v28 = vld [vmem:[#allocation19_spill] sm:$0xff]  ;;  %v19536_v48 = vld [vmem:[#allocation21_spill] sm:$0xff] }
 0x4c0   : > { %v12273_v6 = vcombine.low %v8511_v38, %v8514_v33  ;;  %v19519_v60 = vcombine.low %v19517_v45, %v19518_v32  ;;  %v19525_v37 = vcombine.low %v19523_v58, %v19524_v23  ;;  %v19528_v57 = vcombine.low %v19526_v42, %v19527_v43  ;;  %v19535_v1 = vld [vmem:[#allocation20_spill] sm:$0xff]  ;;  %v19538_v20 = vld [vmem:[#allocation22_spill] sm:$0xff]  ;;  %v19539_v39 = vld [vmem:[#allocation23_spill] sm:$0xff] }
 0x4c1   : > { %v8521_v0 = vsel %vm15047_vm6, %v8519_v50, %v8520_v51  ;;  %v19537_v49 = vcombine.low %v19535_v1, %v19536_v48  ;;  %v19540_v35 = vcombine.low %v19538_v20, %v19539_v39  ;;  %v19541_v13 = vld [vmem:[#allocation24_spill] sm:$0xff]  ;;  %v19542_v40 = vld [vmem:[#allocation25_spill] sm:$0xff]  ;;  %v19544_v18 = vld [vmem:[#allocation26_spill] sm:$0xff] }
 0x4c2   : > { %v12274_v5 = vcombine.low %v8518_v41, %v8521_v0  ;;  %v19543_v33 = vcombine.low %v19541_v13, %v19542_v40  ;;  %v19548_v50 = vld [vmem:[#allocation29_spill] sm:$0xff]  ;;  %v19550_v61 = vld [vmem:[#allocation30_spill] sm:$0xff]  ;;  %v19551_v51 = vld [vmem:[#allocation31_spill] sm:$0xff] }
 0x4c3   : > { %13399 = vmatmul.mubr.msk.bf16.gmra.mrb[24].mxu1 %vm6359_vm9, %v12232_v27  ;;  %v19530_v27 = vld [vmem:[#allocation18_spill] sm:$0xff]  ;;  %v19552_v14 = vcombine.low %v19550_v61, %v19551_v51  ;;  %v19553_v41 = vld [vmem:[#allocation32_spill] sm:$0xff]  ;;  %v18361_v45 = vld [vmem:[%s19213_s3 + $0x80] sm:$0xff]  }
 0x4c4   : > { %13402 = vmatprep.mubr.msk.bf16.mxu1 %vm6359_vm9, %v12233_v34  ;;  %v19531_v26 = vcombine.low %v19529_v21, %v19530_v27  ;;  %v19532_v34 = vld [vmem:[#allocation17_spill] sm:$0xff]  ;;  %v14235_v0 = vld [vmem:[#allocation2 + $0x18] sm:$0xff]   ;;  %v14237_v17 = vld [vmem:[#allocation2 + $0x24] sm:$0xff]  }
 0x4c5   : > { %v19534_v10 = vcombine.low %v19532_v34, %v19533_v28  ;;  %v14245_v63 = vld [vmem:[%s19213_s3 + $0x78] sm:$0xff]   ;;  %v19556_v23 = vld [vmem:[#allocation36_spill] sm:$0xff]  ;;  %v14247_v27 = vld [vmem:[#allocation2 + $0x90] sm:$0xff]  }
 0x4c6   : > { %v14239_v32 = vld [vmem:[#allocation2 + $0x3c] sm:$0xff]   ;;  %v9297_v58 = vld [vmem:[#allocation2 + $0x18] sm:$0xf]  ;;  %v9359_v42 = vshrl.u32 %v19556_v23, 16  ;;  %v14246_v43 = vld [vmem:[#allocation2 + $0x84] sm:$0xff]  }
 0x4c7   : > { %v9349_v21 = vshll.u32 %v9297_v58, 16  ;;  %v19557_v20 = vld [vmem:[#allocation39_spill] sm:$0xff]  ;;  %v9303_v40 = vld [vmem:[#allocation2 + $0x30] sm:$0xf] }
 0x4c8   : > { %v9361_v28 = vrot.slane %v9359_v42, 4  ;;  %v9379_v39 = vshll.u32 %v19557_v20, 16 }
 0x4c9   : > { %v9351_v1 = vrot.slane %v9349_v21, 5 }
 0x4ca   : > { %v18377_v61 = vrot.slane %v9379_v39, 5  ;;  %v19562_v39 = vld [vmem:[#allocation42_spill] sm:$0xff] }
 0x4cb   : > { %13403 = vmatmul.mubr.msk.bf16.gmra.mrb[28].mxu1 %vm6359_vm9, %v12234_v25  ;;  %v19545_v25 = vld [vmem:[#allocation27_spill] sm:$0xff] }
 0x4cc   : > { %13410 = vmatprep.mubr.msk.bf16.mxu1 %vm6359_vm9, %v12273_v6  ;;  %v19546_v38 = vcombine.low %v19544_v18, %v19545_v25  ;;  %v19547_v6 = vld [vmem:[#allocation28_spill] sm:$0xff]  ;;  %v19558_v25 = vld [vmem:[#allocation37_spill] sm:$0xff] }
 0x4cd   : > { %v19549_v52 = vcombine.low %v19547_v6, %v19548_v50 }
 0x4d3   : > { %13411 = vmatmul.mubr.msk.bf16.vlgmr.msra.gmra.mrb[0].mxu1 %vm6359_vm9, %v12274_v5  ;;  %v19554_v5 = vld [vmem:[#allocation33_spill] sm:$0xff] }
 0x4d4   : > { %13443 = vmatpush3.bf16.msra.mxu1 %v18085_v9  ;;  %13414 = vmatprep.mubr.msk.bf16.mxu1 %vm6359_vm9, %v19516_v8  ;;  %v19522_v9 = vcombine.low %v19520_v55, %v19521_v44  ;;  %v14238_v8 = vld [vmem:[#allocation2 + $0x30] sm:$0xff]   ;;  %v14242_v44 = vld [vmem:[#allocation2 + $0x60] sm:$0xff]  }
 0x4d5   : > { %13444 = vmatprep.subr.bf16.mxu1 %v14234_v12  ;;  %v14241_v55 = vld [vmem:[#allocation2 + $0x54] sm:$0xff]  }
 0x4d8   : > { %13445 = vmatpush3.bf16.msra.mxu1 %v14234_v12  ;;  %v19555_v12 = vcombine.low %v19553_v41, %v19554_v5  ;;  %v9394_v5 = vshrl.u32 %v9303_v40, 16 }
 0x4d9   : > { %13478 = vmatprep.subr.bf16.mxu1 %v14236_v22 }
 0x4db   : > { %13415 = vmatmul.mubr.msk.bf16.gmra.mrb[4].mxu1 %vm6359_vm9, %v19519_v60  ;;  %v14240_v60 = vld [vmem:[#allocation2 + $0x48] sm:$0xff]  }
 0x4dc   : > { %13418 = vmatprep.mubr.msk.bf16.mxu1 %vm6359_vm9, %v19522_v9  ;;  %v14244_v9 = vld [vmem:[#allocation2 + $0x78] sm:$0xff]  }
 0x4e3   : > { %13419 = vmatmul.mubr.msk.bf16.gmra.mrb[8].mxu1 %vm6359_vm9, %v19525_v37  ;;  %v9355_v37 = vshll.u32 %v19556_v23, 16  ;;  %v9396_v23 = vrot.slane %v9394_v5, 4  ;;  %v19563_v5 = vld [vmem:[#allocation49_spill] sm:$0xff] }
 0x4e4   : > { %13422 = vmatprep.mubr.msk.bf16.mxu1 %vm6359_vm9, %v19528_v57  ;;  %v9346_v57 = vshrl.u32 %v9297_v58, 16 }
 0x4e5   : > { %v9357_v34 = vrot.slane %v9355_v37, 5 }
 0x4e7   : > { %v9362_v13 = vor.u32 %v9361_v28, %v9357_v34 }
 0x4eb   : > { %13423 = vmatmul.mubr.msk.bf16.gmra.mrb[12].mxu1 %vm6359_vm9, %v19531_v26  ;;  %v9300_v26 = vld [vmem:[#allocation2 + $0x24] sm:$0xf] }
 0x4ec   : > { %13426 = vmatprep.mubr.msk.bf16.mxu1 %vm6359_vm9, %v19534_v10  ;;  %v9348_v10 = vrot.slane %v9346_v57, 4  ;;  %v9370_v48 = vshrl.u32 %v9300_v26, 16  ;;  %v14250_v57 = vld [vmem:[#allocation2 + $0xb4] sm:$0xff]  }
 0x4ee   : > { %v9352_v18 = vor.u32 %v9351_v1, %v9348_v10  ;;  %v9372_v6 = vrot.slane %v9370_v48, 4  ;;  %v14251_v10 = vld [vmem:[#allocation2 + $0xc0] sm:$0xff]  }
 0x4f3   : > { %13427 = vmatmul.mubr.msk.bf16.gmra.mrb[16].mxu1 %vm6359_vm9, %v19537_v49  ;;  %v9373_v49 = vshll.u32 %v9300_v26, 16 }
 0x4f4   : > { %13430 = vmatprep.mubr.msk.bf16.mxu1 %vm6359_vm9, %v19540_v35  ;;  %v9383_v35 = vshrl.u32 %v19557_v20, 16 }
 0x4f5   : > { %v9375_v50 = vrot.slane %v9373_v49, 5  ;;  %v19561_v49 = vld [vmem:[#allocation41_spill] sm:$0xff] }
 0x4f6   : > { %v9385_v51 = vrot.slane %v9383_v35, 4  ;;  %v9413_v20 = vshll.u32 %v19561_v49, 16  ;;  %v9427_v35 = vshll.u32 %v19562_v39, 16 }
 0x4fb   : > { %13431 = vmatmul.mubr.msk.bf16.gmra.mrb[20].mxu1 %vm6359_vm9, %v19543_v33  ;;  %v14248_v33 = vld [vmem:[#allocation2 + $0x9c] sm:$0xff]  }
 0x4fc   : > { %13434 = vmatprep.mubr.msk.bf16.mxu1 %vm6359_vm9, %v19546_v38  ;;  %v9365_v38 = vshll.u32 %v19558_v25, 16  ;;  %v18397_v25 = vld [vmem:[#allocation2 + $0xd0] sm:$0xf] }
 0x503   : > { %13435 = vmatmul.mubr.msk.bf16.gmra.mrb[24].mxu1 %vm6359_vm9, %v19549_v52  ;;  %v14249_v52 = vld [vmem:[#allocation2 + $0xa8] sm:$0xff]  }
 0x504   : > { %13438 = vmatprep.mubr.msk.bf16.mxu1 %vm6359_vm9, %v19552_v14  ;;  %v19559_v14 = vld [vmem:[#allocation38_spill] sm:$0xff] }
 0x505   : > { %v9407_v41 = vshrl.u32 %v19559_v14, 16 }
 0x507   : > { %v9409_v58 = vrot.slane %v9407_v41, 4  ;;  %v9312_v41 = vld [vmem:[#allocation2 + $0x54] sm:$0xf] }
 0x50b   : > { %13439 = vmatmul.mubr.msk.bf16.gmra.mrb[28].mxu1 %vm6359_vm9, %v19555_v12  ;;  %v9397_v12 = vshll.u32 %v9303_v40, 16 }
 0x50c   : > { %13446 = vmatprep.mubr.msk.bf16.mxu1 %vm6359_vm9, %v14235_v0  ;;  %v9403_v0 = vshll.u32 %v19559_v14, 16 }
 0x50d   : > { %v9399_v37 = vrot.slane %v9397_v12, 5  ;;  %v9475_v12 = vshll.u32 %v19563_v5, 16 }
 0x513   : > { %13447 = vmatmul.mubr.msk.bf16.vlgmr.msra.gmra.mrb[0].mxu1 %vm6359_vm9, %v14237_v17  ;;  %v9363_v17 = vrot.slane %v9362_v13, 4  ;;  %v9309_v13 = vld [vmem:[#allocation2 + $0x48] sm:$0xf] }
 0x514   : > { %13479 = vmatpush3.bf16.msra.mxu1 %v14236_v22  ;;  %13450 = vmatprep.mubr.msk.bf16.mxu1 %vm6359_vm9, %v14238_v8  ;;  %v14243_v22 = vld [vmem:[#allocation2 + $0x6c] sm:$0xff]   ;;  %v9376_v8 = vor.u32 %v9375_v50, %v9372_v6  ;;  %v9455_v50 = vshrl.u32 %v17934_v46, 16 }
 0x515   : > { %13480 = vmatprep.subr.bf16.mxu1 %v14245_v63 }
 0x518   : > { %13481 = vmatpush3.bf16.msra.mxu1 %v14245_v63  ;;  %v9353_v63 = vrot.slane %v9352_v18, 4  ;;  %v9431_v18 = vshrl.u32 %v19562_v39, 16 }
 0x519   : > { %13514 = vmatprep.subr.bf16.mxu1 %v18361_v45 }
 0x51a   : > { %v9358_v21 = vsel %vm14731_vm2, %v9353_v63, %v9357_v34  ;;  %v9451_v34 = vshll.u32 %v17934_v46, 16  ;;  %v9445_v46 = vshll.u32 %v9309_v13, 16 }
 0x51b   : > { %13451 = vmatmul.mubr.msk.bf16.gmra.mrb[4].mxu1 %vm6359_vm9, %v14239_v32  ;;  %v19560_v32 = vld [vmem:[#allocation40_spill] sm:$0xff] }
 0x51c   : > { %13454 = vmatprep.mubr.msk.bf16.mxu1 %vm6359_vm9, %v14240_v60  ;;  %v9389_v60 = vshll.u32 %v19560_v32, 16  ;;  %v18407_v32 = vrot.slane %v9427_v35, 5 }
 0x51e   : > { %v9391_v26 = vrot.slane %v9389_v60, 5  ;;  %v9442_v60 = vshrl.u32 %v9309_v13, 16  ;;  %v19564_v13 = vld [vmem:[#allocation43_spill] sm:$0xff] }
 0x523   : > { %13455 = vmatmul.mubr.msk.bf16.gmra.mrb[8].mxu1 %vm6359_vm9, %v14241_v55  ;;  %v9306_v55 = vld [vmem:[#allocation2 + $0x3c] sm:$0xf] }
 0x524   : > { %13458 = vmatprep.mubr.msk.bf16.mxu1 %vm6359_vm9, %v14242_v44  ;;  %v9367_v44 = vrot.slane %v9365_v38, 5  ;;  %v9421_v28 = vshll.u32 %v9306_v55, 16  ;;  %v18399_v38 = vld [vmem:[#allocation2 + $0xd4] sm:$0x1] }
 0x525   : > { %v10209_v14 = vrot.slane %v18399_v38, 5 }
 0x526   : > { %v9368_v42 = vsel %vm14731_vm2, %v9363_v17, %v9367_v44  ;;  %v9479_v17 = vshrl.u32 %v19563_v5, 16  ;;  %v14252_v44 = vld [vmem:[#allocation2 + $0xcc] sm:$0xff]  }
 0x527   : > { %v12349_v40 = vcombine.low %v9358_v21, %v9368_v42  ;;  %v9466_v42 = vshrl.u32 %v9312_v41, 16  ;;  %v9415_v21 = vrot.slane %v9413_v20, 5 }
 0x52b   : > { %13459 = vmatmul.mubr.msk.bf16.gmra.mrb[12].mxu1 %vm6359_vm9, %v14243_v22  ;;  %v9386_v22 = vor.u32 %v9385_v51, %v18377_v61  ;;  %v10206_v51 = vrot.slane %v18397_v25, 5 }
 0x52c   : > { %13462 = vmatprep.mubr.msk.bf16.mxu1 %vm6359_vm9, %v14244_v9  ;;  %v18385_v9 = vrot.slane %v9403_v0, 5  ;;  %v9423_v0 = vrot.slane %v9421_v28, 5  ;;  %v18419_v28 = vrot.slane %v9475_v12, 5  ;;  %v19566_v12 = vld [vmem:[#allocation47_spill] sm:$0xff] }
 0x52d   : > { %v9387_v1 = vrot.slane %v9386_v22, 4  ;;  %v9433_v22 = vrot.slane %v9431_v18, 4  ;;  %v9437_v18 = vshll.u32 %v19564_v13, 16 }
 0x52e   : > { %v9410_v48 = vor.u32 %v9409_v58, %v18385_v9  ;;  %v18409_v58 = vrot.slane %v9451_v34, 5 }
 0x52f   : > { %v9392_v39 = vsel %vm14731_vm2, %v9387_v1, %v9391_v26 }
 0x533   : > { %13463 = vmatmul.mubr.msk.bf16.gmra.mrb[16].mxu1 %vm6359_vm9, %v14246_v43  ;;  %v9418_v43 = vshrl.u32 %v9306_v55, 16  ;;  %v10208_v55 = vrot.slane %v10206_v51, 4 }
 0x534   : > { %13466 = vmatprep.mubr.msk.bf16.mxu1 %vm6359_vm9, %v14247_v27  ;;  %v9377_v27 = vrot.slane %v9376_v8, 4  ;;  %v9411_v8 = vrot.slane %v9410_v48, 4 }
 0x535   : > { %v9420_v6 = vrot.slane %v9418_v43, 4  ;;  %v9469_v43 = vshll.u32 %v9312_v41, 16  ;;  %v9493_v41 = vshll.u32 %v9315_v3, 16 }
 0x536   : > { %v9382_v49 = vsel %vm14731_vm2, %v9377_v27, %v18377_v61  ;;  %v9416_v20 = vsel %vm14731_vm2, %v9411_v8, %v9415_v21  ;;  %v9468_v27 = vrot.slane %v9466_v42, 4 }
 0x537   : > { %v9424_v34 = vor.u32 %v9423_v0, %v9420_v6  ;;  %v9471_v26 = vrot.slane %v9469_v43, 5  ;;  %v12350_v1 = vcombine.low %v9382_v49, %v9392_v39  ;;  %v19565_v6 = vld [vmem:[#allocation46_spill] sm:$0xff]  ;;  %v9495_v49 = vrot.slane %v9493_v41, 5  ;;  %v14254_v39 = vld [vmem:[%s19213_s3 + $0x88] sm:$0xff]   ;;  %v19569_v41 = vld [vmem:[#allocation53_spill] sm:$0xff] }
 0x538   : > { %v9461_v0 = vshll.u32 %v19565_v6, 16 }
 0x539   : > { %v9472_v43 = vor.u32 %v9471_v26, %v9468_v27 }
 0x53b   : > { %13467 = vmatmul.mubr.msk.bf16.gmra.mrb[20].mxu1 %vm6359_vm9, %v14248_v33  ;;  %v9400_v33 = vor.u32 %v9399_v37, %v9396_v23  ;;  %v9457_v37 = vrot.slane %v9455_v50, 4  ;;  %v9434_v50 = vor.u32 %v9433_v22, %v18407_v32 }
 0x53c   : > { %13470 = vmatprep.mubr.msk.bf16.mxu1 %vm6359_vm9, %v14249_v52  ;;  %v10050_v52 = vld [vmem:[#allocation2 + $0xcc] sm:$0xe] }
 0x53d   : > { %v12398_v63 = vrot.slane %v10050_v52, 9  ;;  %v9401_v35 = vrot.slane %v9400_v33, 4  ;;  %v9444_v52 = vrot.slane %v9442_v60, 4  ;;  %v9458_v61 = vor.u32 %v9457_v37, %v18409_v58 }
 0x53e   : > { %v9425_v60 = vrot.slane %v9424_v34, 4 }
 0x53f   : > { %v18413_v23 = vsel %vm15047_vm6, %v12398_v63, %v10206_v51  ;;  %v9447_v51 = vrot.slane %v9445_v46, 5  ;;  %v9406_v5 = vsel %vm14731_vm2, %v9401_v35, %v18385_v9  ;;  %v9318_v63 = vld [vmem:[#allocation2 + $0x6c] sm:$0xf]  ;;  %v9435_v46 = vrot.slane %v9434_v50, 4  ;;  %v19568_v50 = vld [vmem:[#allocation57_spill] sm:$0xff] }
 0x540   : > { %v12351_v8 = vcombine.low %v9406_v5, %v9416_v20  ;;  %v9459_v42 = vrot.slane %v9458_v61, 4  ;;  %v9514_v9 = vshrl.u32 %v9318_v63, 16  ;;  %v9463_v35 = vrot.slane %v9461_v0, 5  ;;  %v9321_v61 = vld [vmem:[#allocation2 + $0x78] sm:$0xf] }
 0x541   : > { %v9448_v37 = vor.u32 %v9447_v51, %v9444_v52  ;;  %v9517_v20 = vshll.u32 %v9318_v63, 16  ;;  %v9523_v52 = vshll.u32 %v19568_v50, 16  ;;  %v9527_v51 = vshrl.u32 %v19568_v50, 16 }
 0x542   : > { %v9509_v5 = vshll.u32 %v19569_v41, 16  ;;  %v9516_v6 = vrot.slane %v9514_v9, 4  ;;  %v19571_v9 = vld [vmem:[#allocation60_spill] sm:$0xff] }
 0x543   : > { %13471 = vmatmul.mubr.msk.bf16.gmra.mrb[24].mxu1 %vm6359_vm9, %v14250_v57  ;;  %v18417_v57 = vsel %vm15047_vm6, %v10208_v55, %v10209_v14  ;;  %v9490_v14 = vshrl.u32 %v9315_v3, 16  ;;  %v9439_v55 = vrot.slane %v9437_v18, 5  ;;  %v9430_v18 = vsel %vm14731_vm2, %v9425_v60, %v18407_v32 }
 0x544   : > { %13474 = vmatprep.mubr.msk.bf16.mxu1 %vm6359_vm9, %v14251_v10  ;;  %v9481_v10 = vrot.slane %v9479_v17, 4  ;;  %v12418_v48 = vcombine.low %v18413_v23, %v18417_v57  ;;  %v9499_v17 = vshll.u32 %v19566_v12, 16  ;;  %v9449_v26 = vrot.slane %v9448_v37, 4  ;;  %v12448_v23 = vld [vmem:[%s14696_s17 + $0x34] sm:$0xf] }
 0x545   : > { %v9440_v27 = vsel %vm14731_vm2, %v9435_v46, %v9439_v55  ;;  %v9519_v0 = vrot.slane %v9517_v20, 5  ;;  %v9529_v63 = vrot.slane %v9527_v51, 4  ;;  %v19572_v51 = vld [vmem:[#allocation65_spill] sm:$0xff]  ;;  %v10869_v57 = vshrl.u32 %v12447_v4, 16 }
 0x546   : > { %v9482_v33 = vor.u32 %v9481_v10, %v18419_v28  ;;  %v9492_v10 = vrot.slane %v9490_v14, 4  ;;  %v18446_v13 = vrot.slane %v9499_v17, 5  ;;  %v9541_v17 = vshll.u32 %v9321_v61, 16 }
 0x548   : > { %v9483_v21 = vrot.slane %v9482_v33, 4  ;;  %v9473_v33 = vrot.slane %v9472_v43, 4  ;;  %v9496_v14 = vor.u32 %v9495_v49, %v9492_v10  ;;  %v9324_v10 = vld [vmem:[#allocation2 + $0x84] sm:$0xf]  ;;  %v9520_v49 = vor.u32 %v9519_v0, %v9516_v6 }
 0x549   : > { %v9543_v20 = vrot.slane %v9541_v17, 5 }
 0x54a   : > { %v9478_v46 = vsel %vm14731_vm2, %v9473_v33, %v18419_v28  ;;  %v9497_v43 = vrot.slane %v9496_v14, 4  ;;  %v9562_v28 = vshrl.u32 %v9324_v10, 16  ;;  %v19573_v33 = vld [vmem:[#allocation63_spill] sm:$0xff] }
 0x54b   : > { %13475 = vmatmul.mubr.msk.bf16.gmra.mrb[28].mxu1 %vm6359_vm9, %v14252_v44  ;;  %v19567_v44 = vld [vmem:[#allocation52_spill] sm:$0xff]  ;;  %v9599_v14 = vshrl.u32 %v19573_v33, 16 }
 0x54c   : > { %13482 = vmatprep.mubr.msk.bf16.mxu1 %vm6359_vm9, %v12349_v40  ;;  %v9503_v40 = vshrl.u32 %v19566_v12, 16  ;;  %v9485_v22 = vshll.u32 %v19567_v44, 16  ;;  %v9538_v12 = vshrl.u32 %v9321_v61, 16  ;;  %v12352_v44 = vcombine.low %v9430_v18, %v9440_v27  ;;  %v9327_v18 = vld [vmem:[#allocation2 + $0x90] sm:$0xf] }
 0x54d   : > { %v9571_v61 = vshll.u32 %v19572_v51, 16  ;;  %v9575_v27 = vshrl.u32 %v19572_v51, 16  ;;  %v9502_v41 = vsel %vm14731_vm2, %v9497_v43, %v18446_v13  ;;  %v9330_v43 = vld [vmem:[#allocation2 + $0x9c] sm:$0xf] }
 0x54e   : > { %v9505_v3 = vrot.slane %v9503_v40, 4  ;;  %v9487_v34 = vrot.slane %v9485_v22, 5  ;;  %v18464_v40 = vrot.slane %v9523_v52, 5  ;;  %v9454_v22 = vsel %vm14731_vm2, %v9449_v26, %v18409_v58 }
 0x54f   : > { %v9586_v26 = vshrl.u32 %v9327_v18, 16 }
 0x550   : > { %v9488_v32 = vsel %vm14731_vm2, %v9483_v21, %v9487_v34  ;;  %v9511_v21 = vrot.slane %v9509_v5, 5  ;;  %v9530_v58 = vor.u32 %v9529_v63, %v18464_v40  ;;  %v9521_v5 = vrot.slane %v9520_v49, 4  ;;  %v19574_v63 = vld [vmem:[#allocation61_spill] sm:$0xff] }
 0x553   : > { %13483 = vmatmul.mubr.msk.bf16.vlgmr.msra.gmra.mrb[0].mxu1 %vm6359_vm9, %v12350_v1  ;;  %v9464_v1 = vsel %vm14731_vm2, %v9459_v42, %v9463_v35  ;;  %v12354_v42 = vcombine.low %v9478_v46, %v9488_v32  ;;  %v9533_v35 = vshll.u32 %v19571_v9, 16  ;;  %v9595_v32 = vshll.u32 %v19573_v33, 16 }
 0x554   : > { %13515 = vmatpush3.bf16.msra.mxu1 %v18361_v45  ;;  %13486 = vmatprep.mubr.msk.bf16.mxu1 %vm6359_vm9, %v12351_v8  ;;  %v9506_v45 = vor.u32 %v9505_v3, %v18446_v13  ;;  %v19570_v8 = vld [vmem:[#allocation55_spill] sm:$0xff]  ;;  %v12353_v37 = vcombine.low %v9454_v22, %v9464_v1  ;;  %v9540_v3 = vrot.slane %v9538_v12, 4  ;;  %v9589_v1 = vshll.u32 %v9327_v18, 16 }
 0x555   : > { %13516 = vmatprep.subr.bf16.mxu1 %v14254_v39  ;;  %v9547_v60 = vshll.u32 %v19570_v8, 16  ;;  %v9551_v55 = vshrl.u32 %v19570_v8, 16  ;;  %v9535_v6 = vrot.slane %v9533_v35, 5  ;;  %v9531_v12 = vrot.slane %v9530_v58, 4 }
 0x556   : > { %v9507_v34 = vrot.slane %v9506_v45, 4  ;;  %v9544_v45 = vor.u32 %v9543_v20, %v9540_v3  ;;  %v9557_v8 = vshll.u32 %v19574_v63, 16  ;;  %v9577_v22 = vrot.slane %v9575_v27, 4 }
 0x557   : > { %v9549_v50 = vrot.slane %v9547_v60, 5  ;;  %v9553_v52 = vrot.slane %v9551_v55, 4  ;;  %v9564_v60 = vrot.slane %v9562_v28, 4  ;;  %v9588_v46 = vrot.slane %v9586_v26, 4  ;;  %v19575_v28 = vld [vmem:[#allocation68_spill] sm:$0xff] }
 0x558   : > { %13517 = vmatpush3.bf16.msra.mxu1 %v14254_v39  ;;  %v9565_v39 = vshll.u32 %v9324_v10, 16  ;;  %v9512_v0 = vsel %vm14731_vm2, %v9507_v34, %v9511_v21  ;;  %v18490_v10 = vrot.slane %v9595_v32, 5  ;;  %v9601_v13 = vrot.slane %v9599_v14, 4 }
 0x559   : > { %v9554_v17 = vor.u32 %v9553_v52, %v9549_v50  ;;  %v12355_v49 = vcombine.low %v9502_v41, %v9512_v0  ;;  %v9545_v9 = vrot.slane %v9544_v45, 4  ;;  %v9526_v21 = vsel %vm14731_vm2, %v9521_v5, %v18464_v40 }
 0x55a   : > { %v9567_v55 = vrot.slane %v9565_v39, 5  ;;  %v9536_v35 = vsel %vm14731_vm2, %v9531_v12, %v9535_v6  ;;  %v9610_v34 = vshrl.u32 %v9330_v43, 16  ;;  %v9613_v58 = vshll.u32 %v9330_v43, 16 }
 0x55b   : > { %13487 = vmatmul.mubr.msk.bf16.gmra.mrb[4].mxu1 %vm6359_vm9, %v12352_v44  ;;  %v18488_v44 = vrot.slane %v9571_v61, 5  ;;  %v9555_v3 = vrot.slane %v9554_v17, 4  ;;  %v9559_v52 = vrot.slane %v9557_v8, 5  ;;  %v9581_v39 = vshll.u32 %v19575_v28, 16 }
 0x55c   : > { %13490 = vmatprep.mubr.msk.bf16.mxu1 %vm6359_vm9, %v12353_v37  ;;  %v9591_v37 = vrot.slane %v9589_v1, 5  ;;  %v9568_v20 = vor.u32 %v9567_v55, %v9564_v60  ;;  %v12356_v61 = vcombine.low %v9526_v21, %v9536_v35  ;;  %v9550_v40 = vsel %vm14731_vm2, %v9545_v9, %v9549_v50  ;;  %v9333_v1 = vld [vmem:[#allocation2 + $0xa8] sm:$0xf] }
 0x55d   : > { %v9578_v18 = vor.u32 %v9577_v22, %v18488_v44  ;;  %v9619_v27 = vshll.u32 %v18070_v54, 16  ;;  %v9623_v26 = vshrl.u32 %v18070_v54, 16  ;;  %v9560_v33 = vsel %vm14731_vm2, %v9555_v3, %v9559_v52  ;;  %v9339_v52 = vld [vmem:[#allocation2 + $0xc0] sm:$0xf] }
 0x55e   : > { %v9592_v51 = vor.u32 %v9591_v37, %v9588_v46  ;;  %v9605_v32 = vshll.u32 %v18045_v16, 16  ;;  %v9643_v14 = vshll.u32 %v18060_v7, 16  ;;  %v9647_v41 = vshrl.u32 %v18060_v7, 16  ;;  %v9336_v7 = vld [vmem:[#allocation2 + $0xb4] sm:$0xf] }
 0x55f   : > { %v9569_v5 = vrot.slane %v9568_v20, 4  ;;  %v9579_v6 = vrot.slane %v9578_v18, 4  ;;  %v9612_v45 = vrot.slane %v9610_v34, 4  ;;  %v9615_v0 = vrot.slane %v9613_v58, 5 }
 0x560   : > { %v9593_v12 = vrot.slane %v9592_v51, 4  ;;  %v9634_v17 = vshrl.u32 %v9333_v1, 16  ;;  %v9637_v63 = vshll.u32 %v9333_v1, 16  ;;  %v12357_v8 = vcombine.low %v9550_v40, %v9560_v33  ;;  %v14530_v1 = vld [vmem:[#allocation2 + $0xb0] sm:$0x1] }
 0x561   : > { %v9583_v54 = vrot.slane %v9581_v39, 5  ;;  %v18511_v60 = vrot.slane %v9619_v27, 5  ;;  %v9625_v55 = vrot.slane %v9623_v26, 4  ;;  %v9607_v16 = vrot.slane %v9605_v32, 5 }
 0x562   : > { %v18514_v22 = vrot.slane %v9643_v14, 5  ;;  %v9649_v46 = vrot.slane %v9647_v41, 4  ;;  %v9574_v37 = vsel %vm14731_vm2, %v9569_v5, %v18488_v44  ;;  %v9616_v43 = vor.u32 %v9615_v0, %v9612_v45  ;;  %v9342_v41 = vld [vmem:[#allocation2 + $0xcc] sm:$0xf] }
 0x563   : > { %13491 = vmatmul.mubr.msk.bf16.gmra.mrb[8].mxu1 %vm6359_vm9, %v12354_v42  ;;  %v9602_v42 = vor.u32 %v9601_v13, %v18490_v10  ;;  %v9584_v13 = vsel %vm14731_vm2, %v9579_v6, %v9583_v54  ;;  %v9598_v21 = vsel %vm14731_vm2, %v9593_v12, %v18490_v10  ;;  %v9636_v3 = vrot.slane %v9634_v17, 4 }
 0x564   : > { %13494 = vmatprep.mubr.msk.bf16.mxu1 %vm6359_vm9, %v12355_v49  ;;  %v14529_v49 = vld [vmem:[#allocation2 + $0xa4] sm:$0x1]  ;;  %v9639_v20 = vrot.slane %v9637_v63, 5  ;;  %v9626_v18 = vor.u32 %v9625_v55, %v18511_v60  ;;  %v9658_v34 = vshrl.u32 %v9336_v7, 16  ;;  %v9667_v44 = vshll.u32 %v18100_v47, 16 }
 0x565   : > { %v9603_v50 = vrot.slane %v9602_v42, 4  ;;  %v9629_v9 = vshll.u32 %v14529_v49, 16  ;;  %v9671_v58 = vshrl.u32 %v18100_v47, 16  ;;  %v9650_v28 = vor.u32 %v9649_v46, %v18514_v22 }
 0x566   : > { %v9661_v39 = vshll.u32 %v9336_v7, 16  ;;  %v9691_v51 = vshll.u32 %v18102_v30, 16  ;;  %v9695_v10 = vshrl.u32 %v18102_v30, 16  ;;  %v12358_v42 = vcombine.low %v9574_v37, %v9584_v13 }
 0x567   : > { %v9608_v35 = vsel %vm14731_vm2, %v9603_v50, %v9607_v16  ;;  %v9617_v40 = vrot.slane %v9616_v43, 4  ;;  %v9631_v27 = vrot.slane %v9629_v9, 5  ;;  %v9640_v26 = vor.u32 %v9639_v20, %v9636_v3 }
 0x568   : > { %v9653_v33 = vshll.u32 %v14530_v1, 16  ;;  %v9682_v32 = vshrl.u32 %v9339_v52, 16  ;;  %v9685_v14 = vshll.u32 %v9339_v52, 16  ;;  %v9627_v5 = vrot.slane %v9626_v18, 4  ;;  %v14532_v52 = vld [vmem:[#allocation2 + $0xc8] sm:$0x1] }
 0x569   : > { %v9660_v47 = vrot.slane %v9658_v34, 4  ;;  %v9669_v6 = vrot.slane %v9667_v44, 5  ;;  %v9673_v45 = vrot.slane %v9671_v58, 4  ;;  %v9651_v0 = vrot.slane %v9650_v28, 4 }
 0x56a   : > { %v9663_v12 = vrot.slane %v9661_v39, 5  ;;  %v9693_v50 = vrot.slane %v9691_v51, 5  ;;  %v9697_v30 = vrot.slane %v9695_v10, 4  ;;  %v9706_v17 = vshrl.u32 %v9342_v41, 16 }
 0x56b   : > { %13495 = vmatmul.mubr.msk.bf16.gmra.mrb[12].mxu1 %vm6359_vm9, %v12356_v61  ;;  %v12359_v61 = vcombine.low %v9598_v21, %v9608_v35  ;;  %v9709_v63 = vshll.u32 %v9342_v41, 16  ;;  %v9719_v54 = vshrl.u32 %v18397_v25, 16  ;;  %v9641_v55 = vrot.slane %v9640_v26, 4  ;;  %v14531_v21 = vld [vmem:[#allocation2 + $0xbc] sm:$0x1] }
 0x56c   : > { %13498 = vmatprep.mubr.msk.bf16.mxu1 %vm6359_vm9, %v12357_v8  ;;  %v9715_v8 = vshll.u32 %v18397_v25, 16  ;;  %v9655_v16 = vrot.slane %v9653_v33, 5  ;;  %v9684_v46 = vrot.slane %v9682_v32, 4  ;;  %v9687_v7 = vrot.slane %v9685_v14, 5 }
 0x56d   : > { %v9622_v37 = vsel %vm14731_vm2, %v9617_v40, %v18511_v60  ;;  %v9632_v13 = vsel %vm14731_vm2, %v9627_v5, %v9631_v27  ;;  %v9674_v43 = vor.u32 %v9673_v45, %v9669_v6  ;;  %v9664_v9 = vor.u32 %v9663_v12, %v9660_v47 }
 0x56e   : > { %v9656_v49 = vsel %vm14731_vm2, %v9651_v0, %v9655_v16  ;;  %v9677_v35 = vshll.u32 %v14531_v21, 16  ;;  %v9698_v3 = vor.u32 %v9697_v30, %v9693_v50  ;;  %v9708_v25 = vrot.slane %v9706_v17, 4  ;;  %v19582_v16 = vld [vmem:[#allocation51_spill] sm:$0xff] }
 0x56f   : > { %v9711_v20 = vrot.slane %v9709_v63, 5  ;;  %v9717_v18 = vrot.slane %v9715_v8, 5  ;;  %v9721_v34 = vrot.slane %v9719_v54, 4  ;;  %v12360_v44 = vcombine.low %v9622_v37, %v9632_v13  ;;  %v19577_v63 = vld [vmem:[#allocation45_spill] sm:$0xff]  ;;  %v19580_v54 = vld [vmem:[#allocation50_spill] sm:$0xff]  ;;  %v19585_v37 = vld [vmem:[#allocation56_spill] sm:$0xff] }
 0x570   : > { %v9646_v60 = vsel %vm14731_vm2, %v9641_v55, %v18514_v22  ;;  %v9688_v58 = vor.u32 %v9687_v7, %v9684_v46  ;;  %v9701_v28 = vshll.u32 %v14532_v52, 16  ;;  %v9675_v51 = vrot.slane %v9674_v43, 4  ;;  %v19583_v46 = vld [vmem:[#allocation54_spill] sm:$0xff] }
 0x571   : > { %v12361_v39 = vcombine.low %v9646_v60, %v9656_v49  ;;  %v9679_v10 = vrot.slane %v9677_v35, 5  ;;  %v9712_v40 = vor.u32 %v9711_v20, %v9708_v25  ;;  %v9722_v27 = vor.u32 %v9721_v34, %v9717_v18  ;;  %v19586_v13 = vld [vmem:[#allocation58_spill] sm:$0xff]  ;;  %v19588_v49 = vld [vmem:[#allocation59_spill] sm:$0xff]  ;;  %v19591_v35 = vld [vmem:[#allocation64_spill] sm:$0xff] }
 0x572   : > { %v9725_v26 = vshll.u32 %v18399_v38, 16  ;;  %v9689_v1 = vrot.slane %v9688_v58, 4  ;;  %v9703_v33 = vrot.slane %v9701_v28, 5  ;;  %v19584_v7 = vcombine.low %v19582_v16, %v19583_v46  ;;  %v19594_v20 = vld [vmem:[#allocation67_spill] sm:$0xff]  ;;  %v19598_v60 = vld [vmem:[#allocation70_spill] sm:$0xff]  ;;  %v19601_v28 = vld [vmem:[#allocation72_spill] sm:$0xff] }
 0x573   : > { %13499 = vmatmul.mubr.msk.bf16.gmra.mrb[16].mxu1 %vm6359_vm9, %v12358_v42  ;;  %v9699_v42 = vrot.slane %v9698_v3, 4  ;;  %v9680_v22 = vsel %vm14731_vm2, %v9675_v51, %v9679_v10  ;;  %v9713_v41 = vrot.slane %v9712_v40, 4  ;;  %v9723_v5 = vrot.slane %v9722_v27, 4  ;;  %v19592_v3 = vld [vmem:[#allocation66_spill] sm:$0xff]  ;;  %v19599_v58 = vld [vmem:[#allocation71_spill] sm:$0xff] }
 0x574   : > { %13502 = vmatprep.mubr.msk.bf16.mxu1 %vm6359_vm9, %v12359_v61  ;;  %v9665_v61 = vrot.slane %v9664_v9, 4  ;;  %v9727_v47 = vrot.slane %v9725_v26, 5  ;;  %v9694_v0 = vsel %vm14731_vm2, %v9689_v1, %v9693_v50  ;;  %v19579_v50 = vld [vmem:[#allocation48_spill] sm:$0xff]  ;;  %v19587_v43 = vcombine.low %v19585_v37, %v19586_v13  ;;  %v19589_v9 = vld [vmem:[#allocation62_spill] sm:$0xff] }
 0x575   : > { %v9704_v32 = vsel %vm14731_vm2, %v9699_v42, %v9703_v33  ;;  %v9718_v38 = vsel %vm14731_vm2, %v9713_v41, %v9717_v18  ;;  %v19581_v55 = vcombine.low %v19579_v50, %v19580_v54  ;;  %v19590_v21 = vcombine.low %v19588_v49, %v19589_v9  ;;  %v19595_v18 = vld [vmem:[#allocation69_spill] sm:$0xff]  ;;  %v19604_v10 = vld [vmem:[#allocation74_spill] sm:$0xff]  ;;  %v19605_v42 = vld [vmem:[#allocation75_spill] sm:$0xff] }
 0x576   : > { %v9670_v14 = vsel %vm14731_vm2, %v9665_v61, %v9669_v6  ;;  %v12363_v12 = vcombine.low %v9694_v0, %v9704_v32  ;;  %v9728_v30 = vsel %vm14731_vm2, %v9723_v5, %v9727_v47  ;;  %v19576_v6 = vld [vmem:[#allocation44_spill] sm:$0xff]  ;;  %v19593_v25 = vcombine.low %v19591_v35, %v19592_v3 }
 0x577   : > { %v12362_v45 = vcombine.low %v9670_v14, %v9680_v22  ;;  %v12364_v17 = vcombine.low %v9718_v38, %v9728_v30  ;;  %v19578_v8 = vcombine.low %v19576_v6, %v19577_v63  ;;  %v19596_v34 = vcombine.low %v19594_v20, %v19595_v18  ;;  %v12445_v32 = vld [vmem:[%s14696_s17 + $0x28] sm:$0xf]  ;;  %v12443_v38 = vld [vmem:[%s14696_s17 + $0x20] sm:$0x1]  ;;  %v12440_v63 = vld [vmem:[%s14696_s17 + $0x14] sm:$0x1] }
 0x578   : > { %v19600_v52 = vcombine.low %v19598_v60, %v19599_v58  ;;  %v19606_v61 = vcombine.low %v19604_v10, %v19605_v42  ;;  %v10845_v14 = vshrl.u32 %v12444_v15, 16  ;;  %v10848_v41 = vshll.u32 %v12444_v15, 16  ;;  %v12453_v49 = vld [vmem:[%s14696_s17 + $0x48] sm:$0xf]  ;;  %v12449_v18 = vld [vmem:[%s14696_s17 + $0x38] sm:$0x1] }
 0x579   : > { %v10882_v6 = vshrl.u32 %v12448_v23, 16  ;;  %v10854_v54 = vshll.u32 %v12445_v32, 16  ;;  %v12446_v60 = vld [vmem:[%s14696_s17 + $0x2c] sm:$0x1]  ;;  %v10917_v58 = vshrl.u32 %v12453_v49, 16 }
 0x57a   : > { %v10847_v16 = vrot.slane %v10845_v14, 4  ;;  %v10850_v46 = vrot.slane %v10848_v41, 5  ;;  %v12451_v41 = vld [vmem:[%s14696_s17 + $0x40] sm:$0xf] }
 0x57b   : > { %13503 = vmatmul.mubr.msk.bf16.gmra.mrb[20].mxu1 %vm6359_vm9, %v12360_v44  ;;  %v19597_v44 = vcombine.low %v18064_v19, %v18074_v53  ;;  %v19607_v19 = vcombine.low %v18129_v59, %v18136_v24  ;;  %v19608_v53 = vcombine.low %v18140_v36, %v18149_v62  ;;  %v12441_v59 = vld [vmem:[%s14696_s17 + $0x18] sm:$0xf]  ;;  %v12442_v24 = vld [vmem:[%s14696_s17 + $0x1c] sm:$0xf]  ;;  %v12438_v36 = vld [vmem:[%s14696_s17 + $0xc] sm:$0xf] }
 0x57c   : > { %13506 = vmatprep.mubr.msk.bf16.mxu1 %vm6359_vm9, %v12361_v39  ;;  %v19602_v39 = vld [vmem:[#allocation73_spill] sm:$0xff]  ;;  %v10821_v40 = vshrl.u32 %v12441_v59, 16  ;;  %v10824_v31 = vshll.u32 %v12441_v59, 16  ;;  %v10834_v27 = vshrl.u32 %v12442_v24, 16  ;;  %v10797_v26 = vshrl.u32 %v12438_v36, 16 }
 0x57d   : > { %v19603_v51 = vcombine.low %v19601_v28, %v19602_v39  ;;  %v12439_v62 = vld [vmem:[%s14696_s17 + $0x10] sm:$0xf]  ;;  %v10800_v2 = vshll.u32 %v12438_v36, 16  ;;  %v10884_v3 = vrot.slane %v10882_v6, 4  ;;  %v10856_v20 = vrot.slane %v10854_v54, 5 }
 0x57e   : > { %v10810_v1 = vshrl.u32 %v12439_v62, 16  ;;  %v10823_v33 = vrot.slane %v10821_v40, 4  ;;  %v10826_v22 = vrot.slane %v10824_v31, 5  ;;  %v10799_v47 = vrot.slane %v10797_v26, 4 }
 0x57f   : > { %v10836_v0 = vrot.slane %v10834_v27, 4  ;;  %v10864_v36 = vshll.u32 %v12446_v60, 16  ;;  %v10919_v31 = vrot.slane %v10917_v58, 4 }
 0x580   : > { %v10812_v30 = vrot.slane %v10810_v1, 4 }
 0x583   : > { %13507 = vmatmul.mubr.msk.bf16.gmra.mrb[24].mxu1 %vm6359_vm9, %v12362_v45  ;;  %v10802_v45 = vrot.slane %v10800_v2, 5 }
 0x584   : > { %13510 = vmatprep.mubr.msk.bf16.mxu1 %vm6359_vm9, %v12363_v12 }
 0x585   : > { %v10803_v37 = vor.u32 %v10802_v45, %v10799_v47 }
 0x587   : > { %v10804_v39 = vrot.slane %v10803_v37, 4  ;;  %v10906_v37 = vshrl.u32 %v12451_v41, 16 }
 0x58b   : > { %13511 = vmatmul.mubr.msk.bf16.gmra.mrb[28].mxu1 %vm6359_vm9, %v12364_v17  ;;  %v10878_v17 = vshll.u32 %v12448_v23, 16 }
 0x58c   : > { %13518 = vmatprep.mubr.msk.bf16.mxu1 %vm6359_vm9, %v19578_v8  ;;  %v10871_v8 = vrot.slane %v10869_v57, 4 }
 0x58d   : > { %v10880_v35 = vrot.slane %v10878_v17, 5 }
 0x593   : > { %13519 = vmatmul.mubr.msk.bf16.vlgmr.msra.gmra.mrb[0].mxu1 %vm6359_vm9, %v19581_v55  ;;  %v10858_v55 = vshrl.u32 %v12445_v32, 16 }
 0x594   : > { %13522 = vmatprep.mubr.msk.bf16.mxu1 %vm6359_vm9, %v19584_v7  ;;  %v10827_v7 = vor.u32 %v10826_v22, %v10823_v33  ;;  %v12450_v33 = vld [vmem:[%s14696_s17 + $0x3c] sm:$0xf] }
 0x595   : > { %v10893_v6 = vshrl.u32 %v12450_v33, 16 }
 0x596   : > { %v10828_v28 = vrot.slane %v10827_v7, 4 }
 0x59b   : > { %13523 = vmatmul.mubr.msk.bf16.gmra.mrb[4].mxu1 %vm6359_vm9, %v19587_v43  ;;  %v10840_v43 = vshll.u32 %v12443_v38, 16 }
 0x59c   : > { %13526 = vmatprep.mubr.msk.bf16.mxu1 %vm6359_vm9, %v19590_v21  ;;  %v10816_v21 = vshll.u32 %v12440_v63, 16  ;;  %v12459_v63 = vld [vmem:[%s14696_s17 + $0x60] sm:$0xf] }
 0x59d   : > { %v10842_v10 = vrot.slane %v10840_v43, 5 }
 0x5a3   : > { %13527 = vmatmul.mubr.msk.bf16.gmra.mrb[8].mxu1 %vm6359_vm9, %v19593_v25 }
 0x5a4   : > { %13530 = vmatprep.mubr.msk.bf16.mxu1 %vm6359_vm9, %v19596_v34  ;;  %v10860_v34 = vrot.slane %v10858_v55, 4  ;;  %v10896_v55 = vshll.u32 %v12450_v33, 16 }
 0x5a6   : > { %v10898_v60 = vrot.slane %v10896_v55, 5 }
 0x5ab   : > { %13531 = vmatmul.mubr.msk.bf16.gmra.mrb[12].mxu1 %vm6359_vm9, %v19597_v44  ;;  %v10851_v44 = vor.u32 %v10850_v46, %v10847_v16  ;;  %v10902_v16 = vshll.u32 %v12451_v41, 16  ;;  %v12460_v46 = vld [vmem:[%s14696_s17 + $0x64] sm:$0xf] }
 0x5ac   : > { %13534 = vmatprep.mubr.msk.bf16.mxu1 %vm6359_vm9, %v19600_v52  ;;  %v10920_v52 = vshll.u32 %v12453_v49, 16  ;;  %v12452_v49 = vld [vmem:[%s14696_s17 + $0x44] sm:$0x1] }
 0x5ad   : > { %v10852_v40 = vrot.slane %v10851_v44, 4  ;;  %v10895_v44 = vrot.slane %v10893_v6, 4  ;;  %v18686_v58 = vrot.slane %v10902_v16, 5 }
 0x5af   : > { %v10857_v22 = vsel %vm14731_vm2, %v10852_v40, %v10856_v20 }
 0x5b3   : > { %13535 = vmatmul.mubr.msk.bf16.gmra.mrb[16].mxu1 %vm6359_vm9, %v19603_v51 }
 0x5b4   : > { %13538 = vmatprep.mubr.msk.bf16.mxu1 %vm6359_vm9, %v19606_v61  ;;  %v10818_v61 = vrot.slane %v10816_v21, 5  ;;  %v10968_v21 = vshll.u32 %v12459_v63, 16 }
 0x5bb   : > { %13539 = vmatmul.mubr.msk.bf16.gmra.mrb[20].mxu1 %vm6359_vm9, %v19607_v19  ;;  %v10885_v19 = vor.u32 %v10884_v3, %v10880_v35 }
 0x5bc   : > { %13542 = vmatprep.mubr.msk.bf16.mxu1 %vm6359_vm9, %v19608_v53  ;;  %v10888_v53 = vshll.u32 %v12449_v18, 16  ;;  %v10974_v18 = vshll.u32 %v12460_v46, 16 }
 0x5bd   : > { %v10886_v15 = vrot.slane %v10885_v19, 4  ;;  %v12466_v19 = vld [vmem:[%s14696_s17 + $0x7c] sm:$0xf] }
 0x5be   : > { %v18694_v40 = vrot.slane %v10974_v18, 5 }
 0x5c3   : > { %13543 = vmatmul.mubr.msk.bf16.gmra.mrb[24].mxu1 %vm6359_vm9, %v12416_v11  ;;  %v10830_v11 = vshll.u32 %v12442_v24, 16  ;;  %v10861_v24 = vor.u32 %v10860_v34, %v10856_v20  ;;  %v10978_v34 = vshrl.u32 %v12460_v46, 16 }
 0x5c4   : > { %13546 = vmatprep.mubr.msk.bf16.mxu1 %vm6359_vm9, %v12417_v56  ;;  %v10806_v56 = vshll.u32 %v12439_v62, 16  ;;  %v12454_v62 = vld [vmem:[%s14696_s17 + $0x4c] sm:$0xf] }
 0x5c5   : > { %v18637_v5 = vrot.slane %v10830_v11, 5  ;;  %v10926_v1 = vshll.u32 %v12454_v62, 16  ;;  %v10862_v57 = vrot.slane %v10861_v24, 4  ;;  %v10930_v14 = vshrl.u32 %v12454_v62, 16  ;;  %v12462_v62 = vld [vmem:[%s14696_s17 + $0x6c] sm:$0xf] }
 0x5c6   : > { %v10808_v12 = vrot.slane %v10806_v56, 5  ;;  %v10890_v56 = vrot.slane %v10888_v53, 5  ;;  %v10992_v33 = vshll.u32 %v12462_v62, 16 }
 0x5c7   : > { %v10837_v13 = vor.u32 %v10836_v0, %v18637_v5  ;;  %v10833_v11 = vsel %vm14731_vm2, %v10828_v28, %v18637_v5  ;;  %v10928_v17 = vrot.slane %v10926_v1, 5  ;;  %v12457_v28 = vld [vmem:[%s14696_s17 + $0x58] sm:$0xf]  ;;  %v10899_v1 = vor.u32 %v10898_v60, %v10895_v44  ;;  %v12471_v60 = vld [vmem:[%s14696_s17 + $0x90] sm:$0xf] }
 0x5c8   : > { %v10813_v9 = vor.u32 %v10812_v30, %v10808_v12  ;;  %v10809_v27 = vsel %vm14731_vm2, %v10804_v39, %v10808_v12  ;;  %v18661_v5 = vunpack.c.l.bf16 %v10833_v11  ;;  %v12455_v12 = vld [vmem:[%s14696_s17 + $0x50] sm:$0x1]  ;;  %v10891_v30 = vsel %vm14731_vm2, %v10886_v15, %v10890_v56 }
 0x5c9   : > { %v10838_v51 = vrot.slane %v10837_v13, 4  ;;  %v18663_v47 = vunpack.c.l.bf16 %v10809_v27  ;;  %v10932_v13 = vrot.slane %v10930_v14, 4  ;;  %v10936_v43 = vshll.u32 %v12455_v12, 16 }
 0x5ca   : > { %v10814_v42 = vrot.slane %v10813_v9, 4  ;;  %v10965_v9 = vshrl.u32 %v12459_v63, 16  ;;  %v10980_v11 = vrot.slane %v10978_v34, 4  ;;  %v11022_v56 = vshll.u32 %v12466_v19, 16  ;;  %v12458_v63 = vld [vmem:[%s14696_s17 + $0x5c] sm:$0x1] }
 0x5cb   : > { %13547 = vmatmul.mubr.msk.bf16.gmra.mrb[28].mxu1 %vm6359_vm9, %v12418_v48  ;;  %v10872_v48 = vshll.u32 %v12447_v4, 16  ;;  %v10922_v4 = vrot.slane %v10920_v52, 5  ;;  %v10843_v26 = vsel %vm14731_vm2, %v10838_v51, %v10842_v10  ;;  %v10912_v52 = vshll.u32 %v12452_v49, 16 }
 0x5cc   : > { %v10819_v2 = vsel %vm14731_vm2, %v10814_v42, %v10818_v61  ;;  %v18665_v45 = vunpack.c.l.bf16 %v10843_v26  ;;  %v10933_v51 = vor.u32 %v10932_v13, %v10928_v17  ;;  %v10938_v10 = vrot.slane %v10936_v43, 5  ;;  %v12465_v61 = vld [vmem:[%s14696_s17 + $0x78] sm:$0xf]  ;;  %v12461_v26 = vld [vmem:[%s14696_s17 + $0x68] sm:$0x1] }
 0x5cd   : > { %v10874_v50 = vrot.slane %v10872_v48, 5  ;;  %v10866_v48 = vrot.slane %v10864_v36, 5  ;;  %v10923_v32 = vor.u32 %v10922_v4, %v10919_v31  ;;  %v18667_v0 = vunpack.c.l.bf16 %v10819_v2 }
 0x5ce   : > { %v10908_v42 = vrot.slane %v10906_v37, 4  ;;  %v10967_v53 = vrot.slane %v10965_v9, 4  ;;  %v10950_v31 = vshll.u32 %v12457_v28, 16  ;;  %v10954_v4 = vshrl.u32 %v12457_v28, 16 }
 0x5cf   : > { %v10875_v25 = vor.u32 %v10874_v50, %v10871_v8  ;;  %v12456_v8 = vld [vmem:[%s14696_s17 + $0x54] sm:$0xf]  ;;  %v18676_v50 = vunpack.c.l.bf16 %v10857_v22  ;;  %v10867_v54 = vsel %vm14731_vm2, %v10862_v57, %v10866_v48  ;;  %v10924_v7 = vrot.slane %v10923_v32, 4  ;;  %v12463_v57 = vld [vmem:[%s14696_s17 + $0x70] sm:$0xf] }
 0x5d0   : > { %v10944_v3 = vshll.u32 %v12456_v8, 16  ;;  %v18684_v20 = vunpack.c.l.bf16 %v10867_v54  ;;  %v11013_v2 = vshrl.u32 %v12465_v61, 16  ;;  %v11016_v15 = vshll.u32 %v12465_v61, 16 }
 0x5d1   : > { %v10876_v59 = vrot.slane %v10875_v25, 4  ;;  %v18682_v25 = vunpack.c.l.bf16 %v10891_v30  ;;  %v10929_v39 = vsel %vm14731_vm2, %v10924_v7, %v10928_v17  ;;  %v10989_v48 = vshrl.u32 %v12462_v62, 16 }
 0x5d2   : > { %v10946_v36 = vrot.slane %v10944_v3, 5  ;;  %v18696_v27 = vunpack.c.l.bf16 %v10929_v39  ;;  %v10934_v22 = vrot.slane %v10933_v51, 4  ;;  %v10909_v32 = vor.u32 %v10908_v42, %v18686_v58 }
 0x5d3   : > { %v10881_v23 = vsel %vm14731_vm2, %v10876_v59, %v10880_v35  ;;  %v10941_v35 = vshrl.u32 %v12456_v8, 16  ;;  %v10970_v59 = vrot.slane %v10968_v21, 5  ;;  %v10952_v12 = vrot.slane %v10950_v31, 5 }
 0x5d4   : > { %v18670_v38 = vunpack.c.l.bf16 %v10881_v23  ;;  %v11026_v23 = vshrl.u32 %v12466_v19, 16  ;;  %v10981_v30 = vor.u32 %v10980_v11, %v18694_v40  ;;  %v10984_v17 = vshll.u32 %v12461_v26, 16 }
 0x5d5   : > { %v10943_v24 = vrot.slane %v10941_v35, 4  ;;  %v10971_v14 = vor.u32 %v10970_v59, %v10967_v53  ;;  %v10956_v6 = vrot.slane %v10954_v4, 4  ;;  %v11015_v8 = vrot.slane %v11013_v2, 4  ;;  %v12467_v35 = vld [vmem:[%s14696_s17 + $0x80] sm:$0x1] }
 0x5d6   : > { %v11018_v54 = vrot.slane %v11016_v15, 5  ;;  %v18703_v55 = vrot.slane %v11022_v56, 5  ;;  %v10998_v16 = vshll.u32 %v12463_v57, 16  ;;  %v10991_v46 = vrot.slane %v10989_v48, 4  ;;  %v12468_v2 = vld [vmem:[%s14696_s17 + $0x84] sm:$0xf] }
 0x5d7   : > { %v10947_v41 = vor.u32 %v10946_v36, %v10943_v24  ;;  %v10994_v7 = vrot.slane %v10992_v33, 5  ;;  %v11002_v37 = vshrl.u32 %v12463_v57, 16  ;;  %v11028_v13 = vrot.slane %v11026_v23, 4  ;;  %v12472_v23 = vld [vmem:[%s14696_s17 + $0x94] sm:$0xf] }
 0x5d8   : > { %v10900_v43 = vrot.slane %v10899_v1, 4  ;;  %v10939_v49 = vsel %vm14731_vm2, %v10934_v22, %v10938_v10  ;;  %v10910_v9 = vrot.slane %v10909_v32, 4  ;;  %v10914_v21 = vrot.slane %v10912_v52, 5  ;;  %v12464_v10 = vld [vmem:[%s14696_s17 + $0x74] sm:$0x1] }
 0x5d9   : > { %v10972_v3 = vrot.slane %v10971_v14, 4  ;;  %v10948_v18 = vrot.slane %v10947_v41, 4  ;;  %v10986_v34 = vrot.slane %v10984_v17, 5  ;;  %v10960_v44 = vshll.u32 %v12458_v63, 16 }
 0x5da   : > { %v10982_v28 = vrot.slane %v10981_v30, 4  ;;  %v10957_v39 = vor.u32 %v10956_v6, %v10952_v12  ;;  %v11019_v51 = vor.u32 %v11018_v54, %v11015_v8  ;;  %v11000_v42 = vrot.slane %v10998_v16, 5 }
 0x5db   : > { %v10995_v61 = vor.u32 %v10994_v7, %v10991_v46  ;;  %v11029_v19 = vor.u32 %v11028_v13, %v18703_v55  ;;  %v11032_v53 = vshll.u32 %v12467_v35, 16  ;;  %v11004_v59 = vrot.slane %v11002_v37, 4  ;;  %v18743_v46 = vld [vmem:[%s19214_s4] ss:$0 sm:$0xff] }
 0x5dc   : > { %v10905_v52 = vsel %vm14731_vm2, %v10900_v43, %v18686_v58  ;;  %v18714_v24 = vunpack.c.l.bf16 %v10939_v49  ;;  %v11061_v36 = vshrl.u32 %v12471_v60, 16  ;;  %v11064_v62 = vshll.u32 %v12471_v60, 16  ;;  %v12469_v49 = vld [vmem:[%s14696_s17 + $0x88] sm:$0xf] }
 0x5dd   : > { %v10915_v31 = vsel %vm14731_vm2, %v10910_v9, %v10914_v21  ;;  %v10977_v4 = vsel %vm14731_vm2, %v10972_v3, %v18694_v40  ;;  %v10953_v11 = vsel %vm14731_vm2, %v10948_v18, %v10952_v12  ;;  %v10962_v26 = vrot.slane %v10960_v44, 5  ;;  %v12473_v3 = vld [vmem:[%s14696_s17 + $0x98] sm:$0x1] }
 0x5de   : > { %v10987_v15 = vsel %vm14731_vm2, %v10982_v28, %v10986_v34  ;;  %v10958_v58 = vrot.slane %v10957_v39, 4  ;;  %v11020_v56 = vrot.slane %v11019_v51, 4  ;;  %v11008_v1 = vshll.u32 %v12464_v10, 16 }
 0x5df   : > { %v10996_v57 = vrot.slane %v10995_v61, 4  ;;  %v11030_v48 = vrot.slane %v11029_v19, 4  ;;  %v11034_v33 = vrot.slane %v11032_v53, 5  ;;  %v11005_v22 = vor.u32 %v11004_v59, %v11000_v42  ;;  %v12470_v53 = vld [vmem:[%s14696_s17 + $0x8c] sm:$0x1] }
 0x5e0   : > { %v11063_v32 = vrot.slane %v11061_v36, 4  ;;  %v11066_v14 = vrot.slane %v11064_v62, 5  ;;  %v11037_v40 = vshrl.u32 %v12468_v2, 16  ;;  %v11040_v41 = vshll.u32 %v12468_v2, 16 }
 0x5e1   : > { %v18727_v30 = vunpack.c.l.bf16 %v10905_v52  ;;  %v18729_v12 = vunpack.c.l.bf16 %v10915_v31  ;;  %v11070_v17 = vshll.u32 %v12472_v23, 16  ;;  %v11074_v6 = vshrl.u32 %v12472_v23, 16 }
 0x5e2   : > { %v18731_v63 = vunpack.c.l.bf16 %v10977_v4  ;;  %v18733_v8 = vunpack.c.l.bf16 %v10953_v11  ;;  %v10963_v54 = vsel %vm14731_vm2, %v10958_v58, %v10962_v26  ;;  %v11025_v16 = vsel %vm14731_vm2, %v11020_v56, %v18703_v55 }
 0x5e3   : > { %v18745_v7 = vunpack.c.l.bf16 %v10987_v15  ;;  %v11001_v37 = vsel %vm14731_vm2, %v10996_v57, %v11000_v42  ;;  %v11006_v13 = vrot.slane %v11005_v22, 4  ;;  %v11010_v43 = vrot.slane %v11008_v1, 5  ;;  %v12477_v15 = vld [vmem:[%s14696_s17 + $0xa8] sm:$0xf] }
 0x5e4   : > { %v11035_v9 = vsel %vm14731_vm2, %v11030_v48, %v11034_v33  ;;  %v11067_v21 = vor.u32 %v11066_v14, %v11063_v32  ;;  %v11039_v35 = vrot.slane %v11037_v40, 4  ;;  %v11042_v55 = vrot.slane %v11040_v41, 5 }
 0x5e5   : > { %v18753_v34 = vunpack.c.l.bf16 %v10963_v54  ;;  %v18755_v44 = vunpack.c.l.bf16 %v11025_v16  ;;  %v18757_v60 = vrot.slane %v11070_v17, 5  ;;  %v11076_v28 = vrot.slane %v11074_v6, 4 }
 0x5e6   : > { %v18762_v42 = vunpack.c.l.bf16 %v11001_v37  ;;  %v11046_v61 = vshll.u32 %v12469_v49, 16  ;;  %v11050_v19 = vshrl.u32 %v12469_v49, 16  ;;  %v18768_v52 = vunpack.c.l.bf16 %v11035_v9  ;;  %v18790_v49 = vld [vmem:[%s14696_s17 + $0xac] sm:$0xf] }
 0x5e7   : > { %v11011_v36 = vsel %vm14731_vm2, %v11006_v13, %v11010_v43  ;;  %v11080_v62 = vshll.u32 %v12473_v3, 16  ;;  %v11068_v26 = vrot.slane %v11067_v21, 4  ;;  %v11043_v2 = vor.u32 %v11042_v55, %v11039_v35  ;;  %v18798_v3 = vld [vmem:[%s14696_s17 + $0x9c] sm:$0xf] }
 0x5e8   : > { %v11077_v1 = vor.u32 %v11076_v28, %v18757_v60  ;;  %v11056_v23 = vshll.u32 %v12470_v53, 16  ;;  %v11048_v33 = vrot.slane %v11046_v61, 5  ;;  %v11052_v22 = vrot.slane %v11050_v19, 4 }
 0x5e9   : > { %v18784_v40 = vunpack.c.l.bf16 %v11011_v36  ;;  %v11109_v41 = vshrl.u32 %v12477_v15, 16  ;;  %v11044_v6 = vrot.slane %v11043_v2, 4  ;;  %v11082_v54 = vrot.slane %v11080_v62, 5 }
 0x5ea   : > { %v11073_v13 = vsel %vm14731_vm2, %v11068_v26, %v18757_v60  ;;  %v11078_v43 = vrot.slane %v11077_v1, 4  ;;  %v11053_v35 = vor.u32 %v11052_v22, %v11048_v33  ;;  %v18795_v55 = vrot.slane %v11056_v23, 5 }
 0x5eb   : > { %v11112_v60 = vshll.u32 %v12477_v15, 16  ;;  %v11118_v36 = vshll.u32 %v18790_v49, 16  ;;  %v11085_v26 = vshrl.u32 %v18798_v3, 16 }
 0x5ec   : > { %v11054_v1 = vrot.slane %v11053_v35, 4 }
 0x666   : > { %v13520_v18 = vpop.f32.mrb[0].mxu1 }
 0x667   : > { %v18760_v39 = vadd.f32 %v13520_v18, %v18743_v46  ;;  %v10358_v51 = vpop.f32.mrb[1].mxu1 }
 0x668   : > { %v18766_v10 = vadd.f32 %v18743_v46, %v10358_v51  ;;  %v13521_v59 = vpop.f32.mrb[2].mxu1  ;;  %v18803_v51 = vrot.slane %v11109_v41, 4  ;;  %v12475_v41 = vld [vmem:[%s14696_s17 + $0xa0] sm:$0xf] }
 0x669   : > { %v10558_v31 = vsub.f32 0.0, %v18760_v39  ;;  %v18774_v4 = vadd.f32 %v13521_v59, %v18743_v46  ;;  %v10361_v11 = vpop.f32.mrb[3].mxu1  ;;  %v11049_v59 = vsel %vm14731_vm2, %v11044_v6, %v11048_v33  ;;  %v11122_v33 = vshrl.u32 %v18790_v49, 16 }
 0x66a   : > { %v10556_v58 = vsub.f32 0.0, %v18766_v10  ;;  %v18779_v56 = vadd.f32 %v18743_v46, %v10361_v11  ;;  %v11083_v11 = vsel %vm14731_vm2, %v11078_v43, %v11082_v54  ;;  %v18829_v54 = vrot.slane %v11118_v36, 5 }
 0x66b   : > { %v10592_v57 = vmul.f32 1.442695, %v10558_v31  ;;  %v10559_v48 = vsub.f32 0.0, %v18774_v4  ;;  %v11059_v49 = vsel %vm14731_vm2, %v11054_v1, %v18795_v55 }
 0x66c   : > { %v10588_v32 = vmul.f32 1.442695, %v10556_v58  ;;  %v10557_v14 = vsub.f32 0.0, %v18779_v56  ;;  %v18820_v58 = vunpack.c.l.bf16 %v11073_v13 }
 0x66d   : > { %14383 = vpow2.f32 %v10592_v57  ;;  %v10594_v17 = vmul.f32 1.442695, %v10559_v48  ;;  %v11114_v48 = vrot.slane %v11112_v60, 5 }
 0x66e   : > { %14385 = vpow2.f32 %v10588_v32  ;;  %v10590_v16 = vmul.f32 1.442695, %v10557_v14  ;;  %v13524_v37 = vpop.f32.mrb[4].mxu1  ;;  %19609 = vst [vmem:[#allocation34_spill] sm:$0xff] %v18820_v58  ;;  %v18824_v32 = vunpack.c.l.bf16 %v11049_v59  ;;  %v18826_v14 = vunpack.c.l.bf16 %v11083_v11 }
 0x66f   : > { %14387 = vpow2.f32 %v10594_v17  ;;  %v18793_v9 = vadd.f32 %v13524_v37, %v18743_v46  ;;  %v10374_v21 = vpop.f32.mrb[5].mxu1 }
 0x670   : > { %14389 = vpow2.f32 %v10590_v16  ;;  %v18801_v18 = vadd.f32 %v18743_v46, %v10374_v21  ;;  %v13525_v28 = vpop.f32.mrb[6].mxu1  ;;  %19610 = vst [vmem:[#allocation35_spill] sm:$0xff] %v18824_v32  ;;  %19611 = vst [vmem:[#allocation9_spill] sm:$0xff] %v18826_v14  ;;  %v18831_v16 = vrot.slane %v11085_v26, 4  ;;  %v11088_v21 = vshll.u32 %v18798_v3, 16 }
 0x671   : > { %v10562_v61 = vsub.f32 0.0, %v18793_v9  ;;  %v18807_v19 = vadd.f32 %v13525_v28, %v18743_v46  ;;  %v10377_v53 = vpop.f32.mrb[7].mxu1  ;;  %v11094_v26 = vshll.u32 %v12475_v41, 16 }
 0x672   : > { %v10560_v62 = vsub.f32 0.0, %v18801_v18  ;;  %v18814_v31 = vadd.f32 %v18743_v46, %v10377_v53  ;;  %v11115_v53 = vor.u32 %v11114_v48, %v18803_v51  ;;  %v18854_v48 = vld [vmem:[%s14696_s17 + $0xb0] sm:$0x1] }
 0x673   : > { %v10600_v2 = vmul.f32 1.442695, %v10562_v61  ;;  %v10563_v15 = vsub.f32 0.0, %v18807_v19 }
 0x674   : > { %v10596_v23 = vmul.f32 1.442695, %v10560_v62  ;;  %v10561_v57 = vsub.f32 0.0, %v18814_v31 }
 0x675   : > { %14391 = vpow2.f32 %v10600_v2  ;;  %v10602_v22 = vmul.f32 1.442695, %v10563_v15 }
 0x676   : > { %14393 = vpow2.f32 %v10596_v23  ;;  %v10598_v17 = vmul.f32 1.442695, %v10561_v57  ;;  %v13528_v6 = vpop.f32.mrb[8].mxu1 }
 0x677   : > { %v14384_v37 = vpop.eup %14383  ;;  %14395 = vpow2.f32 %v10602_v22  ;;  %v18834_v13 = vadd.f32 %v13528_v6, %v18743_v46  ;;  %v10390_v43 = vpop.f32.mrb[9].mxu1  ;;  %v11098_v6 = vshrl.u32 %v12475_v41, 16 }
 0x678   : > { %v14386_v35 = vpop.eup %14385  ;;  %v10654_v28 = vadd.f32 1.0, %v14384_v37  ;;  %14397 = vpow2.f32 %v10598_v17  ;;  %v18841_v60 = vadd.f32 %v18743_v46, %v10390_v43  ;;  %v13529_v61 = vpop.f32.mrb[10].mxu1  ;;  %v18857_v43 = vunpack.c.l.bf16 %v11059_v49 }
 0x679   : > { %v14388_v59 = vpop.eup %14387  ;;  %v10652_v36 = vadd.f32 1.0, %v14386_v35  ;;  %v10566_v62 = vsub.f32 0.0, %v18834_v13  ;;  %v18846_v11 = vadd.f32 %v13529_v61, %v18743_v46  ;;  %v10393_v55 = vpop.f32.mrb[11].mxu1  ;;  %v18859_v35 = vrot.slane %v11088_v21, 5 }
 0x67a   : > { %v14390_v3 = vpop.eup %14389  ;;  %14399 = vrcp.f32 %v10654_v28  ;;  %v10655_v2 = vadd.f32 1.0, %v14388_v59  ;;  %v10564_v15 = vsub.f32 0.0, %v18841_v60  ;;  %v18850_v1 = vadd.f32 %v18743_v46, %v10393_v55  ;;  %19612 = vst [vmem:[#allocation10_spill] sm:$0xff] %v18857_v43 }
 0x67b   : > { %14401 = vrcp.f32 %v10652_v36  ;;  %v10653_v51 = vadd.f32 1.0, %v14390_v3  ;;  %v10608_v23 = vmul.f32 1.442695, %v10566_v62  ;;  %v10567_v57 = vsub.f32 0.0, %v18846_v11 }
 0x67c   : > { %14403 = vrcp.f32 %v10655_v2  ;;  %v10604_v22 = vmul.f32 1.442695, %v10564_v15  ;;  %v10565_v17 = vsub.f32 0.0, %v18850_v1  ;;  %v18861_v59 = vrot.slane %v11122_v33, 4 }
 0x67d   : > { %14405 = vrcp.f32 %v10653_v51  ;;  %v10610_v37 = vmul.f32 1.442695, %v10567_v57  ;;  %v18867_v3 = vrot.slane %v11115_v53, 4  ;;  %v18869_v49 = vrot.slane %v11094_v26, 5 }
 0x67e   : > { %14407 = vpow2.f32 %v10608_v23  ;;  %v10606_v28 = vmul.f32 1.442695, %v10565_v17  ;;  %v13532_v61 = vpop.f32.mrb[12].mxu1  ;;  %v18875_v51 = vrot.slane %v11098_v6, 4  ;;  %v18882_v17 = vld [vmem:[%s14696_s17 + $0xa4] sm:$0x1]  ;;  %v11091_v32 = vor.u32 %v18859_v35, %v18831_v16 }
 0x67f   : > { %v14392_v62 = vpop.eup %14391  ;;  %14409 = vpow2.f32 %v10604_v22  ;;  %v18865_v55 = vadd.f32 %v13532_v61, %v18743_v46  ;;  %v10406_v41 = vpop.f32.mrb[13].mxu1  ;;  %v12480_v16 = vld [vmem:[%s14696_s17 + $0xb4] sm:$0xf] }
 0x680   : > { %v14394_v21 = vpop.eup %14393  ;;  %v10658_v2 = vadd.f32 1.0, %v14392_v62  ;;  %14411 = vpow2.f32 %v10610_v37  ;;  %v18873_v33 = vadd.f32 %v18743_v46, %v10406_v41  ;;  %v13533_v15 = vpop.f32.mrb[14].mxu1 }
 0x681   : > { %v14396_v23 = vpop.eup %14395  ;;  %v10656_v57 = vadd.f32 1.0, %v14394_v21  ;;  %14413 = vpow2.f32 %v10606_v28  ;;  %v10570_v22 = vsub.f32 0.0, %v18865_v55  ;;  %v18879_v53 = vadd.f32 %v13533_v15, %v18743_v46  ;;  %v10409_v26 = vpop.f32.mrb[15].mxu1 }
 0x682   : > { %v14398_v61 = vpop.eup %14397  ;;  %14415 = vrcp.f32 %v10658_v2  ;;  %v10659_v37 = vadd.f32 1.0, %v14396_v23  ;;  %v10568_v62 = vsub.f32 0.0, %v18873_v33  ;;  %v18886_v41 = vadd.f32 %v18743_v46, %v10409_v26 }
 0x683   : > { %14417 = vrcp.f32 %v10656_v57  ;;  %v10657_v6 = vadd.f32 1.0, %v14398_v61  ;;  %v10616_v28 = vmul.f32 1.442695, %v10570_v22  ;;  %v10571_v21 = vsub.f32 0.0, %v18879_v53 }
 0x684   : > { %v14400_v15 = vpop.eup %14399  ;;  %14419 = vrcp.f32 %v10659_v37  ;;  %v10612_v36 = vmul.f32 1.442695, %v10568_v62  ;;  %v10569_v43 = vsub.f32 0.0, %v18886_v41 }
 0x685   : > { %v14402_v23 = vpop.eup %14401  ;;  %v10718_v14 = vmul.f32 %v14400_v15, %v18760_v39  ;;  %14421 = vrcp.f32 %v10657_v6  ;;  %v10618_v26 = vmul.f32 1.442695, %v10571_v21 }
 0x686   : > { %v14404_v57 = vpop.eup %14403  ;;  %v10716_v22 = vmul.f32 %v14402_v23, %v18766_v10  ;;  %14423 = vpow2.f32 %v10616_v28  ;;  %v10614_v61 = vmul.f32 1.442695, %v10569_v43  ;;  %v13536_v37 = vpop.f32.mrb[16].mxu1 }
 0x687   : > { %v14406_v58 = vpop.eup %14405  ;;  %v11246_v2 = vadd.f32 %v18661_v5, %v10718_v14  ;;  %v10719_v39 = vmul.f32 %v14404_v57, %v18774_v4  ;;  %14425 = vpow2.f32 %v10612_v36  ;;  %v18904_v6 = vadd.f32 %v13536_v37, %v18743_v46  ;;  %v10422_v21 = vpop.f32.mrb[17].mxu1  ;;  %v18931_v37 = vld [vmem:[%s14696_s17 + $0xc0] sm:$0xf] }
 0x688   : > { %v14408_v15 = vpop.eup %14407  ;;  %v11244_v10 = vadd.f32 %v18663_v47, %v10716_v22  ;;  %v10717_v43 = vmul.f32 %v14406_v58, %v18779_v56  ;;  %14427 = vpow2.f32 %v10618_v26  ;;  %v18909_v28 = vadd.f32 %v18743_v46, %v10422_v21  ;;  %v13537_v23 = vpop.f32.mrb[18].mxu1 }
 0x689   : > { %v14410_v62 = vpop.eup %14409  ;;  %11278 = vst.msk [vmem:[%s18912_s7 + $0x10] sm:$0xff] %vm748_vm3, %v11246_v2  ;;  %v11247_v5 = vadd.f32 %v18665_v45, %v10719_v39  ;;  %v10662_v4 = vadd.f32 1.0, %v14408_v15  ;;  %14429 = vpow2.f32 %v10614_v61  ;;  %v10574_v47 = vsub.f32 0.0, %v18904_v6  ;;  %v10425_v56 = vpop.f32.mrb[19].mxu1 }
 0x68a   : > { %v14412_v58 = vpop.eup %14411  ;;  %11276 = vst.msk [vmem:[%s18912_s7] sm:$0xff] %vm748_vm3, %v11244_v10  ;;  %v11245_v14 = vadd.f32 %v18667_v0, %v10717_v43  ;;  %v10660_v36 = vadd.f32 1.0, %v14410_v62  ;;  %v10572_v26 = vsub.f32 0.0, %v18909_v28  ;;  %v18923_v57 = vadd.f32 %v13537_v23, %v18743_v46 }
 0x68b   : > { %v14414_v2 = vpop.eup %14413  ;;  %11279 = vst.msk [vmem:[%s18912_s7 + $0x18] sm:$0xff] %vm748_vm3, %v11247_v5  ;;  %14431 = vrcp.f32 %v10662_v4  ;;  %v10663_v45 = vadd.f32 1.0, %v14412_v58  ;;  %v10624_v22 = vmul.f32 1.442695, %v10574_v47  ;;  %v18928_v61 = vadd.f32 %v18743_v46, %v10425_v56 }
 0x68c   : > { %v14416_v39 = vpop.eup %14415  ;;  %11277 = vst.msk [vmem:[%s18912_s7 + $0x8] sm:$0xff] %vm748_vm3, %v11245_v14  ;;  %14433 = vrcp.f32 %v10660_v36  ;;  %v10661_v0 = vadd.f32 1.0, %v14414_v2  ;;  %v10620_v62 = vmul.f32 1.442695, %v10572_v26  ;;  %v10575_v21 = vsub.f32 0.0, %v18923_v57 }
 0x68d   : > { %v14418_v15 = vpop.eup %14417  ;;  %v10722_v10 = vmul.f32 %v14416_v39, %v18793_v9  ;;  %14435 = vrcp.f32 %v10663_v45  ;;  %v10573_v43 = vsub.f32 0.0, %v18928_v61  ;;  %v19613_v23 = vshll.u32 %v18854_v48, 16 }
 0x68e   : > { %v14420_v4 = vpop.eup %14419  ;;  %v10720_v47 = vmul.f32 %v14418_v15, %v18801_v18  ;;  %14437 = vrcp.f32 %v10661_v0  ;;  %v10626_v56 = vmul.f32 1.442695, %v10575_v21  ;;  %v13540_v58 = vpop.f32.mrb[20].mxu1  ;;  %v11157_v14 = vshrl.u32 %v18931_v37, 16 }
 0x68f   : > { %v18940_v5 = vrot.slane %v19613_v23, 5  ;;  %v14422_v36 = vpop.eup %14421  ;;  %v11250_v26 = vadd.f32 %v18670_v38, %v10722_v10  ;;  %v10723_v9 = vmul.f32 %v14420_v4, %v18807_v19  ;;  %14439 = vpow2.f32 %v10624_v22  ;;  %v10438_v48 = vpop.f32.mrb[21].mxu1 }
 0x690   : > { %v10622_v2 = vmul.f32 1.442695, %v10573_v43  ;;  %v14424_v45 = vpop.eup %14423  ;;  %v11248_v39 = vadd.f32 %v18676_v50, %v10720_v47  ;;  %v10721_v18 = vmul.f32 %v14422_v36, %v18814_v31  ;;  %14441 = vpow2.f32 %v10620_v62  ;;  %v13541_v21 = vpop.f32.mrb[22].mxu1 }
 0x691   : > { %v18949_v0 = vadd.f32 %v13540_v58, %v18743_v46  ;;  %v14426_v15 = vpop.eup %14425  ;;  %11282 = vst.msk [vmem:[%s18912_s7 + $0x30] sm:$0xff] %vm748_vm3, %v11250_v26  ;;  %v11251_v38 = vadd.f32 %v18682_v25, %v10723_v9  ;;  %v10666_v19 = vadd.f32 1.0, %v14424_v45  ;;  %14443 = vpow2.f32 %v10626_v56  ;;  %v10441_v50 = vpop.f32.mrb[23].mxu1 }
 0x692   : > { %v18955_v22 = vadd.f32 %v18743_v46, %v10438_v48  ;;  %v14428_v10 = vpop.eup %14427  ;;  %11280 = vst.msk [vmem:[%s18912_s7 + $0x20] sm:$0xff] %vm748_vm3, %v11248_v39  ;;  %v11249_v31 = vadd.f32 %v18684_v20, %v10721_v18  ;;  %v10664_v62 = vadd.f32 1.0, %v14426_v15  ;;  %14445 = vpow2.f32 %v10622_v2 }
 0x693   : > { %v10578_v43 = vsub.f32 0.0, %v18949_v0  ;;  %v14430_v23 = vpop.eup %14429  ;;  %11283 = vst.msk [vmem:[%s18912_s7 + $0x38] sm:$0xff] %vm748_vm3, %v11251_v38  ;;  %14447 = vrcp.f32 %v10666_v19  ;;  %v10667_v25 = vadd.f32 1.0, %v14428_v10  ;;  %v18965_v47 = vadd.f32 %v13541_v21, %v18743_v46 }
 0x694   : > { %v10576_v4 = vsub.f32 0.0, %v18955_v22  ;;  %11281 = vst.msk [vmem:[%s18912_s7 + $0x28] sm:$0xff] %vm748_vm3, %v11249_v31  ;;  %14449 = vrcp.f32 %v10664_v62  ;;  %v10665_v56 = vadd.f32 1.0, %v14430_v23  ;;  %v18970_v20 = vadd.f32 %v18743_v46, %v10441_v50 }
 0x695   : > { %v10632_v58 = vmul.f32 1.442695, %v10578_v43  ;;  %v14432_v36 = vpop.eup %14431  ;;  %14451 = vrcp.f32 %v10667_v25  ;;  %v10579_v9 = vsub.f32 0.0, %v18965_v47  ;;  %v11121_v2 = vsel %vm14731_vm2, %v18867_v3, %v18829_v54 }
 0x696   : > { %v10628_v26 = vmul.f32 1.442695, %v10576_v4  ;;  %v14434_v48 = vpop.eup %14433  ;;  %v10726_v45 = vmul.f32 %v14432_v36, %v18834_v13  ;;  %14453 = vrcp.f32 %v10665_v56  ;;  %v10577_v39 = vsub.f32 0.0, %v18970_v20  ;;  %v13544_v18 = vpop.f32.mrb[24].mxu1 }
 0x697   : > { %v11101_v21 = vor.u32 %v18875_v51, %v18869_v49  ;;  %v14436_v15 = vpop.eup %14435  ;;  %v10724_v38 = vmul.f32 %v14434_v48, %v18841_v60  ;;  %14455 = vpow2.f32 %v10632_v58  ;;  %v10634_v19 = vmul.f32 1.442695, %v10579_v9  ;;  %v10454_v10 = vpop.f32.mrb[25].mxu1 }
 0x698   : > { %v18983_v50 = vadd.f32 %v13544_v18, %v18743_v46  ;;  %v14438_v31 = vpop.eup %14437  ;;  %v11254_v13 = vadd.f32 %v18696_v27, %v10726_v45  ;;  %v10727_v62 = vmul.f32 %v14436_v15, %v18846_v11  ;;  %14457 = vpow2.f32 %v10628_v26  ;;  %v13545_v23 = vpop.f32.mrb[26].mxu1 }
 0x699   : > { %v10630_v43 = vmul.f32 1.442695, %v10577_v39  ;;  %v14440_v25 = vpop.eup %14439  ;;  %v11252_v4 = vadd.f32 %v18727_v30, %v10724_v38  ;;  %v10725_v60 = vmul.f32 %v14438_v31, %v18850_v1  ;;  %14459 = vpow2.f32 %v10634_v19  ;;  %v10457_v58 = vpop.f32.mrb[27].mxu1 }
 0x69a   : > { %v10582_v56 = vsub.f32 0.0, %v18983_v50  ;;  %v14442_v36 = vpop.eup %14441  ;;  %11286 = vst.msk [vmem:[%s18912_s7 + $0x50] sm:$0xff] %vm748_vm3, %v11254_v13  ;;  %v11255_v27 = vadd.f32 %v18714_v24, %v10727_v62  ;;  %v10670_v11 = vadd.f32 1.0, %v14440_v25  ;;  %v18994_v26 = vadd.f32 %v18743_v46, %v10454_v10 }
 0x69b   : > { %14461 = vpow2.f32 %v10630_v43  ;;  %v14444_v9 = vpop.eup %14443  ;;  %11284 = vst.msk [vmem:[%s18912_s7 + $0x40] sm:$0xff] %vm748_vm3, %v11252_v4  ;;  %v11253_v30 = vadd.f32 %v18729_v12, %v10725_v60  ;;  %v10668_v1 = vadd.f32 1.0, %v14442_v36  ;;  %v19000_v45 = vadd.f32 %v13545_v23, %v18743_v46 }
 0x69c   : > { %v10640_v48 = vmul.f32 1.442695, %v10582_v56  ;;  %v14446_v39 = vpop.eup %14445  ;;  %11287 = vst.msk [vmem:[%s18912_s7 + $0x58] sm:$0xff] %vm748_vm3, %v11255_v27  ;;  %14463 = vrcp.f32 %v10670_v11  ;;  %v10671_v24 = vadd.f32 1.0, %v14444_v9  ;;  %v10580_v18 = vsub.f32 0.0, %v18994_v26 }
 0x69d   : > { %v19006_v15 = vadd.f32 %v18743_v46, %v10457_v58  ;;  %v14448_v38 = vpop.eup %14447  ;;  %11285 = vst.msk [vmem:[%s18912_s7 + $0x48] sm:$0xff] %vm748_vm3, %v11253_v30  ;;  %14465 = vrcp.f32 %v10668_v1  ;;  %v10669_v12 = vadd.f32 1.0, %v14446_v39  ;;  %v10583_v19 = vsub.f32 0.0, %v19000_v45 }
 0x69e   : > { %v19614_v10 = vshll.u32 %v18882_v17, 16  ;;  %v14450_v13 = vpop.eup %14449  ;;  %v10730_v62 = vmul.f32 %v14448_v38, %v18865_v55  ;;  %14467 = vrcp.f32 %v10671_v24  ;;  %v10636_v43 = vmul.f32 1.442695, %v10580_v18  ;;  %v13548_v25 = vpop.f32.mrb[28].mxu1 }
 0x69f   : > { %v10581_v23 = vsub.f32 0.0, %v19006_v15  ;;  %v14452_v4 = vpop.eup %14451  ;;  %v10728_v60 = vmul.f32 %v14450_v13, %v18873_v33  ;;  %14469 = vrcp.f32 %v10669_v12  ;;  %v10642_v56 = vmul.f32 1.442695, %v10583_v19  ;;  %v10470_v17 = vpop.f32.mrb[29].mxu1 }
 0x6a0   : > { %v19013_v31 = vrot.slane %v19614_v10, 5  ;;  %v19019_v58 = vadd.f32 %v13548_v25, %v18743_v46  ;;  %v14454_v36 = vpop.eup %14453  ;;  %v11258_v27 = vadd.f32 %v18731_v63, %v10730_v62  ;;  %v10731_v55 = vmul.f32 %v14452_v4, %v18879_v53  ;;  %v13549_v9 = vpop.f32.mrb[30].mxu1 }
 0x6a1   : > { %14471 = vpow2.f32 %v10640_v48  ;;  %v10638_v11 = vmul.f32 1.442695, %v10581_v23  ;;  %v14456_v30 = vpop.eup %14455  ;;  %v11256_v1 = vadd.f32 %v18733_v8, %v10728_v60  ;;  %v10729_v33 = vmul.f32 %v14454_v36, %v18886_v41  ;;  %v10473_v24 = vpop.f32.mrb[31].mxu1 }
 0x6a2   : > { %14473 = vpow2.f32 %v10636_v43  ;;  %v10586_v39 = vsub.f32 0.0, %v19019_v58  ;;  %v14458_v18 = vpop.eup %14457  ;;  %11290 = vst.msk [vmem:[%s18912_s7 + $0x70] sm:$0xff] %vm748_vm3, %v11258_v27  ;;  %v11259_v63 = vadd.f32 %v18745_v7, %v10731_v55  ;;  %v10674_v53 = vadd.f32 1.0, %v14456_v30 }
 0x6a3   : > { %14475 = vpow2.f32 %v10642_v56  ;;  %v19030_v48 = vadd.f32 %v18743_v46, %v10470_v17  ;;  %v14460_v38 = vpop.eup %14459  ;;  %11288 = vst.msk [vmem:[%s18912_s7 + $0x60] sm:$0xff] %vm748_vm3, %v11256_v1  ;;  %v11257_v8 = vadd.f32 %v18753_v34, %v10729_v33  ;;  %v10672_v41 = vadd.f32 1.0, %v14458_v18 }
 0x6a4   : > { %14477 = vpow2.f32 %v10638_v11  ;;  %v10648_v12 = vmul.f32 1.442695, %v10586_v39  ;;  %11291 = vst.msk [vmem:[%s18912_s7 + $0x78] sm:$0xff] %vm748_vm3, %v11259_v63  ;;  %v10675_v10 = vadd.f32 1.0, %v14460_v38  ;;  %v19039_v13 = vadd.f32 %v13549_v9, %v18743_v46 }
 0x6a5   : > { %v14462_v19 = vpop.eup %14461  ;;  %14479 = vrcp.f32 %v10674_v53  ;;  %v10584_v7 = vsub.f32 0.0, %v19030_v48  ;;  %11289 = vst.msk [vmem:[%s18912_s7 + $0x68] sm:$0xff] %vm748_vm3, %v11257_v8  ;;  %v11160_v43 = vshll.u32 %v18931_v37, 16  ;;  %v19045_v34 = vadd.f32 %v18743_v46, %v10473_v24 }
 0x6a6   : > { %14481 = vrcp.f32 %v10672_v41  ;;  %v10673_v62 = vadd.f32 1.0, %v14462_v19  ;;  %v14464_v23 = vpop.eup %14463  ;;  %v19052_v25 = vunpack.c.l.bf16 %v11121_v2  ;;  %v10587_v60 = vsub.f32 0.0, %v19039_v13 }
 0x6a7   : > { %14483 = vrcp.f32 %v10675_v10  ;;  %v10644_v4 = vmul.f32 1.442695, %v10584_v7  ;;  %v14466_v56 = vpop.eup %14465  ;;  %v10734_v17 = vmul.f32 %v14464_v23, %v18904_v6  ;;  %v19059_v46 = vrot.slane %v11091_v32, 4 }
 0x6a8   : > { %14485 = vrcp.f32 %v10673_v62  ;;  %v10585_v36 = vsub.f32 0.0, %v19045_v34  ;;  %v14468_v27 = vpop.eup %14467  ;;  %v10732_v3 = vmul.f32 %v14466_v56, %v18909_v28  ;;  %v19615_v2 = vor.u32 %v18861_v59, %v18829_v54  ;;  %v12484_v59 = vld [vmem:[%s14696_s17 + $0xc4] sm:$0xf]  ;;  %v19616_v56 = vld [vmem:[#allocation34_spill] sm:$0xff] }
 0x6a9   : > { %14487 = vpow2.f32 %v10648_v12  ;;  %v10650_v6 = vmul.f32 1.442695, %v10587_v60  ;;  %v14470_v11 = vpop.eup %14469  ;;  %v11262_v9 = vadd.f32 %v18755_v44, %v10734_v17  ;;  %v10735_v32 = vmul.f32 %v14468_v27, %v18923_v57 }
 0x6aa   : > { %v19066_v55 = vrot.slane %v19615_v2, 4  ;;  %14489 = vpow2.f32 %v10644_v4  ;;  %v10646_v35 = vmul.f32 1.442695, %v10585_v36  ;;  %v11260_v28 = vadd.f32 %v18762_v42, %v10732_v3  ;;  %v12481_v42 = vld [vmem:[%s14696_s17 + $0xb8] sm:$0xf] }
 0x6ab   : > { %v14472_v30 = vpop.eup %14471  ;;  %v10733_v54 = vmul.f32 %v14470_v11, %v18928_v61  ;;  %v19076_v1 = vrot.slane %v11157_v14, 4  ;;  %14491 = vpow2.f32 %v10650_v6  ;;  %11294 = vst.msk [vmem:[%s18912_s7 + $0x90] sm:$0xff] %vm748_vm3, %v11262_v9  ;;  %v11263_v57 = vadd.f32 %v18768_v52, %v10735_v32  ;;  %v19618_v9 = vld [vmem:[#allocation9_spill] sm:$0xff] }
 0x6ac   : > { %v14474_v44 = vpop.eup %14473  ;;  %v10678_v33 = vadd.f32 1.0, %v14472_v30  ;;  %v19084_v39 = vrot.slane %v11101_v21, 4  ;;  %14493 = vpow2.f32 %v10646_v35  ;;  %11292 = vst.msk [vmem:[%s18912_s7 + $0x80] sm:$0xff] %vm748_vm3, %v11260_v28  ;;  %v11133_v24 = vshrl.u32 %v12480_v16, 16  ;;  %v12482_v30 = vld [vmem:[%s14696_s17 + $0xbc] sm:$0x1] }
 0x6ad   : > { %v14476_v61 = vpop.eup %14475  ;;  %v11261_v37 = vadd.f32 %v18784_v40, %v10733_v54  ;;  %v10676_v14 = vadd.f32 1.0, %v14474_v44  ;;  %v11136_v18 = vshll.u32 %v12480_v16, 16  ;;  %11295 = vst.msk [vmem:[%s18912_s7 + $0x98] sm:$0xff] %vm748_vm3, %v11263_v57  ;;  %v11166_v53 = vshll.u32 %v12484_v59, 16  ;;  %v19619_v28 = vld [vmem:[#allocation10_spill] sm:$0xff] }
 0x6ae   : > { %v14478_v63 = vpop.eup %14477  ;;  %14495 = vrcp.f32 %v10678_v33  ;;  %v10679_v52 = vadd.f32 1.0, %v14476_v61  ;;  %v11170_v51 = vshrl.u32 %v12484_v59, 16  ;;  %v11142_v8 = vshll.u32 %v12481_v42, 16 }
 0x6af   : > { %v14480_v21 = vpop.eup %14479  ;;  %11293 = vst.msk [vmem:[%s18912_s7 + $0x88] sm:$0xff] %vm748_vm3, %v11261_v37  ;;  %14497 = vrcp.f32 %v10676_v14  ;;  %v10677_v38 = vadd.f32 1.0, %v14478_v63  ;;  %v11146_v41 = vshrl.u32 %v12481_v42, 16  ;;  %v11097_v19 = vsel %vm14731_vm2, %v19059_v46, %v18869_v49  ;;  %v19617_v46 = vld [vmem:[#allocation35_spill] sm:$0xff] }
 0x6b0   : > { %v14482_v12 = vpop.eup %14481  ;;  %v10738_v40 = vmul.f32 %v14480_v21, %v18949_v0  ;;  %14499 = vrcp.f32 %v10679_v52  ;;  %v11162_v10 = vrot.slane %v11160_v43, 5  ;;  %v11135_v23 = vrot.slane %v11133_v24, 4 }
 0x6b1   : > { %v14484_v7 = vpop.eup %14483  ;;  %v10736_v62 = vmul.f32 %v14482_v12, %v18955_v22  ;;  %14501 = vrcp.f32 %v10677_v38  ;;  %v11138_v4 = vrot.slane %v11136_v18, 5  ;;  %v11168_v36 = vrot.slane %v11166_v53, 5  ;;  %v12485_v22 = vld [vmem:[%s14696_s17 + $0xc8] sm:$0x1]  ;;  %s12523_s17 = sshll.u32 %s14652_s22, 12  ;;  %s19169_s22 = scalar_lea.sflag [#allocation4], %s215_s30 }
 0x6b2   : > { %v14486_v60 = vpop.eup %14485  ;;  %v11266_v17 = vadd.f32 %v19616_v56, %v10738_v40  ;;  %v10739_v0 = vmul.f32 %v14484_v7, %v18965_v47  ;;  %v11172_v27 = vrot.slane %v11170_v51, 4  ;;  %v11144_v2 = vrot.slane %v11142_v8, 5  ;;  %s19157_s11 = scalar_lea.hbm %s19215_s5, %s12523_s17 }
 0x6b3   : > { %v14488_v49 = vpop.eup %14487  ;;  %v11264_v3 = vadd.f32 %v19617_v46, %v10736_v62  ;;  %v10737_v43 = vmul.f32 %v14486_v60, %v18970_v20  ;;  %v11148_v6 = vrot.slane %v11146_v41, 4  ;;  %v11131_v47 = vsel %vm14731_vm2, %v19066_v55, %v18940_v5 }
 0x6b4   : > { %v14490_v11 = vpop.eup %14489  ;;  %11298 = vst.msk [vmem:[%s18912_s7 + $0xb0] sm:$0xff] %vm748_vm3, %v11266_v17  ;;  %v11267_v32 = vadd.f32 %v19618_v9, %v10739_v0  ;;  %v10682_v16 = vadd.f32 1.0, %v14488_v49  ;;  %v11163_v35 = vor.u32 %v11162_v10, %v19076_v1  ;;  %v11107_v59 = vsel %vm14731_vm2, %v19084_v39, %v19013_v31 }
 0x6b5   : > { %v14492_v20 = vpop.eup %14491  ;;  %11296 = vst.msk [vmem:[%s18912_s7 + $0xa0] sm:$0xff] %vm748_vm3, %v11264_v3  ;;  %v11265_v54 = vadd.f32 %v19619_v28, %v10737_v43  ;;  %v10680_v44 = vadd.f32 1.0, %v14490_v11  ;;  %v11139_v57 = vor.u32 %v11138_v4, %v11135_v23  ;;  %v11173_v55 = vor.u32 %v11172_v27, %v11168_v36 }
 0x6b6   : > { %v14494_v33 = vpop.eup %14493  ;;  %11299 = vst.msk [vmem:[%s18912_s7 + $0xb8] sm:$0xff] %vm748_vm3, %v11267_v32  ;;  %14503 = vrcp.f32 %v10682_v16  ;;  %v10683_v5 = vadd.f32 1.0, %v14492_v20  ;;  %v11176_v1 = vshll.u32 %v12485_v22, 16  ;;  %v11149_v61 = vor.u32 %v11148_v6, %v11144_v2 }
 0x6b7   : > { %11297 = vst.msk [vmem:[%s18912_s7 + $0xa8] sm:$0xff] %vm748_vm3, %v11265_v54  ;;  %14505 = vrcp.f32 %v10680_v44  ;;  %v10681_v42 = vadd.f32 1.0, %v14494_v33  ;;  %v11152_v37 = vshll.u32 %v12482_v30, 16  ;;  %v11236_v24 = vunpack.c.l.bf16 %v11097_v19 }
 0x6b8   : > { %v14496_v14 = vpop.eup %14495  ;;  %v11164_v18 = vrot.slane %v11163_v35, 4  ;;  %14507 = vrcp.f32 %v10683_v5  ;;  %v11239_v63 = vunpack.c.l.bf16 %v11131_v47  ;;  %v11140_v52 = vrot.slane %v11139_v57, 4 }
 0x6b9   : > { %v14498_v31 = vpop.eup %14497  ;;  %v10742_v39 = vmul.f32 %v14496_v14, %v18983_v50  ;;  %14509 = vrcp.f32 %v10681_v42  ;;  %v11237_v21 = vunpack.c.l.bf16 %v11107_v59  ;;  %v11174_v38 = vrot.slane %v11173_v55, 4 }
 0x6ba   : > { %v14500_v53 = vpop.eup %14499  ;;  %v10740_v51 = vmul.f32 %v14498_v31, %v18994_v26  ;;  %v11178_v8 = vrot.slane %v11176_v1, 5  ;;  %v11150_v19 = vrot.slane %v11149_v61, 4  ;;  %v11154_v50 = vrot.slane %v11152_v37, 5 }
 0x6bb   : > { %v14502_v41 = vpop.eup %14501  ;;  %v11270_v12 = vadd.f32 %v19052_v25, %v10742_v39  ;;  %v10743_v40 = vmul.f32 %v14500_v53, %v19000_v45  ;;  %v11169_v62 = vsel %vm14731_vm2, %v11164_v18, %v11168_v36  ;;  %v11145_v23 = vsel %vm14731_vm2, %v11140_v52, %v11144_v2 }
 0x6bc   : > { %v11268_v10 = vadd.f32 %v11236_v24, %v10740_v51  ;;  %v10741_v7 = vmul.f32 %v14502_v41, %v19006_v15  ;;  %v11179_v25 = vsel %vm14731_vm2, %v11174_v38, %v11178_v8  ;;  %v11242_v15 = vunpack.c.l.bf16 %v11169_v62 }
 0x6bd   : > { %11302 = vst.msk [vmem:[%s18912_s7 + $0xd0] sm:$0xff] %vm748_vm3, %v11270_v12  ;;  %v11271_v26 = vadd.f32 %v11239_v63, %v10743_v40  ;;  %v11155_v4 = vsel %vm14731_vm2, %v11150_v19, %v11154_v50  ;;  %v11240_v56 = vunpack.c.l.bf16 %v11145_v23  ;;  %v11243_v36 = vunpack.c.l.bf16 %v11179_v25 }
 0x6be   : > { %11300 = vst.msk [vmem:[%s18912_s7 + $0xc0] sm:$0xff] %vm748_vm3, %v11268_v10  ;;  %v11269_v45 = vadd.f32 %v11237_v21, %v10741_v7  ;;  %v11241_v46 = vunpack.c.l.bf16 %v11155_v4 }
 0x6bf   : > { %11303 = vst.msk [vmem:[%s18912_s7 + $0xd8] sm:$0xff] %vm748_vm3, %v11271_v26 }
 0x6c0   : > { %v14504_v60 = vpop.eup %14503  ;;  %11301 = vst.msk [vmem:[%s18912_s7 + $0xc8] sm:$0xff] %vm748_vm3, %v11269_v45 }
 0x6c1   : > { %v14506_v17 = vpop.eup %14505  ;;  %v10746_v0 = vmul.f32 %v14504_v60, %v19019_v58 }
 0x6c2   : > { %v14508_v27 = vpop.eup %14507  ;;  %v10744_v49 = vmul.f32 %v14506_v17, %v19030_v48 }
 0x6c3   : > { %v14510_v29 = vpop.eup %14509  ;;  %v11274_v3 = vadd.f32 %v11242_v15, %v10746_v0  ;;  %v10747_v43 = vmul.f32 %v14508_v27, %v19039_v13 }
 0x6c4   : > { %v11272_v2 = vadd.f32 %v11240_v56, %v10744_v49  ;;  %v10745_v22 = vmul.f32 %v14510_v29, %v19045_v34 }
 0x6c5   : > { %11306 = vst.msk [vmem:[%s18912_s7 + $0xf0] sm:$0xff] %vm748_vm3, %v11274_v3  ;;  %v11275_v58 = vadd.f32 %v11243_v36, %v10747_v43 }
 0x6c6   : > { %11304 = vst.msk [vmem:[%s18912_s7 + $0xe0] sm:$0xff] %vm748_vm3, %v11272_v2  ;;  %v11273_v48 = vadd.f32 %v11241_v46, %v10745_v22 }
 0x6c7   : > { %11307 = vst.msk [vmem:[%s18912_s7 + $0xf8] sm:$0xff] %vm748_vm3, %v11275_v58 }
 0x6c8   : > { %11305 = vst.msk [vmem:[%s18912_s7 + $0xe8] sm:$0xff] %vm748_vm3, %v11273_v48 }
 0x6c9   : > { %14546 = shalt.err (!%p14543_p3)
}
 0x6ca   : > { %s14547_s16 = scalar_lea.hbm %s19157_s11, 4096  ;;  %s14551_s26 = scalar_lea.hbm %s19215_s5, 8192 }
 0x6cb   : > { %p14548_p4 = scmp.ne.s32.totalorder %s19157_s11, %s14547_s16  ;;  %p14552_p9 = scmp.lt.u32.totalorder %s19157_s11, %s19215_s5 }
 0x6cc   : > { %p14553_p10 = scmp.lt.u32.totalorder %s14551_s26, %s14547_s16  ;;  %p14555_p12 = scmp.lt.u32.totalorder %s14547_s16, %s19157_s11 }
 0x6cd   : > { %p14549_p7 = pnand %p14548_p4, %p14669_p5 }
 0x6ce   : > { %p14554_p11 = por %p14553_p10, %p14552_p9 }
 0x6cf   : > { %p14550_p8 = pneg %p14549_p7 }
 0x6d0   : > { %p14556_p13 = por %p14555_p12, %p14554_p11 }
 0x6d2   : > { %p14557_p0 = pnand %p14556_p13, %p14550_p8 }
 0x6d4   : > { %14560 = shalt.err (!%p14557_p0)
}
 0x6d5   : > { %s14599_s7 = smov 128   ;;  %s14600_s17 = smov 8  }
 0x6d6   : > { %14063 = dma.vmem_to_hbm [thread:$0]  (%p14669_p5), %s19159_s8, 4096, %s19157_s11, %s19169_s22, %s14599_s7, %s14599_s7, %s14600_s17  }
 0x6d7 PF: > { %p14069_p1 = scmp.ge.s32.totalorder %s14595_s21, 2  ;;  %s11337_s9 = sand.u32 1, %s14583_s18  }
 0x6d8   : > { %s11338_s10 = scalar_lea.sflag [#allocation4], %s11337_s9 }
 0x6d9   : > { %p14066_p2 = pnand %p14069_p1, %p14673_p6 }
 0x6db   : > { %14578 = dma.done.wait (!%p14066_p2), %s11338_s10, 4096  }
 0x6dc   : > { %14580 = vsyncadd (!%p14066_p2), %s11338_s10, 4294963200  ;;  %p15_p3 = scmp.ge.s32.totalorder %s14656_s24, 4   ;;  %s19620_s18 = smov %s14587_s19 }
 0x6dd   : > { %s19621_s19 = smov %s14591_s20  ;;  %s19622_s20 = smov %s14667_s27 }
 0x6de   : > { %s19623_s21 = smov %s14656_s24  ;;  %17 = sbr.rel (!%p15_p3) target bundleno = 3 (0x3), region = 95 }
 0x6e5   :  { %11343 = vsyncpa [#allocation4], 1 }
 0x6e6   :  { %11345 = vsyncpa [#allocation4 + $0x1], 1 }

</bundles_post_ra>
